<compile_context>
chip_gen: v6e
topology: v6e:2x2x1
jax: 0.10.0
libtpu: 0.0.40
codegen_flags: <defaults>
</compile_context>

<pallas_src>
import functools

import jax
import jax.numpy as jnp
from jax import lax
from jax.experimental import pallas as pl
from jax.experimental.pallas import tpu as pltpu


# ---------------------------------------------------------------------------
# Pallas kernel: (fold BN of the input) -> conv(stride 1) -> bias -> ReLU
#                [-> per-batch BN statistics]
# ---------------------------------------------------------------------------
def _conv_bn_relu_kernel(x_ref, w_ref, b_ref, *rest, kh, kw, pad, th, cin,
                         cin_start, with_bn_in, with_stats, inv_count, eps):
    """
    x_ref     : (1, H, W, C_total)    raw NHWC input block (one batch element)
    w_ref     : (kh*kw, cin, Cout)    tap-stacked weights
    b_ref     : (1, Cout)             bias
    if with_bn_in (stats of the producer, folded to scale/shift in the prologue):
      ssum_ref: (Ns, 1, L)            per-batch partial sums of the producer output
      sssq_ref: (Ns, 1, L)            per-batch partial sums of squares
      gamma_ref, beta_ref: (1, cin)   BN affine parameters for this channel slice
    o_ref     : (1, th, W, Cout)      output row block
    if with_stats:
      sum_ref, ssq_ref: (1, 1, Cout)  per-batch partial BN statistics (accumulated
                                      over the h axis; blocked per batch index)
    xpad_ref  : (H+2p, W+2p, cin)     VMEM scratch (padded, normalized, ch-sliced)
    """
    i = 0
    if with_bn_in:
        ssum_ref, sssq_ref, gamma_ref, beta_ref = rest[0], rest[1], rest[2], rest[3]
        i = 4
    o_ref = rest[i]
    i += 1
    if with_stats:
        sum_ref, ssq_ref = rest[i], rest[i + 1]
        i += 2
    xpad_ref = rest[i]

    h_id = pl.program_id(1)
    H = x_ref.shape[1]
    W = x_ref.shape[2]
    Cout = w_ref.shape[2]

    # ---- prologue, once per batch element: halo pad + channel slice + BN fold ----
    @pl.when(h_id == 0)
    def _():
        if pad > 0:                                    # static python branch
            xpad_ref[...] = jnp.zeros_like(xpad_ref)   # zero the halo border
        xin = x_ref[0, :, :, cin_start:cin_start + cin].astype(jnp.float32)
        if with_bn_in:
            # Reduce per-batch partial stats and fold BN into scale/shift (VPU, tiny).
            ssum = jnp.sum(ssum_ref[...], axis=0)[:, cin_start:cin_start + cin]
            sssq = jnp.sum(sssq_ref[...], axis=0)[:, cin_start:cin_start + cin]
            mean = ssum * inv_count
            # TODO(synk): E[x^2]-E[x]^2 in f32 can cancel at large N*H*W; switch to
            #             shifted / per-block moments before scaling up.
            var = jnp.maximum(sssq * inv_count - mean * mean, 0.0)
            inv_std = lax.rsqrt(var + eps)
            scale = gamma_ref[...] * inv_std           # (1, cin)
            shift = beta_ref[...] - mean * scale
            xin = xin * scale.reshape(1, 1, cin) + shift.reshape(1, 1, cin)
        xpad_ref[pad:pad + H, pad:pad + W, :] = xin

    # ---- per-batch BN-statistics accumulator init ----
    if with_stats:
        @pl.when(h_id == 0)
        def _():
            sum_ref[...] = jnp.zeros_like(sum_ref)
            ssq_ref[...] = jnp.zeros_like(ssq_ref)

    # ---- conv as kh*kw accumulating MXU dots over aligned row slices ----
    h0 = pl.multiple_of(h_id * th, th)
    acc = jnp.zeros((th * W, Cout), jnp.float32)
    for t in range(kh * kw):                           # static taps (kh*kw <= 9)
        dy, dx = t // kw, t % kw
        tap = xpad_ref[pl.ds(h0 + dy, th), dx:dx + W, :]          # (th, W, cin)
        acc = acc + jnp.dot(tap.reshape(th * W, cin), w_ref[t],
                            preferred_element_type=jnp.float32)

    acc = jnp.maximum(acc + b_ref[...], 0.0)           # bias + ReLU
    o_ref[...] = acc.reshape(1, th, W, Cout).astype(o_ref.dtype)

    # ---- per-batch BN statistics epilogue ----
    if with_stats:
        sum_ref[...] += jnp.sum(acc, axis=0, keepdims=True).reshape(1, 1, Cout)
        ssq_ref[...] += jnp.sum(acc * acc, axis=0, keepdims=True).reshape(1, 1, Cout)


# ---------------------------------------------------------------------------
# Wrapper
# ---------------------------------------------------------------------------
def conv2d_bn_relu(x_nhwc, w_taps, bias, *, kh, kw, padding, cin_start=0,
                   bn_in=None, with_stats=False, target_rows=256):
    """Fused (fold input BN ->) Conv2d(stride 1) -> bias -> ReLU (-> BN stats).

    bn_in: None, or (sum (N,1,L), ssq (N,1,L), gamma (1,Cin), beta (1,Cin)) of the
    producer's per-batch partial statistics (BN is folded inside the kernel).
    target_rows: th*W target; 256 feeds the v6e/v7x MXU, use 128 on v5e.
    """
    N, H, W, C_total = x_nhwc.shape
    ktaps, Cin, Cout = w_taps.shape
    assert ktaps == kh * kw and cin_start + Cin <= C_total

    # largest divisor of H with th*W <= target_rows (at least 1 row)
    th = 1
    for cand in range(1, H + 1):
        if H % cand == 0 and cand * W <= max(W, target_rows):
            th = cand
    n_hblk = H // th
    Hp, Wp = H + 2 * padding, W + 2 * padding

    with_bn_in = bn_in is not None
    kern = functools.partial(
        _conv_bn_relu_kernel, kh=kh, kw=kw, pad=padding, th=th, cin=Cin,
        cin_start=cin_start, with_bn_in=with_bn_in, with_stats=with_stats,
        inv_count=1.0 / float(N * H * W), eps=1e-5)

    in_specs = [
        pl.BlockSpec((1, H, W, C_total), lambda n, h: (n, 0, 0, 0)),
        pl.BlockSpec((kh * kw, Cin, Cout), lambda n, h: (0, 0, 0)),
        pl.BlockSpec((1, Cout), lambda n, h: (0, 0)),
    ]
    inputs = [x_nhwc, w_taps, bias]
    if with_bn_in:
        ssum, sssq, gamma, beta = bn_in
        Ns, _, L = ssum.shape
        in_specs += [
            pl.BlockSpec((Ns, 1, L), lambda n, h: (0, 0, 0)),
            pl.BlockSpec((Ns, 1, L), lambda n, h: (0, 0, 0)),
            pl.BlockSpec((1, Cin), lambda n, h: (0, 0)),
            pl.BlockSpec((1, Cin), lambda n, h: (0, 0)),
        ]
        inputs += [ssum, sssq, gamma, beta]

    out_shape = [jax.ShapeDtypeStruct((N, H, W, Cout), jnp.float32)]
    out_specs = [pl.BlockSpec((1, th, W, Cout), lambda n, h: (n, h, 0, 0))]
    if with_stats:
        # Per-batch partial stats: keeps the batch axis "parallel" (v7x megacore);
        # the consumer reduces the tiny (N, 1, Cout) arrays in its prologue.
        out_shape += [jax.ShapeDtypeStruct((N, 1, Cout), jnp.float32)] * 2
        out_specs += [pl.BlockSpec((1, 1, Cout), lambda n, h: (n, 0, 0))] * 2

    return pl.pallas_call(
        kern,
        grid=(N, n_hblk),
        in_specs=in_specs,
        out_specs=tuple(out_specs) if with_stats else out_specs[0],
        out_shape=tuple(out_shape) if with_stats else out_shape[0],
        scratch_shapes=[pltpu.VMEM((Hp, Wp, Cin), jnp.float32)],
        compiler_params=pltpu.CompilerParams(
            dimension_semantics=("parallel", "arbitrary")),
    )(*inputs)


# ---------------------------------------------------------------------------
# Parameter construction (deterministic, synthetic) + one-time weight prep
# ---------------------------------------------------------------------------
def make_conv_params(key, cin, cout, k):
    kw_key, kb_key = jax.random.split(key)
    w = jax.random.normal(kw_key, (cout, cin, k, k), jnp.float32) * 0.1
    b = jax.random.normal(kb_key, (cout,), jnp.float32) * 0.1
    return w, b


def make_bn_params(c):
    # PyTorch BatchNorm2d init: weight=1, bias=0
    return jnp.ones((c,), jnp.float32), jnp.zeros((c,), jnp.float32)


def init_inception_params(key, in_channels1, c1, c2, c3, c4, c5, c6, c7, c9):
    keys = jax.random.split(key, 9)
    p = {}
    p["b1_conv1"] = make_conv_params(keys[0], in_channels1, c1, 3)
    p["b1_bn1"] = make_bn_params(c1)
    p["b1_conv2"] = make_conv_params(keys[1], c1, c5, 1)
    p["b2_conv1"] = make_conv_params(keys[2], in_channels1, c2, 1)
    p["b2_bn1"] = make_bn_params(c2)
    p["b2_conv2"] = make_conv_params(keys[3], c2, c6, 3)
    p["b2_bn2"] = make_bn_params(c6)
    p["b2_conv3"] = make_conv_params(keys[4], c6, c9, 3)
    p["b3_conv1"] = make_conv_params(keys[5], in_channels1, c3, 1)
    p["b3_bn1"] = make_bn_params(c3)
    p["b3_conv2"] = make_conv_params(keys[6], c3, c7, 3)
    p["b4_conv1"] = make_conv_params(keys[7], in_channels1, c4, 1)
    return p


def prepare_inception_params(params):
    """One-time weight prep (off the traced forward's critical path)."""
    w_b1c1, b_b1c1 = params["b1_conv1"]
    w_b2c1, b_b2c1 = params["b2_conv1"]
    w_b3c1, b_b3c1 = params["b3_conv1"]
    w_b4c1, b_b4c1 = params["b4_conv1"]
    w_b1c2, b_b1c2 = params["b1_conv2"]
    w_b2c2, b_b2c2 = params["b2_conv2"]
    w_b2c3, b_b2c3 = params["b2_conv3"]
    w_b3c2, b_b3c2 = params["b3_conv2"]

    c1, cin0 = w_b1c1.shape[0], w_b1c1.shape[1]
    c2, c3, c4 = w_b2c1.shape[0], w_b3c1.shape[0], w_b4c1.shape[0]
    c6 = w_b2c2.shape[0]
    ch = c1 + c2 + c3 + c4

    def taps(w):  # OIHW -> (kh*kw, Cin, Cout)
        co, ci, kh, kw = w.shape
        return jnp.transpose(w, (2, 3, 1, 0)).reshape(kh * kw, ci, co).astype(jnp.float32)

    # Fused head: b1 3x3 conv, plus the three 1x1 convs embedded at the centre tap.
    wh = jnp.zeros((9, cin0, ch), jnp.float32)
    wh = wh.at[:, :, :c1].set(taps(w_b1c1))
    ctr = 4  # (dy=1, dx=1) of a 3x3 kernel
    wh = wh.at[ctr, :, c1:c1 + c2].set(w_b2c1[:, :, 0, 0].T)
    wh = wh.at[ctr, :, c1 + c2:c1 + c2 + c3].set(w_b3c1[:, :, 0, 0].T)
    wh = wh.at[ctr, :, c1 + c2 + c3:].set(w_b4c1[:, :, 0, 0].T)
    bh = jnp.concatenate([b_b1c1, b_b2c1, b_b3c1, b_b4c1]).reshape(1, ch)

    # Fused block-diagonal 3x3: branch2 stage-2 (c2->c6) + branch3 stage-2 (c3->c7).
    c7 = w_b3c2.shape[0]
    w23 = jnp.zeros((9, c2 + c3, c6 + c7), jnp.float32)
    w23 = w23.at[:, :c2, :c6].set(taps(w_b2c2))
    w23 = w23.at[:, c2:, c6:].set(taps(w_b3c2))
    b23 = jnp.concatenate([b_b2c2, b_b3c2]).reshape(1, c6 + c7)
    g23 = jnp.concatenate([params["b2_bn1"][0], params["b3_bn1"][0]]).reshape(1, c2 + c3)
    be23 = jnp.concatenate([params["b2_bn1"][1], params["b3_bn1"][1]]).reshape(1, c2 + c3)

    return dict(
        w_head=wh, b_head=bh.astype(jnp.float32),
        w_b1t=taps(w_b1c2), b_b1t=b_b1c2.reshape(1, -1).astype(jnp.float32),
        g_b1=params["b1_bn1"][0].reshape(1, -1), be_b1=params["b1_bn1"][1].reshape(1, -1),
        w_23=w23, b_23=b23.astype(jnp.float32), g_23=g23, be_23=be23,
        w_b2t=taps(w_b2c3), b_b2t=b_b2c3.reshape(1, -1).astype(jnp.float32),
        g_b2=params["b2_bn2"][0].reshape(1, -1), be_b2=params["b2_bn2"][1].reshape(1, -1),
    )


# ---------------------------------------------------------------------------
# Inception forward (NCHW in / NCHW out, like the PyTorch module)
# ---------------------------------------------------------------------------
def inception_forward(prepared, x_nchw):
    x = jnp.transpose(x_nchw, (0, 2, 3, 1)).astype(jnp.float32)   # NCHW -> NHWC

    c1 = prepared["w_b1t"].shape[1]          # branch1 head channels
    c23 = prepared["w_23"].shape[1]          # c2 + c3
    c6 = prepared["w_b2t"].shape[1]

    # Call 1: fused head 3x3 (b1 3x3 + b2/b3/b4 1x1 at centre tap), emits BN stats.
    y_head, hs, hq = conv2d_bn_relu(x, prepared["w_head"], prepared["b_head"],
                                    kh=3, kw=3, padding=1, with_stats=True)

    # Call 2: branch1 tail 1x1, BN(c1) folded inside from head stats.
    b1 = conv2d_bn_relu(y_head, prepared["w_b1t"], prepared["b_b1t"],
                        kh=1, kw=1, padding=0, cin_start=0,
                        bn_in=(hs, hq, prepared["g_b1"], prepared["be_b1"]))

    # Call 3: fused branch2/branch3 3x3 (block-diagonal), BN(c2)+BN(c3) folded inside.
    y23, s23, q23 = conv2d_bn_relu(y_head, prepared["w_23"], prepared["b_23"],
                                   kh=3, kw=3, padding=1, cin_start=c1,
                                   bn_in=(hs, hq, prepared["g_23"], prepared["be_23"]),
                                   with_stats=True)

    # Call 4: branch2 tail 3x3, BN(c6) folded inside from y23 stats.
    b2 = conv2d_bn_relu(y23, prepared["w_b2t"], prepared["b_b2t"],
                        kh=3, kw=3, padding=1, cin_start=0,
                        bn_in=(s23, q23, prepared["g_b2"], prepared["be_b2"]))

    b3 = y23[:, :, :, c6:]                   # branch3 final = its slice of y23
    b4 = y_head[:, :, :, c1 + c23:]          # branch4 final = its slice of y_head

    out = jnp.concatenate([b1, b2, b3, b4], axis=-1)   # channel concat (NHWC)
    return jnp.transpose(out, (0, 3, 1, 2))            # NHWC -> NCHW


# ---------------------------------------------------------------------------
# Pure-JAX reference (for correctness check; training-mode batch statistics)
# ---------------------------------------------------------------------------
def _ref_conv_relu(x, w, b, padding):
    y = lax.conv_general_dilated(
        x, jnp.transpose(w, (2, 3, 1, 0)),
        window_strides=(1, 1), padding=[(padding, padding)] * 2,
        dimension_numbers=("NHWC", "HWIO", "NHWC"))
    return jnp.maximum(y + b.reshape(1, 1, 1, -1), 0.0)


def _ref_bn(x, g, b):
    mean = jnp.mean(x, axis=(0, 1, 2), keepdims=True)
    var = jnp.mean((x - mean) ** 2, axis=(0, 1, 2), keepdims=True)
    return (x - mean) * lax.rsqrt(var + 1e-5) * g.reshape(1, 1, 1, -1) + b.reshape(1, 1, 1, -1)


def inception_reference(params, x_nchw):
    x = jnp.transpose(x_nchw, (0, 2, 3, 1))
    b1 = _ref_conv_relu(x, *params["b1_conv1"], 1)
    b1 = _ref_bn(b1, *params["b1_bn1"])
    b1 = _ref_conv_relu(b1, *params["b1_conv2"], 0)
    b2 = _ref_conv_relu(x, *params["b2_conv1"], 0)
    b2 = _ref_bn(b2, *params["b2_bn1"])
    b2 = _ref_conv_relu(b2, *params["b2_conv2"], 1)
    b2 = _ref_bn(b2, *params["b2_bn2"])
    b2 = _ref_conv_relu(b2, *params["b2_conv3"], 1)
    b3 = _ref_conv_relu(x, *params["b3_conv1"], 0)
    b3 = _ref_bn(b3, *params["b3_bn1"])
    b3 = _ref_conv_relu(b3, *params["b3_conv2"], 1)
    b4 = _ref_conv_relu(x, *params["b4_conv1"], 0)
    out = jnp.concatenate([b1, b2, b3, b4], axis=-1)
    return jnp.transpose(out, (0, 3, 1, 2))


# ---------------------------------------------------------------------------
if __name__ == "__main__":
    key = jax.random.PRNGKey(0)
    k_x, k_p = jax.random.split(key)

    # Small deterministic config: Inception(in=4, c1..c9 = 8)
    in_channels1 = 4
    c1 = c2 = c3 = c4 = c5 = c6 = c7 = c9 = 8

    x = jax.random.normal(k_x, (2, in_channels1, 16, 16), jnp.float32)  # NCHW
    params = init_inception_params(k_p, in_channels1, c1, c2, c3, c4, c5, c6, c7, c9)
    prepared = prepare_inception_params(params)   # one-time weight prep (not traced)

    fwd = jax.jit(inception_forward)
    out = jax.block_until_ready(fwd(prepared, x))
    ref = jax.block_until_ready(inception_reference(params, x))

    assert out.shape == (2, c5 + c9 + c7 + c4, 16, 16), out.shape
    err = float(jnp.abs(out - ref).max())
    assert jnp.allclose(out, ref, atol=1e-3, rtol=1e-3), err

    print("KERNEL_OK")
</pallas_src>

<mosaic_0001>
module attributes {stable_mosaic.version = 11 : i64} {
  func.func @_conv_bn_relu_kernel(%arg0: i32, %arg1: i32, %arg2: memref<1x16x16x32xf32, #tpu.memory_space<vmem>>, %arg3: memref<1x8x8xf32, #tpu.memory_space<vmem>>, %arg4: memref<1x8xf32, #tpu.memory_space<vmem>>, %arg5: memref<2x1x32xf32, #tpu.memory_space<vmem>>, %arg6: memref<2x1x32xf32, #tpu.memory_space<vmem>>, %arg7: memref<1x8xf32, #tpu.memory_space<vmem>>, %arg8: memref<1x8xf32, #tpu.memory_space<vmem>>, %arg9: memref<1x16x16x8xf32, #tpu.memory_space<vmem>>, %arg10: memref<16x16x8xf32, #tpu.memory_space<vmem>>) attributes {dimension_semantics = [#tpu.dimension_semantics<parallel>, #tpu.dimension_semantics<arbitrary>], iteration_bounds = array<i64: 2, 1>, scalar_prefetch = 0 : i64, scratch_operands = 1 : i64, tpu.core_type = #tpu.core_type<tc>, window_params = [{transform_indices = @transform_0, window_bounds = array<i64: 1, 16, 16, 32>}, {pipeline_mode = #tpu.pipeline_mode<synchronous>, transform_indices = @transform_1, window_bounds = array<i64: 1, 8, 8>}, {pipeline_mode = #tpu.pipeline_mode<synchronous>, transform_indices = @transform_2, window_bounds = array<i64: 1, 8>}, {pipeline_mode = #tpu.pipeline_mode<synchronous>, transform_indices = @transform_3, window_bounds = array<i64: 2, 1, 32>}, {pipeline_mode = #tpu.pipeline_mode<synchronous>, transform_indices = @transform_4, window_bounds = array<i64: 2, 1, 32>}, {pipeline_mode = #tpu.pipeline_mode<synchronous>, transform_indices = @transform_5, window_bounds = array<i64: 1, 8>}, {pipeline_mode = #tpu.pipeline_mode<synchronous>, transform_indices = @transform_6, window_bounds = array<i64: 1, 8>}, {transform_indices = @transform_7, window_bounds = array<i64: 1, 16, 16, 8>}]} {
    %c0_i32 = arith.constant 0 : i32
    %0 = arith.cmpi eq, %arg1, %c0_i32 : i32
    %1 = arith.extui %0 : i1 to i32
    %c0_i32_0 = arith.constant 0 : i32
    %2 = arith.cmpi ne, %1, %c0_i32_0 : i32
    scf.if %2 {
      %c0_14 = arith.constant 0 : index
      %c0_15 = arith.constant 0 : index
      %c0_16 = arith.constant 0 : index
      %c0_17 = arith.constant 0 : index
      %21 = vector.load %arg2[%c0_14, %c0_15, %c0_16, %c0_17] : memref<1x16x16x32xf32, #tpu.memory_space<vmem>>, vector<1x16x16x8xf32>
      %22 = vector.shape_cast %21 : vector<1x16x16x8xf32> to vector<16x16x8xf32>
      %c0_18 = arith.constant 0 : index
      %c0_19 = arith.constant 0 : index
      %c0_20 = arith.constant 0 : index
      %23 = vector.load %arg5[%c0_18, %c0_19, %c0_20] : memref<2x1x32xf32, #tpu.memory_space<vmem>>, vector<2x1x32xf32>
      %cst_21 = arith.constant dense<0.000000e+00> : vector<1x32xf32>
      %24 = vector.multi_reduction <add>, %23, %cst_21 [0] : vector<2x1x32xf32> to vector<1x32xf32>
      %25 = vector.extract_strided_slice %24 {offsets = [0, 0], sizes = [1, 8], strides = [1, 1]} : vector<1x32xf32> to vector<1x8xf32>
      %c0_22 = arith.constant 0 : index
      %c0_23 = arith.constant 0 : index
      %c0_24 = arith.constant 0 : index
      %26 = vector.load %arg6[%c0_22, %c0_23, %c0_24] : memref<2x1x32xf32, #tpu.memory_space<vmem>>, vector<2x1x32xf32>
      %cst_25 = arith.constant dense<0.000000e+00> : vector<1x32xf32>
      %27 = vector.multi_reduction <add>, %26, %cst_25 [0] : vector<2x1x32xf32> to vector<1x32xf32>
      %28 = vector.extract_strided_slice %27 {offsets = [0, 0], sizes = [1, 8], strides = [1, 1]} : vector<1x32xf32> to vector<1x8xf32>
      %cst_26 = arith.constant 0.001953125 : f32
      %29 = vector.broadcast %cst_26 : f32 to vector<1x8xf32>
      %30 = arith.mulf %25, %29 : vector<1x8xf32>
      %cst_27 = arith.constant 0.001953125 : f32
      %31 = vector.broadcast %cst_27 : f32 to vector<1x8xf32>
      %32 = arith.mulf %28, %31 : vector<1x8xf32>
      %33 = arith.mulf %30, %30 : vector<1x8xf32>
      %34 = arith.subf %32, %33 : vector<1x8xf32>
      %cst_28 = arith.constant 0.000000e+00 : f32
      %35 = vector.broadcast %cst_28 : f32 to vector<1x8xf32>
      %36 = arith.maximumf %34, %35 : vector<1x8xf32>
      %cst_29 = arith.constant 9.99999974E-6 : f32
      %37 = vector.broadcast %cst_29 : f32 to vector<1x8xf32>
      %38 = arith.addf %36, %37 : vector<1x8xf32>
      %39 = math.rsqrt %38 : vector<1x8xf32>
      %c0_30 = arith.constant 0 : index
      %c0_31 = arith.constant 0 : index
      %40 = vector.load %arg7[%c0_30, %c0_31] : memref<1x8xf32, #tpu.memory_space<vmem>>, vector<1x8xf32>
      %41 = arith.mulf %40, %39 : vector<1x8xf32>
      %c0_32 = arith.constant 0 : index
      %c0_33 = arith.constant 0 : index
      %42 = vector.load %arg8[%c0_32, %c0_33] : memref<1x8xf32, #tpu.memory_space<vmem>>, vector<1x8xf32>
      %43 = arith.mulf %30, %41 : vector<1x8xf32>
      %44 = arith.subf %42, %43 : vector<1x8xf32>
      %45 = vector.shape_cast %41 : vector<1x8xf32> to vector<1x1x8xf32>
      %46 = vector.broadcast %45 : vector<1x1x8xf32> to vector<16x16x8xf32>
      %47 = arith.mulf %22, %46 : vector<16x16x8xf32>
      %48 = vector.shape_cast %44 : vector<1x8xf32> to vector<1x1x8xf32>
      %49 = vector.broadcast %48 : vector<1x1x8xf32> to vector<16x16x8xf32>
      %50 = arith.addf %47, %49 : vector<16x16x8xf32>
      %c0_34 = arith.constant 0 : index
      %c0_35 = arith.constant 0 : index
      %c0_36 = arith.constant 0 : index
      %51 = vector.load %arg10[%c0_34, %c0_35, %c0_36] : memref<16x16x8xf32, #tpu.memory_space<vmem>>, vector<16x16x8xf32>
      tpu.vector_store %arg10[%c0_34, %c0_35, %c0_36], %50 {strides = array<i32>} : memref<16x16x8xf32, #tpu.memory_space<vmem>>, vector<16x16x8xf32>,
    } else {
    }
    %c16_i32 = arith.constant 16 : i32
    %3 = arith.muli %arg1, %c16_i32 : i32
    %4 = tpu.assume_multiple %3, 16 : i32
    %cst = arith.constant 0.000000e+00 : f32
    %5 = vector.broadcast %cst : f32 to vector<256x8xf32>
    %c0_i32_1 = arith.constant 0 : i32
    %6 = arith.addi %4, %c0_i32_1 : i32
    %7 = arith.index_cast %6 : i32 to index
    %c0 = arith.constant 0 : index
    %c0_2 = arith.constant 0 : index
    %8 = vector.load %arg10[%7, %c0, %c0_2] : memref<16x16x8xf32, #tpu.memory_space<vmem>>, vector<16x16x8xf32>
    %9 = vector.shape_cast %8 : vector<16x16x8xf32> to vector<256x8xf32>
    %c0_3 = arith.constant 0 : index
    %c0_4 = arith.constant 0 : index
    %c0_5 = arith.constant 0 : index
    %10 = vector.load %arg3[%c0_3, %c0_4, %c0_5] : memref<1x8x8xf32, #tpu.memory_space<vmem>>, vector<1x8x8xf32>
    %11 = vector.shape_cast %10 : vector<1x8x8xf32> to vector<8x8xf32>
    %cst_6 = arith.constant dense<0.000000e+00> : vector<256x8xf32>
    %12 = tpu.matmul %9, %11, %cst_6 {dimension_numbers = #tpu.dot_dimension_numbers<[1], [0], [0], [1], [0, 0, 1, 1], [], []>} : vector<256x8xf32>, vector<8x8xf32>, vector<256x8xf32> -> vector<256x8xf32>
    %13 = arith.addf %5, %12 : vector<256x8xf32>
    %c0_7 = arith.constant 0 : index
    %c0_8 = arith.constant 0 : index
    %14 = vector.load %arg4[%c0_7, %c0_8] : memref<1x8xf32, #tpu.memory_space<vmem>>, vector<1x8xf32>
    %15 = vector.broadcast %14 : vector<1x8xf32> to vector<256x8xf32>
    %16 = arith.addf %13, %15 : vector<256x8xf32>
    %cst_9 = arith.constant 0.000000e+00 : f32
    %17 = vector.broadcast %cst_9 : f32 to vector<256x8xf32>
    %18 = arith.maximumf %16, %17 : vector<256x8xf32>
    %19 = vector.shape_cast %18 : vector<256x8xf32> to vector<1x16x16x8xf32>
    %c0_10 = arith.constant 0 : index
    %c0_11 = arith.constant 0 : index
    %c0_12 = arith.constant 0 : index
    %c0_13 = arith.constant 0 : index
    %20 = vector.load %arg9[%c0_10, %c0_11, %c0_12, %c0_13] : memref<1x16x16x8xf32, #tpu.memory_space<vmem>>, vector<1x16x16x8xf32>
    tpu.vector_store %arg9[%c0_10, %c0_11, %c0_12, %c0_13], %19 {strides = array<i32>} : memref<1x16x16x8xf32, #tpu.memory_space<vmem>>, vector<1x16x16x8xf32>,
    return
  }
  func.func @transform_0(%arg0: i32, %arg1: i32) -> (i32, i32, i32, i32) {
    %c0_i32 = arith.constant 0 : i32
    %c0_i32_0 = arith.constant 0 : i32
    %c0_i32_1 = arith.constant 0 : i32
    %c0_i32_2 = arith.constant 0 : i32
    return %arg0, %c0_i32, %c0_i32_0, %c0_i32_1 : i32, i32, i32, i32
  }
  func.func @transform_1(%arg0: i32, %arg1: i32) -> (i32, i32, i32) {
    %c0_i32 = arith.constant 0 : i32
    %c0_i32_0 = arith.constant 0 : i32
    %c0_i32_1 = arith.constant 0 : i32
    %c0_i32_2 = arith.constant 0 : i32
    return %c0_i32, %c0_i32_0, %c0_i32_1 : i32, i32, i32
  }
  func.func @transform_2(%arg0: i32, %arg1: i32) -> (i32, i32) {
    %c0_i32 = arith.constant 0 : i32
    %c0_i32_0 = arith.constant 0 : i32
    %c0_i32_1 = arith.constant 0 : i32
    return %c0_i32, %c0_i32_0 : i32, i32
  }
  func.func @transform_3(%arg0: i32, %arg1: i32) -> (i32, i32, i32) {
    %c0_i32 = arith.constant 0 : i32
    %c0_i32_0 = arith.constant 0 : i32
    %c0_i32_1 = arith.constant 0 : i32
    %c0_i32_2 = arith.constant 0 : i32
    return %c0_i32, %c0_i32_0, %c0_i32_1 : i32, i32, i32
  }
  func.func @transform_4(%arg0: i32, %arg1: i32) -> (i32, i32, i32) {
    %c0_i32 = arith.constant 0 : i32
    %c0_i32_0 = arith.constant 0 : i32
    %c0_i32_1 = arith.constant 0 : i32
    %c0_i32_2 = arith.constant 0 : i32
    return %c0_i32, %c0_i32_0, %c0_i32_1 : i32, i32, i32
  }
  func.func @transform_5(%arg0: i32, %arg1: i32) -> (i32, i32) {
    %c0_i32 = arith.constant 0 : i32
    %c0_i32_0 = arith.constant 0 : i32
    %c0_i32_1 = arith.constant 0 : i32
    return %c0_i32, %c0_i32_0 : i32, i32
  }
  func.func @transform_6(%arg0: i32, %arg1: i32) -> (i32, i32) {
    %c0_i32 = arith.constant 0 : i32
    %c0_i32_0 = arith.constant 0 : i32
    %c0_i32_1 = arith.constant 0 : i32
    return %c0_i32, %c0_i32_0 : i32, i32
  }
  func.func @transform_7(%arg0: i32, %arg1: i32) -> (i32, i32, i32, i32) {
    %c0_i32 = arith.constant 0 : i32
    %c0_i32_0 = arith.constant 0 : i32
    %c0_i32_1 = arith.constant 0 : i32
    return %arg0, %arg1, %c0_i32, %c0_i32_0 : i32, i32, i32, i32
  }
}

module attributes {stable_mosaic.version = 11 : i64} {
  func.func @_conv_bn_relu_kernel(%arg0: i32, %arg1: i32, %arg2: memref<1x16x16x4xf32, #tpu.memory_space<vmem>>, %arg3: memref<9x4x32xf32, #tpu.memory_space<vmem>>, %arg4: memref<1x32xf32, #tpu.memory_space<vmem>>, %arg5: memref<1x16x16x32xf32, #tpu.memory_space<vmem>>, %arg6: memref<1x1x32xf32, #tpu.memory_space<vmem>>, %arg7: memref<1x1x32xf32, #tpu.memory_space<vmem>>, %arg8: memref<18x18x4xf32, #tpu.memory_space<vmem>>) attributes {dimension_semantics = [#tpu.dimension_semantics<parallel>, #tpu.dimension_semantics<arbitrary>], iteration_bounds = array<i64: 2, 1>, scalar_prefetch = 0 : i64, scratch_operands = 1 : i64, tpu.core_type = #tpu.core_type<tc>, window_params = [{transform_indices = @transform_0, window_bounds = array<i64: 1, 16, 16, 4>}, {pipeline_mode = #tpu.pipeline_mode<synchronous>, transform_indices = @transform_1, window_bounds = array<i64: 9, 4, 32>}, {pipeline_mode = #tpu.pipeline_mode<synchronous>, transform_indices = @transform_2, window_bounds = array<i64: 1, 32>}, {transform_indices = @transform_3, window_bounds = array<i64: 1, 16, 16, 32>}, {transform_indices = @transform_4, window_bounds = array<i64: 1, 1, 32>}, {transform_indices = @transform_5, window_bounds = array<i64: 1, 1, 32>}]} {
    %c0_i32 = arith.constant 0 : i32
    %0 = arith.cmpi eq, %arg1, %c0_i32 : i32
    %1 = arith.extui %0 : i1 to i32
    %c0_i32_0 = arith.constant 0 : i32
    %2 = arith.cmpi ne, %1, %c0_i32_0 : i32
    scf.if %2 {
      %cst_76 = arith.constant 0.000000e+00 : f32
      %101 = vector.broadcast %cst_76 : f32 to vector<18x18x4xf32>
      %c0_77 = arith.constant 0 : index
      %c0_78 = arith.constant 0 : index
      %c0_79 = arith.constant 0 : index
      %102 = vector.load %arg8[%c0_77, %c0_78, %c0_79] : memref<18x18x4xf32, #tpu.memory_space<vmem>>, vector<18x18x4xf32>
      tpu.vector_store %arg8[%c0_77, %c0_78, %c0_79], %101 {strides = array<i32>} : memref<18x18x4xf32, #tpu.memory_space<vmem>>, vector<18x18x4xf32>,
      %c0_80 = arith.constant 0 : index
      %c0_81 = arith.constant 0 : index
      %c0_82 = arith.constant 0 : index
      %c0_83 = arith.constant 0 : index
      %103 = vector.load %arg2[%c0_80, %c0_81, %c0_82, %c0_83] : memref<1x16x16x4xf32, #tpu.memory_space<vmem>>, vector<1x16x16x4xf32>
      %104 = vector.shape_cast %103 : vector<1x16x16x4xf32> to vector<16x16x4xf32>
      %c1_84 = arith.constant 1 : index
      %c1_85 = arith.constant 1 : index
      %c0_86 = arith.constant 0 : index
      %105 = vector.load %arg8[%c1_84, %c1_85, %c0_86] : memref<18x18x4xf32, #tpu.memory_space<vmem>>, vector<16x16x4xf32>
      tpu.vector_store %arg8[%c1_84, %c1_85, %c0_86], %104 {strides = array<i32>} : memref<18x18x4xf32, #tpu.memory_space<vmem>>, vector<16x16x4xf32>,
    } else {
    }
    %c0_i32_1 = arith.constant 0 : i32
    %3 = arith.cmpi eq, %arg1, %c0_i32_1 : i32
    %4 = arith.extui %3 : i1 to i32
    %c0_i32_2 = arith.constant 0 : i32
    %5 = arith.cmpi ne, %4, %c0_i32_2 : i32
    scf.if %5 {
      %cst_76 = arith.constant 0.000000e+00 : f32
      %101 = vector.broadcast %cst_76 : f32 to vector<1x1x32xf32>
      %c0_77 = arith.constant 0 : index
      %c0_78 = arith.constant 0 : index
      %c0_79 = arith.constant 0 : index
      %102 = vector.load %arg6[%c0_77, %c0_78, %c0_79] : memref<1x1x32xf32, #tpu.memory_space<vmem>>, vector<1x1x32xf32>
      tpu.vector_store %arg6[%c0_77, %c0_78, %c0_79], %101 {strides = array<i32>} : memref<1x1x32xf32, #tpu.memory_space<vmem>>, vector<1x1x32xf32>,
      %cst_80 = arith.constant 0.000000e+00 : f32
      %103 = vector.broadcast %cst_80 : f32 to vector<1x1x32xf32>
      %c0_81 = arith.constant 0 : index
      %c0_82 = arith.constant 0 : index
      %c0_83 = arith.constant 0 : index
      %104 = vector.load %arg7[%c0_81, %c0_82, %c0_83] : memref<1x1x32xf32, #tpu.memory_space<vmem>>, vector<1x1x32xf32>
      tpu.vector_store %arg7[%c0_81, %c0_82, %c0_83], %103 {strides = array<i32>} : memref<1x1x32xf32, #tpu.memory_space<vmem>>, vector<1x1x32xf32>,
    } else {
    }
    %c16_i32 = arith.constant 16 : i32
    %6 = arith.muli %arg1, %c16_i32 : i32
    %7 = tpu.assume_multiple %6, 16 : i32
    %cst = arith.constant 0.000000e+00 : f32
    %8 = vector.broadcast %cst : f32 to vector<256x32xf32>
    %c0_i32_3 = arith.constant 0 : i32
    %9 = arith.addi %7, %c0_i32_3 : i32
    %10 = arith.index_cast %9 : i32 to index
    %c0 = arith.constant 0 : index
    %c0_4 = arith.constant 0 : index
    %11 = vector.load %arg8[%10, %c0, %c0_4] : memref<18x18x4xf32, #tpu.memory_space<vmem>>, vector<16x16x4xf32>
    %12 = vector.shape_cast %11 : vector<16x16x4xf32> to vector<256x4xf32>
    %c0_5 = arith.constant 0 : index
    %c0_6 = arith.constant 0 : index
    %c0_7 = arith.constant 0 : index
    %13 = vector.load %arg3[%c0_5, %c0_6, %c0_7] : memref<9x4x32xf32, #tpu.memory_space<vmem>>, vector<1x4x32xf32>
    %14 = vector.shape_cast %13 : vector<1x4x32xf32> to vector<4x32xf32>
    %cst_8 = arith.constant dense<0.000000e+00> : vector<256x32xf32>
    %15 = tpu.matmul %12, %14, %cst_8 {dimension_numbers = #tpu.dot_dimension_numbers<[1], [0], [0], [1], [0, 0, 1, 1], [], []>} : vector<256x4xf32>, vector<4x32xf32>, vector<256x32xf32> -> vector<256x32xf32>
    %16 = arith.addf %8, %15 : vector<256x32xf32>
    %c0_i32_9 = arith.constant 0 : i32
    %17 = arith.addi %7, %c0_i32_9 : i32
    %18 = arith.index_cast %17 : i32 to index
    %c1 = arith.constant 1 : index
    %c0_10 = arith.constant 0 : index
    %19 = vector.load %arg8[%18, %c1, %c0_10] : memref<18x18x4xf32, #tpu.memory_space<vmem>>, vector<16x16x4xf32>
    %20 = vector.shape_cast %19 : vector<16x16x4xf32> to vector<256x4xf32>
    %c1_11 = arith.constant 1 : index
    %c0_12 = arith.constant 0 : index
    %c0_13 = arith.constant 0 : index
    %21 = vector.load %arg3[%c1_11, %c0_12, %c0_13] : memref<9x4x32xf32, #tpu.memory_space<vmem>>, vector<1x4x32xf32>
    %22 = vector.shape_cast %21 : vector<1x4x32xf32> to vector<4x32xf32>
    %cst_14 = arith.constant dense<0.000000e+00> : vector<256x32xf32>
    %23 = tpu.matmul %20, %22, %cst_14 {dimension_numbers = #tpu.dot_dimension_numbers<[1], [0], [0], [1], [0, 0, 1, 1], [], []>} : vector<256x4xf32>, vector<4x32xf32>, vector<256x32xf32> -> vector<256x32xf32>
    %24 = arith.addf %16, %23 : vector<256x32xf32>
    %c0_i32_15 = arith.constant 0 : i32
    %25 = arith.addi %7, %c0_i32_15 : i32
    %26 = arith.index_cast %25 : i32 to index
    %c2 = arith.constant 2 : index
    %c0_16 = arith.constant 0 : index
    %27 = vector.load %arg8[%26, %c2, %c0_16] : memref<18x18x4xf32, #tpu.memory_space<vmem>>, vector<16x16x4xf32>
    %28 = vector.shape_cast %27 : vector<16x16x4xf32> to vector<256x4xf32>
    %c2_17 = arith.constant 2 : index
    %c0_18 = arith.constant 0 : index
    %c0_19 = arith.constant 0 : index
    %29 = vector.load %arg3[%c2_17, %c0_18, %c0_19] : memref<9x4x32xf32, #tpu.memory_space<vmem>>, vector<1x4x32xf32>
    %30 = vector.shape_cast %29 : vector<1x4x32xf32> to vector<4x32xf32>
    %cst_20 = arith.constant dense<0.000000e+00> : vector<256x32xf32>
    %31 = tpu.matmul %28, %30, %cst_20 {dimension_numbers = #tpu.dot_dimension_numbers<[1], [0], [0], [1], [0, 0, 1, 1], [], []>} : vector<256x4xf32>, vector<4x32xf32>, vector<256x32xf32> -> vector<256x32xf32>
    %32 = arith.addf %24, %31 : vector<256x32xf32>
    %c1_i32 = arith.constant 1 : i32
    %33 = arith.addi %7, %c1_i32 : i32
    %34 = arith.index_cast %33 : i32 to index
    %c0_21 = arith.constant 0 : index
    %c0_22 = arith.constant 0 : index
    %35 = vector.load %arg8[%34, %c0_21, %c0_22] : memref<18x18x4xf32, #tpu.memory_space<vmem>>, vector<16x16x4xf32>
    %36 = vector.shape_cast %35 : vector<16x16x4xf32> to vector<256x4xf32>
    %c3 = arith.constant 3 : index
    %c0_23 = arith.constant 0 : index
    %c0_24 = arith.constant 0 : index
    %37 = vector.load %arg3[%c3, %c0_23, %c0_24] : memref<9x4x32xf32, #tpu.memory_space<vmem>>, vector<1x4x32xf32>
    %38 = vector.shape_cast %37 : vector<1x4x32xf32> to vector<4x32xf32>
    %cst_25 = arith.constant dense<0.000000e+00> : vector<256x32xf32>
    %39 = tpu.matmul %36, %38, %cst_25 {dimension_numbers = #tpu.dot_dimension_numbers<[1], [0], [0], [1], [0, 0, 1, 1], [], []>} : vector<256x4xf32>, vector<4x32xf32>, vector<256x32xf32> -> vector<256x32xf32>
    %40 = arith.addf %32, %39 : vector<256x32xf32>
    %c1_i32_26 = arith.constant 1 : i32
    %41 = arith.addi %7, %c1_i32_26 : i32
    %42 = arith.index_cast %41 : i32 to index
    %c1_27 = arith.constant 1 : index
    %c0_28 = arith.constant 0 : index
    %43 = vector.load %arg8[%42, %c1_27, %c0_28] : memref<18x18x4xf32, #tpu.memory_space<vmem>>, vector<16x16x4xf32>
    %44 = vector.shape_cast %43 : vector<16x16x4xf32> to vector<256x4xf32>
    %c4 = arith.constant 4 : index
    %c0_29 = arith.constant 0 : index
    %c0_30 = arith.constant 0 : index
    %45 = vector.load %arg3[%c4, %c0_29, %c0_30] : memref<9x4x32xf32, #tpu.memory_space<vmem>>, vector<1x4x32xf32>
    %46 = vector.shape_cast %45 : vector<1x4x32xf32> to vector<4x32xf32>
    %cst_31 = arith.constant dense<0.000000e+00> : vector<256x32xf32>
    %47 = tpu.matmul %44, %46, %cst_31 {dimension_numbers = #tpu.dot_dimension_numbers<[1], [0], [0], [1], [0, 0, 1, 1], [], []>} : vector<256x4xf32>, vector<4x32xf32>, vector<256x32xf32> -> vector<256x32xf32>
    %48 = arith.addf %40, %47 : vector<256x32xf32>
    %c1_i32_32 = arith.constant 1 : i32
    %49 = arith.addi %7, %c1_i32_32 : i32
    %50 = arith.index_cast %49 : i32 to index
    %c2_33 = arith.constant 2 : index
    %c0_34 = arith.constant 0 : index
    %51 = vector.load %arg8[%50, %c2_33, %c0_34] : memref<18x18x4xf32, #tpu.memory_space<vmem>>, vector<16x16x4xf32>
    %52 = vector.shape_cast %51 : vector<16x16x4xf32> to vector<256x4xf32>
    %c5 = arith.constant 5 : index
    %c0_35 = arith.constant 0 : index
    %c0_36 = arith.constant 0 : index
    %53 = vector.load %arg3[%c5, %c0_35, %c0_36] : memref<9x4x32xf32, #tpu.memory_space<vmem>>, vector<1x4x32xf32>
    %54 = vector.shape_cast %53 : vector<1x4x32xf32> to vector<4x32xf32>
    %cst_37 = arith.constant dense<0.000000e+00> : vector<256x32xf32>
    %55 = tpu.matmul %52, %54, %cst_37 {dimension_numbers = #tpu.dot_dimension_numbers<[1], [0], [0], [1], [0, 0, 1, 1], [], []>} : vector<256x4xf32>, vector<4x32xf32>, vector<256x32xf32> -> vector<256x32xf32>
    %56 = arith.addf %48, %55 : vector<256x32xf32>
    %c2_i32 = arith.constant 2 : i32
    %57 = arith.addi %7, %c2_i32 : i32
    %58 = arith.index_cast %57 : i32 to index
    %c0_38 = arith.constant 0 : index
    %c0_39 = arith.constant 0 : index
    %59 = vector.load %arg8[%58, %c0_38, %c0_39] : memref<18x18x4xf32, #tpu.memory_space<vmem>>, vector<16x16x4xf32>
    %60 = vector.shape_cast %59 : vector<16x16x4xf32> to vector<256x4xf32>
    %c6 = arith.constant 6 : index
    %c0_40 = arith.constant 0 : index
    %c0_41 = arith.constant 0 : index
    %61 = vector.load %arg3[%c6, %c0_40, %c0_41] : memref<9x4x32xf32, #tpu.memory_space<vmem>>, vector<1x4x32xf32>
    %62 = vector.shape_cast %61 : vector<1x4x32xf32> to vector<4x32xf32>
    %cst_42 = arith.constant dense<0.000000e+00> : vector<256x32xf32>
    %63 = tpu.matmul %60, %62, %cst_42 {dimension_numbers = #tpu.dot_dimension_numbers<[1], [0], [0], [1], [0, 0, 1, 1], [], []>} : vector<256x4xf32>, vector<4x32xf32>, vector<256x32xf32> -> vector<256x32xf32>
    %64 = arith.addf %56, %63 : vector<256x32xf32>
    %c2_i32_43 = arith.constant 2 : i32
    %65 = arith.addi %7, %c2_i32_43 : i32
    %66 = arith.index_cast %65 : i32 to index
    %c1_44 = arith.constant 1 : index
    %c0_45 = arith.constant 0 : index
    %67 = vector.load %arg8[%66, %c1_44, %c0_45] : memref<18x18x4xf32, #tpu.memory_space<vmem>>, vector<16x16x4xf32>
    %68 = vector.shape_cast %67 : vector<16x16x4xf32> to vector<256x4xf32>
    %c7 = arith.constant 7 : index
    %c0_46 = arith.constant 0 : index
    %c0_47 = arith.constant 0 : index
    %69 = vector.load %arg3[%c7, %c0_46, %c0_47] : memref<9x4x32xf32, #tpu.memory_space<vmem>>, vector<1x4x32xf32>
    %70 = vector.shape_cast %69 : vector<1x4x32xf32> to vector<4x32xf32>
    %cst_48 = arith.constant dense<0.000000e+00> : vector<256x32xf32>
    %71 = tpu.matmul %68, %70, %cst_48 {dimension_numbers = #tpu.dot_dimension_numbers<[1], [0], [0], [1], [0, 0, 1, 1], [], []>} : vector<256x4xf32>, vector<4x32xf32>, vector<256x32xf32> -> vector<256x32xf32>
    %72 = arith.addf %64, %71 : vector<256x32xf32>
    %c2_i32_49 = arith.constant 2 : i32
    %73 = arith.addi %7, %c2_i32_49 : i32
    %74 = arith.index_cast %73 : i32 to index
    %c2_50 = arith.constant 2 : index
    %c0_51 = arith.constant 0 : index
    %75 = vector.load %arg8[%74, %c2_50, %c0_51] : memref<18x18x4xf32, #tpu.memory_space<vmem>>, vector<16x16x4xf32>
    %76 = vector.shape_cast %75 : vector<16x16x4xf32> to vector<256x4xf32>
    %c8 = arith.constant 8 : index
    %c0_52 = arith.constant 0 : index
    %c0_53 = arith.constant 0 : index
    %77 = vector.load %arg3[%c8, %c0_52, %c0_53] : memref<9x4x32xf32, #tpu.memory_space<vmem>>, vector<1x4x32xf32>
    %78 = vector.shape_cast %77 : vector<1x4x32xf32> to vector<4x32xf32>
    %cst_54 = arith.constant dense<0.000000e+00> : vector<256x32xf32>
    %79 = tpu.matmul %76, %78, %cst_54 {dimension_numbers = #tpu.dot_dimension_numbers<[1], [0], [0], [1], [0, 0, 1, 1], [], []>} : vector<256x4xf32>, vector<4x32xf32>, vector<256x32xf32> -> vector<256x32xf32>
    %80 = arith.addf %72, %79 : vector<256x32xf32>
    %c0_55 = arith.constant 0 : index
    %c0_56 = arith.constant 0 : index
    %81 = vector.load %arg4[%c0_55, %c0_56] : memref<1x32xf32, #tpu.memory_space<vmem>>, vector<1x32xf32>
    %82 = vector.broadcast %81 : vector<1x32xf32> to vector<256x32xf32>
    %83 = arith.addf %80, %82 : vector<256x32xf32>
    %cst_57 = arith.constant 0.000000e+00 : f32
    %84 = vector.broadcast %cst_57 : f32 to vector<256x32xf32>
    %85 = arith.maximumf %83, %84 : vector<256x32xf32>
    %86 = vector.shape_cast %85 : vector<256x32xf32> to vector<1x16x16x32xf32>
    %c0_58 = arith.constant 0 : index
    %c0_59 = arith.constant 0 : index
    %c0_60 = arith.constant 0 : index
    %c0_61 = arith.constant 0 : index
    %87 = vector.load %arg5[%c0_58, %c0_59, %c0_60, %c0_61] : memref<1x16x16x32xf32, #tpu.memory_space<vmem>>, vector<1x16x16x32xf32>
    tpu.vector_store %arg5[%c0_58, %c0_59, %c0_60, %c0_61], %86 {strides = array<i32>} : memref<1x16x16x32xf32, #tpu.memory_space<vmem>>, vector<1x16x16x32xf32>,
    %c0_62 = arith.constant 0 : index
    %c0_63 = arith.constant 0 : index
    %c0_64 = arith.constant 0 : index
    %88 = vector.load %arg6[%c0_62, %c0_63, %c0_64] : memref<1x1x32xf32, #tpu.memory_space<vmem>>, vector<1x1x32xf32>
    %cst_65 = arith.constant dense<0.000000e+00> : vector<32xf32>
    %89 = vector.multi_reduction <add>, %85, %cst_65 [0] : vector<256x32xf32> to vector<32xf32>
    %90 = vector.shape_cast %89 : vector<32xf32> to vector<1x32xf32>
    %91 = vector.shape_cast %90 : vector<1x32xf32> to vector<1x1x32xf32>
    %92 = arith.addf %88, %91 : vector<1x1x32xf32>
    %c0_66 = arith.constant 0 : index
    %c0_67 = arith.constant 0 : index
    %c0_68 = arith.constant 0 : index
    %93 = vector.load %arg6[%c0_66, %c0_67, %c0_68] : memref<1x1x32xf32, #tpu.memory_space<vmem>>, vector<1x1x32xf32>
    tpu.vector_store %arg6[%c0_66, %c0_67, %c0_68], %92 {strides = array<i32>} : memref<1x1x32xf32, #tpu.memory_space<vmem>>, vector<1x1x32xf32>,
    %c0_69 = arith.constant 0 : index
    %c0_70 = arith.constant 0 : index
    %c0_71 = arith.constant 0 : index
    %94 = vector.load %arg7[%c0_69, %c0_70, %c0_71] : memref<1x1x32xf32, #tpu.memory_space<vmem>>, vector<1x1x32xf32>
    %95 = arith.mulf %85, %85 : vector<256x32xf32>
    %cst_72 = arith.constant dense<0.000000e+00> : vector<32xf32>
    %96 = vector.multi_reduction <add>, %95, %cst_72 [0] : vector<256x32xf32> to vector<32xf32>
    %97 = vector.shape_cast %96 : vector<32xf32> to vector<1x32xf32>
    %98 = vector.shape_cast %97 : vector<1x32xf32> to vector<1x1x32xf32>
    %99 = arith.addf %94, %98 : vector<1x1x32xf32>
    %c0_73 = arith.constant 0 : index
    %c0_74 = arith.constant 0 : index
    %c0_75 = arith.constant 0 : index
    %100 = vector.load %arg7[%c0_73, %c0_74, %c0_75] : memref<1x1x32xf32, #tpu.memory_space<vmem>>, vector<1x1x32xf32>
    tpu.vector_store %arg7[%c0_73, %c0_74, %c0_75], %99 {strides = array<i32>} : memref<1x1x32xf32, #tpu.memory_space<vmem>>, vector<1x1x32xf32>,
    return
  }
  func.func @transform_0(%arg0: i32, %arg1: i32) -> (i32, i32, i32, i32) {
    %c0_i32 = arith.constant 0 : i32
    %c0_i32_0 = arith.constant 0 : i32
    %c0_i32_1 = arith.constant 0 : i32
    %c0_i32_2 = arith.constant 0 : i32
    return %arg0, %c0_i32, %c0_i32_0, %c0_i32_1 : i32, i32, i32, i32
  }
  func.func @transform_1(%arg0: i32, %arg1: i32) -> (i32, i32, i32) {
    %c0_i32 = arith.constant 0 : i32
    %c0_i32_0 = arith.constant 0 : i32
    %c0_i32_1 = arith.constant 0 : i32
    %c0_i32_2 = arith.constant 0 : i32
    return %c0_i32, %c0_i32_0, %c0_i32_1 : i32, i32, i32
  }
  func.func @transform_2(%arg0: i32, %arg1: i32) -> (i32, i32) {
    %c0_i32 = arith.constant 0 : i32
    %c0_i32_0 = arith.constant 0 : i32
    %c0_i32_1 = arith.constant 0 : i32
    return %c0_i32, %c0_i32_0 : i32, i32
  }
  func.func @transform_3(%arg0: i32, %arg1: i32) -> (i32, i32, i32, i32) {
    %c0_i32 = arith.constant 0 : i32
    %c0_i32_0 = arith.constant 0 : i32
    %c0_i32_1 = arith.constant 0 : i32
    return %arg0, %arg1, %c0_i32, %c0_i32_0 : i32, i32, i32, i32
  }
  func.func @transform_4(%arg0: i32, %arg1: i32) -> (i32, i32, i32) {
    %c0_i32 = arith.constant 0 : i32
    %c0_i32_0 = arith.constant 0 : i32
    %c0_i32_1 = arith.constant 0 : i32
    return %arg0, %c0_i32, %c0_i32_0 : i32, i32, i32
  }
  func.func @transform_5(%arg0: i32, %arg1: i32) -> (i32, i32, i32) {
    %c0_i32 = arith.constant 0 : i32
    %c0_i32_0 = arith.constant 0 : i32
    %c0_i32_1 = arith.constant 0 : i32
    return %arg0, %c0_i32, %c0_i32_0 : i32, i32, i32
  }
}

module attributes {stable_mosaic.version = 11 : i64} {
  func.func @_conv_bn_relu_kernel(%arg0: i32, %arg1: i32, %arg2: memref<1x16x16x32xf32, #tpu.memory_space<vmem>>, %arg3: memref<9x16x16xf32, #tpu.memory_space<vmem>>, %arg4: memref<1x16xf32, #tpu.memory_space<vmem>>, %arg5: memref<2x1x32xf32, #tpu.memory_space<vmem>>, %arg6: memref<2x1x32xf32, #tpu.memory_space<vmem>>, %arg7: memref<1x16xf32, #tpu.memory_space<vmem>>, %arg8: memref<1x16xf32, #tpu.memory_space<vmem>>, %arg9: memref<1x16x16x16xf32, #tpu.memory_space<vmem>>, %arg10: memref<1x1x16xf32, #tpu.memory_space<vmem>>, %arg11: memref<1x1x16xf32, #tpu.memory_space<vmem>>, %arg12: memref<18x18x16xf32, #tpu.memory_space<vmem>>) attributes {dimension_semantics = [#tpu.dimension_semantics<parallel>, #tpu.dimension_semantics<arbitrary>], iteration_bounds = array<i64: 2, 1>, scalar_prefetch = 0 : i64, scratch_operands = 1 : i64, tpu.core_type = #tpu.core_type<tc>, window_params = [{transform_indices = @transform_0, window_bounds = array<i64: 1, 16, 16, 32>}, {pipeline_mode = #tpu.pipeline_mode<synchronous>, transform_indices = @transform_1, window_bounds = array<i64: 9, 16, 16>}, {pipeline_mode = #tpu.pipeline_mode<synchronous>, transform_indices = @transform_2, window_bounds = array<i64: 1, 16>}, {pipeline_mode = #tpu.pipeline_mode<synchronous>, transform_indices = @transform_3, window_bounds = array<i64: 2, 1, 32>}, {pipeline_mode = #tpu.pipeline_mode<synchronous>, transform_indices = @transform_4, window_bounds = array<i64: 2, 1, 32>}, {pipeline_mode = #tpu.pipeline_mode<synchronous>, transform_indices = @transform_5, window_bounds = array<i64: 1, 16>}, {pipeline_mode = #tpu.pipeline_mode<synchronous>, transform_indices = @transform_6, window_bounds = array<i64: 1, 16>}, {transform_indices = @transform_7, window_bounds = array<i64: 1, 16, 16, 16>}, {transform_indices = @transform_8, window_bounds = array<i64: 1, 1, 16>}, {transform_indices = @transform_9, window_bounds = array<i64: 1, 1, 16>}]} {
    %c0_i32 = arith.constant 0 : i32
    %0 = arith.cmpi eq, %arg1, %c0_i32 : i32
    %1 = arith.extui %0 : i1 to i32
    %c0_i32_0 = arith.constant 0 : i32
    %2 = arith.cmpi ne, %1, %c0_i32_0 : i32
    scf.if %2 {
      %cst_76 = arith.constant 0.000000e+00 : f32
      %101 = vector.broadcast %cst_76 : f32 to vector<18x18x16xf32>
      %c0_77 = arith.constant 0 : index
      %c0_78 = arith.constant 0 : index
      %c0_79 = arith.constant 0 : index
      %102 = vector.load %arg12[%c0_77, %c0_78, %c0_79] : memref<18x18x16xf32, #tpu.memory_space<vmem>>, vector<18x18x16xf32>
      tpu.vector_store %arg12[%c0_77, %c0_78, %c0_79], %101 {strides = array<i32>} : memref<18x18x16xf32, #tpu.memory_space<vmem>>, vector<18x18x16xf32>,
      %c0_80 = arith.constant 0 : index
      %c0_81 = arith.constant 0 : index
      %c0_82 = arith.constant 0 : index
      %c8_83 = arith.constant 8 : index
      %103 = vector.load %arg2[%c0_80, %c0_81, %c0_82, %c8_83] : memref<1x16x16x32xf32, #tpu.memory_space<vmem>>, vector<1x16x16x16xf32>
      %104 = vector.shape_cast %103 : vector<1x16x16x16xf32> to vector<16x16x16xf32>
      %c0_84 = arith.constant 0 : index
      %c0_85 = arith.constant 0 : index
      %c0_86 = arith.constant 0 : index
      %105 = vector.load %arg5[%c0_84, %c0_85, %c0_86] : memref<2x1x32xf32, #tpu.memory_space<vmem>>, vector<2x1x32xf32>
      %cst_87 = arith.constant dense<0.000000e+00> : vector<1x32xf32>
      %106 = vector.multi_reduction <add>, %105, %cst_87 [0] : vector<2x1x32xf32> to vector<1x32xf32>
      %107 = vector.extract_strided_slice %106 {offsets = [0, 8], sizes = [1, 16], strides = [1, 1]} : vector<1x32xf32> to vector<1x16xf32>
      %c0_88 = arith.constant 0 : index
      %c0_89 = arith.constant 0 : index
      %c0_90 = arith.constant 0 : index
      %108 = vector.load %arg6[%c0_88, %c0_89, %c0_90] : memref<2x1x32xf32, #tpu.memory_space<vmem>>, vector<2x1x32xf32>
      %cst_91 = arith.constant dense<0.000000e+00> : vector<1x32xf32>
      %109 = vector.multi_reduction <add>, %108, %cst_91 [0] : vector<2x1x32xf32> to vector<1x32xf32>
      %110 = vector.extract_strided_slice %109 {offsets = [0, 8], sizes = [1, 16], strides = [1, 1]} : vector<1x32xf32> to vector<1x16xf32>
      %cst_92 = arith.constant 0.001953125 : f32
      %111 = vector.broadcast %cst_92 : f32 to vector<1x16xf32>
      %112 = arith.mulf %107, %111 : vector<1x16xf32>
      %cst_93 = arith.constant 0.001953125 : f32
      %113 = vector.broadcast %cst_93 : f32 to vector<1x16xf32>
      %114 = arith.mulf %110, %113 : vector<1x16xf32>
      %115 = arith.mulf %112, %112 : vector<1x16xf32>
      %116 = arith.subf %114, %115 : vector<1x16xf32>
      %cst_94 = arith.constant 0.000000e+00 : f32
      %117 = vector.broadcast %cst_94 : f32 to vector<1x16xf32>
      %118 = arith.maximumf %116, %117 : vector<1x16xf32>
      %cst_95 = arith.constant 9.99999974E-6 : f32
      %119 = vector.broadcast %cst_95 : f32 to vector<1x16xf32>
      %120 = arith.addf %118, %119 : vector<1x16xf32>
      %121 = math.rsqrt %120 : vector<1x16xf32>
      %c0_96 = arith.constant 0 : index
      %c0_97 = arith.constant 0 : index
      %122 = vector.load %arg7[%c0_96, %c0_97] : memref<1x16xf32, #tpu.memory_space<vmem>>, vector<1x16xf32>
      %123 = arith.mulf %122, %121 : vector<1x16xf32>
      %c0_98 = arith.constant 0 : index
      %c0_99 = arith.constant 0 : index
      %124 = vector.load %arg8[%c0_98, %c0_99] : memref<1x16xf32, #tpu.memory_space<vmem>>, vector<1x16xf32>
      %125 = arith.mulf %112, %123 : vector<1x16xf32>
      %126 = arith.subf %124, %125 : vector<1x16xf32>
      %127 = vector.shape_cast %123 : vector<1x16xf32> to vector<1x1x16xf32>
      %128 = vector.broadcast %127 : vector<1x1x16xf32> to vector<16x16x16xf32>
      %129 = arith.mulf %104, %128 : vector<16x16x16xf32>
      %130 = vector.shape_cast %126 : vector<1x16xf32> to vector<1x1x16xf32>
      %131 = vector.broadcast %130 : vector<1x1x16xf32> to vector<16x16x16xf32>
      %132 = arith.addf %129, %131 : vector<16x16x16xf32>
      %c1_100 = arith.constant 1 : index
      %c1_101 = arith.constant 1 : index
      %c0_102 = arith.constant 0 : index
      %133 = vector.load %arg12[%c1_100, %c1_101, %c0_102] : memref<18x18x16xf32, #tpu.memory_space<vmem>>, vector<16x16x16xf32>
      tpu.vector_store %arg12[%c1_100, %c1_101, %c0_102], %132 {strides = array<i32>} : memref<18x18x16xf32, #tpu.memory_space<vmem>>, vector<16x16x16xf32>,
    } else {
    }
    %c0_i32_1 = arith.constant 0 : i32
    %3 = arith.cmpi eq, %arg1, %c0_i32_1 : i32
    %4 = arith.extui %3 : i1 to i32
    %c0_i32_2 = arith.constant 0 : i32
    %5 = arith.cmpi ne, %4, %c0_i32_2 : i32
    scf.if %5 {
      %cst_76 = arith.constant 0.000000e+00 : f32
      %101 = vector.broadcast %cst_76 : f32 to vector<1x1x16xf32>
      %c0_77 = arith.constant 0 : index
      %c0_78 = arith.constant 0 : index
      %c0_79 = arith.constant 0 : index
      %102 = vector.load %arg10[%c0_77, %c0_78, %c0_79] : memref<1x1x16xf32, #tpu.memory_space<vmem>>, vector<1x1x16xf32>
      tpu.vector_store %arg10[%c0_77, %c0_78, %c0_79], %101 {strides = array<i32>} : memref<1x1x16xf32, #tpu.memory_space<vmem>>, vector<1x1x16xf32>,
      %cst_80 = arith.constant 0.000000e+00 : f32
      %103 = vector.broadcast %cst_80 : f32 to vector<1x1x16xf32>
      %c0_81 = arith.constant 0 : index
      %c0_82 = arith.constant 0 : index
      %c0_83 = arith.constant 0 : index
      %104 = vector.load %arg11[%c0_81, %c0_82, %c0_83] : memref<1x1x16xf32, #tpu.memory_space<vmem>>, vector<1x1x16xf32>
      tpu.vector_store %arg11[%c0_81, %c0_82, %c0_83], %103 {strides = array<i32>} : memref<1x1x16xf32, #tpu.memory_space<vmem>>, vector<1x1x16xf32>,
    } else {
    }
    %c16_i32 = arith.constant 16 : i32
    %6 = arith.muli %arg1, %c16_i32 : i32
    %7 = tpu.assume_multiple %6, 16 : i32
    %cst = arith.constant 0.000000e+00 : f32
    %8 = vector.broadcast %cst : f32 to vector<256x16xf32>
    %c0_i32_3 = arith.constant 0 : i32
    %9 = arith.addi %7, %c0_i32_3 : i32
    %10 = arith.index_cast %9 : i32 to index
    %c0 = arith.constant 0 : index
    %c0_4 = arith.constant 0 : index
    %11 = vector.load %arg12[%10, %c0, %c0_4] : memref<18x18x16xf32, #tpu.memory_space<vmem>>, vector<16x16x16xf32>
    %12 = vector.shape_cast %11 : vector<16x16x16xf32> to vector<256x16xf32>
    %c0_5 = arith.constant 0 : index
    %c0_6 = arith.constant 0 : index
    %c0_7 = arith.constant 0 : index
    %13 = vector.load %arg3[%c0_5, %c0_6, %c0_7] : memref<9x16x16xf32, #tpu.memory_space<vmem>>, vector<1x16x16xf32>
    %14 = vector.shape_cast %13 : vector<1x16x16xf32> to vector<16x16xf32>
    %cst_8 = arith.constant dense<0.000000e+00> : vector<256x16xf32>
    %15 = tpu.matmul %12, %14, %cst_8 {dimension_numbers = #tpu.dot_dimension_numbers<[1], [0], [0], [1], [0, 0, 1, 1], [], []>} : vector<256x16xf32>, vector<16x16xf32>, vector<256x16xf32> -> vector<256x16xf32>
    %16 = arith.addf %8, %15 : vector<256x16xf32>
    %c0_i32_9 = arith.constant 0 : i32
    %17 = arith.addi %7, %c0_i32_9 : i32
    %18 = arith.index_cast %17 : i32 to index
    %c1 = arith.constant 1 : index
    %c0_10 = arith.constant 0 : index
    %19 = vector.load %arg12[%18, %c1, %c0_10] : memref<18x18x16xf32, #tpu.memory_space<vmem>>, vector<16x16x16xf32>
    %20 = vector.shape_cast %19 : vector<16x16x16xf32> to vector<256x16xf32>
    %c1_11 = arith.constant 1 : index
    %c0_12 = arith.constant 0 : index
    %c0_13 = arith.constant 0 : index
    %21 = vector.load %arg3[%c1_11, %c0_12, %c0_13] : memref<9x16x16xf32, #tpu.memory_space<vmem>>, vector<1x16x16xf32>
    %22 = vector.shape_cast %21 : vector<1x16x16xf32> to vector<16x16xf32>
    %cst_14 = arith.constant dense<0.000000e+00> : vector<256x16xf32>
    %23 = tpu.matmul %20, %22, %cst_14 {dimension_numbers = #tpu.dot_dimension_numbers<[1], [0], [0], [1], [0, 0, 1, 1], [], []>} : vector<256x16xf32>, vector<16x16xf32>, vector<256x16xf32> -> vector<256x16xf32>
    %24 = arith.addf %16, %23 : vector<256x16xf32>
    %c0_i32_15 = arith.constant 0 : i32
    %25 = arith.addi %7, %c0_i32_15 : i32
    %26 = arith.index_cast %25 : i32 to index
    %c2 = arith.constant 2 : index
    %c0_16 = arith.constant 0 : index
    %27 = vector.load %arg12[%26, %c2, %c0_16] : memref<18x18x16xf32, #tpu.memory_space<vmem>>, vector<16x16x16xf32>
    %28 = vector.shape_cast %27 : vector<16x16x16xf32> to vector<256x16xf32>
    %c2_17 = arith.constant 2 : index
    %c0_18 = arith.constant 0 : index
    %c0_19 = arith.constant 0 : index
    %29 = vector.load %arg3[%c2_17, %c0_18, %c0_19] : memref<9x16x16xf32, #tpu.memory_space<vmem>>, vector<1x16x16xf32>
    %30 = vector.shape_cast %29 : vector<1x16x16xf32> to vector<16x16xf32>
    %cst_20 = arith.constant dense<0.000000e+00> : vector<256x16xf32>
    %31 = tpu.matmul %28, %30, %cst_20 {dimension_numbers = #tpu.dot_dimension_numbers<[1], [0], [0], [1], [0, 0, 1, 1], [], []>} : vector<256x16xf32>, vector<16x16xf32>, vector<256x16xf32> -> vector<256x16xf32>
    %32 = arith.addf %24, %31 : vector<256x16xf32>
    %c1_i32 = arith.constant 1 : i32
    %33 = arith.addi %7, %c1_i32 : i32
    %34 = arith.index_cast %33 : i32 to index
    %c0_21 = arith.constant 0 : index
    %c0_22 = arith.constant 0 : index
    %35 = vector.load %arg12[%34, %c0_21, %c0_22] : memref<18x18x16xf32, #tpu.memory_space<vmem>>, vector<16x16x16xf32>
    %36 = vector.shape_cast %35 : vector<16x16x16xf32> to vector<256x16xf32>
    %c3 = arith.constant 3 : index
    %c0_23 = arith.constant 0 : index
    %c0_24 = arith.constant 0 : index
    %37 = vector.load %arg3[%c3, %c0_23, %c0_24] : memref<9x16x16xf32, #tpu.memory_space<vmem>>, vector<1x16x16xf32>
    %38 = vector.shape_cast %37 : vector<1x16x16xf32> to vector<16x16xf32>
    %cst_25 = arith.constant dense<0.000000e+00> : vector<256x16xf32>
    %39 = tpu.matmul %36, %38, %cst_25 {dimension_numbers = #tpu.dot_dimension_numbers<[1], [0], [0], [1], [0, 0, 1, 1], [], []>} : vector<256x16xf32>, vector<16x16xf32>, vector<256x16xf32> -> vector<256x16xf32>
    %40 = arith.addf %32, %39 : vector<256x16xf32>
    %c1_i32_26 = arith.constant 1 : i32
    %41 = arith.addi %7, %c1_i32_26 : i32
    %42 = arith.index_cast %41 : i32 to index
    %c1_27 = arith.constant 1 : index
    %c0_28 = arith.constant 0 : index
    %43 = vector.load %arg12[%42, %c1_27, %c0_28] : memref<18x18x16xf32, #tpu.memory_space<vmem>>, vector<16x16x16xf32>
    %44 = vector.shape_cast %43 : vector<16x16x16xf32> to vector<256x16xf32>
    %c4 = arith.constant 4 : index
    %c0_29 = arith.constant 0 : index
    %c0_30 = arith.constant 0 : index
    %45 = vector.load %arg3[%c4, %c0_29, %c0_30] : memref<9x16x16xf32, #tpu.memory_space<vmem>>, vector<1x16x16xf32>
    %46 = vector.shape_cast %45 : vector<1x16x16xf32> to vector<16x16xf32>
    %cst_31 = arith.constant dense<0.000000e+00> : vector<256x16xf32>
    %47 = tpu.matmul %44, %46, %cst_31 {dimension_numbers = #tpu.dot_dimension_numbers<[1], [0], [0], [1], [0, 0, 1, 1], [], []>} : vector<256x16xf32>, vector<16x16xf32>, vector<256x16xf32> -> vector<256x16xf32>
    %48 = arith.addf %40, %47 : vector<256x16xf32>
    %c1_i32_32 = arith.constant 1 : i32
    %49 = arith.addi %7, %c1_i32_32 : i32
    %50 = arith.index_cast %49 : i32 to index
    %c2_33 = arith.constant 2 : index
    %c0_34 = arith.constant 0 : index
    %51 = vector.load %arg12[%50, %c2_33, %c0_34] : memref<18x18x16xf32, #tpu.memory_space<vmem>>, vector<16x16x16xf32>
    %52 = vector.shape_cast %51 : vector<16x16x16xf32> to vector<256x16xf32>
    %c5 = arith.constant 5 : index
    %c0_35 = arith.constant 0 : index
    %c0_36 = arith.constant 0 : index
    %53 = vector.load %arg3[%c5, %c0_35, %c0_36] : memref<9x16x16xf32, #tpu.memory_space<vmem>>, vector<1x16x16xf32>
    %54 = vector.shape_cast %53 : vector<1x16x16xf32> to vector<16x16xf32>
    %cst_37 = arith.constant dense<0.000000e+00> : vector<256x16xf32>
    %55 = tpu.matmul %52, %54, %cst_37 {dimension_numbers = #tpu.dot_dimension_numbers<[1], [0], [0], [1], [0, 0, 1, 1], [], []>} : vector<256x16xf32>, vector<16x16xf32>, vector<256x16xf32> -> vector<256x16xf32>
    %56 = arith.addf %48, %55 : vector<256x16xf32>
    %c2_i32 = arith.constant 2 : i32
    %57 = arith.addi %7, %c2_i32 : i32
    %58 = arith.index_cast %57 : i32 to index
    %c0_38 = arith.constant 0 : index
    %c0_39 = arith.constant 0 : index
    %59 = vector.load %arg12[%58, %c0_38, %c0_39] : memref<18x18x16xf32, #tpu.memory_space<vmem>>, vector<16x16x16xf32>
    %60 = vector.shape_cast %59 : vector<16x16x16xf32> to vector<256x16xf32>
    %c6 = arith.constant 6 : index
    %c0_40 = arith.constant 0 : index
    %c0_41 = arith.constant 0 : index
    %61 = vector.load %arg3[%c6, %c0_40, %c0_41] : memref<9x16x16xf32, #tpu.memory_space<vmem>>, vector<1x16x16xf32>
    %62 = vector.shape_cast %61 : vector<1x16x16xf32> to vector<16x16xf32>
    %cst_42 = arith.constant dense<0.000000e+00> : vector<256x16xf32>
    %63 = tpu.matmul %60, %62, %cst_42 {dimension_numbers = #tpu.dot_dimension_numbers<[1], [0], [0], [1], [0, 0, 1, 1], [], []>} : vector<256x16xf32>, vector<16x16xf32>, vector<256x16xf32> -> vector<256x16xf32>
    %64 = arith.addf %56, %63 : vector<256x16xf32>
    %c2_i32_43 = arith.constant 2 : i32
    %65 = arith.addi %7, %c2_i32_43 : i32
    %66 = arith.index_cast %65 : i32 to index
    %c1_44 = arith.constant 1 : index
    %c0_45 = arith.constant 0 : index
    %67 = vector.load %arg12[%66, %c1_44, %c0_45] : memref<18x18x16xf32, #tpu.memory_space<vmem>>, vector<16x16x16xf32>
    %68 = vector.shape_cast %67 : vector<16x16x16xf32> to vector<256x16xf32>
    %c7 = arith.constant 7 : index
    %c0_46 = arith.constant 0 : index
    %c0_47 = arith.constant 0 : index
    %69 = vector.load %arg3[%c7, %c0_46, %c0_47] : memref<9x16x16xf32, #tpu.memory_space<vmem>>, vector<1x16x16xf32>
    %70 = vector.shape_cast %69 : vector<1x16x16xf32> to vector<16x16xf32>
    %cst_48 = arith.constant dense<0.000000e+00> : vector<256x16xf32>
    %71 = tpu.matmul %68, %70, %cst_48 {dimension_numbers = #tpu.dot_dimension_numbers<[1], [0], [0], [1], [0, 0, 1, 1], [], []>} : vector<256x16xf32>, vector<16x16xf32>, vector<256x16xf32> -> vector<256x16xf32>
    %72 = arith.addf %64, %71 : vector<256x16xf32>
    %c2_i32_49 = arith.constant 2 : i32
    %73 = arith.addi %7, %c2_i32_49 : i32
    %74 = arith.index_cast %73 : i32 to index
    %c2_50 = arith.constant 2 : index
    %c0_51 = arith.constant 0 : index
    %75 = vector.load %arg12[%74, %c2_50, %c0_51] : memref<18x18x16xf32, #tpu.memory_space<vmem>>, vector<16x16x16xf32>
    %76 = vector.shape_cast %75 : vector<16x16x16xf32> to vector<256x16xf32>
    %c8 = arith.constant 8 : index
    %c0_52 = arith.constant 0 : index
    %c0_53 = arith.constant 0 : index
    %77 = vector.load %arg3[%c8, %c0_52, %c0_53] : memref<9x16x16xf32, #tpu.memory_space<vmem>>, vector<1x16x16xf32>
    %78 = vector.shape_cast %77 : vector<1x16x16xf32> to vector<16x16xf32>
    %cst_54 = arith.constant dense<0.000000e+00> : vector<256x16xf32>
    %79 = tpu.matmul %76, %78, %cst_54 {dimension_numbers = #tpu.dot_dimension_numbers<[1], [0], [0], [1], [0, 0, 1, 1], [], []>} : vector<256x16xf32>, vector<16x16xf32>, vector<256x16xf32> -> vector<256x16xf32>
    %80 = arith.addf %72, %79 : vector<256x16xf32>
    %c0_55 = arith.constant 0 : index
    %c0_56 = arith.constant 0 : index
    %81 = vector.load %arg4[%c0_55, %c0_56] : memref<1x16xf32, #tpu.memory_space<vmem>>, vector<1x16xf32>
    %82 = vector.broadcast %81 : vector<1x16xf32> to vector<256x16xf32>
    %83 = arith.addf %80, %82 : vector<256x16xf32>
    %cst_57 = arith.constant 0.000000e+00 : f32
    %84 = vector.broadcast %cst_57 : f32 to vector<256x16xf32>
    %85 = arith.maximumf %83, %84 : vector<256x16xf32>
    %86 = vector.shape_cast %85 : vector<256x16xf32> to vector<1x16x16x16xf32>
    %c0_58 = arith.constant 0 : index
    %c0_59 = arith.constant 0 : index
    %c0_60 = arith.constant 0 : index
    %c0_61 = arith.constant 0 : index
    %87 = vector.load %arg9[%c0_58, %c0_59, %c0_60, %c0_61] : memref<1x16x16x16xf32, #tpu.memory_space<vmem>>, vector<1x16x16x16xf32>
    tpu.vector_store %arg9[%c0_58, %c0_59, %c0_60, %c0_61], %86 {strides = array<i32>} : memref<1x16x16x16xf32, #tpu.memory_space<vmem>>, vector<1x16x16x16xf32>,
    %c0_62 = arith.constant 0 : index
    %c0_63 = arith.constant 0 : index
    %c0_64 = arith.constant 0 : index
    %88 = vector.load %arg10[%c0_62, %c0_63, %c0_64] : memref<1x1x16xf32, #tpu.memory_space<vmem>>, vector<1x1x16xf32>
    %cst_65 = arith.constant dense<0.000000e+00> : vector<16xf32>
    %89 = vector.multi_reduction <add>, %85, %cst_65 [0] : vector<256x16xf32> to vector<16xf32>
    %90 = vector.shape_cast %89 : vector<16xf32> to vector<1x16xf32>
    %91 = vector.shape_cast %90 : vector<1x16xf32> to vector<1x1x16xf32>
    %92 = arith.addf %88, %91 : vector<1x1x16xf32>
    %c0_66 = arith.constant 0 : index
    %c0_67 = arith.constant 0 : index
    %c0_68 = arith.constant 0 : index
    %93 = vector.load %arg10[%c0_66, %c0_67, %c0_68] : memref<1x1x16xf32, #tpu.memory_space<vmem>>, vector<1x1x16xf32>
    tpu.vector_store %arg10[%c0_66, %c0_67, %c0_68], %92 {strides = array<i32>} : memref<1x1x16xf32, #tpu.memory_space<vmem>>, vector<1x1x16xf32>,
    %c0_69 = arith.constant 0 : index
    %c0_70 = arith.constant 0 : index
    %c0_71 = arith.constant 0 : index
    %94 = vector.load %arg11[%c0_69, %c0_70, %c0_71] : memref<1x1x16xf32, #tpu.memory_space<vmem>>, vector<1x1x16xf32>
    %95 = arith.mulf %85, %85 : vector<256x16xf32>
    %cst_72 = arith.constant dense<0.000000e+00> : vector<16xf32>
    %96 = vector.multi_reduction <add>, %95, %cst_72 [0] : vector<256x16xf32> to vector<16xf32>
    %97 = vector.shape_cast %96 : vector<16xf32> to vector<1x16xf32>
    %98 = vector.shape_cast %97 : vector<1x16xf32> to vector<1x1x16xf32>
    %99 = arith.addf %94, %98 : vector<1x1x16xf32>
    %c0_73 = arith.constant 0 : index
    %c0_74 = arith.constant 0 : index
    %c0_75 = arith.constant 0 : index
    %100 = vector.load %arg11[%c0_73, %c0_74, %c0_75] : memref<1x1x16xf32, #tpu.memory_space<vmem>>, vector<1x1x16xf32>
    tpu.vector_store %arg11[%c0_73, %c0_74, %c0_75], %99 {strides = array<i32>} : memref<1x1x16xf32, #tpu.memory_space<vmem>>, vector<1x1x16xf32>,
    return
  }
  func.func @transform_0(%arg0: i32, %arg1: i32) -> (i32, i32, i32, i32) {
    %c0_i32 = arith.constant 0 : i32
    %c0_i32_0 = arith.constant 0 : i32
    %c0_i32_1 = arith.constant 0 : i32
    %c0_i32_2 = arith.constant 0 : i32
    return %arg0, %c0_i32, %c0_i32_0, %c0_i32_1 : i32, i32, i32, i32
  }
  func.func @transform_1(%arg0: i32, %arg1: i32) -> (i32, i32, i32) {
    %c0_i32 = arith.constant 0 : i32
    %c0_i32_0 = arith.constant 0 : i32
    %c0_i32_1 = arith.constant 0 : i32
    %c0_i32_2 = arith.constant 0 : i32
    return %c0_i32, %c0_i32_0, %c0_i32_1 : i32, i32, i32
  }
  func.func @transform_2(%arg0: i32, %arg1: i32) -> (i32, i32) {
    %c0_i32 = arith.constant 0 : i32
    %c0_i32_0 = arith.constant 0 : i32
    %c0_i32_1 = arith.constant 0 : i32
    return %c0_i32, %c0_i32_0 : i32, i32
  }
  func.func @transform_3(%arg0: i32, %arg1: i32) -> (i32, i32, i32) {
    %c0_i32 = arith.constant 0 : i32
    %c0_i32_0 = arith.constant 0 : i32
    %c0_i32_1 = arith.constant 0 : i32
    %c0_i32_2 = arith.constant 0 : i32
    return %c0_i32, %c0_i32_0, %c0_i32_1 : i32, i32, i32
  }
  func.func @transform_4(%arg0: i32, %arg1: i32) -> (i32, i32, i32) {
    %c0_i32 = arith.constant 0 : i32
    %c0_i32_0 = arith.constant 0 : i32
    %c0_i32_1 = arith.constant 0 : i32
    %c0_i32_2 = arith.constant 0 : i32
    return %c0_i32, %c0_i32_0, %c0_i32_1 : i32, i32, i32
  }
  func.func @transform_5(%arg0: i32, %arg1: i32) -> (i32, i32) {
    %c0_i32 = arith.constant 0 : i32
    %c0_i32_0 = arith.constant 0 : i32
    %c0_i32_1 = arith.constant 0 : i32
    return %c0_i32, %c0_i32_0 : i32, i32
  }
  func.func @transform_6(%arg0: i32, %arg1: i32) -> (i32, i32) {
    %c0_i32 = arith.constant 0 : i32
    %c0_i32_0 = arith.constant 0 : i32
    %c0_i32_1 = arith.constant 0 : i32
    return %c0_i32, %c0_i32_0 : i32, i32
  }
  func.func @transform_7(%arg0: i32, %arg1: i32) -> (i32, i32, i32, i32) {
    %c0_i32 = arith.constant 0 : i32
    %c0_i32_0 = arith.constant 0 : i32
    %c0_i32_1 = arith.constant 0 : i32
    return %arg0, %arg1, %c0_i32, %c0_i32_0 : i32, i32, i32, i32
  }
  func.func @transform_8(%arg0: i32, %arg1: i32) -> (i32, i32, i32) {
    %c0_i32 = arith.constant 0 : i32
    %c0_i32_0 = arith.constant 0 : i32
    %c0_i32_1 = arith.constant 0 : i32
    return %arg0, %c0_i32, %c0_i32_0 : i32, i32, i32
  }
  func.func @transform_9(%arg0: i32, %arg1: i32) -> (i32, i32, i32) {
    %c0_i32 = arith.constant 0 : i32
    %c0_i32_0 = arith.constant 0 : i32
    %c0_i32_1 = arith.constant 0 : i32
    return %arg0, %c0_i32, %c0_i32_0 : i32, i32, i32
  }
}

module attributes {stable_mosaic.version = 11 : i64} {
  func.func @_conv_bn_relu_kernel(%arg0: i32, %arg1: i32, %arg2: memref<1x16x16x16xf32, #tpu.memory_space<vmem>>, %arg3: memref<9x8x8xf32, #tpu.memory_space<vmem>>, %arg4: memref<1x8xf32, #tpu.memory_space<vmem>>, %arg5: memref<2x1x16xf32, #tpu.memory_space<vmem>>, %arg6: memref<2x1x16xf32, #tpu.memory_space<vmem>>, %arg7: memref<1x8xf32, #tpu.memory_space<vmem>>, %arg8: memref<1x8xf32, #tpu.memory_space<vmem>>, %arg9: memref<1x16x16x8xf32, #tpu.memory_space<vmem>>, %arg10: memref<18x18x8xf32, #tpu.memory_space<vmem>>) attributes {dimension_semantics = [#tpu.dimension_semantics<parallel>, #tpu.dimension_semantics<arbitrary>], iteration_bounds = array<i64: 2, 1>, scalar_prefetch = 0 : i64, scratch_operands = 1 : i64, tpu.core_type = #tpu.core_type<tc>, window_params = [{transform_indices = @transform_0, window_bounds = array<i64: 1, 16, 16, 16>}, {pipeline_mode = #tpu.pipeline_mode<synchronous>, transform_indices = @transform_1, window_bounds = array<i64: 9, 8, 8>}, {pipeline_mode = #tpu.pipeline_mode<synchronous>, transform_indices = @transform_2, window_bounds = array<i64: 1, 8>}, {pipeline_mode = #tpu.pipeline_mode<synchronous>, transform_indices = @transform_3, window_bounds = array<i64: 2, 1, 16>}, {pipeline_mode = #tpu.pipeline_mode<synchronous>, transform_indices = @transform_4, window_bounds = array<i64: 2, 1, 16>}, {pipeline_mode = #tpu.pipeline_mode<synchronous>, transform_indices = @transform_5, window_bounds = array<i64: 1, 8>}, {pipeline_mode = #tpu.pipeline_mode<synchronous>, transform_indices = @transform_6, window_bounds = array<i64: 1, 8>}, {transform_indices = @transform_7, window_bounds = array<i64: 1, 16, 16, 8>}]} {
    %c0_i32 = arith.constant 0 : i32
    %0 = arith.cmpi eq, %arg1, %c0_i32 : i32
    %1 = arith.extui %0 : i1 to i32
    %c0_i32_0 = arith.constant 0 : i32
    %2 = arith.cmpi ne, %1, %c0_i32_0 : i32
    scf.if %2 {
      %cst_60 = arith.constant 0.000000e+00 : f32
      %85 = vector.broadcast %cst_60 : f32 to vector<18x18x8xf32>
      %c0_61 = arith.constant 0 : index
      %c0_62 = arith.constant 0 : index
      %c0_63 = arith.constant 0 : index
      %86 = vector.load %arg10[%c0_61, %c0_62, %c0_63] : memref<18x18x8xf32, #tpu.memory_space<vmem>>, vector<18x18x8xf32>
      tpu.vector_store %arg10[%c0_61, %c0_62, %c0_63], %85 {strides = array<i32>} : memref<18x18x8xf32, #tpu.memory_space<vmem>>, vector<18x18x8xf32>,
      %c0_64 = arith.constant 0 : index
      %c0_65 = arith.constant 0 : index
      %c0_66 = arith.constant 0 : index
      %c0_67 = arith.constant 0 : index
      %87 = vector.load %arg2[%c0_64, %c0_65, %c0_66, %c0_67] : memref<1x16x16x16xf32, #tpu.memory_space<vmem>>, vector<1x16x16x8xf32>
      %88 = vector.shape_cast %87 : vector<1x16x16x8xf32> to vector<16x16x8xf32>
      %c0_68 = arith.constant 0 : index
      %c0_69 = arith.constant 0 : index
      %c0_70 = arith.constant 0 : index
      %89 = vector.load %arg5[%c0_68, %c0_69, %c0_70] : memref<2x1x16xf32, #tpu.memory_space<vmem>>, vector<2x1x16xf32>
      %cst_71 = arith.constant dense<0.000000e+00> : vector<1x16xf32>
      %90 = vector.multi_reduction <add>, %89, %cst_71 [0] : vector<2x1x16xf32> to vector<1x16xf32>
      %91 = vector.extract_strided_slice %90 {offsets = [0, 0], sizes = [1, 8], strides = [1, 1]} : vector<1x16xf32> to vector<1x8xf32>
      %c0_72 = arith.constant 0 : index
      %c0_73 = arith.constant 0 : index
      %c0_74 = arith.constant 0 : index
      %92 = vector.load %arg6[%c0_72, %c0_73, %c0_74] : memref<2x1x16xf32, #tpu.memory_space<vmem>>, vector<2x1x16xf32>
      %cst_75 = arith.constant dense<0.000000e+00> : vector<1x16xf32>
      %93 = vector.multi_reduction <add>, %92, %cst_75 [0] : vector<2x1x16xf32> to vector<1x16xf32>
      %94 = vector.extract_strided_slice %93 {offsets = [0, 0], sizes = [1, 8], strides = [1, 1]} : vector<1x16xf32> to vector<1x8xf32>
      %cst_76 = arith.constant 0.001953125 : f32
      %95 = vector.broadcast %cst_76 : f32 to vector<1x8xf32>
      %96 = arith.mulf %91, %95 : vector<1x8xf32>
      %cst_77 = arith.constant 0.001953125 : f32
      %97 = vector.broadcast %cst_77 : f32 to vector<1x8xf32>
      %98 = arith.mulf %94, %97 : vector<1x8xf32>
      %99 = arith.mulf %96, %96 : vector<1x8xf32>
      %100 = arith.subf %98, %99 : vector<1x8xf32>
      %cst_78 = arith.constant 0.000000e+00 : f32
      %101 = vector.broadcast %cst_78 : f32 to vector<1x8xf32>
      %102 = arith.maximumf %100, %101 : vector<1x8xf32>
      %cst_79 = arith.constant 9.99999974E-6 : f32
      %103 = vector.broadcast %cst_79 : f32 to vector<1x8xf32>
      %104 = arith.addf %102, %103 : vector<1x8xf32>
      %105 = math.rsqrt %104 : vector<1x8xf32>
      %c0_80 = arith.constant 0 : index
      %c0_81 = arith.constant 0 : index
      %106 = vector.load %arg7[%c0_80, %c0_81] : memref<1x8xf32, #tpu.memory_space<vmem>>, vector<1x8xf32>
      %107 = arith.mulf %106, %105 : vector<1x8xf32>
      %c0_82 = arith.constant 0 : index
      %c0_83 = arith.constant 0 : index
      %108 = vector.load %arg8[%c0_82, %c0_83] : memref<1x8xf32, #tpu.memory_space<vmem>>, vector<1x8xf32>
      %109 = arith.mulf %96, %107 : vector<1x8xf32>
      %110 = arith.subf %108, %109 : vector<1x8xf32>
      %111 = vector.shape_cast %107 : vector<1x8xf32> to vector<1x1x8xf32>
      %112 = vector.broadcast %111 : vector<1x1x8xf32> to vector<16x16x8xf32>
      %113 = arith.mulf %88, %112 : vector<16x16x8xf32>
      %114 = vector.shape_cast %110 : vector<1x8xf32> to vector<1x1x8xf32>
      %115 = vector.broadcast %114 : vector<1x1x8xf32> to vector<16x16x8xf32>
      %116 = arith.addf %113, %115 : vector<16x16x8xf32>
      %c1_84 = arith.constant 1 : index
      %c1_85 = arith.constant 1 : index
      %c0_86 = arith.constant 0 : index
      %117 = vector.load %arg10[%c1_84, %c1_85, %c0_86] : memref<18x18x8xf32, #tpu.memory_space<vmem>>, vector<16x16x8xf32>
      tpu.vector_store %arg10[%c1_84, %c1_85, %c0_86], %116 {strides = array<i32>} : memref<18x18x8xf32, #tpu.memory_space<vmem>>, vector<16x16x8xf32>,
    } else {
    }
    %c16_i32 = arith.constant 16 : i32
    %3 = arith.muli %arg1, %c16_i32 : i32
    %4 = tpu.assume_multiple %3, 16 : i32
    %cst = arith.constant 0.000000e+00 : f32
    %5 = vector.broadcast %cst : f32 to vector<256x8xf32>
    %c0_i32_1 = arith.constant 0 : i32
    %6 = arith.addi %4, %c0_i32_1 : i32
    %7 = arith.index_cast %6 : i32 to index
    %c0 = arith.constant 0 : index
    %c0_2 = arith.constant 0 : index
    %8 = vector.load %arg10[%7, %c0, %c0_2] : memref<18x18x8xf32, #tpu.memory_space<vmem>>, vector<16x16x8xf32>
    %9 = vector.shape_cast %8 : vector<16x16x8xf32> to vector<256x8xf32>
    %c0_3 = arith.constant 0 : index
    %c0_4 = arith.constant 0 : index
    %c0_5 = arith.constant 0 : index
    %10 = vector.load %arg3[%c0_3, %c0_4, %c0_5] : memref<9x8x8xf32, #tpu.memory_space<vmem>>, vector<1x8x8xf32>
    %11 = vector.shape_cast %10 : vector<1x8x8xf32> to vector<8x8xf32>
    %cst_6 = arith.constant dense<0.000000e+00> : vector<256x8xf32>
    %12 = tpu.matmul %9, %11, %cst_6 {dimension_numbers = #tpu.dot_dimension_numbers<[1], [0], [0], [1], [0, 0, 1, 1], [], []>} : vector<256x8xf32>, vector<8x8xf32>, vector<256x8xf32> -> vector<256x8xf32>
    %13 = arith.addf %5, %12 : vector<256x8xf32>
    %c0_i32_7 = arith.constant 0 : i32
    %14 = arith.addi %4, %c0_i32_7 : i32
    %15 = arith.index_cast %14 : i32 to index
    %c1 = arith.constant 1 : index
    %c0_8 = arith.constant 0 : index
    %16 = vector.load %arg10[%15, %c1, %c0_8] : memref<18x18x8xf32, #tpu.memory_space<vmem>>, vector<16x16x8xf32>
    %17 = vector.shape_cast %16 : vector<16x16x8xf32> to vector<256x8xf32>
    %c1_9 = arith.constant 1 : index
    %c0_10 = arith.constant 0 : index
    %c0_11 = arith.constant 0 : index
    %18 = vector.load %arg3[%c1_9, %c0_10, %c0_11] : memref<9x8x8xf32, #tpu.memory_space<vmem>>, vector<1x8x8xf32>
    %19 = vector.shape_cast %18 : vector<1x8x8xf32> to vector<8x8xf32>
    %cst_12 = arith.constant dense<0.000000e+00> : vector<256x8xf32>
    %20 = tpu.matmul %17, %19, %cst_12 {dimension_numbers = #tpu.dot_dimension_numbers<[1], [0], [0], [1], [0, 0, 1, 1], [], []>} : vector<256x8xf32>, vector<8x8xf32>, vector<256x8xf32> -> vector<256x8xf32>
    %21 = arith.addf %13, %20 : vector<256x8xf32>
    %c0_i32_13 = arith.constant 0 : i32
    %22 = arith.addi %4, %c0_i32_13 : i32
    %23 = arith.index_cast %22 : i32 to index
    %c2 = arith.constant 2 : index
    %c0_14 = arith.constant 0 : index
    %24 = vector.load %arg10[%23, %c2, %c0_14] : memref<18x18x8xf32, #tpu.memory_space<vmem>>, vector<16x16x8xf32>
    %25 = vector.shape_cast %24 : vector<16x16x8xf32> to vector<256x8xf32>
    %c2_15 = arith.constant 2 : index
    %c0_16 = arith.constant 0 : index
    %c0_17 = arith.constant 0 : index
    %26 = vector.load %arg3[%c2_15, %c0_16, %c0_17] : memref<9x8x8xf32, #tpu.memory_space<vmem>>, vector<1x8x8xf32>
    %27 = vector.shape_cast %26 : vector<1x8x8xf32> to vector<8x8xf32>
    %cst_18 = arith.constant dense<0.000000e+00> : vector<256x8xf32>
    %28 = tpu.matmul %25, %27, %cst_18 {dimension_numbers = #tpu.dot_dimension_numbers<[1], [0], [0], [1], [0, 0, 1, 1], [], []>} : vector<256x8xf32>, vector<8x8xf32>, vector<256x8xf32> -> vector<256x8xf32>
    %29 = arith.addf %21, %28 : vector<256x8xf32>
    %c1_i32 = arith.constant 1 : i32
    %30 = arith.addi %4, %c1_i32 : i32
    %31 = arith.index_cast %30 : i32 to index
    %c0_19 = arith.constant 0 : index
    %c0_20 = arith.constant 0 : index
    %32 = vector.load %arg10[%31, %c0_19, %c0_20] : memref<18x18x8xf32, #tpu.memory_space<vmem>>, vector<16x16x8xf32>
    %33 = vector.shape_cast %32 : vector<16x16x8xf32> to vector<256x8xf32>
    %c3 = arith.constant 3 : index
    %c0_21 = arith.constant 0 : index
    %c0_22 = arith.constant 0 : index
    %34 = vector.load %arg3[%c3, %c0_21, %c0_22] : memref<9x8x8xf32, #tpu.memory_space<vmem>>, vector<1x8x8xf32>
    %35 = vector.shape_cast %34 : vector<1x8x8xf32> to vector<8x8xf32>
    %cst_23 = arith.constant dense<0.000000e+00> : vector<256x8xf32>
    %36 = tpu.matmul %33, %35, %cst_23 {dimension_numbers = #tpu.dot_dimension_numbers<[1], [0], [0], [1], [0, 0, 1, 1], [], []>} : vector<256x8xf32>, vector<8x8xf32>, vector<256x8xf32> -> vector<256x8xf32>
    %37 = arith.addf %29, %36 : vector<256x8xf32>
    %c1_i32_24 = arith.constant 1 : i32
    %38 = arith.addi %4, %c1_i32_24 : i32
    %39 = arith.index_cast %38 : i32 to index
    %c1_25 = arith.constant 1 : index
    %c0_26 = arith.constant 0 : index
    %40 = vector.load %arg10[%39, %c1_25, %c0_26] : memref<18x18x8xf32, #tpu.memory_space<vmem>>, vector<16x16x8xf32>
    %41 = vector.shape_cast %40 : vector<16x16x8xf32> to vector<256x8xf32>
    %c4 = arith.constant 4 : index
    %c0_27 = arith.constant 0 : index
    %c0_28 = arith.constant 0 : index
    %42 = vector.load %arg3[%c4, %c0_27, %c0_28] : memref<9x8x8xf32, #tpu.memory_space<vmem>>, vector<1x8x8xf32>
    %43 = vector.shape_cast %42 : vector<1x8x8xf32> to vector<8x8xf32>
    %cst_29 = arith.constant dense<0.000000e+00> : vector<256x8xf32>
    %44 = tpu.matmul %41, %43, %cst_29 {dimension_numbers = #tpu.dot_dimension_numbers<[1], [0], [0], [1], [0, 0, 1, 1], [], []>} : vector<256x8xf32>, vector<8x8xf32>, vector<256x8xf32> -> vector<256x8xf32>
    %45 = arith.addf %37, %44 : vector<256x8xf32>
    %c1_i32_30 = arith.constant 1 : i32
    %46 = arith.addi %4, %c1_i32_30 : i32
    %47 = arith.index_cast %46 : i32 to index
    %c2_31 = arith.constant 2 : index
    %c0_32 = arith.constant 0 : index
    %48 = vector.load %arg10[%47, %c2_31, %c0_32] : memref<18x18x8xf32, #tpu.memory_space<vmem>>, vector<16x16x8xf32>
    %49 = vector.shape_cast %48 : vector<16x16x8xf32> to vector<256x8xf32>
    %c5 = arith.constant 5 : index
    %c0_33 = arith.constant 0 : index
    %c0_34 = arith.constant 0 : index
    %50 = vector.load %arg3[%c5, %c0_33, %c0_34] : memref<9x8x8xf32, #tpu.memory_space<vmem>>, vector<1x8x8xf32>
    %51 = vector.shape_cast %50 : vector<1x8x8xf32> to vector<8x8xf32>
    %cst_35 = arith.constant dense<0.000000e+00> : vector<256x8xf32>
    %52 = tpu.matmul %49, %51, %cst_35 {dimension_numbers = #tpu.dot_dimension_numbers<[1], [0], [0], [1], [0, 0, 1, 1], [], []>} : vector<256x8xf32>, vector<8x8xf32>, vector<256x8xf32> -> vector<256x8xf32>
    %53 = arith.addf %45, %52 : vector<256x8xf32>
    %c2_i32 = arith.constant 2 : i32
    %54 = arith.addi %4, %c2_i32 : i32
    %55 = arith.index_cast %54 : i32 to index
    %c0_36 = arith.constant 0 : index
    %c0_37 = arith.constant 0 : index
    %56 = vector.load %arg10[%55, %c0_36, %c0_37] : memref<18x18x8xf32, #tpu.memory_space<vmem>>, vector<16x16x8xf32>
    %57 = vector.shape_cast %56 : vector<16x16x8xf32> to vector<256x8xf32>
    %c6 = arith.constant 6 : index
    %c0_38 = arith.constant 0 : index
    %c0_39 = arith.constant 0 : index
    %58 = vector.load %arg3[%c6, %c0_38, %c0_39] : memref<9x8x8xf32, #tpu.memory_space<vmem>>, vector<1x8x8xf32>
    %59 = vector.shape_cast %58 : vector<1x8x8xf32> to vector<8x8xf32>
    %cst_40 = arith.constant dense<0.000000e+00> : vector<256x8xf32>
    %60 = tpu.matmul %57, %59, %cst_40 {dimension_numbers = #tpu.dot_dimension_numbers<[1], [0], [0], [1], [0, 0, 1, 1], [], []>} : vector<256x8xf32>, vector<8x8xf32>, vector<256x8xf32> -> vector<256x8xf32>
    %61 = arith.addf %53, %60 : vector<256x8xf32>
    %c2_i32_41 = arith.constant 2 : i32
    %62 = arith.addi %4, %c2_i32_41 : i32
    %63 = arith.index_cast %62 : i32 to index
    %c1_42 = arith.constant 1 : index
    %c0_43 = arith.constant 0 : index
    %64 = vector.load %arg10[%63, %c1_42, %c0_43] : memref<18x18x8xf32, #tpu.memory_space<vmem>>, vector<16x16x8xf32>
    %65 = vector.shape_cast %64 : vector<16x16x8xf32> to vector<256x8xf32>
    %c7 = arith.constant 7 : index
    %c0_44 = arith.constant 0 : index
    %c0_45 = arith.constant 0 : index
    %66 = vector.load %arg3[%c7, %c0_44, %c0_45] : memref<9x8x8xf32, #tpu.memory_space<vmem>>, vector<1x8x8xf32>
    %67 = vector.shape_cast %66 : vector<1x8x8xf32> to vector<8x8xf32>
    %cst_46 = arith.constant dense<0.000000e+00> : vector<256x8xf32>
    %68 = tpu.matmul %65, %67, %cst_46 {dimension_numbers = #tpu.dot_dimension_numbers<[1], [0], [0], [1], [0, 0, 1, 1], [], []>} : vector<256x8xf32>, vector<8x8xf32>, vector<256x8xf32> -> vector<256x8xf32>
    %69 = arith.addf %61, %68 : vector<256x8xf32>
    %c2_i32_47 = arith.constant 2 : i32
    %70 = arith.addi %4, %c2_i32_47 : i32
    %71 = arith.index_cast %70 : i32 to index
    %c2_48 = arith.constant 2 : index
    %c0_49 = arith.constant 0 : index
    %72 = vector.load %arg10[%71, %c2_48, %c0_49] : memref<18x18x8xf32, #tpu.memory_space<vmem>>, vector<16x16x8xf32>
    %73 = vector.shape_cast %72 : vector<16x16x8xf32> to vector<256x8xf32>
    %c8 = arith.constant 8 : index
    %c0_50 = arith.constant 0 : index
    %c0_51 = arith.constant 0 : index
    %74 = vector.load %arg3[%c8, %c0_50, %c0_51] : memref<9x8x8xf32, #tpu.memory_space<vmem>>, vector<1x8x8xf32>
    %75 = vector.shape_cast %74 : vector<1x8x8xf32> to vector<8x8xf32>
    %cst_52 = arith.constant dense<0.000000e+00> : vector<256x8xf32>
    %76 = tpu.matmul %73, %75, %cst_52 {dimension_numbers = #tpu.dot_dimension_numbers<[1], [0], [0], [1], [0, 0, 1, 1], [], []>} : vector<256x8xf32>, vector<8x8xf32>, vector<256x8xf32> -> vector<256x8xf32>
    %77 = arith.addf %69, %76 : vector<256x8xf32>
    %c0_53 = arith.constant 0 : index
    %c0_54 = arith.constant 0 : index
    %78 = vector.load %arg4[%c0_53, %c0_54] : memref<1x8xf32, #tpu.memory_space<vmem>>, vector<1x8xf32>
    %79 = vector.broadcast %78 : vector<1x8xf32> to vector<256x8xf32>
    %80 = arith.addf %77, %79 : vector<256x8xf32>
    %cst_55 = arith.constant 0.000000e+00 : f32
    %81 = vector.broadcast %cst_55 : f32 to vector<256x8xf32>
    %82 = arith.maximumf %80, %81 : vector<256x8xf32>
    %83 = vector.shape_cast %82 : vector<256x8xf32> to vector<1x16x16x8xf32>
    %c0_56 = arith.constant 0 : index
    %c0_57 = arith.constant 0 : index
    %c0_58 = arith.constant 0 : index
    %c0_59 = arith.constant 0 : index
    %84 = vector.load %arg9[%c0_56, %c0_57, %c0_58, %c0_59] : memref<1x16x16x8xf32, #tpu.memory_space<vmem>>, vector<1x16x16x8xf32>
    tpu.vector_store %arg9[%c0_56, %c0_57, %c0_58, %c0_59], %83 {strides = array<i32>} : memref<1x16x16x8xf32, #tpu.memory_space<vmem>>, vector<1x16x16x8xf32>,
    return
  }
  func.func @transform_0(%arg0: i32, %arg1: i32) -> (i32, i32, i32, i32) {
    %c0_i32 = arith.constant 0 : i32
    %c0_i32_0 = arith.constant 0 : i32
    %c0_i32_1 = arith.constant 0 : i32
    %c0_i32_2 = arith.constant 0 : i32
    return %arg0, %c0_i32, %c0_i32_0, %c0_i32_1 : i32, i32, i32, i32
  }
  func.func @transform_1(%arg0: i32, %arg1: i32) -> (i32, i32, i32) {
    %c0_i32 = arith.constant 0 : i32
    %c0_i32_0 = arith.constant 0 : i32
    %c0_i32_1 = arith.constant 0 : i32
    %c0_i32_2 = arith.constant 0 : i32
    return %c0_i32, %c0_i32_0, %c0_i32_1 : i32, i32, i32
  }
  func.func @transform_2(%arg0: i32, %arg1: i32) -> (i32, i32) {
    %c0_i32 = arith.constant 0 : i32
    %c0_i32_0 = arith.constant 0 : i32
    %c0_i32_1 = arith.constant 0 : i32
    return %c0_i32, %c0_i32_0 : i32, i32
  }
  func.func @transform_3(%arg0: i32, %arg1: i32) -> (i32, i32, i32) {
    %c0_i32 = arith.constant 0 : i32
    %c0_i32_0 = arith.constant 0 : i32
    %c0_i32_1 = arith.constant 0 : i32
    %c0_i32_2 = arith.constant 0 : i32
    return %c0_i32, %c0_i32_0, %c0_i32_1 : i32, i32, i32
  }
  func.func @transform_4(%arg0: i32, %arg1: i32) -> (i32, i32, i32) {
    %c0_i32 = arith.constant 0 : i32
    %c0_i32_0 = arith.constant 0 : i32
    %c0_i32_1 = arith.constant 0 : i32
    %c0_i32_2 = arith.constant 0 : i32
    return %c0_i32, %c0_i32_0, %c0_i32_1 : i32, i32, i32
  }
  func.func @transform_5(%arg0: i32, %arg1: i32) -> (i32, i32) {
    %c0_i32 = arith.constant 0 : i32
    %c0_i32_0 = arith.constant 0 : i32
    %c0_i32_1 = arith.constant 0 : i32
    return %c0_i32, %c0_i32_0 : i32, i32
  }
  func.func @transform_6(%arg0: i32, %arg1: i32) -> (i32, i32) {
    %c0_i32 = arith.constant 0 : i32
    %c0_i32_0 = arith.constant 0 : i32
    %c0_i32_1 = arith.constant 0 : i32
    return %c0_i32, %c0_i32_0 : i32, i32
  }
  func.func @transform_7(%arg0: i32, %arg1: i32) -> (i32, i32, i32, i32) {
    %c0_i32 = arith.constant 0 : i32
    %c0_i32_0 = arith.constant 0 : i32
    %c0_i32_1 = arith.constant 0 : i32
    return %arg0, %arg1, %c0_i32, %c0_i32_0 : i32, i32, i32, i32
  }
}

</mosaic_0001>

<bundles_post_ra>
// kernel: inception_forward.5
= control target key start
LH: loop header
LB: loop body
LE: loop exit
PB: predicated region body
PF: predicated region fallthrough
CT: control target
= control target key end

     0   :  { %s1211_s24 = smov 0   ;;  %s1213_s25 = smov 0   ;;  %s1545_s0 = inlined_call_operand.vmem [shape: f32[2,16,16,32], index: 0, kind: input, shape index: {}]   ;;  %s1546_s1 = inlined_call_operand.vmem [shape: f32[1,8,8], index: 1, kind: input, shape index: {}]   ;;  %s1547_s2 = inlined_call_operand.vmem [shape: f32[1,8], index: 2, kind: input, shape index: {}]   ;;  %s1548_s3 = inlined_call_operand.vmem [shape: f32[2,1,32], index: 3, kind: input, shape index: {}]   ;;  %s1549_s4 = inlined_call_operand.vmem [shape: f32[2,1,32], index: 4, kind: input, shape index: {}]   ;;  %s1550_s5 = inlined_call_operand.vmem [shape: f32[1,8], index: 5, kind: input, shape index: {}]   ;;  %s1551_s6 = inlined_call_operand.vmem [shape: f32[1,8], index: 6, kind: input, shape index: {}]   ;;  %s1552_s7 = inlined_call_operand.vmem [shape: f32[2,16,16,8], index: 7, kind: output, shape index: {}]  }
   0x1   :  { %s1215_s26 = smov 0  }
   0x2 LB: > { %s29_s27 = sadd.s32 1, %s1165_s25  ;;  %p994_p0 = scmp.ge.s32.totalorder %s1169_s26, 1  ;;  %s1169_s26 = sphi %s1215_s26, %s17_s26   ;;  %s1165_s25 = sphi %s1213_s25, %s1554_s25   ;;  %s1161_s24 = sphi %s1211_s24, %s1553_s24  }
   0x3   : > { %p31_p1 = scmp.ge.s32.totalorder %s29_s27, 2  ;;  %p251_p2 = scmp.lt.s32.totalorder %s1169_s26, 3 }
   0x5   : > { %s1556_s27 = smov (%p31_p1, %s29_s27), 0  ;;  %p252_p3 = pnand %p994_p0, %p251_p2 }
   0x6   : > { %p288_p4 = scmp.lt.s32.totalorder (!%p252_p3), %s1161_s24, 1 }
   0x7   : > { %255 = sbr.rel (%p252_p3) target bundleno = 290 (0x122), region = 48 }
   0xc   : > { %v507_v0 = vld [vmem:[%s1546_s1] sm:$0xff]  ;;  %vm342_vm0 = vcmask 253952   ;;  %s1558_s24 = smov (!%p288_p4, %s1161_s24), 1  ;;  %v364_v17 = vlaneseq  ;;  %vm439_vm1 = vcmask 64512  }
   0xd   : > { %v340_v1 = vld [vmem:[%s1548_s3] sm:$0x1]  ;;  %v341_v2 = vld [vmem:[%s1548_s3 + $0x1] sm:$0x1]  ;;  %1069 = vmatprep.subr.mxu0 %v507_v0  ;;  %1119 = vmatprep.subr.mxu1 %v507_v0  ;;  %s1034_s15 = sshll.u32 %s1558_s24, 8 }
   0xe   : > { %v346_v3 = vld [vmem:[%s1549_s4] sm:$0x1]  ;;  %v347_v4 = vld [vmem:[%s1549_s4 + $0x1] sm:$0x1]  ;;  %1070 = vmatpush3.msra.mxu0 %v507_v0  ;;  %1120 = vmatpush3.msra.mxu1 %v507_v0  ;;  %v343_v5 = vsel %vm342_vm0, %v340_v1, 0.0  ;;  %v344_v6 = vsel %vm342_vm0, %v341_v2, 0.0  ;;  %s1256_s18 = scalar_lea.vmem %s1545_s0, %s1034_s15  ;;  %s1440_s8 = scalar_lea.vmem %s1552_s7, %s1034_s15 }
   0xf   : > { %v348_v7 = vsel %vm342_vm0, %v346_v3, 0.0  ;;  %v349_v8 = vsel %vm342_vm0, %v347_v4, 0.0  ;;  %v345_v9 = vadd.f32 %v344_v6, %v343_v5  ;;  %v365_v18 = vshrl.u32 %v364_v17, 7  ;;  %v358_v19 = vld [vmem:[%s1550_s5] sm:$0x1]  ;;  %v309_v26 = vld [vmem:[%s1256_s18 + $0x8] sm:$0xff] }
  0x10   : > { %v350_v10 = vadd.f32 %v349_v8, %v348_v7  ;;  %v308_v22 = vld [vmem:[%s1256_s18] sm:$0xff]  ;;  %v325_v27 = vld [vmem:[%s1256_s18 + $0x88] sm:$0xff]  ;;  %v310_v28 = vld [vmem:[%s1256_s18 + $0x10] sm:$0xff] }
  0x11   : > { %v351_v11 = vmul.f32 0.001953125, %v345_v9  ;;  %v366_v20 = vsub.s32 0, %v365_v18  ;;  %v360_v24 = vld [vmem:[%s1551_s6] sm:$0x1]  ;;  %v326_v31 = vld [vmem:[%s1256_s18 + $0x90] sm:$0xff]  ;;  %v311_v32 = vld [vmem:[%s1256_s18 + $0x18] sm:$0xff] }
  0x12   : > { %v352_v12 = vmul.f32 0.001953125, %v350_v10  ;;  %v324_v25 = vld [vmem:[%s1256_s18 + $0x80] sm:$0xff]  ;;  %v327_v33 = vld [vmem:[%s1256_s18 + $0x98] sm:$0xff]  ;;  %v313_v36 = vld [vmem:[%s1256_s18 + $0x28] sm:$0xff] }
  0x13   : > { %v353_v13 = vmul.f32 %v351_v11, %v351_v11  ;;  %v312_v34 = vld [vmem:[%s1256_s18 + $0x20] sm:$0xff]  ;;  %v329_v41 = vld [vmem:[%s1256_s18 + $0xa8] sm:$0xff]  ;;  %v314_v42 = vld [vmem:[%s1256_s18 + $0x30] sm:$0xff] }
  0x14   : > { %v328_v35 = vld [vmem:[%s1256_s18 + $0xa0] sm:$0xff]  ;;  %v330_v43 = vld [vmem:[%s1256_s18 + $0xb0] sm:$0xff]  ;;  %v315_v60 = vld [vmem:[%s1256_s18 + $0x38] sm:$0xff] }
  0x15   : > { %v354_v14 = vsub.f32 %v352_v12, %v353_v13  ;;  %v331_v61 = vld [vmem:[%s1256_s18 + $0xb8] sm:$0xff]  ;;  %v316_v62 = vld [vmem:[%s1256_s18 + $0x40] sm:$0xff]  ;;  %v317_v4 = vld [vmem:[%s1256_s18 + $0x48] sm:$0xff] }
  0x16   : > { %v332_v3 = vld [vmem:[%s1256_s18 + $0xc0] sm:$0xff]  ;;  %v333_v5 = vld [vmem:[%s1256_s18 + $0xc8] sm:$0xff]  ;;  %v318_v10 = vld [vmem:[%s1256_s18 + $0x50] sm:$0xff] }
  0x17   : > { %v355_v15 = vmax.f32 %v354_v14, 0.0 }
  0x19   : > { %v356_v16 = vadd.f32 1e-05, %v355_v15 }
  0x1b   : > { %1145 = vrsqrt.f32 %v356_v16 }
  0x28   : > { %v1146_v21 = vpop.eup %1145 }
  0x29   : > { %v359_v23 = vmul.f32 %v1146_v21, %v358_v19  ;;  %v335_v21 = vld [vmem:[%s1256_s18 + $0xd8] sm:$0xff] }
  0x2b   : > { %v361_v29 = vmul.f32 %v359_v23, %v351_v11  ;;  %v1269_v30 = vrot.slane %v359_v23, %v366_v20  ;;  %v334_v11 = vld [vmem:[%s1256_s18 + $0xd0] sm:$0xff] }
  0x2d   : > { %v362_v37 = vsub.f32 %v360_v24, %v361_v29  ;;  %v369_v38 = vmul.f32 %v1269_v30, %v308_v22  ;;  %v385_v39 = vmul.f32 %v1269_v30, %v324_v25  ;;  %v370_v40 = vmul.f32 %v1269_v30, %v309_v26  ;;  %v320_v22 = vld [vmem:[%s1256_s18 + $0x60] sm:$0xff]  ;;  %v337_v29 = vld [vmem:[%s1256_s18 + $0xe8] sm:$0xff] }
  0x2e   : > { %v386_v44 = vmul.f32 %v1269_v30, %v325_v27  ;;  %v371_v45 = vmul.f32 %v1269_v30, %v310_v28  ;;  %v387_v46 = vmul.f32 %v1269_v30, %v326_v31  ;;  %v372_v47 = vmul.f32 %v1269_v30, %v311_v32  ;;  %v336_v27 = vld [vmem:[%s1256_s18 + $0xe0] sm:$0xff]  ;;  %v321_v28 = vld [vmem:[%s1256_s18 + $0x68] sm:$0xff] }
  0x2f   : > { %v1287_v48 = vrot.slane %v362_v37, %v366_v20  ;;  %v388_v49 = vmul.f32 %v1269_v30, %v327_v33  ;;  %v373_v50 = vmul.f32 %v1269_v30, %v312_v34  ;;  %v389_v51 = vmul.f32 %v1269_v30, %v328_v35  ;;  %v319_v20 = vld [vmem:[%s1256_s18 + $0x58] sm:$0xff]  ;;  %v322_v35 = vld [vmem:[%s1256_s18 + $0x70] sm:$0xff] }
  0x30   : > { %v374_v52 = vmul.f32 %v1269_v30, %v313_v36  ;;  %v390_v53 = vmul.f32 %v1269_v30, %v329_v41  ;;  %v375_v54 = vmul.f32 %v1269_v30, %v314_v42  ;;  %v391_v55 = vmul.f32 %v1269_v30, %v330_v43  ;;  %v338_v36 = vld [vmem:[%s1256_s18 + $0xf0] sm:$0xff] }
  0x31   : > { %v407_v56 = vadd.f32 %v1287_v48, %v369_v38  ;;  %v423_v57 = vadd.f32 %v1287_v48, %v385_v39  ;;  %v408_v58 = vadd.f32 %v1287_v48, %v370_v40  ;;  %v424_v59 = vadd.f32 %v1287_v48, %v386_v44 }
  0x32   : > { %v409_v63 = vadd.f32 %v1287_v48, %v371_v45  ;;  %v425_v0 = vadd.f32 %v1287_v48, %v387_v46  ;;  %v410_v1 = vadd.f32 %v1287_v48, %v372_v47  ;;  %v426_v2 = vadd.f32 %v1287_v48, %v388_v49  ;;  %v323_v45 = vld [vmem:[%s1256_s18 + $0x78] sm:$0xff] }
  0x33   : > { %440 = vst.msk [vmem:[#allocation2] sm:$0xff] %vm439_vm1, %v407_v56  ;;  %456 = vst.msk [vmem:[#allocation2 + $0x80] sm:$0xff] %vm439_vm1, %v423_v57  ;;  %v411_v6 = vadd.f32 %v1287_v48, %v373_v50  ;;  %v427_v7 = vadd.f32 %v1287_v48, %v389_v51  ;;  %v412_v8 = vadd.f32 %v1287_v48, %v374_v52  ;;  %v339_v46 = vld [vmem:[%s1256_s18 + $0xf8] sm:$0xff] }
  0x34   : > { %441 = vst.msk [vmem:[#allocation2 + $0x8] sm:$0xff] %vm439_vm1, %v408_v58  ;;  %457 = vst.msk [vmem:[#allocation2 + $0x88] sm:$0xff] %vm439_vm1, %v424_v59  ;;  %v428_v9 = vadd.f32 %v1287_v48, %v390_v53  ;;  %v413_v12 = vadd.f32 %v1287_v48, %v375_v54  ;;  %v429_v13 = vadd.f32 %v1287_v48, %v391_v55 }
  0x35   : > { %442 = vst.msk [vmem:[#allocation2 + $0x10] sm:$0xff] %vm439_vm1, %v409_v63  ;;  %458 = vst.msk [vmem:[#allocation2 + $0x90] sm:$0xff] %vm439_vm1, %v425_v0  ;;  %v376_v14 = vmul.f32 %v1269_v30, %v315_v60  ;;  %v392_v15 = vmul.f32 %v1269_v30, %v331_v61  ;;  %v377_v16 = vmul.f32 %v1269_v30, %v316_v62 }
  0x36   : > { %443 = vst.msk [vmem:[#allocation2 + $0x18] sm:$0xff] %vm439_vm1, %v410_v1  ;;  %459 = vst.msk [vmem:[#allocation2 + $0x98] sm:$0xff] %vm439_vm1, %v426_v2  ;;  %v393_v17 = vmul.f32 %v1269_v30, %v332_v3  ;;  %v378_v18 = vmul.f32 %v1269_v30, %v317_v4  ;;  %v394_v19 = vmul.f32 %v1269_v30, %v333_v5 }
  0x37   : > { %444 = vst.msk [vmem:[#allocation2 + $0x20] sm:$0xff] %vm439_vm1, %v411_v6  ;;  %460 = vst.msk [vmem:[#allocation2 + $0xa0] sm:$0xff] %vm439_vm1, %v427_v7  ;;  %v414_v23 = vadd.f32 %v1287_v48, %v376_v14  ;;  %v430_v24 = vadd.f32 %v1287_v48, %v392_v15  ;;  %v379_v25 = vmul.f32 %v1269_v30, %v318_v10 }
  0x38   : > { %445 = vst.msk [vmem:[#allocation2 + $0x28] sm:$0xff] %vm439_vm1, %v412_v8  ;;  %461 = vst.msk [vmem:[#allocation2 + $0xa8] sm:$0xff] %vm439_vm1, %v428_v9  ;;  %v395_v26 = vmul.f32 %v1269_v30, %v334_v11  ;;  %v415_v31 = vadd.f32 %v1287_v48, %v377_v16  ;;  %v431_v32 = vadd.f32 %v1287_v48, %v393_v17 }
  0x39   : > { %446 = vst.msk [vmem:[#allocation2 + $0x30] sm:$0xff] %vm439_vm1, %v413_v12  ;;  %462 = vst.msk [vmem:[#allocation2 + $0xb0] sm:$0xff] %vm439_vm1, %v429_v13  ;;  %v416_v33 = vadd.f32 %v1287_v48, %v378_v18  ;;  %v432_v34 = vadd.f32 %v1287_v48, %v394_v19  ;;  %v417_v37 = vadd.f32 %v1287_v48, %v379_v25 }
  0x3a   : > { %447 = vst.msk [vmem:[#allocation2 + $0x38] sm:$0xff] %vm439_vm1, %v414_v23  ;;  %463 = vst.msk [vmem:[#allocation2 + $0xb8] sm:$0xff] %vm439_vm1, %v430_v24  ;;  %v433_v38 = vadd.f32 %v1287_v48, %v395_v26  ;;  %v380_v39 = vmul.f32 %v1269_v30, %v319_v20  ;;  %v396_v40 = vmul.f32 %v1269_v30, %v335_v21  ;;  %v475_v47 = vld [vmem:[#allocation2] sm:$0xff] }
  0x3b   : > { %448 = vst.msk [vmem:[#allocation2 + $0x40] sm:$0xff] %vm439_vm1, %v415_v31  ;;  %464 = vst.msk [vmem:[#allocation2 + $0xc0] sm:$0xff] %vm439_vm1, %v431_v32  ;;  %v381_v41 = vmul.f32 %v1269_v30, %v320_v22  ;;  %v397_v42 = vmul.f32 %v1269_v30, %v336_v27  ;;  %v382_v43 = vmul.f32 %v1269_v30, %v321_v28  ;;  %v491_v49 = vld [vmem:[#allocation2 + $0x80] sm:$0xff]  ;;  %v476_v50 = vld [vmem:[#allocation2 + $0x8] sm:$0xff]  ;;  %1071 = vmatprep.mubr.msk.f32.mxu0 %vm439_vm1, %v475_v47 }
  0x3c   : > { %449 = vst.msk [vmem:[#allocation2 + $0x48] sm:$0xff] %vm439_vm1, %v416_v33  ;;  %465 = vst.msk [vmem:[#allocation2 + $0xc8] sm:$0xff] %vm439_vm1, %v432_v34  ;;  %v398_v44 = vmul.f32 %v1269_v30, %v337_v29  ;;  %v418_v51 = vadd.f32 %v1287_v48, %v380_v39  ;;  %v434_v52 = vadd.f32 %v1287_v48, %v396_v40  ;;  %1095 = vmatprep.mubr.msk.f32.mxu1 %vm439_vm1, %v491_v49  ;;  %v492_v55 = vld [vmem:[#allocation2 + $0x88] sm:$0xff]  ;;  %v477_v56 = vld [vmem:[#allocation2 + $0x10] sm:$0xff] }
  0x3d   : > { %450 = vst.msk [vmem:[#allocation2 + $0x50] sm:$0xff] %vm439_vm1, %v417_v37  ;;  %466 = vst.msk [vmem:[#allocation2 + $0xd0] sm:$0xff] %vm439_vm1, %v433_v38  ;;  %v383_v53 = vmul.f32 %v1269_v30, %v322_v35  ;;  %v399_v54 = vmul.f32 %v1269_v30, %v338_v36  ;;  %v493_v57 = vld [vmem:[#allocation2 + $0x90] sm:$0xff]  ;;  %v419_v58 = vadd.f32 %v1287_v48, %v381_v41  ;;  %1072 = vmatmul.mubr.msk.f32.vlgmr.msra.gmra.mxu0 %vm439_vm1, %v476_v50  ;;  %v478_v0 = vld [vmem:[#allocation2 + $0x18] sm:$0xff] }
  0x3e   : > { %v435_v59 = vadd.f32 %v1287_v48, %v397_v42  ;;  %v420_v60 = vadd.f32 %v1287_v48, %v382_v43  ;;  %1096 = vmatmul.mubr.msk.f32.vlgmr.msra.gmra.mxu1 %vm439_vm1, %v492_v55  ;;  %451 = vst.msk [vmem:[#allocation2 + $0x58] sm:$0xff] %vm439_vm1, %v418_v51  ;;  %467 = vst.msk [vmem:[#allocation2 + $0xd8] sm:$0xff] %vm439_vm1, %v434_v52  ;;  %v436_v61 = vadd.f32 %v1287_v48, %v398_v44  ;;  %v494_v1 = vld [vmem:[#allocation2 + $0x98] sm:$0xff]  ;;  %v479_v4 = vld [vmem:[#allocation2 + $0x20] sm:$0xff] }
  0x3f   : > { %v421_v62 = vadd.f32 %v1287_v48, %v383_v53  ;;  %v437_v63 = vadd.f32 %v1287_v48, %v399_v54  ;;  %1074 = vmatprep.mubr.msk.f32.mxu0 %vm439_vm1, %v477_v56  ;;  %1098 = vmatprep.mubr.msk.f32.mxu1 %vm439_vm1, %v493_v57  ;;  %452 = vst.msk [vmem:[#allocation2 + $0x60] sm:$0xff] %vm439_vm1, %v419_v58  ;;  %v495_v5 = vld [vmem:[#allocation2 + $0xa0] sm:$0xff]  ;;  %v496_v8 = vld [vmem:[#allocation2 + $0xa8] sm:$0xff] }
  0x40   : > { %468 = vst.msk [vmem:[#allocation2 + $0xe0] sm:$0xff] %vm439_vm1, %v435_v59  ;;  %453 = vst.msk [vmem:[#allocation2 + $0x68] sm:$0xff] %vm439_vm1, %v420_v60  ;;  %v384_v2 = vmul.f32 %v1269_v30, %v323_v45  ;;  %v400_v3 = vmul.f32 %v1269_v30, %v339_v46  ;;  %v480_v30 = vld [vmem:[#allocation2 + $0x28] sm:$0xff]  ;;  %v481_v9 = vld [vmem:[#allocation2 + $0x30] sm:$0xff] }
  0x41   : > { %469 = vst.msk [vmem:[#allocation2 + $0xe8] sm:$0xff] %vm439_vm1, %v436_v61  ;;  %454 = vst.msk [vmem:[#allocation2 + $0x70] sm:$0xff] %vm439_vm1, %v421_v62  ;;  %1075 = vmatmul.mubr.msk.f32.gmra.mxu0 %vm439_vm1, %v478_v0  ;;  %v497_v10 = vld [vmem:[#allocation2 + $0xb0] sm:$0xff]  ;;  %v498_v11 = vld [vmem:[#allocation2 + $0xb8] sm:$0xff] }
  0x42   : > { %470 = vst.msk [vmem:[#allocation2 + $0xf0] sm:$0xff] %vm439_vm1, %v437_v63  ;;  %v422_v6 = vadd.f32 %v1287_v48, %v384_v2  ;;  %v438_v7 = vadd.f32 %v1287_v48, %v400_v3  ;;  %1099 = vmatmul.mubr.msk.f32.gmra.mxu1 %vm439_vm1, %v494_v1  ;;  %1077 = vmatprep.mubr.msk.f32.mxu0 %vm439_vm1, %v479_v4  ;;  %v482_v48 = vld [vmem:[#allocation2 + $0x38] sm:$0xff]  ;;  %v483_v12 = vld [vmem:[#allocation2 + $0x40] sm:$0xff] }
  0x43   : > { %1101 = vmatprep.mubr.msk.f32.mxu1 %vm439_vm1, %v495_v5  ;;  %v499_v13 = vld [vmem:[#allocation2 + $0xc0] sm:$0xff]  ;;  %v484_v14 = vld [vmem:[#allocation2 + $0x48] sm:$0xff] }
  0x44   : > { %455 = vst.msk [vmem:[#allocation2 + $0x78] sm:$0xff] %vm439_vm1, %v422_v6  ;;  %471 = vst.msk [vmem:[#allocation2 + $0xf8] sm:$0xff] %vm439_vm1, %v438_v7  ;;  %v500_v15 = vld [vmem:[#allocation2 + $0xc8] sm:$0xff]  ;;  %v485_v16 = vld [vmem:[#allocation2 + $0x50] sm:$0xff] }
  0x45   : > { %1078 = vmatmul.mubr.msk.f32.gmra.mxu0 %vm439_vm1, %v480_v30  ;;  %v501_v17 = vld [vmem:[#allocation2 + $0xd0] sm:$0xff]  ;;  %v486_v18 = vld [vmem:[#allocation2 + $0x58] sm:$0xff]  ;;  %v1431_v28 = vld [vmem:[%s1547_s2] ss:$0 sm:$0xff] }
  0x46   : > { %1102 = vmatmul.mubr.msk.f32.gmra.mxu1 %vm439_vm1, %v496_v8  ;;  %1080 = vmatprep.mubr.msk.f32.mxu0 %vm439_vm1, %v481_v9  ;;  %v502_v19 = vld [vmem:[#allocation2 + $0xd8] sm:$0xff]  ;;  %v487_v20 = vld [vmem:[#allocation2 + $0x60] sm:$0xff] }
  0x47   : > { %1104 = vmatprep.mubr.msk.f32.mxu1 %vm439_vm1, %v497_v10  ;;  %v503_v21 = vld [vmem:[#allocation2 + $0xe0] sm:$0xff]  ;;  %v488_v22 = vld [vmem:[#allocation2 + $0x68] sm:$0xff] }
  0x48   : > { %v504_v23 = vld [vmem:[#allocation2 + $0xe8] sm:$0xff]  ;;  %v489_v24 = vld [vmem:[#allocation2 + $0x70] sm:$0xff] }
  0x49   : > { %1081 = vmatmul.mubr.msk.f32.gmra.mxu0 %vm439_vm1, %v482_v48  ;;  %v505_v25 = vld [vmem:[#allocation2 + $0xf0] sm:$0xff] }
  0x4a   : > { %1105 = vmatmul.mubr.msk.f32.gmra.mxu1 %vm439_vm1, %v498_v11  ;;  %1083 = vmatprep.mubr.msk.f32.mxu0 %vm439_vm1, %v483_v12 }
  0x4b   : > { %1107 = vmatprep.mubr.msk.f32.mxu1 %vm439_vm1, %v499_v13  ;;  %v490_v26 = vld [vmem:[#allocation2 + $0x78] sm:$0xff] }
  0x4c   : > { %v506_v27 = vld [vmem:[#allocation2 + $0xf8] sm:$0xff] }
  0x4d   : > { %1084 = vmatmul.mubr.msk.f32.gmra.mxu0 %vm439_vm1, %v484_v14 }
  0x4e   : > { %1108 = vmatmul.mubr.msk.f32.gmra.mxu1 %vm439_vm1, %v500_v15  ;;  %1086 = vmatprep.mubr.msk.f32.mxu0 %vm439_vm1, %v485_v16 }
  0x4f   : > { %1110 = vmatprep.mubr.msk.f32.mxu1 %vm439_vm1, %v501_v17 }
  0x51   : > { %1087 = vmatmul.mubr.msk.f32.gmra.mxu0 %vm439_vm1, %v486_v18 }
  0x52   : > { %1111 = vmatmul.mubr.msk.f32.gmra.mxu1 %vm439_vm1, %v502_v19  ;;  %1089 = vmatprep.mubr.msk.f32.mxu0 %vm439_vm1, %v487_v20 }
  0x53   : > { %1113 = vmatprep.mubr.msk.f32.mxu1 %vm439_vm1, %v503_v21 }
  0x55   : > { %1090 = vmatmul.mubr.msk.f32.gmra.mxu0 %vm439_vm1, %v488_v22 }
  0x56   : > { %1114 = vmatmul.mubr.msk.f32.gmra.mxu1 %vm439_vm1, %v504_v23  ;;  %1092 = vmatprep.mubr.msk.f32.mxu0 %vm439_vm1, %v489_v24 }
  0x57   : > { %1116 = vmatprep.mubr.msk.f32.mxu1 %vm439_vm1, %v505_v25 }
  0x59   : > { %1093 = vmatmul.mubr.msk.f32.gmra.mxu0 %vm439_vm1, %v490_v26 }
  0x5a   : > { %1117 = vmatmul.mubr.msk.f32.gmra.mxu1 %vm439_vm1, %v506_v27 }
  0xfd   : > { %v1073_v29 = vpop.f32.mrf.mxu0 }
  0xfe   : > { %v1097_v31 = vpop.f32.mrf.mxu1  ;;  %v684_v32 = vadd.f32 %v1073_v29, %v1431_v28 }
  0xff   : > { %v764_v33 = vadd.f32 %v1097_v31, %v1431_v28  ;;  %v678_v34 = vpop.f32.mrf.mxu0 }
 0x100   : > { %v758_v35 = vpop.f32.mrf.mxu1  ;;  %v838_v36 = vmax.f32 %v684_v32, 0.0  ;;  %v679_v38 = vadd.f32 %v1431_v28, %v678_v34 }
 0x101   : > { %v854_v37 = vmax.f32 %v764_v33, 0.0  ;;  %v759_v39 = vadd.f32 %v1431_v28, %v758_v35  ;;  %v1076_v40 = vpop.f32.mrf.mxu0 }
 0x102   : > { %v1100_v41 = vpop.f32.mrf.mxu1  ;;  %870 = vst.msk [vmem:[%s1440_s8 + $0x8] sm:$0xff] %vm439_vm1, %v838_v36  ;;  %v837_v42 = vmax.f32 %v679_v38, 0.0  ;;  %v694_v44 = vadd.f32 %v1076_v40, %v1431_v28 }
 0x103   : > { %886 = vst.msk [vmem:[%s1440_s8 + $0x88] sm:$0xff] %vm439_vm1, %v854_v37  ;;  %v853_v43 = vmax.f32 %v759_v39, 0.0  ;;  %v774_v45 = vadd.f32 %v1100_v41, %v1431_v28  ;;  %v688_v46 = vpop.f32.mrf.mxu0 }
 0x104   : > { %v768_v47 = vpop.f32.mrf.mxu1  ;;  %869 = vst.msk [vmem:[%s1440_s8] sm:$0xff] %vm439_vm1, %v837_v42  ;;  %v840_v49 = vmax.f32 %v694_v44, 0.0  ;;  %v689_v51 = vadd.f32 %v1431_v28, %v688_v46 }
 0x105   : > { %885 = vst.msk [vmem:[%s1440_s8 + $0x80] sm:$0xff] %vm439_vm1, %v853_v43  ;;  %v856_v50 = vmax.f32 %v774_v45, 0.0  ;;  %v769_v52 = vadd.f32 %v1431_v28, %v768_v47  ;;  %v1079_v53 = vpop.f32.mrf.mxu0 }
 0x106   : > { %v1103_v54 = vpop.f32.mrf.mxu1  ;;  %872 = vst.msk [vmem:[%s1440_s8 + $0x18] sm:$0xff] %vm439_vm1, %v840_v49  ;;  %v839_v55 = vmax.f32 %v689_v51, 0.0  ;;  %v704_v57 = vadd.f32 %v1079_v53, %v1431_v28 }
 0x107   : > { %888 = vst.msk [vmem:[%s1440_s8 + $0x98] sm:$0xff] %vm439_vm1, %v856_v50  ;;  %v855_v56 = vmax.f32 %v769_v52, 0.0  ;;  %v784_v58 = vadd.f32 %v1103_v54, %v1431_v28  ;;  %v698_v59 = vpop.f32.mrf.mxu0 }
 0x108   : > { %v778_v60 = vpop.f32.mrf.mxu1  ;;  %871 = vst.msk [vmem:[%s1440_s8 + $0x10] sm:$0xff] %vm439_vm1, %v839_v55  ;;  %v842_v61 = vmax.f32 %v704_v57, 0.0  ;;  %v699_v63 = vadd.f32 %v1431_v28, %v698_v59 }
 0x109   : > { %887 = vst.msk [vmem:[%s1440_s8 + $0x90] sm:$0xff] %vm439_vm1, %v855_v56  ;;  %v858_v62 = vmax.f32 %v784_v58, 0.0  ;;  %v779_v0 = vadd.f32 %v1431_v28, %v778_v60  ;;  %v1082_v1 = vpop.f32.mrf.mxu0 }
 0x10a   : > { %v1106_v2 = vpop.f32.mrf.mxu1  ;;  %874 = vst.msk [vmem:[%s1440_s8 + $0x28] sm:$0xff] %vm439_vm1, %v842_v61  ;;  %v841_v3 = vmax.f32 %v699_v63, 0.0  ;;  %v714_v5 = vadd.f32 %v1082_v1, %v1431_v28 }
 0x10b   : > { %890 = vst.msk [vmem:[%s1440_s8 + $0xa8] sm:$0xff] %vm439_vm1, %v858_v62  ;;  %v857_v4 = vmax.f32 %v779_v0, 0.0  ;;  %v794_v6 = vadd.f32 %v1106_v2, %v1431_v28  ;;  %v708_v7 = vpop.f32.mrf.mxu0 }
 0x10c   : > { %v788_v30 = vpop.f32.mrf.mxu1  ;;  %873 = vst.msk [vmem:[%s1440_s8 + $0x20] sm:$0xff] %vm439_vm1, %v841_v3  ;;  %v844_v8 = vmax.f32 %v714_v5, 0.0  ;;  %v709_v10 = vadd.f32 %v1431_v28, %v708_v7 }
 0x10d   : > { %889 = vst.msk [vmem:[%s1440_s8 + $0xa0] sm:$0xff] %vm439_vm1, %v857_v4  ;;  %v860_v9 = vmax.f32 %v794_v6, 0.0  ;;  %v789_v48 = vadd.f32 %v1431_v28, %v788_v30  ;;  %v1085_v11 = vpop.f32.mrf.mxu0 }
 0x10e   : > { %v1109_v12 = vpop.f32.mrf.mxu1  ;;  %876 = vst.msk [vmem:[%s1440_s8 + $0x38] sm:$0xff] %vm439_vm1, %v844_v8  ;;  %v843_v13 = vmax.f32 %v709_v10, 0.0  ;;  %v724_v15 = vadd.f32 %v1085_v11, %v1431_v28 }
 0x10f   : > { %892 = vst.msk [vmem:[%s1440_s8 + $0xb8] sm:$0xff] %vm439_vm1, %v860_v9  ;;  %v859_v14 = vmax.f32 %v789_v48, 0.0  ;;  %v804_v16 = vadd.f32 %v1109_v12, %v1431_v28  ;;  %v718_v17 = vpop.f32.mrf.mxu0 }
 0x110   : > { %v798_v18 = vpop.f32.mrf.mxu1  ;;  %875 = vst.msk [vmem:[%s1440_s8 + $0x30] sm:$0xff] %vm439_vm1, %v843_v13  ;;  %v846_v19 = vmax.f32 %v724_v15, 0.0  ;;  %v719_v21 = vadd.f32 %v1431_v28, %v718_v17 }
 0x111   : > { %891 = vst.msk [vmem:[%s1440_s8 + $0xb0] sm:$0xff] %vm439_vm1, %v859_v14  ;;  %v862_v20 = vmax.f32 %v804_v16, 0.0  ;;  %v799_v22 = vadd.f32 %v1431_v28, %v798_v18  ;;  %v1088_v23 = vpop.f32.mrf.mxu0 }
 0x112   : > { %v1112_v24 = vpop.f32.mrf.mxu1  ;;  %878 = vst.msk [vmem:[%s1440_s8 + $0x48] sm:$0xff] %vm439_vm1, %v846_v19  ;;  %v845_v25 = vmax.f32 %v719_v21, 0.0  ;;  %v734_v27 = vadd.f32 %v1088_v23, %v1431_v28 }
 0x113   : > { %894 = vst.msk [vmem:[%s1440_s8 + $0xc8] sm:$0xff] %vm439_vm1, %v862_v20  ;;  %v861_v26 = vmax.f32 %v799_v22, 0.0  ;;  %v814_v29 = vadd.f32 %v1112_v24, %v1431_v28  ;;  %v728_v31 = vpop.f32.mrf.mxu0 }
 0x114   : > { %v808_v32 = vpop.f32.mrf.mxu1  ;;  %877 = vst.msk [vmem:[%s1440_s8 + $0x40] sm:$0xff] %vm439_vm1, %v845_v25  ;;  %v848_v33 = vmax.f32 %v734_v27, 0.0  ;;  %v729_v35 = vadd.f32 %v1431_v28, %v728_v31 }
 0x115   : > { %893 = vst.msk [vmem:[%s1440_s8 + $0xc0] sm:$0xff] %vm439_vm1, %v861_v26  ;;  %v864_v34 = vmax.f32 %v814_v29, 0.0  ;;  %v809_v36 = vadd.f32 %v1431_v28, %v808_v32  ;;  %v1091_v37 = vpop.f32.mrf.mxu0 }
 0x116   : > { %v1115_v38 = vpop.f32.mrf.mxu1  ;;  %880 = vst.msk [vmem:[%s1440_s8 + $0x58] sm:$0xff] %vm439_vm1, %v848_v33  ;;  %v847_v39 = vmax.f32 %v729_v35, 0.0  ;;  %v744_v41 = vadd.f32 %v1091_v37, %v1431_v28 }
 0x117   : > { %896 = vst.msk [vmem:[%s1440_s8 + $0xd8] sm:$0xff] %vm439_vm1, %v864_v34  ;;  %v863_v40 = vmax.f32 %v809_v36, 0.0  ;;  %v824_v42 = vadd.f32 %v1115_v38, %v1431_v28  ;;  %v738_v43 = vpop.f32.mrf.mxu0 }
 0x118   : > { %v818_v44 = vpop.f32.mrf.mxu1  ;;  %879 = vst.msk [vmem:[%s1440_s8 + $0x50] sm:$0xff] %vm439_vm1, %v847_v39  ;;  %v850_v45 = vmax.f32 %v744_v41, 0.0  ;;  %v739_v47 = vadd.f32 %v1431_v28, %v738_v43 }
 0x119   : > { %895 = vst.msk [vmem:[%s1440_s8 + $0xd0] sm:$0xff] %vm439_vm1, %v863_v40  ;;  %v866_v46 = vmax.f32 %v824_v42, 0.0  ;;  %v819_v49 = vadd.f32 %v1431_v28, %v818_v44  ;;  %v1094_v50 = vpop.f32.mrf.mxu0 }
 0x11a   : > { %v1118_v51 = vpop.f32.mrf.mxu1  ;;  %882 = vst.msk [vmem:[%s1440_s8 + $0x68] sm:$0xff] %vm439_vm1, %v850_v45  ;;  %v849_v52 = vmax.f32 %v739_v47, 0.0  ;;  %v754_v54 = vadd.f32 %v1094_v50, %v1431_v28 }
 0x11b   : > { %898 = vst.msk [vmem:[%s1440_s8 + $0xe8] sm:$0xff] %vm439_vm1, %v866_v46  ;;  %v865_v53 = vmax.f32 %v819_v49, 0.0  ;;  %v834_v55 = vadd.f32 %v1118_v51, %v1431_v28  ;;  %v748_v56 = vpop.f32.mrf.mxu0 }
 0x11c   : > { %v828_v57 = vpop.f32.mrf.mxu1  ;;  %881 = vst.msk [vmem:[%s1440_s8 + $0x60] sm:$0xff] %vm439_vm1, %v849_v52  ;;  %v852_v58 = vmax.f32 %v754_v54, 0.0  ;;  %v749_v60 = vadd.f32 %v1431_v28, %v748_v56 }
 0x11d   : > { %897 = vst.msk [vmem:[%s1440_s8 + $0xe0] sm:$0xff] %vm439_vm1, %v865_v53  ;;  %v868_v59 = vmax.f32 %v834_v55, 0.0  ;;  %v829_v61 = vadd.f32 %v1431_v28, %v828_v57 }
 0x11e   : > { %884 = vst.msk [vmem:[%s1440_s8 + $0x78] sm:$0xff] %vm439_vm1, %v852_v58  ;;  %v851_v62 = vmax.f32 %v749_v60, 0.0 }
 0x11f   : > { %900 = vst.msk [vmem:[%s1440_s8 + $0xf8] sm:$0xff] %vm439_vm1, %v868_v59  ;;  %v867_v63 = vmax.f32 %v829_v61, 0.0 }
 0x120   : > { %883 = vst.msk [vmem:[%s1440_s8 + $0x70] sm:$0xff] %vm439_vm1, %v851_v62 }
 0x121   : > { %899 = vst.msk [vmem:[%s1440_s8 + $0xf0] sm:$0xff] %vm439_vm1, %v867_v63 }
 0x122 PF: > { %s17_s26 = sadd.s32 1, %s1169_s26   ;;  %s1553_s24 = smov %s1165_s25 }
 0x123   : > { %p14_p5 = scmp.ge.s32.totalorder %s17_s26, 4   ;;  %s1554_s25 = smov %s1556_s27 }
 0x125   :  { %16 = sbr.rel (!%p14_p5) target bundleno = 2 (0x2), region = 83 }

// kernel: inception_forward.4
= control target key start
LH: loop header
LB: loop body
LE: loop exit
PB: predicated region body
PF: predicated region fallthrough
CT: control target
= control target key end

     0   :  { %s5619_s18 = smov 0   ;;  %s5621_s19 = smov 0   ;;  %s7295_s0 = inlined_call_operand.vmem [shape: f32[2,16,16,4], index: 0, kind: input, shape index: {}]   ;;  %s7296_s1 = inlined_call_operand.vmem [shape: f32[9,4,32], index: 1, kind: input, shape index: {}]   ;;  %s7297_s2 = inlined_call_operand.vmem [shape: f32[1,32], index: 2, kind: input, shape index: {}]   ;;  %s7298_s3 = inlined_call_operand.vmem [shape: f32[2,16,16,32], index: 3, kind: output, shape index: {0}]   ;;  %s7299_s4 = inlined_call_operand.vmem [shape: f32[2,1,32], index: 4, kind: output, shape index: {1}]   ;;  %s7300_s5 = inlined_call_operand.vmem [shape: f32[2,1,32], index: 5, kind: output, shape index: {2}]  }
   0x1   :  { %s5623_s20 = smov 0  }
   0x2 LB: > { %s28_s21 = sadd.s32 1, %s5582_s19  ;;  %p4283_p0 = scmp.ge.s32.totalorder %s5586_s20, 1  ;;  %s5586_s20 = sphi %s5623_s20, %s16_s20   ;;  %s5582_s19 = sphi %s5621_s19, %s7475_s19   ;;  %s5578_s18 = sphi %s5619_s18, %s7474_s18  }
   0x3   : > { %p30_p1 = scmp.ge.s32.totalorder %s28_s21, 2  ;;  %p206_p2 = scmp.lt.s32.totalorder %s5586_s20, 3 }
   0x5   : > { %s7477_s21 = smov (%p30_p1, %s28_s21), 0  ;;  %p207_p3 = pnand %p4283_p0, %p206_p2 }
   0x7   : > { %210 = sbr.rel (%p207_p3) target bundleno = 565 (0x235), region = 32 }
   0xc   : > { %v4288_v0 = vld [vmem:[%s7296_s1 + $0x4] sm:$0xf]  ;;  %vm562_vm0 = vcmask 1043456   ;;  %vm271_vm1 = vcmask 31744   ;;  %p245_p4 = scmp.lt.s32.totalorder %s5578_s18, 1  ;;  %v7301_v1 = vmov 0.0  }
   0xd   : > { %5537 = vmatprep.subr.msk.mxu1 %vm562_vm0, %v4288_v0  ;;  %5087 = vmatprep.subr.msk.mxu0 %vm562_vm0, %v4288_v0  ;;  %272 = vst.msk [vmem:[#allocation2] sm:$0xff] %vm271_vm1, %v7301_v1  ;;  %273 = vst.msk [vmem:[#allocation2 + $0x8] sm:$0xff] %vm271_vm1, %v7301_v1  ;;  %v5720_v2 = vld [vmem:[%s7296_s1] sm:$0xf]  ;;  %vm274_vm2 = vcmask 25600   ;;  %vm392_vm3 = vcmask 253952  }
   0xe   : > { %276 = vst.msk [vmem:[#allocation2 + $0x18] sm:$0xff] %vm271_vm1, %v7301_v1  ;;  %277 = vst.msk [vmem:[#allocation2 + $0x20] sm:$0xff] %vm271_vm1, %v7301_v1  ;;  %v4355_v3 = vld [vmem:[%s7296_s1 + $0x8] sm:$0xf]  ;;  %5538 = vmatpush3.msk.msra.mxu1 %vm562_vm0, %v4288_v0  ;;  %5088 = vmatpush3.msk.msra.mxu0 %vm562_vm0, %v4288_v0  ;;  %s7479_s18 = smov (!%p245_p4, %s5578_s18), 1  ;;  %vm3922_vm4 = vcmask 261120  }
   0xf   : > { %279 = vst.msk [vmem:[#allocation2 + $0x30] sm:$0xff] %vm271_vm1, %v7301_v1  ;;  %280 = vst.msk [vmem:[#allocation2 + $0x38] sm:$0xff] %vm271_vm1, %v7301_v1  ;;  %5137 = vmatprep.subr.msk.mxu1 %vm562_vm0, %v5720_v2  ;;  %5187 = vmatprep.subr.msk.mxu0 %vm562_vm0, %v4355_v3  ;;  %s4788_s28 = sshll.u32 %s7479_s18, 8  ;;  %v5791_v10 = vld [vmem:[%s7296_s1 + $0x10] sm:$0xf]  ;;  %s6917_s25 = scalar_lea.vmem %s7299_s4, %s7479_s18 }
  0x10   : > { %282 = vst.msk [vmem:[#allocation2 + $0x48] sm:$0xff] %vm271_vm1, %v7301_v1  ;;  %283 = vst.msk [vmem:[#allocation2 + $0x50] sm:$0xff] %vm271_vm1, %v7301_v1  ;;  %s5777_s6 = scalar_lea.vmem %s7295_s0, %s4788_s28  ;;  %v5850_v34 = vld [vmem:[%s7296_s1 + $0xc] sm:$0xf]  ;;  %s6923_s29 = scalar_lea.vmem %s7300_s5, %s7479_s18 }
  0x11   : > { %285 = vst.msk [vmem:[#allocation2 + $0x60] sm:$0xff] %vm271_vm1, %v7301_v1  ;;  %286 = vst.msk [vmem:[#allocation2 + $0x68] sm:$0xff] %vm271_vm1, %v7301_v1  ;;  %v341_v4 = vld [vmem:[%s5777_s6 + $0x70] sm:$0xff]  ;;  %v342_v5 = vld [vmem:[%s5777_s6 + $0x78] sm:$0xff]  ;;  %s7069_s9 = scalar_lea.vmem %s7298_s3, %s4788_s28 }
  0x12   : > { %288 = vst.msk [vmem:[#allocation2 + $0x78] sm:$0xff] %vm271_vm1, %v7301_v1  ;;  %289 = vst.msk [vmem:[#allocation2 + $0x80] sm:$0xff] %vm271_vm1, %v7301_v1  ;;  %v327_v6 = vld [vmem:[%s5777_s6] sm:$0xff]  ;;  %v328_v8 = vld [vmem:[%s5777_s6 + $0x8] sm:$0xff] }
  0x13   : > { %291 = vst.msk [vmem:[#allocation2 + $0x90] sm:$0xff] %vm271_vm1, %v7301_v1  ;;  %292 = vst.msk [vmem:[#allocation2 + $0x98] sm:$0xff] %vm271_vm1, %v7301_v1  ;;  %v343_v7 = vld [vmem:[%s5777_s6 + $0x80] sm:$0xff]  ;;  %v344_v9 = vld [vmem:[%s5777_s6 + $0x88] sm:$0xff] }
  0x14   : > { %294 = vst.msk [vmem:[#allocation2 + $0xa8] sm:$0xff] %vm271_vm1, %v7301_v1  ;;  %295 = vst.msk [vmem:[#allocation2 + $0xb0] sm:$0xff] %vm271_vm1, %v7301_v1  ;;  %v431_v11 = vld [vmem:[#allocation2 + $0x1] sm:$0xff]  ;;  %v329_v12 = vld [vmem:[%s5777_s6 + $0x10] sm:$0xff] }
  0x15   : > { %297 = vst.msk [vmem:[#allocation2 + $0xc0] sm:$0xff] %vm271_vm1, %v7301_v1  ;;  %298 = vst.msk [vmem:[#allocation2 + $0xc8] sm:$0xff] %vm271_vm1, %v7301_v1  ;;  %v345_v13 = vld [vmem:[%s5777_s6 + $0x90] sm:$0xff]  ;;  %5089 = vmatprep.mubr.msk.f32.mxu0 %vm271_vm1, %v431_v11  ;;  %v330_v15 = vld [vmem:[%s5777_s6 + $0x18] sm:$0xff] }
  0x16   : > { %300 = vst.msk [vmem:[#allocation2 + $0xd8] sm:$0xff] %vm271_vm1, %v7301_v1  ;;  %301 = vst.msk [vmem:[#allocation2 + $0xe0] sm:$0xff] %vm271_vm1, %v7301_v1  ;;  %v346_v16 = vld [vmem:[%s5777_s6 + $0x98] sm:$0xff]  ;;  %v331_v17 = vld [vmem:[%s5777_s6 + $0x20] sm:$0xff] }
  0x17   : > { %303 = vst.msk [vmem:[#allocation2 + $0xf0] sm:$0xff] %vm271_vm1, %v7301_v1  ;;  %304 = vst.msk [vmem:[#allocation2 + $0xf8] sm:$0xff] %vm271_vm1, %v7301_v1  ;;  %v347_v18 = vld [vmem:[%s5777_s6 + $0xa0] sm:$0xff]  ;;  %v332_v19 = vld [vmem:[%s5777_s6 + $0x28] sm:$0xff] }
  0x18   : > { %306 = vst.msk [vmem:[#allocation2 + $0x108] sm:$0xff] %vm271_vm1, %v7301_v1  ;;  %307 = vst.msk [vmem:[#allocation2 + $0x110] sm:$0xff] %vm271_vm1, %v7301_v1  ;;  %v348_v20 = vld [vmem:[%s5777_s6 + $0xa8] sm:$0xff]  ;;  %v333_v21 = vld [vmem:[%s5777_s6 + $0x30] sm:$0xff] }
  0x19   : > { %309 = vst.msk [vmem:[#allocation2 + $0x120] sm:$0xff] %vm271_vm1, %v7301_v1  ;;  %310 = vst.msk [vmem:[#allocation2 + $0x128] sm:$0xff] %vm271_vm1, %v7301_v1  ;;  %v349_v22 = vld [vmem:[%s5777_s6 + $0xb0] sm:$0xff]  ;;  %v334_v23 = vld [vmem:[%s5777_s6 + $0x38] sm:$0xff] }
  0x1a   : > { %312 = vst.msk [vmem:[#allocation2 + $0x138] sm:$0xff] %vm271_vm1, %v7301_v1  ;;  %313 = vst.msk [vmem:[#allocation2 + $0x140] sm:$0xff] %vm271_vm1, %v7301_v1  ;;  %v350_v24 = vld [vmem:[%s5777_s6 + $0xb8] sm:$0xff]  ;;  %v335_v25 = vld [vmem:[%s5777_s6 + $0x40] sm:$0xff] }
  0x1b   : > { %315 = vst.msk [vmem:[#allocation2 + $0x150] sm:$0xff] %vm271_vm1, %v7301_v1  ;;  %316 = vst.msk [vmem:[#allocation2 + $0x158] sm:$0xff] %vm271_vm1, %v7301_v1  ;;  %v351_v26 = vld [vmem:[%s5777_s6 + $0xc0] sm:$0xff]  ;;  %v336_v27 = vld [vmem:[%s5777_s6 + $0x48] sm:$0xff] }
  0x1c   : > { %318 = vst.msk [vmem:[#allocation2 + $0x168] sm:$0xff] %vm271_vm1, %v7301_v1  ;;  %319 = vst.msk [vmem:[#allocation2 + $0x170] sm:$0xff] %vm271_vm1, %v7301_v1  ;;  %v352_v28 = vld [vmem:[%s5777_s6 + $0xc8] sm:$0xff]  ;;  %v337_v36 = vld [vmem:[%s5777_s6 + $0x50] sm:$0xff] }
  0x1d   : > { %321 = vst.msk [vmem:[#allocation2 + $0x180] sm:$0xff] %vm271_vm1, %v7301_v1  ;;  %322 = vst.msk [vmem:[#allocation2 + $0x188] sm:$0xff] %vm271_vm1, %v7301_v1  ;;  %v353_v39 = vld [vmem:[%s5777_s6 + $0xd0] sm:$0xff]  ;;  %v338_v46 = vld [vmem:[%s5777_s6 + $0x58] sm:$0xff] }
  0x1e   : > { %324 = vst.msk [vmem:[#allocation2 + $0x198] sm:$0xff] %vm271_vm1, %v7301_v1  ;;  %325 = vst.msk [vmem:[#allocation2 + $0x1a0] sm:$0xff] %vm271_vm1, %v7301_v1  ;;  %v354_v47 = vld [vmem:[%s5777_s6 + $0xd8] sm:$0xff]  ;;  %v339_v48 = vld [vmem:[%s5777_s6 + $0x60] sm:$0xff] }
  0x1f   : > { %275 = vst.msk [vmem:[#allocation2 + $0x10] sm:$0x3] %vm274_vm2, %v7301_v1  ;;  %278 = vst.msk [vmem:[#allocation2 + $0x28] sm:$0x3] %vm274_vm2, %v7301_v1  ;;  %v355_v49 = vld [vmem:[%s5777_s6 + $0xe0] sm:$0xff]  ;;  %v340_v50 = vld [vmem:[%s5777_s6 + $0x68] sm:$0xff] }
  0x20   : > { %281 = vst.msk [vmem:[#allocation2 + $0x40] sm:$0x3] %vm274_vm2, %v7301_v1  ;;  %284 = vst.msk [vmem:[#allocation2 + $0x58] sm:$0x3] %vm274_vm2, %v7301_v1  ;;  %v356_v51 = vld [vmem:[%s5777_s6 + $0xe8] sm:$0xff] }
  0x21   : > { %287 = vst.msk [vmem:[#allocation2 + $0x70] sm:$0x3] %vm274_vm2, %v7301_v1  ;;  %290 = vst.msk [vmem:[#allocation2 + $0x88] sm:$0x3] %vm274_vm2, %v7301_v1  ;;  %v399_v11 = vld [vmem:[#allocation2 + $0x8] sm:$0xff] }
  0x22   : > { %293 = vst.msk [vmem:[#allocation2 + $0xa0] sm:$0x3] %vm274_vm2, %v7301_v1  ;;  %296 = vst.msk [vmem:[#allocation2 + $0xb8] sm:$0x3] %vm274_vm2, %v7301_v1 }
  0x23   : > { %299 = vst.msk [vmem:[#allocation2 + $0xd0] sm:$0x3] %vm274_vm2, %v7301_v1  ;;  %302 = vst.msk [vmem:[#allocation2 + $0xe8] sm:$0x3] %vm274_vm2, %v7301_v1 }
  0x24   : > { %305 = vst.msk [vmem:[#allocation2 + $0x100] sm:$0x3] %vm274_vm2, %v7301_v1  ;;  %308 = vst.msk [vmem:[#allocation2 + $0x118] sm:$0x3] %vm274_vm2, %v7301_v1 }
  0x25   : > { %311 = vst.msk [vmem:[#allocation2 + $0x130] sm:$0x3] %vm274_vm2, %v7301_v1  ;;  %314 = vst.msk [vmem:[#allocation2 + $0x148] sm:$0x3] %vm274_vm2, %v7301_v1 }
  0x26   : > { %317 = vst.msk [vmem:[#allocation2 + $0x160] sm:$0x3] %vm274_vm2, %v7301_v1  ;;  %320 = vst.msk [vmem:[#allocation2 + $0x178] sm:$0x3] %vm274_vm2, %v7301_v1  ;;  %v432_v14 = vld [vmem:[#allocation2 + $0x9] sm:$0xff] }
  0x27   : > { %323 = vst.msk [vmem:[#allocation2 + $0x190] sm:$0x3] %vm274_vm2, %v7301_v1  ;;  %326 = vst.msk [vmem:[#allocation2 + $0x1a8] sm:$0x3] %vm274_vm2, %v7301_v1  ;;  %5090 = vmatmul.mubr.msk.f32.vlgmr.msra.gmra.mxu0 %vm271_vm1, %v432_v14 }
  0x28   : > { %374 = vst.msk [vmem:[#allocation2 + $0xc1] sm:$0xff] %vm271_vm1, %v341_v4  ;;  %375 = vst.msk [vmem:[#allocation2 + $0xc9] sm:$0xff] %vm271_vm1, %v342_v5  ;;  %5188 = vmatpush3.msk.msra.mxu0 %vm562_vm0, %v4355_v3  ;;  %v1115_v4 = vld [vmem:[#allocation2 + $0x2] sm:$0xff] }
  0x29   : > { %360 = vst.msk [vmem:[#allocation2 + $0x19] sm:$0xff] %vm271_vm1, %v327_v6  ;;  %376 = vst.msk [vmem:[#allocation2 + $0xd9] sm:$0xff] %vm271_vm1, %v343_v7  ;;  %5287 = vmatprep.subr.msk.mxu0 %vm562_vm0, %v5791_v10  ;;  %v1116_v6 = vld [vmem:[#allocation2 + $0xa] sm:$0xff]  ;;  %v398_v7 = vld [vmem:[#allocation2] sm:$0xff] }
  0x2a   : > { %361 = vst.msk [vmem:[#allocation2 + $0x21] sm:$0xff] %vm271_vm1, %v328_v8  ;;  %377 = vst.msk [vmem:[#allocation2 + $0xe1] sm:$0xff] %vm271_vm1, %v344_v9  ;;  %v5982_v9 = vld [vmem:[%s7296_s1 + $0x18] sm:$0xf] }
  0x2b   : > { %362 = vst.msk [vmem:[#allocation2 + $0x31] sm:$0xff] %vm271_vm1, %v329_v12  ;;  %378 = vst.msk [vmem:[#allocation2 + $0xf1] sm:$0xff] %vm271_vm1, %v345_v13 }
  0x2c   : > { %363 = vst.msk [vmem:[#allocation2 + $0x39] sm:$0xff] %vm271_vm1, %v330_v15  ;;  %379 = vst.msk [vmem:[#allocation2 + $0xf9] sm:$0xff] %vm271_vm1, %v346_v16  ;;  %v6003_v15 = vld [vmem:[%s7296_s1 + $0x14] sm:$0xf]  ;;  %v358_v16 = vld [vmem:[%s5777_s6 + $0xf8] sm:$0xff] }
  0x2d   : > { %364 = vst.msk [vmem:[#allocation2 + $0x49] sm:$0xff] %vm271_vm1, %v331_v17  ;;  %380 = vst.msk [vmem:[#allocation2 + $0x109] sm:$0xff] %vm271_vm1, %v347_v18 }
  0x2e   : > { %365 = vst.msk [vmem:[#allocation2 + $0x51] sm:$0xff] %vm271_vm1, %v332_v19  ;;  %381 = vst.msk [vmem:[#allocation2 + $0x111] sm:$0xff] %vm271_vm1, %v348_v20 }
  0x2f   : > { %366 = vst.msk [vmem:[#allocation2 + $0x61] sm:$0xff] %vm271_vm1, %v333_v21  ;;  %382 = vst.msk [vmem:[#allocation2 + $0x121] sm:$0xff] %vm271_vm1, %v349_v22  ;;  %v5830_v29 = vld [vmem:[#allocation2 + $0xc1] sm:$0xff]  ;;  %v5832_v30 = vld [vmem:[#allocation2 + $0xc9] sm:$0xff] }
  0x30   : > { %367 = vst.msk [vmem:[#allocation2 + $0x69] sm:$0xff] %vm271_vm1, %v334_v23  ;;  %383 = vst.msk [vmem:[#allocation2 + $0x129] sm:$0xff] %vm271_vm1, %v350_v24  ;;  %v5834_v31 = vld [vmem:[#allocation2 + $0x19] sm:$0xff]  ;;  %5113 = vmatprep.mubr.msk.f32.mxu1 %vm271_vm1, %v5830_v29 }
  0x31   : > { %368 = vst.msk [vmem:[#allocation2 + $0x79] sm:$0xff] %vm271_vm1, %v335_v25  ;;  %384 = vst.msk [vmem:[#allocation2 + $0x139] sm:$0xff] %vm271_vm1, %v351_v26  ;;  %5092 = vmatprep.mubr.msk.f32.mxu0 %vm271_vm1, %v5834_v31  ;;  %v5843_v32 = vld [vmem:[#allocation2 + $0xd9] sm:$0xff]  ;;  %v5845_v33 = vld [vmem:[#allocation2 + $0x21] sm:$0xff]  ;;  %5114 = vmatmul.mubr.msk.f32.vlgmr.msra.gmra.mxu1 %vm271_vm1, %v5832_v30 }
  0x32   : > { %369 = vst.msk [vmem:[#allocation2 + $0x81] sm:$0xff] %vm271_vm1, %v336_v27  ;;  %385 = vst.msk [vmem:[#allocation2 + $0x141] sm:$0xff] %vm271_vm1, %v352_v28  ;;  %5093 = vmatmul.mubr.msk.f32.gmra.mxu0 %vm271_vm1, %v5845_v33  ;;  %v5856_v35 = vld [vmem:[#allocation2 + $0x31] sm:$0xff]  ;;  %5138 = vmatpush3.msk.msra.mxu1 %vm562_vm0, %v5720_v2  ;;  %v5863_v37 = vld [vmem:[#allocation2 + $0xe1] sm:$0xff] }
  0x33   : > { %5116 = vmatprep.mubr.msk.f32.mxu1 %vm271_vm1, %v5843_v32  ;;  %v5865_v38 = vld [vmem:[#allocation2 + $0x39] sm:$0xff]  ;;  %370 = vst.msk [vmem:[#allocation2 + $0x91] sm:$0xff] %vm271_vm1, %v337_v36  ;;  %5095 = vmatprep.mubr.msk.f32.mxu0 %vm271_vm1, %v5856_v35  ;;  %v5871_v40 = vld [vmem:[#allocation2 + $0xf1] sm:$0xff]  ;;  %386 = vst.msk [vmem:[#allocation2 + $0x151] sm:$0xff] %vm271_vm1, %v353_v39 }
  0x34   : > { %v5873_v41 = vld [vmem:[#allocation2 + $0x49] sm:$0xff]  ;;  %5237 = vmatprep.subr.msk.mxu1 %vm562_vm0, %v5850_v34  ;;  %v5882_v42 = vld [vmem:[#allocation2 + $0xf9] sm:$0xff]  ;;  %371 = vst.msk [vmem:[#allocation2 + $0x99] sm:$0xff] %vm271_vm1, %v338_v46  ;;  %387 = vst.msk [vmem:[#allocation2 + $0x159] sm:$0xff] %vm271_vm1, %v354_v47 }
  0x35   : > { %5117 = vmatmul.mubr.msk.f32.gmra.mxu1 %vm271_vm1, %v5863_v37  ;;  %v5888_v43 = vld [vmem:[#allocation2 + $0x109] sm:$0xff]  ;;  %v5890_v44 = vld [vmem:[#allocation2 + $0x51] sm:$0xff]  ;;  %372 = vst.msk [vmem:[#allocation2 + $0xa9] sm:$0xff] %vm271_vm1, %v339_v48  ;;  %388 = vst.msk [vmem:[#allocation2 + $0x169] sm:$0xff] %vm271_vm1, %v355_v49 }
  0x36   : > { %5096 = vmatmul.mubr.msk.f32.gmra.mxu0 %vm271_vm1, %v5865_v38  ;;  %5119 = vmatprep.mubr.msk.f32.mxu1 %vm271_vm1, %v5871_v40  ;;  %v5892_v45 = vld [vmem:[#allocation2 + $0x61] sm:$0xff]  ;;  %373 = vst.msk [vmem:[#allocation2 + $0xb1] sm:$0xff] %vm271_vm1, %v340_v50  ;;  %389 = vst.msk [vmem:[#allocation2 + $0x171] sm:$0xff] %vm271_vm1, %v356_v51  ;;  %v5912_v52 = vld [vmem:[#allocation2 + $0x111] sm:$0xff] }
  0x37   : > { %5098 = vmatprep.mubr.msk.f32.mxu0 %vm271_vm1, %v5873_v41  ;;  %v5916_v53 = vld [vmem:[#allocation2 + $0x69] sm:$0xff]  ;;  %v5918_v54 = vld [vmem:[#allocation2 + $0x121] sm:$0xff]  ;;  %v5992_v13 = vld [vmem:[#allocation2 + $0x18] sm:$0xff]  ;;  %391 = vst.msk [vmem:[#allocation2 + $0x189] sm:$0xff] %vm271_vm1, %v358_v16 }
  0x38   : > { %v5920_v55 = vld [vmem:[#allocation2 + $0x79] sm:$0xff]  ;;  %v5928_v56 = vld [vmem:[#allocation2 + $0x129] sm:$0xff] }
  0x39   : > { %5120 = vmatmul.mubr.msk.f32.gmra.mxu1 %vm271_vm1, %v5882_v42  ;;  %v5932_v57 = vld [vmem:[#allocation2 + $0x81] sm:$0xff]  ;;  %v5934_v58 = vld [vmem:[#allocation2 + $0x139] sm:$0xff]  ;;  %v6020_v19 = vld [vmem:[#allocation2 + $0x30] sm:$0xff] }
  0x3a   : > { %5099 = vmatmul.mubr.msk.f32.gmra.mxu0 %vm271_vm1, %v5890_v44  ;;  %5122 = vmatprep.mubr.msk.f32.mxu1 %vm271_vm1, %v5888_v43  ;;  %v5936_v59 = vld [vmem:[#allocation2 + $0x91] sm:$0xff]  ;;  %v5944_v60 = vld [vmem:[#allocation2 + $0x141] sm:$0xff] }
  0x3b   : > { %5101 = vmatprep.mubr.msk.f32.mxu0 %vm271_vm1, %v5892_v45  ;;  %v5948_v61 = vld [vmem:[#allocation2 + $0x99] sm:$0xff]  ;;  %v5950_v62 = vld [vmem:[#allocation2 + $0x151] sm:$0xff]  ;;  %v5990_v12 = vld [vmem:[#allocation2 + $0x22] sm:$0xff] }
  0x3c   : > { %v5952_v63 = vld [vmem:[#allocation2 + $0xa9] sm:$0xff]  ;;  %v5960_v0 = vld [vmem:[#allocation2 + $0x159] sm:$0xff]  ;;  %7360 = vst [vmem:[#allocation4_spill] sm:$0xff] %v5990_v12 }
  0x3d   : > { %5123 = vmatmul.mubr.msk.f32.gmra.mxu1 %vm271_vm1, %v5912_v52  ;;  %v5964_v2 = vld [vmem:[#allocation2 + $0xb1] sm:$0xff]  ;;  %v5966_v3 = vld [vmem:[#allocation2 + $0x169] sm:$0xff]  ;;  %v5977_v8 = vld [vmem:[#allocation2 + $0x1a] sm:$0xff] }
  0x3e   : > { %5102 = vmatmul.mubr.msk.f32.gmra.mxu0 %vm271_vm1, %v5916_v53  ;;  %5125 = vmatprep.mubr.msk.f32.mxu1 %vm271_vm1, %v5918_v54  ;;  %v5974_v5 = vld [vmem:[#allocation2 + $0x171] sm:$0xff]  ;;  %7359 = vst [vmem:[#allocation3_spill] sm:$0xff] %v5977_v8  ;;  %v6014_v17 = vld [vmem:[#allocation2 + $0x20] sm:$0xff]  ;;  %v6040_v23 = vld [vmem:[#allocation2 + $0x48] sm:$0xff] }
  0x3f   : > { %5104 = vmatprep.mubr.msk.f32.mxu0 %vm271_vm1, %v5920_v55  ;;  %v5998_v14 = vld [vmem:[#allocation2 + $0x32] sm:$0xff]  ;;  %v6016_v18 = vld [vmem:[#allocation2 + $0x3a] sm:$0xff]  ;;  %v6024_v20 = vld [vmem:[#allocation2 + $0x4a] sm:$0xff] }
  0x40   : > { %7361 = vst [vmem:[#allocation5_spill] sm:$0xff] %v5998_v14  ;;  %7362 = vst [vmem:[#allocation6_spill] sm:$0xff] %v6016_v18  ;;  %v6034_v21 = vld [vmem:[#allocation2 + $0x38] sm:$0xff]  ;;  %v6042_v24 = vld [vmem:[#allocation2 + $0x62] sm:$0xff] }
  0x41   : > { %5126 = vmatmul.mubr.msk.f32.gmra.mxu1 %vm271_vm1, %v5928_v56  ;;  %7363 = vst [vmem:[#allocation7_spill] sm:$0xff] %v6024_v20  ;;  %v6038_v22 = vld [vmem:[#allocation2 + $0x52] sm:$0xff]  ;;  %7365 = vst [vmem:[#allocation9_spill] sm:$0xff] %v6042_v24  ;;  %v6054_v26 = vld [vmem:[#allocation2 + $0x6a] sm:$0xff] }
  0x42   : > { %5105 = vmatmul.mubr.msk.f32.gmra.mxu0 %vm271_vm1, %v5932_v57  ;;  %5128 = vmatprep.mubr.msk.f32.mxu1 %vm271_vm1, %v5934_v58  ;;  %7364 = vst [vmem:[#allocation8_spill] sm:$0xff] %v6038_v22  ;;  %v6050_v25 = vld [vmem:[#allocation2 + $0x50] sm:$0xff]  ;;  %7366 = vst [vmem:[#allocation10_spill] sm:$0xff] %v6054_v26  ;;  %v6056_v27 = vld [vmem:[#allocation2 + $0x60] sm:$0xff] }
  0x43   : > { %5107 = vmatprep.mubr.msk.f32.mxu0 %vm271_vm1, %v5936_v59  ;;  %v6058_v28 = vld [vmem:[#allocation2 + $0x7a] sm:$0xff]  ;;  %v6070_v36 = vld [vmem:[#allocation2 + $0x82] sm:$0xff]  ;;  %v6074_v46 = vld [vmem:[#allocation2 + $0x92] sm:$0xff] }
  0x44   : > { %7367 = vst [vmem:[#allocation11_spill] sm:$0xff] %v6058_v28  ;;  %7368 = vst [vmem:[#allocation12_spill] sm:$0xff] %v6070_v36  ;;  %v6072_v39 = vld [vmem:[#allocation2 + $0x78] sm:$0xff]  ;;  %v6082_v47 = vld [vmem:[#allocation2 + $0x80] sm:$0xff] }
  0x45   : > { %5129 = vmatmul.mubr.msk.f32.gmra.mxu1 %vm271_vm1, %v5944_v60  ;;  %7369 = vst [vmem:[#allocation13_spill] sm:$0xff] %v6074_v46  ;;  %v6086_v48 = vld [vmem:[#allocation2 + $0x9a] sm:$0xff]  ;;  %v6088_v49 = vld [vmem:[#allocation2 + $0x90] sm:$0xff] }
  0x46   : > { %5108 = vmatmul.mubr.msk.f32.gmra.mxu0 %vm271_vm1, %v5948_v61  ;;  %5131 = vmatprep.mubr.msk.f32.mxu1 %vm271_vm1, %v5950_v62  ;;  %7370 = vst [vmem:[#allocation14_spill] sm:$0xff] %v6086_v48  ;;  %v6090_v50 = vld [vmem:[#allocation2 + $0xaa] sm:$0xff]  ;;  %v6098_v51 = vld [vmem:[#allocation2 + $0x98] sm:$0xff]  ;;  %v6120_v16 = vld [vmem:[#allocation2 + $0xc0] sm:$0xff] }
  0x47   : > { %5110 = vmatprep.mubr.msk.f32.mxu0 %vm271_vm1, %v5952_v63  ;;  %7371 = vst [vmem:[#allocation15_spill] sm:$0xff] %v6090_v50  ;;  %v6122_v1 = vld [vmem:[#allocation2 + $0xda] sm:$0xff] }
  0x48   : > { %7375 = vst [vmem:[#allocation19_spill] sm:$0xff] %v6122_v1 }
  0x49   : > { %5132 = vmatmul.mubr.msk.f32.gmra.mxu1 %vm271_vm1, %v5960_v0 }
  0x4a   : > { %5111 = vmatmul.mubr.msk.f32.gmra.mxu0 %vm271_vm1, %v5964_v2  ;;  %5134 = vmatprep.mubr.msk.f32.mxu1 %vm271_vm1, %v5966_v3 }
  0x4b   : > { %5189 = vmatprep.mubr.msk.f32.mxu0 %vm271_vm1, %v1115_v4  ;;  %v6102_v4 = vld [vmem:[#allocation2 + $0xb2] sm:$0xff] }
  0x4c   : > { %7372 = vst [vmem:[#allocation16_spill] sm:$0xff] %v6102_v4 }
  0x4d   : > { %5135 = vmatmul.mubr.msk.f32.gmra.mxu1 %vm271_vm1, %v5974_v5 }
  0x4e   : > { %5190 = vmatmul.mubr.msk.f32.vlgmr.msra.gmra.mxu0 %vm271_vm1, %v1116_v6  ;;  %5139 = vmatprep.mubr.msk.f32.mxu1 %vm271_vm1, %v398_v7  ;;  %v6104_v6 = vld [vmem:[#allocation2 + $0xa8] sm:$0xff] }
  0x4f   : > { %5288 = vmatpush3.msk.msra.mxu0 %vm562_vm0, %v5791_v10  ;;  %5192 = vmatprep.mubr.msk.f32.mxu0 %vm271_vm1, %v5977_v8  ;;  %v357_v10 = vld [vmem:[%s5777_s6 + $0xf0] sm:$0xff]  ;;  %v6106_v7 = vld [vmem:[#allocation2 + $0xc2] sm:$0xff] }
  0x50   : > { %5387 = vmatprep.subr.msk.mxu0 %vm562_vm0, %v5982_v9  ;;  %390 = vst.msk [vmem:[#allocation2 + $0x181] sm:$0xff] %vm271_vm1, %v357_v10  ;;  %7373 = vst [vmem:[#allocation17_spill] sm:$0xff] %v6106_v7  ;;  %v6118_v10 = vld [vmem:[#allocation2 + $0xca] sm:$0xff] }
  0x51   : > { %5140 = vmatmul.mubr.msk.f32.vlgmr.msra.gmra.mxu1 %vm271_vm1, %v399_v11  ;;  %v6114_v11 = vld [vmem:[#allocation2 + $0xb0] sm:$0xff]  ;;  %7374 = vst [vmem:[#allocation18_spill] sm:$0xff] %v6118_v10  ;;  %v6232_v8 = vld [vmem:[#allocation2 + $0x168] sm:$0xff] }
  0x52   : > { %5193 = vmatmul.mubr.msk.f32.gmra.mxu0 %vm271_vm1, %v5990_v12  ;;  %5238 = vmatpush3.msk.msra.mxu1 %vm562_vm0, %v5850_v34  ;;  %v6066_v34 = vld [vmem:[#allocation2 + $0x68] sm:$0xff] }
  0x53   : > { %5142 = vmatprep.mubr.msk.f32.mxu1 %vm271_vm1, %v5992_v13  ;;  %5195 = vmatprep.mubr.msk.f32.mxu0 %vm271_vm1, %v5998_v14  ;;  %v6216_v14 = vld [vmem:[#allocation2 + $0x150] sm:$0xff] }
  0x54   : > { %5337 = vmatprep.subr.msk.mxu1 %vm562_vm0, %v6003_v15  ;;  %v6218_v12 = vld [vmem:[#allocation2 + $0x16a] sm:$0xff] }
  0x55   : > { %5143 = vmatmul.mubr.msk.f32.gmra.mxu1 %vm271_vm1, %v6014_v17  ;;  %7387 = vst [vmem:[#allocation31_spill] sm:$0xff] %v6218_v12 }
  0x56   : > { %5196 = vmatmul.mubr.msk.f32.gmra.mxu0 %vm271_vm1, %v6016_v18  ;;  %5145 = vmatprep.mubr.msk.f32.mxu1 %vm271_vm1, %v6020_v19  ;;  %v6202_v18 = vld [vmem:[#allocation2 + $0x152] sm:$0xff] }
  0x57   : > { %5198 = vmatprep.mubr.msk.f32.mxu0 %vm271_vm1, %v6024_v20  ;;  %v6200_v20 = vld [vmem:[#allocation2 + $0x138] sm:$0xff]  ;;  %7385 = vst [vmem:[#allocation29_spill] sm:$0xff] %v6202_v18 }
  0x59   : > { %5146 = vmatmul.mubr.msk.f32.gmra.mxu1 %vm271_vm1, %v6034_v21 }
  0x5a   : > { %5199 = vmatmul.mubr.msk.f32.gmra.mxu0 %vm271_vm1, %v6038_v22  ;;  %5148 = vmatprep.mubr.msk.f32.mxu1 %vm271_vm1, %v6040_v23  ;;  %v6186_v22 = vld [vmem:[#allocation2 + $0x13a] sm:$0xff] }
  0x5b   : > { %5201 = vmatprep.mubr.msk.f32.mxu0 %vm271_vm1, %v6042_v24  ;;  %v6184_v24 = vld [vmem:[#allocation2 + $0x120] sm:$0xff]  ;;  %7383 = vst [vmem:[#allocation27_spill] sm:$0xff] %v6186_v22 }
  0x5d   : > { %5149 = vmatmul.mubr.msk.f32.gmra.mxu1 %vm271_vm1, %v6050_v25 }
  0x5e   : > { %5202 = vmatmul.mubr.msk.f32.gmra.mxu0 %vm271_vm1, %v6054_v26  ;;  %5151 = vmatprep.mubr.msk.f32.mxu1 %vm271_vm1, %v6056_v27  ;;  %v6170_v26 = vld [vmem:[#allocation2 + $0x122] sm:$0xff] }
  0x5f   : > { %5204 = vmatprep.mubr.msk.f32.mxu0 %vm271_vm1, %v6058_v28  ;;  %v6168_v28 = vld [vmem:[#allocation2 + $0x108] sm:$0xff]  ;;  %7381 = vst [vmem:[#allocation25_spill] sm:$0xff] %v6170_v26 }
  0x61   : > { %5152 = vmatmul.mubr.msk.f32.gmra.mxu1 %vm271_vm1, %v6066_v34 }
  0x62   : > { %5205 = vmatmul.mubr.msk.f32.gmra.mxu0 %vm271_vm1, %v6070_v36  ;;  %5154 = vmatprep.mubr.msk.f32.mxu1 %vm271_vm1, %v6072_v39  ;;  %v6154_v36 = vld [vmem:[#allocation2 + $0x10a] sm:$0xff] }
  0x63   : > { %5207 = vmatprep.mubr.msk.f32.mxu0 %vm271_vm1, %v6074_v46  ;;  %v6152_v46 = vld [vmem:[#allocation2 + $0xf0] sm:$0xff]  ;;  %7379 = vst [vmem:[#allocation23_spill] sm:$0xff] %v6154_v36 }
  0x65   : > { %5155 = vmatmul.mubr.msk.f32.gmra.mxu1 %vm271_vm1, %v6082_v47 }
  0x66   : > { %5208 = vmatmul.mubr.msk.f32.gmra.mxu0 %vm271_vm1, %v6086_v48  ;;  %5157 = vmatprep.mubr.msk.f32.mxu1 %vm271_vm1, %v6088_v49  ;;  %v6138_v48 = vld [vmem:[#allocation2 + $0xf2] sm:$0xff] }
  0x67   : > { %5210 = vmatprep.mubr.msk.f32.mxu0 %vm271_vm1, %v6090_v50  ;;  %v6136_v50 = vld [vmem:[#allocation2 + $0xd8] sm:$0xff]  ;;  %7377 = vst [vmem:[#allocation21_spill] sm:$0xff] %v6138_v48 }
  0x69   : > { %5158 = vmatmul.mubr.msk.f32.gmra.mxu1 %vm271_vm1, %v6098_v51 }
  0x6a   : > { %5211 = vmatmul.mubr.msk.f32.gmra.mxu0 %vm271_vm1, %v6102_v4  ;;  %5160 = vmatprep.mubr.msk.f32.mxu1 %vm271_vm1, %v6104_v6  ;;  %v6130_v4 = vld [vmem:[#allocation2 + $0xc8] sm:$0xff] }
  0x6b   : > { %5213 = vmatprep.mubr.msk.f32.mxu0 %vm271_vm1, %v6106_v7  ;;  %v6134_v7 = vld [vmem:[#allocation2 + $0xe2] sm:$0xff] }
  0x6c   : > { %7376 = vst [vmem:[#allocation20_spill] sm:$0xff] %v6134_v7 }
  0x6d   : > { %5161 = vmatmul.mubr.msk.f32.gmra.mxu1 %vm271_vm1, %v6114_v11 }
  0x6e   : > { %5214 = vmatmul.mubr.msk.f32.gmra.mxu0 %vm271_vm1, %v6118_v10  ;;  %5163 = vmatprep.mubr.msk.f32.mxu1 %vm271_vm1, %v6120_v16  ;;  %v6146_v10 = vld [vmem:[#allocation2 + $0xe0] sm:$0xff] }
  0x6f   : > { %5216 = vmatprep.mubr.msk.f32.mxu0 %vm271_vm1, %v6122_v1  ;;  %v6150_v1 = vld [vmem:[#allocation2 + $0xfa] sm:$0xff] }
  0x70   : > { %7378 = vst [vmem:[#allocation22_spill] sm:$0xff] %v6150_v1 }
  0x71   : > { %5164 = vmatmul.mubr.msk.f32.gmra.mxu1 %vm271_vm1, %v6130_v4 }
  0x72   : > { %5217 = vmatmul.mubr.msk.f32.gmra.mxu0 %vm271_vm1, %v6134_v7  ;;  %5166 = vmatprep.mubr.msk.f32.mxu1 %vm271_vm1, %v6136_v50  ;;  %v6162_v7 = vld [vmem:[#allocation2 + $0xf8] sm:$0xff] }
  0x73   : > { %5219 = vmatprep.mubr.msk.f32.mxu0 %vm271_vm1, %v6138_v48  ;;  %v6166_v48 = vld [vmem:[#allocation2 + $0x112] sm:$0xff] }
  0x74   : > { %7380 = vst [vmem:[#allocation24_spill] sm:$0xff] %v6166_v48 }
  0x75   : > { %5167 = vmatmul.mubr.msk.f32.gmra.mxu1 %vm271_vm1, %v6146_v10 }
  0x76   : > { %5220 = vmatmul.mubr.msk.f32.gmra.mxu0 %vm271_vm1, %v6150_v1  ;;  %5169 = vmatprep.mubr.msk.f32.mxu1 %vm271_vm1, %v6152_v46  ;;  %v6178_v1 = vld [vmem:[#allocation2 + $0x110] sm:$0xff] }
  0x77   : > { %5222 = vmatprep.mubr.msk.f32.mxu0 %vm271_vm1, %v6154_v36  ;;  %v6182_v36 = vld [vmem:[#allocation2 + $0x12a] sm:$0xff] }
  0x78   : > { %7382 = vst [vmem:[#allocation26_spill] sm:$0xff] %v6182_v36 }
  0x79   : > { %5170 = vmatmul.mubr.msk.f32.gmra.mxu1 %vm271_vm1, %v6162_v7 }
  0x7a   : > { %5223 = vmatmul.mubr.msk.f32.gmra.mxu0 %vm271_vm1, %v6166_v48  ;;  %5172 = vmatprep.mubr.msk.f32.mxu1 %vm271_vm1, %v6168_v28  ;;  %v6194_v48 = vld [vmem:[#allocation2 + $0x128] sm:$0xff] }
  0x7b   : > { %5225 = vmatprep.mubr.msk.f32.mxu0 %vm271_vm1, %v6170_v26  ;;  %v6198_v26 = vld [vmem:[#allocation2 + $0x142] sm:$0xff] }
  0x7c   : > { %7384 = vst [vmem:[#allocation28_spill] sm:$0xff] %v6198_v26 }
  0x7d   : > { %5173 = vmatmul.mubr.msk.f32.gmra.mxu1 %vm271_vm1, %v6178_v1 }
  0x7e   : > { %5226 = vmatmul.mubr.msk.f32.gmra.mxu0 %vm271_vm1, %v6182_v36  ;;  %5175 = vmatprep.mubr.msk.f32.mxu1 %vm271_vm1, %v6184_v24  ;;  %v6210_v36 = vld [vmem:[#allocation2 + $0x140] sm:$0xff] }
  0x7f   : > { %5228 = vmatprep.mubr.msk.f32.mxu0 %vm271_vm1, %v6186_v22  ;;  %v6214_v22 = vld [vmem:[#allocation2 + $0x15a] sm:$0xff] }
  0x80   : > { %7386 = vst [vmem:[#allocation30_spill] sm:$0xff] %v6214_v22 }
  0x81   : > { %5176 = vmatmul.mubr.msk.f32.gmra.mxu1 %vm271_vm1, %v6194_v48 }
  0x82   : > { %5229 = vmatmul.mubr.msk.f32.gmra.mxu0 %vm271_vm1, %v6198_v26  ;;  %5178 = vmatprep.mubr.msk.f32.mxu1 %vm271_vm1, %v6200_v20  ;;  %v6226_v26 = vld [vmem:[#allocation2 + $0x158] sm:$0xff] }
  0x83   : > { %5231 = vmatprep.mubr.msk.f32.mxu0 %vm271_vm1, %v6202_v18  ;;  %v6230_v18 = vld [vmem:[#allocation2 + $0x172] sm:$0xff] }
  0x85   : > { %5179 = vmatmul.mubr.msk.f32.gmra.mxu1 %vm271_vm1, %v6210_v36 }
  0x86   : > { %5232 = vmatmul.mubr.msk.f32.gmra.mxu0 %vm271_vm1, %v6214_v22  ;;  %5181 = vmatprep.mubr.msk.f32.mxu1 %vm271_vm1, %v6216_v14  ;;  %v6240_v22 = vld [vmem:[#allocation2 + $0x170] sm:$0xff] }
  0x87   : > { %5234 = vmatprep.mubr.msk.f32.mxu0 %vm271_vm1, %v6218_v12  ;;  %v6247_v12 = vld [vmem:[%s7296_s1 + $0x20] sm:$0xf] }
  0x89   : > { %5182 = vmatmul.mubr.msk.f32.gmra.mxu1 %vm271_vm1, %v6226_v26 }
  0x8a   : > { %5235 = vmatmul.mubr.msk.f32.gmra.mxu0 %vm271_vm1, %v6230_v18  ;;  %5184 = vmatprep.mubr.msk.f32.mxu1 %vm271_vm1, %v6232_v8 }
  0x8b   : > { %5289 = vmatprep.mubr.msk.f32.mxu0 %vm271_vm1, %v5834_v31  ;;  %v6264_v31 = vld [vmem:[%s7296_s1 + $0x1c] sm:$0xf] }
  0x8d   : > { %5185 = vmatmul.mubr.msk.f32.gmra.mxu1 %vm271_vm1, %v6240_v22 }
  0x8e   : > { %5290 = vmatmul.mubr.msk.f32.vlgmr.msra.gmra.mxu0 %vm271_vm1, %v5845_v33  ;;  %5239 = vmatprep.mubr.msk.f32.mxu1 %vm271_vm1, %v5992_v13  ;;  %v6394_v33 = vld [vmem:[#allocation2 + $0x188] sm:$0xff] }
  0x8f   : > { %5388 = vmatpush3.msk.msra.mxu0 %vm562_vm0, %v5982_v9  ;;  %5292 = vmatprep.mubr.msk.f32.mxu0 %vm271_vm1, %v5856_v35  ;;  %v7390_v35 = vld [vmem:[#allocation3_spill] sm:$0xff] }
  0x90   : > { %5487 = vmatprep.subr.msk.mxu0 %vm562_vm0, %v6247_v12 }
  0x91   : > { %5240 = vmatmul.mubr.msk.f32.vlgmr.msra.gmra.mxu1 %vm271_vm1, %v6014_v17 }
  0x92   : > { %5293 = vmatmul.mubr.msk.f32.gmra.mxu0 %vm271_vm1, %v5865_v38  ;;  %5338 = vmatpush3.msk.msra.mxu1 %vm562_vm0, %v6003_v15  ;;  %v7392_v38 = vld [vmem:[#allocation5_spill] sm:$0xff] }
  0x93   : > { %5242 = vmatprep.mubr.msk.f32.mxu1 %vm271_vm1, %v6020_v19  ;;  %5295 = vmatprep.mubr.msk.f32.mxu0 %vm271_vm1, %v5873_v41  ;;  %v7394_v41 = vld [vmem:[#allocation7_spill] sm:$0xff] }
  0x94   : > { %5437 = vmatprep.subr.msk.mxu1 %vm562_vm0, %v6264_v31 }
  0x95   : > { %5243 = vmatmul.mubr.msk.f32.gmra.mxu1 %vm271_vm1, %v6034_v21 }
  0x96   : > { %5296 = vmatmul.mubr.msk.f32.gmra.mxu0 %vm271_vm1, %v5890_v44  ;;  %5245 = vmatprep.mubr.msk.f32.mxu1 %vm271_vm1, %v6040_v23  ;;  %v7397_v44 = vld [vmem:[#allocation10_spill] sm:$0xff] }
  0x97   : > { %5298 = vmatprep.mubr.msk.f32.mxu0 %vm271_vm1, %v5892_v45  ;;  %v7398_v45 = vld [vmem:[#allocation11_spill] sm:$0xff] }
  0x99   : > { %5246 = vmatmul.mubr.msk.f32.gmra.mxu1 %vm271_vm1, %v6050_v25 }
  0x9a   : > { %5299 = vmatmul.mubr.msk.f32.gmra.mxu0 %vm271_vm1, %v5916_v53  ;;  %5248 = vmatprep.mubr.msk.f32.mxu1 %vm271_vm1, %v6056_v27  ;;  %v7400_v53 = vld [vmem:[#allocation13_spill] sm:$0xff] }
  0x9b   : > { %5301 = vmatprep.mubr.msk.f32.mxu0 %vm271_vm1, %v5920_v55  ;;  %v7402_v55 = vld [vmem:[#allocation15_spill] sm:$0xff] }
  0x9d   : > { %5249 = vmatmul.mubr.msk.f32.gmra.mxu1 %vm271_vm1, %v6066_v34 }
  0x9e   : > { %5302 = vmatmul.mubr.msk.f32.gmra.mxu0 %vm271_vm1, %v5932_v57  ;;  %5251 = vmatprep.mubr.msk.f32.mxu1 %vm271_vm1, %v6072_v39  ;;  %v7404_v57 = vld [vmem:[#allocation17_spill] sm:$0xff] }
  0x9f   : > { %5304 = vmatprep.mubr.msk.f32.mxu0 %vm271_vm1, %v5936_v59  ;;  %v7405_v59 = vld [vmem:[#allocation18_spill] sm:$0xff] }
  0xa1   : > { %5252 = vmatmul.mubr.msk.f32.gmra.mxu1 %vm271_vm1, %v6082_v47 }
  0xa2   : > { %5305 = vmatmul.mubr.msk.f32.gmra.mxu0 %vm271_vm1, %v5948_v61  ;;  %5254 = vmatprep.mubr.msk.f32.mxu1 %vm271_vm1, %v6088_v49  ;;  %v7406_v61 = vld [vmem:[#allocation19_spill] sm:$0xff] }
  0xa3   : > { %5307 = vmatprep.mubr.msk.f32.mxu0 %vm271_vm1, %v5952_v63  ;;  %v7407_v63 = vld [vmem:[#allocation20_spill] sm:$0xff] }
  0xa5   : > { %5255 = vmatmul.mubr.msk.f32.gmra.mxu1 %vm271_vm1, %v6098_v51 }
  0xa6   : > { %5308 = vmatmul.mubr.msk.f32.gmra.mxu0 %vm271_vm1, %v5964_v2  ;;  %5257 = vmatprep.mubr.msk.f32.mxu1 %vm271_vm1, %v6104_v6  ;;  %v7408_v2 = vld [vmem:[#allocation21_spill] sm:$0xff] }
  0xa7   : > { %5310 = vmatprep.mubr.msk.f32.mxu0 %vm271_vm1, %v5830_v29  ;;  %v6374_v29 = vld [vmem:[#allocation2 + $0x181] sm:$0xff] }
  0xa8   : > { %7388 = vst [vmem:[#allocation32_spill] sm:$0xff] %v6374_v29 }
  0xa9   : > { %5258 = vmatmul.mubr.msk.f32.gmra.mxu1 %vm271_vm1, %v6114_v11 }
  0xaa   : > { %5311 = vmatmul.mubr.msk.f32.gmra.mxu0 %vm271_vm1, %v5832_v30  ;;  %5260 = vmatprep.mubr.msk.f32.mxu1 %vm271_vm1, %v6120_v16  ;;  %v6384_v30 = vld [vmem:[#allocation2 + $0x189] sm:$0xff] }
  0xab   : > { %5313 = vmatprep.mubr.msk.f32.mxu0 %vm271_vm1, %v5843_v32  ;;  %7389 = vst [vmem:[#allocation33_spill] sm:$0xff] %v6384_v30  ;;  %v6386_v32 = vld [vmem:[#allocation2 + $0x180] sm:$0xff] }
  0xad   : > { %5261 = vmatmul.mubr.msk.f32.gmra.mxu1 %vm271_vm1, %v6130_v4 }
  0xae   : > { %5314 = vmatmul.mubr.msk.f32.gmra.mxu0 %vm271_vm1, %v5863_v37  ;;  %5263 = vmatprep.mubr.msk.f32.mxu1 %vm271_vm1, %v6136_v50  ;;  %v7391_v37 = vld [vmem:[#allocation4_spill] sm:$0xff] }
  0xaf   : > { %5316 = vmatprep.mubr.msk.f32.mxu0 %vm271_vm1, %v5871_v40  ;;  %v7393_v40 = vld [vmem:[#allocation6_spill] sm:$0xff] }
  0xb1   : > { %5264 = vmatmul.mubr.msk.f32.gmra.mxu1 %vm271_vm1, %v6146_v10 }
  0xb2   : > { %5317 = vmatmul.mubr.msk.f32.gmra.mxu0 %vm271_vm1, %v5882_v42  ;;  %5266 = vmatprep.mubr.msk.f32.mxu1 %vm271_vm1, %v6152_v46  ;;  %v7395_v42 = vld [vmem:[#allocation8_spill] sm:$0xff] }
  0xb3   : > { %5319 = vmatprep.mubr.msk.f32.mxu0 %vm271_vm1, %v5888_v43  ;;  %v7396_v43 = vld [vmem:[#allocation9_spill] sm:$0xff] }
  0xb5   : > { %5267 = vmatmul.mubr.msk.f32.gmra.mxu1 %vm271_vm1, %v6162_v7 }
  0xb6   : > { %5320 = vmatmul.mubr.msk.f32.gmra.mxu0 %vm271_vm1, %v5912_v52  ;;  %5269 = vmatprep.mubr.msk.f32.mxu1 %vm271_vm1, %v6168_v28  ;;  %v7399_v52 = vld [vmem:[#allocation12_spill] sm:$0xff] }
  0xb7   : > { %5322 = vmatprep.mubr.msk.f32.mxu0 %vm271_vm1, %v5918_v54  ;;  %v7401_v54 = vld [vmem:[#allocation14_spill] sm:$0xff] }
  0xb9   : > { %5270 = vmatmul.mubr.msk.f32.gmra.mxu1 %vm271_vm1, %v6178_v1 }
  0xba   : > { %5323 = vmatmul.mubr.msk.f32.gmra.mxu0 %vm271_vm1, %v5928_v56  ;;  %5272 = vmatprep.mubr.msk.f32.mxu1 %vm271_vm1, %v6184_v24  ;;  %v7403_v56 = vld [vmem:[#allocation16_spill] sm:$0xff] }
  0xbb   : > { %5325 = vmatprep.mubr.msk.f32.mxu0 %vm271_vm1, %v5934_v58 }
  0xbd   : > { %5273 = vmatmul.mubr.msk.f32.gmra.mxu1 %vm271_vm1, %v6194_v48 }
  0xbe   : > { %5326 = vmatmul.mubr.msk.f32.gmra.mxu0 %vm271_vm1, %v5944_v60  ;;  %5275 = vmatprep.mubr.msk.f32.mxu1 %vm271_vm1, %v6200_v20 }
  0xbf   : > { %5328 = vmatprep.mubr.msk.f32.mxu0 %vm271_vm1, %v5950_v62 }
  0xc1   : > { %5276 = vmatmul.mubr.msk.f32.gmra.mxu1 %vm271_vm1, %v6210_v36 }
  0xc2   : > { %5329 = vmatmul.mubr.msk.f32.gmra.mxu0 %vm271_vm1, %v5960_v0  ;;  %5278 = vmatprep.mubr.msk.f32.mxu1 %vm271_vm1, %v6216_v14 }
  0xc3   : > { %5331 = vmatprep.mubr.msk.f32.mxu0 %vm271_vm1, %v5966_v3 }
  0xc5   : > { %5279 = vmatmul.mubr.msk.f32.gmra.mxu1 %vm271_vm1, %v6226_v26 }
  0xc6   : > { %5332 = vmatmul.mubr.msk.f32.gmra.mxu0 %vm271_vm1, %v5974_v5  ;;  %5281 = vmatprep.mubr.msk.f32.mxu1 %vm271_vm1, %v6232_v8 }
  0xc7   : > { %5334 = vmatprep.mubr.msk.f32.mxu0 %vm271_vm1, %v6374_v29 }
  0xc9   : > { %5282 = vmatmul.mubr.msk.f32.gmra.mxu1 %vm271_vm1, %v6240_v22 }
  0xca   : > { %5335 = vmatmul.mubr.msk.f32.gmra.mxu0 %vm271_vm1, %v6384_v30  ;;  %5284 = vmatprep.mubr.msk.f32.mxu1 %vm271_vm1, %v6386_v32 }
  0xcb   : > { %5389 = vmatprep.mubr.msk.f32.mxu0 %vm271_vm1, %v6020_v19 }
  0xcd   : > { %5285 = vmatmul.mubr.msk.f32.gmra.mxu1 %vm271_vm1, %v6394_v33 }
  0xce   : > { %5390 = vmatmul.mubr.msk.f32.vlgmr.msra.gmra.mxu0 %vm271_vm1, %v6034_v21  ;;  %5339 = vmatprep.mubr.msk.f32.mxu1 %vm271_vm1, %v7390_v35  ;;  %v7411_v21 = vld [vmem:[#allocation24_spill] sm:$0xff] }
  0xcf   : > { %5488 = vmatpush3.msk.msra.mxu0 %vm562_vm0, %v6247_v12  ;;  %5392 = vmatprep.mubr.msk.f32.mxu0 %vm271_vm1, %v6040_v23  ;;  %v7409_v12 = vld [vmem:[#allocation22_spill] sm:$0xff] }
  0xd1   : > { %5340 = vmatmul.mubr.msk.f32.vlgmr.msra.gmra.mxu1 %vm271_vm1, %v7391_v37 }
  0xd2   : > { %5393 = vmatmul.mubr.msk.f32.gmra.mxu0 %vm271_vm1, %v6050_v25  ;;  %5438 = vmatpush3.msk.msra.mxu1 %vm562_vm0, %v6264_v31 }
  0xd3   : > { %5342 = vmatprep.mubr.msk.f32.mxu1 %vm271_vm1, %v7392_v38  ;;  %5395 = vmatprep.mubr.msk.f32.mxu0 %vm271_vm1, %v6056_v27 }
  0xd5   : > { %5343 = vmatmul.mubr.msk.f32.gmra.mxu1 %vm271_vm1, %v7393_v40 }
  0xd6   : > { %5396 = vmatmul.mubr.msk.f32.gmra.mxu0 %vm271_vm1, %v6066_v34  ;;  %5345 = vmatprep.mubr.msk.f32.mxu1 %vm271_vm1, %v7394_v41 }
  0xd7   : > { %5398 = vmatprep.mubr.msk.f32.mxu0 %vm271_vm1, %v6072_v39 }
  0xd9   : > { %5346 = vmatmul.mubr.msk.f32.gmra.mxu1 %vm271_vm1, %v7395_v42 }
  0xda   : > { %5399 = vmatmul.mubr.msk.f32.gmra.mxu0 %vm271_vm1, %v6082_v47  ;;  %5348 = vmatprep.mubr.msk.f32.mxu1 %vm271_vm1, %v7396_v43  ;;  %v7415_v47 = vld [vmem:[#allocation28_spill] sm:$0xff] }
  0xdb   : > { %5401 = vmatprep.mubr.msk.f32.mxu0 %vm271_vm1, %v6088_v49 }
  0xdd   : > { %5349 = vmatmul.mubr.msk.f32.gmra.mxu1 %vm271_vm1, %v7397_v44 }
  0xde   : > { %5402 = vmatmul.mubr.msk.f32.gmra.mxu0 %vm271_vm1, %v6098_v51  ;;  %5351 = vmatprep.mubr.msk.f32.mxu1 %vm271_vm1, %v7398_v45 }
  0xdf   : > { %5404 = vmatprep.mubr.msk.f32.mxu0 %vm271_vm1, %v6104_v6 }
  0xe1   : > { %5352 = vmatmul.mubr.msk.f32.gmra.mxu1 %vm271_vm1, %v7399_v52 }
  0xe2   : > { %5405 = vmatmul.mubr.msk.f32.gmra.mxu0 %vm271_vm1, %v6114_v11  ;;  %5354 = vmatprep.mubr.msk.f32.mxu1 %vm271_vm1, %v7400_v53 }
  0xe3   : > { %5407 = vmatprep.mubr.msk.f32.mxu0 %vm271_vm1, %v6120_v16  ;;  %v6573_v16 = vld [vmem:[#allocation2 + $0x182] sm:$0xff] }
  0xe5   : > { %5355 = vmatmul.mubr.msk.f32.gmra.mxu1 %vm271_vm1, %v7401_v54 }
  0xe6   : > { %5408 = vmatmul.mubr.msk.f32.gmra.mxu0 %vm271_vm1, %v6130_v4  ;;  %5357 = vmatprep.mubr.msk.f32.mxu1 %vm271_vm1, %v7402_v55  ;;  %v7418_v4 = vld [vmem:[#allocation30_spill] sm:$0xff] }
  0xe7   : > { %5410 = vmatprep.mubr.msk.f32.mxu0 %vm271_vm1, %v6136_v50  ;;  %v6466_v58 = vpop.f32.mrf.mxu0  ;;  %v4617_v50 = vld [vmem:[#allocation2 + $0x198] sm:$0xff] }
  0xe9   : > { %5358 = vmatmul.mubr.msk.f32.gmra.mxu1 %vm271_vm1, %v7403_v56  ;;  %v6472_v60 = vpop.f32.mrf.mxu0 }
  0xea   : > { %5411 = vmatmul.mubr.msk.f32.gmra.mxu0 %vm271_vm1, %v6146_v10  ;;  %5360 = vmatprep.mubr.msk.f32.mxu1 %vm271_vm1, %v7404_v57 }
  0xeb   : > { %5413 = vmatprep.mubr.msk.f32.mxu0 %vm271_vm1, %v6152_v46 }
  0xed   : > { %5361 = vmatmul.mubr.msk.f32.gmra.mxu1 %vm271_vm1, %v7405_v59 }
  0xee   : > { %5414 = vmatmul.mubr.msk.f32.gmra.mxu0 %vm271_vm1, %v6162_v7  ;;  %5363 = vmatprep.mubr.msk.f32.mxu1 %vm271_vm1, %v7406_v61  ;;  %v4618_v7 = vld [vmem:[#allocation2 + $0x1a0] sm:$0xff] }
  0xef   : > { %5416 = vmatprep.mubr.msk.f32.mxu0 %vm271_vm1, %v6168_v28  ;;  %v7413_v28 = vld [vmem:[#allocation26_spill] sm:$0xff] }
  0xf1   : > { %v6478_v62 = vpop.f32.mrf.mxu1  ;;  %5364 = vmatmul.mubr.msk.f32.gmra.mxu1 %vm271_vm1, %v7407_v63 }
  0xf2   : > { %v6482_v0 = vpop.f32.mrf.mxu0  ;;  %5417 = vmatmul.mubr.msk.f32.gmra.mxu0 %vm271_vm1, %v6178_v1  ;;  %5366 = vmatprep.mubr.msk.f32.mxu1 %vm271_vm1, %v7408_v2  ;;  %v7410_v1 = vld [vmem:[#allocation23_spill] sm:$0xff] }
  0xf3   : > { %5419 = vmatprep.mubr.msk.f32.mxu0 %vm271_vm1, %v6184_v24  ;;  %v6490_v3 = vpop.f32.mrf.mxu1  ;;  %v7412_v24 = vld [vmem:[#allocation25_spill] sm:$0xff] }
  0xf4   : > { %v6492_v5 = vpop.f32.mrf.mxu0 }
  0xf5   : > { %v6494_v9 = vpop.f32.mrf.mxu1  ;;  %5367 = vmatmul.mubr.msk.f32.gmra.mxu1 %vm271_vm1, %v7409_v12 }
  0xf6   : > { %v6498_v13 = vpop.f32.mrf.mxu0  ;;  %5420 = vmatmul.mubr.msk.f32.gmra.mxu0 %vm271_vm1, %v6194_v48  ;;  %5369 = vmatprep.mubr.msk.f32.mxu1 %vm271_vm1, %v7410_v1 }
  0xf7   : > { %5422 = vmatprep.mubr.msk.f32.mxu0 %vm271_vm1, %v6200_v20  ;;  %v6506_v15 = vpop.f32.mrf.mxu1 }
  0xf8   : > { %v6508_v17 = vpop.f32.mrf.mxu0 }
  0xf9   : > { %v6510_v19 = vpop.f32.mrf.mxu1  ;;  %5370 = vmatmul.mubr.msk.f32.gmra.mxu1 %vm271_vm1, %v7411_v21 }
  0xfa   : > { %v6514_v23 = vpop.f32.mrf.mxu0  ;;  %5423 = vmatmul.mubr.msk.f32.gmra.mxu0 %vm271_vm1, %v6210_v36  ;;  %5372 = vmatprep.mubr.msk.f32.mxu1 %vm271_vm1, %v7412_v24  ;;  %v7414_v36 = vld [vmem:[#allocation27_spill] sm:$0xff] }
  0xfb   : > { %5425 = vmatprep.mubr.msk.f32.mxu0 %vm271_vm1, %v6216_v14  ;;  %v6522_v20 = vpop.f32.mrf.mxu1 }
  0xfc   : > { %v6524_v25 = vpop.f32.mrf.mxu0 }
  0xfd   : > { %v6526_v27 = vpop.f32.mrf.mxu1  ;;  %5373 = vmatmul.mubr.msk.f32.gmra.mxu1 %vm271_vm1, %v7413_v28 }
  0xfe   : > { %v6530_v34 = vpop.f32.mrf.mxu0  ;;  %5426 = vmatmul.mubr.msk.f32.gmra.mxu0 %vm271_vm1, %v6226_v26  ;;  %5375 = vmatprep.mubr.msk.f32.mxu1 %vm271_vm1, %v7414_v36  ;;  %v7416_v26 = vld [vmem:[#allocation29_spill] sm:$0xff] }
  0xff   : > { %5428 = vmatprep.mubr.msk.f32.mxu0 %vm271_vm1, %v6232_v8  ;;  %v6538_v14 = vpop.f32.mrf.mxu1 }
 0x100   : > { %v6540_v39 = vpop.f32.mrf.mxu0 }
 0x101   : > { %v6542_v46 = vpop.f32.mrf.mxu1  ;;  %5376 = vmatmul.mubr.msk.f32.gmra.mxu1 %vm271_vm1, %v7415_v47 }
 0x102   : > { %v6546_v48 = vpop.f32.mrf.mxu0  ;;  %5429 = vmatmul.mubr.msk.f32.gmra.mxu0 %vm271_vm1, %v6240_v22  ;;  %5378 = vmatprep.mubr.msk.f32.mxu1 %vm271_vm1, %v7416_v26  ;;  %v7419_v22 = vld [vmem:[#allocation31_spill] sm:$0xff] }
 0x103   : > { %5431 = vmatprep.mubr.msk.f32.mxu0 %vm271_vm1, %v6386_v32  ;;  %v6554_v8 = vpop.f32.mrf.mxu1 }
 0x104   : > { %v6556_v49 = vpop.f32.mrf.mxu0 }
 0x105   : > { %v6558_v51 = vpop.f32.mrf.mxu1  ;;  %5379 = vmatmul.mubr.msk.f32.gmra.mxu1 %vm271_vm1, %v7418_v4 }
 0x106   : > { %7417 = vst [vmem:[#allocation3_spill] sm:$0xff] %v6558_v51  ;;  %v6562_v6 = vpop.f32.mrf.mxu0  ;;  %5432 = vmatmul.mubr.msk.f32.gmra.mxu0 %vm271_vm1, %v6394_v33  ;;  %5381 = vmatprep.mubr.msk.f32.mxu1 %vm271_vm1, %v7419_v22  ;;  %v6584_v33 = vld [vmem:[#allocation2 + $0x18a] sm:$0xff]  ;;  %v4654_v22 = vld [vmem:[#allocation2 + $0x39] sm:$0xff] }
 0x107   : > { %5434 = vmatprep.mubr.msk.f32.mxu0 %vm271_vm1, %v4617_v50  ;;  %v6569_v11 = vpop.f32.mrf.mxu1  ;;  %v4653_v50 = vld [vmem:[#allocation2 + $0x31] sm:$0xff] }
 0x108   : > { %7420 = vst [vmem:[#allocation4_spill] sm:$0xff] %v6569_v11  ;;  %v6571_v10 = vpop.f32.mrf.mxu0 }
 0x109   : > { %v6575_v31 = vpop.f32.mrf.mxu1  ;;  %5382 = vmatmul.mubr.msk.f32.gmra.mxu1 %vm271_vm1, %v6230_v18 }
 0x10a   : > { %7421 = vst [vmem:[#allocation5_spill] sm:$0xff] %v6575_v31  ;;  %v6579_v32 = vpop.f32.mrf.mxu0  ;;  %5435 = vmatmul.mubr.msk.f32.gmra.mxu0 %vm271_vm1, %v4618_v7  ;;  %5384 = vmatprep.mubr.msk.f32.mxu1 %vm271_vm1, %v6573_v16 }
 0x10b   : > { %5489 = vmatprep.mubr.msk.f32.mxu0 %vm271_vm1, %v7392_v38  ;;  %v6588_v35 = vpop.f32.mrf.mxu1 }
 0x10c   : > { %7422 = vst [vmem:[#allocation6_spill] sm:$0xff] %v6588_v35  ;;  %v6590_v37 = vpop.f32.mrf.mxu0  ;;  %v4655_v35 = vld [vmem:[#allocation2 + $0x49] sm:$0xff] }
 0x10d   : > { %v6592_v4 = vpop.f32.mrf.mxu1  ;;  %5385 = vmatmul.mubr.msk.f32.gmra.mxu1 %vm271_vm1, %v6584_v33 }
 0x10e   : > { %7423 = vst [vmem:[#allocation7_spill] sm:$0xff] %v6592_v4  ;;  %v5191_v18 = vpop.f32.mrf.mxu0  ;;  %5490 = vmatmul.mubr.msk.f32.vlgmr.msra.gmra.mxu0 %vm271_vm1, %v7393_v40  ;;  %5439 = vmatprep.mubr.msk.f32.mxu1 %vm271_vm1, %v4653_v50  ;;  %v4656_v40 = vld [vmem:[#allocation2 + $0x51] sm:$0xff] }
 0x10f   : > { %5492 = vmatprep.mubr.msk.f32.mxu0 %vm271_vm1, %v7394_v41  ;;  %v6601_v38 = vpop.f32.mrf.mxu1 }
 0x110   : > { %7424 = vst [vmem:[#allocation8_spill] sm:$0xff] %v6601_v38  ;;  %v1314_v7 = vpop.f32.mrf.mxu0  ;;  %v4657_v38 = vld [vmem:[#allocation2 + $0x61] sm:$0xff] }
 0x111   : > { %v5141_v31 = vpop.f32.mrf.mxu1  ;;  %5440 = vmatmul.mubr.msk.f32.vlgmr.msra.gmra.mxu1 %vm271_vm1, %v4654_v22 }
 0x112   : > { %v5194_v4 = vpop.f32.mrf.mxu0  ;;  %5493 = vmatmul.mubr.msk.f32.gmra.mxu0 %vm271_vm1, %v7395_v42  ;;  %v962_v30 = vadd.f32 %v5141_v31, %v6466_v58  ;;  %5442 = vmatprep.mubr.msk.f32.mxu1 %vm271_vm1, %v4655_v35 }
 0x113   : > { %5495 = vmatprep.mubr.msk.f32.mxu0 %vm271_vm1, %v7396_v43  ;;  %v956_v41 = vpop.f32.mrf.mxu1  ;;  %v4658_v43 = vld [vmem:[#allocation2 + $0x69] sm:$0xff] }
 0x114   : > { %v1324_v50 = vpop.f32.mrf.mxu0  ;;  %v6610_v11 = vadd.f32 %v5191_v18, %v962_v30  ;;  %v957_v29 = vadd.f32 %v956_v41, %v6472_v60  ;;  %v4659_v60 = vld [vmem:[#allocation2 + $0x79] sm:$0xff] }
 0x115   : > { %v5144_v22 = vpop.f32.mrf.mxu1  ;;  %5443 = vmatmul.mubr.msk.f32.gmra.mxu1 %vm271_vm1, %v4656_v40 }
 0x116   : > { %v5197_v51 = vpop.f32.mrf.mxu0  ;;  %5496 = vmatmul.mubr.msk.f32.gmra.mxu0 %vm271_vm1, %v7397_v44  ;;  %v6616_v42 = vadd.f32 %v1314_v7, %v957_v29  ;;  %v972_v58 = vadd.f32 %v5144_v22, %v6482_v0  ;;  %5445 = vmatprep.mubr.msk.f32.mxu1 %vm271_vm1, %v4657_v38 }
 0x117   : > { %5498 = vmatprep.mubr.msk.f32.mxu0 %vm271_vm1, %v7398_v45  ;;  %v966_v30 = vpop.f32.mrf.mxu1  ;;  %v4660_v45 = vld [vmem:[#allocation2 + $0x81] sm:$0xff] }
 0x118   : > { %v1334_v31 = vpop.f32.mrf.mxu0  ;;  %v6622_v35 = vadd.f32 %v5194_v4, %v972_v58  ;;  %v967_v18 = vadd.f32 %v966_v30, %v6492_v5  ;;  %v4661_v5 = vld [vmem:[#allocation2 + $0x91] sm:$0xff] }
 0x119   : > { %v5147_v40 = vpop.f32.mrf.mxu1  ;;  %5446 = vmatmul.mubr.msk.f32.gmra.mxu1 %vm271_vm1, %v4658_v43 }
 0x11a   : > { %v5200_v29 = vpop.f32.mrf.mxu0  ;;  %5499 = vmatmul.mubr.msk.f32.gmra.mxu0 %vm271_vm1, %v7399_v52  ;;  %v6628_v44 = vadd.f32 %v1324_v50, %v967_v18  ;;  %v982_v0 = vadd.f32 %v5147_v40, %v6498_v13  ;;  %5448 = vmatprep.mubr.msk.f32.mxu1 %vm271_vm1, %v4659_v60 }
 0x11b   : > { %5501 = vmatprep.mubr.msk.f32.mxu0 %vm271_vm1, %v7400_v53  ;;  %v976_v4 = vpop.f32.mrf.mxu1  ;;  %v4662_v53 = vld [vmem:[#allocation2 + $0x99] sm:$0xff] }
 0x11c   : > { %v1344_v38 = vpop.f32.mrf.mxu0  ;;  %v6634_v7 = vadd.f32 %v5197_v51, %v982_v0  ;;  %v977_v41 = vadd.f32 %v976_v4, %v6508_v17  ;;  %v4663_v17 = vld [vmem:[#allocation2 + $0xa9] sm:$0xff] }
 0x11d   : > { %v5150_v22 = vpop.f32.mrf.mxu1  ;;  %5449 = vmatmul.mubr.msk.f32.gmra.mxu1 %vm271_vm1, %v4660_v45 }
 0x11e   : > { %v5203_v52 = vpop.f32.mrf.mxu0  ;;  %5502 = vmatmul.mubr.msk.f32.gmra.mxu0 %vm271_vm1, %v7401_v54  ;;  %v6640_v13 = vadd.f32 %v1334_v31, %v977_v41  ;;  %v992_v50 = vadd.f32 %v5150_v22, %v6514_v23  ;;  %5451 = vmatprep.mubr.msk.f32.mxu1 %vm271_vm1, %v4661_v5 }
 0x11f   : > { %5504 = vmatprep.mubr.msk.f32.mxu0 %vm271_vm1, %v7402_v55  ;;  %v986_v51 = vpop.f32.mrf.mxu1  ;;  %v4664_v55 = vld [vmem:[#allocation2 + $0xb1] sm:$0xff] }
 0x120   : > { %v1354_v58 = vpop.f32.mrf.mxu0  ;;  %v6646_v43 = vadd.f32 %v5200_v29, %v992_v50  ;;  %v987_v30 = vadd.f32 %v986_v51, %v6524_v25  ;;  %v4665_v25 = vld [vmem:[#allocation2 + $0xc1] sm:$0xff] }
 0x121   : > { %v5153_v60 = vpop.f32.mrf.mxu1  ;;  %5452 = vmatmul.mubr.msk.f32.gmra.mxu1 %vm271_vm1, %v4662_v53 }
 0x122   : > { %v5206_v54 = vpop.f32.mrf.mxu0  ;;  %5505 = vmatmul.mubr.msk.f32.gmra.mxu0 %vm271_vm1, %v7403_v56  ;;  %v6652_v23 = vadd.f32 %v1344_v38, %v987_v30  ;;  %v1002_v31 = vadd.f32 %v5153_v60, %v6530_v34  ;;  %5454 = vmatprep.mubr.msk.f32.mxu1 %vm271_vm1, %v4663_v17 }
 0x123   : > { %5507 = vmatprep.mubr.msk.f32.mxu0 %vm271_vm1, %v7404_v57  ;;  %v996_v18 = vpop.f32.mrf.mxu1  ;;  %v4666_v57 = vld [vmem:[#allocation2 + $0xc9] sm:$0xff] }
 0x124   : > { %v1364_v40 = vpop.f32.mrf.mxu0  ;;  %v6658_v29 = vadd.f32 %v5203_v52, %v1002_v31  ;;  %v997_v0 = vadd.f32 %v996_v18, %v6540_v39  ;;  %v4667_v39 = vld [vmem:[#allocation2 + $0xd9] sm:$0xff] }
 0x125   : > { %v5156_v45 = vpop.f32.mrf.mxu1  ;;  %5455 = vmatmul.mubr.msk.f32.gmra.mxu1 %vm271_vm1, %v4664_v55 }
 0x126   : > { %v5209_v56 = vpop.f32.mrf.mxu0  ;;  %5508 = vmatmul.mubr.msk.f32.gmra.mxu0 %vm271_vm1, %v7405_v59  ;;  %v6664_v34 = vadd.f32 %v1354_v58, %v997_v0  ;;  %v1012_v4 = vadd.f32 %v5156_v45, %v6546_v48  ;;  %5457 = vmatprep.mubr.msk.f32.mxu1 %vm271_vm1, %v4665_v25 }
 0x127   : > { %5510 = vmatprep.mubr.msk.f32.mxu0 %vm271_vm1, %v7406_v61  ;;  %v1006_v38 = vpop.f32.mrf.mxu1  ;;  %v4668_v61 = vld [vmem:[#allocation2 + $0xe1] sm:$0xff] }
 0x128   : > { %v1374_v5 = vpop.f32.mrf.mxu0  ;;  %v6670_v41 = vadd.f32 %v5206_v54, %v1012_v4  ;;  %v1007_v22 = vadd.f32 %v1006_v38, %v6556_v49  ;;  %v4669_v49 = vld [vmem:[#allocation2 + $0xf1] sm:$0xff] }
 0x129   : > { %v5159_v52 = vpop.f32.mrf.mxu1  ;;  %5458 = vmatmul.mubr.msk.f32.gmra.mxu1 %vm271_vm1, %v4666_v57 }
 0x12a   : > { %v5212_v59 = vpop.f32.mrf.mxu0  ;;  %5511 = vmatmul.mubr.msk.f32.gmra.mxu0 %vm271_vm1, %v7407_v63  ;;  %v6676_v48 = vadd.f32 %v1364_v40, %v1007_v22  ;;  %v1022_v50 = vadd.f32 %v5159_v52, %v6562_v6  ;;  %5460 = vmatprep.mubr.msk.f32.mxu1 %vm271_vm1, %v4667_v39 }
 0x12b   : > { %5513 = vmatprep.mubr.msk.f32.mxu0 %vm271_vm1, %v7408_v2  ;;  %v1016_v53 = vpop.f32.mrf.mxu1  ;;  %v4670_v2 = vld [vmem:[#allocation2 + $0xf9] sm:$0xff] }
 0x12c   : > { %v1384_v51 = vpop.f32.mrf.mxu0  ;;  %v6682_v58 = vadd.f32 %v5209_v56, %v1022_v50  ;;  %v1017_v17 = vadd.f32 %v1016_v53, %v6571_v10  ;;  %v4671_v10 = vld [vmem:[#allocation2 + $0x109] sm:$0xff] }
 0x12d   : > { %v5162_v30 = vpop.f32.mrf.mxu1  ;;  %5461 = vmatmul.mubr.msk.f32.gmra.mxu1 %vm271_vm1, %v4668_v61  ;;  %v4744_v61 = vld [vmem:[#allocation2 + $0x15a] sm:$0xff] }
 0x12e   : > { %v5215_v63 = vpop.f32.mrf.mxu0  ;;  %5514 = vmatmul.mubr.msk.f32.gmra.mxu0 %vm271_vm1, %v7409_v12  ;;  %v6688_v6 = vadd.f32 %v1374_v5, %v1017_v17  ;;  %v1032_v60 = vadd.f32 %v5162_v30, %v6579_v32  ;;  %5463 = vmatprep.mubr.msk.f32.mxu1 %vm271_vm1, %v4669_v49  ;;  %v4745_v49 = vld [vmem:[#allocation2 + $0x16a] sm:$0xff] }
 0x12f   : > { %5516 = vmatprep.mubr.msk.f32.mxu0 %vm271_vm1, %v7410_v1  ;;  %v1026_v54 = vpop.f32.mrf.mxu1  ;;  %v4672_v1 = vld [vmem:[#allocation2 + $0x111] sm:$0xff] }
 0x130   : > { %v1394_v31 = vpop.f32.mrf.mxu0  ;;  %v6694_v55 = vadd.f32 %v5212_v59, %v1032_v60  ;;  %v1027_v18 = vadd.f32 %v1026_v54, %v6590_v37  ;;  %v4673_v37 = vld [vmem:[#allocation2 + $0x121] sm:$0xff] }
 0x131   : > { %v5165_v40 = vpop.f32.mrf.mxu1  ;;  %5464 = vmatmul.mubr.msk.f32.gmra.mxu1 %vm271_vm1, %v4670_v2  ;;  %v4746_v2 = vld [vmem:[#allocation2 + $0x172] sm:$0xff] }
 0x132   : > { %v5218_v12 = vpop.f32.mrf.mxu0  ;;  %5517 = vmatmul.mubr.msk.f32.gmra.mxu0 %vm271_vm1, %v7411_v21  ;;  %v6700_v32 = vadd.f32 %v1384_v51, %v1027_v18  ;;  %v1042_v25 = vadd.f32 %v5165_v40, %v6478_v62  ;;  %5466 = vmatprep.mubr.msk.f32.mxu1 %vm271_vm1, %v4671_v10  ;;  %v4677_v51 = vld [vmem:[#allocation2 + $0x151] sm:$0xff]  ;;  %v4679_v10 = vld [vmem:[#allocation2 + $0x169] sm:$0xff] }
 0x133   : > { %5519 = vmatprep.mubr.msk.f32.mxu0 %vm271_vm1, %v7412_v24  ;;  %v1036_v0 = vpop.f32.mrf.mxu1  ;;  %v4674_v24 = vld [vmem:[#allocation2 + $0x129] sm:$0xff] }
 0x134   : > { %v1404_v45 = vpop.f32.mrf.mxu0  ;;  %v6706_v56 = vadd.f32 %v5215_v63, %v1042_v25  ;;  %v1037_v4 = vadd.f32 %v1036_v0, %v6490_v3  ;;  %v4675_v3 = vld [vmem:[#allocation2 + $0x139] sm:$0xff] }
 0x135   : > { %v5168_v57 = vpop.f32.mrf.mxu1  ;;  %5467 = vmatmul.mubr.msk.f32.gmra.mxu1 %vm271_vm1, %v4672_v1  ;;  %v4680_v1 = vld [vmem:[#allocation2 + $0x171] sm:$0xff] }
 0x136   : > { %v5221_v21 = vpop.f32.mrf.mxu0  ;;  %5520 = vmatmul.mubr.msk.f32.gmra.mxu0 %vm271_vm1, %v7413_v28  ;;  %v6712_v62 = vadd.f32 %v1394_v31, %v1037_v4  ;;  %v1052_v38 = vadd.f32 %v5168_v57, %v6494_v9  ;;  %5469 = vmatprep.mubr.msk.f32.mxu1 %vm271_vm1, %v4673_v37  ;;  %v4749_v37 = vld [vmem:[#allocation2 + $0x19a] sm:$0xff] }
 0x137   : > { %5522 = vmatprep.mubr.msk.f32.mxu0 %vm271_vm1, %v7414_v36  ;;  %v1046_v5 = vpop.f32.mrf.mxu1  ;;  %v4676_v36 = vld [vmem:[#allocation2 + $0x141] sm:$0xff] }
 0x138   : > { %v1414_v39 = vpop.f32.mrf.mxu0  ;;  %v6718_v22 = vadd.f32 %v5218_v12, %v1052_v38  ;;  %v1047_v52 = vadd.f32 %v1046_v5, %v6506_v15  ;;  %v7425_v38 = vld [vmem:[#allocation3_spill] sm:$0xff]  ;;  %v7426_v5 = vld [vmem:[#allocation32_spill] sm:$0xff] }
 0x139   : > { %v5171_v59 = vpop.f32.mrf.mxu1  ;;  %5470 = vmatmul.mubr.msk.f32.gmra.mxu1 %vm271_vm1, %v4674_v24 }
 0x13a   : > { %v5224_v28 = vpop.f32.mrf.mxu0  ;;  %5523 = vmatmul.mubr.msk.f32.gmra.mxu0 %vm271_vm1, %v7415_v47  ;;  %v6724_v9 = vadd.f32 %v1404_v45, %v1047_v52  ;;  %v1062_v50 = vadd.f32 %v5171_v59, %v6510_v19  ;;  %5472 = vmatprep.mubr.msk.f32.mxu1 %vm271_vm1, %v4675_v3  ;;  %v7427_v59 = vld [vmem:[#allocation4_spill] sm:$0xff] }
 0x13b   : > { %5525 = vmatprep.mubr.msk.f32.mxu0 %vm271_vm1, %v7416_v26  ;;  %v1056_v53 = vpop.f32.mrf.mxu1  ;;  %v4678_v26 = vld [vmem:[#allocation2 + $0x159] sm:$0xff] }
 0x13c   : > { %v1424_v15 = vpop.f32.mrf.mxu0  ;;  %v6730_v17 = vadd.f32 %v5221_v21, %v1062_v50  ;;  %v1057_v30 = vadd.f32 %v1056_v53, %v6522_v20  ;;  %v7429_v53 = vld [vmem:[#allocation5_spill] sm:$0xff] }
 0x13d   : > { %v5174_v47 = vpop.f32.mrf.mxu1  ;;  %5473 = vmatmul.mubr.msk.f32.gmra.mxu1 %vm271_vm1, %v4676_v36  ;;  %v7428_v36 = vld [vmem:[#allocation33_spill] sm:$0xff] }
 0x13e   : > { %v5227_v63 = vpop.f32.mrf.mxu0  ;;  %5526 = vmatmul.mubr.msk.f32.gmra.mxu0 %vm271_vm1, %v4744_v61  ;;  %v6735_v19 = vadd.f32 %v1414_v39, %v1057_v30  ;;  %v1072_v60 = vadd.f32 %v5174_v47, %v6526_v27  ;;  %5475 = vmatprep.mubr.msk.f32.mxu1 %vm271_vm1, %v4677_v51  ;;  %v4684_v51 = vld [vmem:[#allocation2 + $0x1a1] sm:$0xff] }
 0x13f   : > { %5528 = vmatprep.mubr.msk.f32.mxu0 %vm271_vm1, %v4745_v49  ;;  %v1066_v54 = vpop.f32.mrf.mxu1 }
 0x140   : > { %v1434_v31 = vpop.f32.mrf.mxu0  ;;  %v6740_v20 = vadd.f32 %v5224_v28, %v1072_v60  ;;  %v1067_v18 = vadd.f32 %v1066_v54, %v6538_v14 }
 0x141   : > { %v5177_v40 = vpop.f32.mrf.mxu1  ;;  %5476 = vmatmul.mubr.msk.f32.gmra.mxu1 %vm271_vm1, %v4678_v26 }
 0x142   : > { %v5230_v12 = vpop.f32.mrf.mxu0  ;;  %5529 = vmatmul.mubr.msk.f32.gmra.mxu0 %vm271_vm1, %v4746_v2  ;;  %v6745_v27 = vadd.f32 %v1424_v15, %v1067_v18  ;;  %v1082_v25 = vadd.f32 %v5177_v40, %v6542_v46  ;;  %5478 = vmatprep.mubr.msk.f32.mxu1 %vm271_vm1, %v4679_v10 }
 0x143   : > { %5531 = vmatprep.mubr.msk.f32.mxu0 %vm271_vm1, %v6573_v16  ;;  %v1076_v0 = vpop.f32.mrf.mxu1  ;;  %v4750_v16 = vld [vmem:[#allocation2 + $0x1a2] sm:$0xff] }
 0x144   : > { %v1444_v45 = vpop.f32.mrf.mxu0  ;;  %v6751_v14 = vadd.f32 %v5227_v63, %v1082_v25  ;;  %v1077_v4 = vadd.f32 %v1076_v0, %v6554_v8  ;;  %v4683_v8 = vld [vmem:[#allocation2 + $0x199] sm:$0xff]  ;;  %v7430_v63 = vld [vmem:[#allocation6_spill] sm:$0xff] }
 0x145   : > { %v5180_v57 = vpop.f32.mrf.mxu1  ;;  %5479 = vmatmul.mubr.msk.f32.gmra.mxu1 %vm271_vm1, %v4680_v1  ;;  %v7432_v25 = vld [vmem:[#allocation8_spill] sm:$0xff] }
 0x146   : > { %v5233_v21 = vpop.f32.mrf.mxu0  ;;  %5532 = vmatmul.mubr.msk.f32.gmra.mxu0 %vm271_vm1, %v6584_v33  ;;  %v6757_v46 = vadd.f32 %v1434_v31, %v1077_v4  ;;  %v1092_v24 = vadd.f32 %v5180_v57, %v7425_v38  ;;  %5481 = vmatprep.mubr.msk.f32.mxu1 %vm271_vm1, %v7426_v5  ;;  %v7431_v31 = vld [vmem:[#allocation7_spill] sm:$0xff] }
 0x147   : > { %5534 = vmatprep.mubr.msk.f32.mxu0 %vm271_vm1, %v4749_v37  ;;  %v1086_v39 = vpop.f32.mrf.mxu1 }
 0x148   : > { %v1454_v3 = vpop.f32.mrf.mxu0  ;;  %v6763_v52 = vadd.f32 %v5230_v12, %v1092_v24  ;;  %v1087_v28 = vadd.f32 %v1086_v39, %v7427_v59 }
 0x149   : > { %v5183_v50 = vpop.f32.mrf.mxu1  ;;  %5482 = vmatmul.mubr.msk.f32.gmra.mxu1 %vm271_vm1, %v7428_v36 }
 0x14a   : > { %v5236_v33 = vpop.f32.mrf.mxu0  ;;  %5535 = vmatmul.mubr.msk.f32.gmra.mxu0 %vm271_vm1, %v4750_v16  ;;  %v6769_v61 = vadd.f32 %v1444_v45, %v1087_v28  ;;  %v1102_v15 = vadd.f32 %v5183_v50, %v7429_v53  ;;  %5484 = vmatprep.mubr.msk.f32.mxu1 %vm271_vm1, %v4683_v8 }
 0x14b   : > { %v1096_v49 = vpop.f32.mrf.mxu1 }
 0x14c   : > { %v1464_v30 = vpop.f32.mrf.mxu0  ;;  %v6773_v47 = vadd.f32 %v5233_v21, %v1102_v15  ;;  %v1097_v60 = vadd.f32 %v1096_v49, %v7430_v63 }
 0x14d   : > { %v5186_v26 = vpop.f32.mrf.mxu1  ;;  %5485 = vmatmul.mubr.msk.f32.gmra.mxu1 %vm271_vm1, %v4684_v51 }
 0x14e   : > { %v5291_v2 = vpop.f32.mrf.mxu0  ;;  %v6777_v54 = vadd.f32 %v1454_v3, %v1097_v60  ;;  %v1112_v10 = vadd.f32 %v5186_v26, %v7431_v31 }
 0x14f   : > { %v1106_v18 = vpop.f32.mrf.mxu1 }
 0x150   : > { %v2097_v40 = vpop.f32.mrf.mxu0  ;;  %v6780_v12 = vadd.f32 %v5236_v33, %v1112_v10  ;;  %v1107_v1 = vadd.f32 %v1106_v18, %v7432_v25 }
 0x151   : > { %v5241_v0 = vpop.f32.mrf.mxu1 }
 0x152   : > { %v5294_v45 = vpop.f32.mrf.mxu0  ;;  %v6783_v37 = vadd.f32 %v1464_v30, %v1107_v1  ;;  %v1867_v4 = vadd.f32 %v5241_v0, %v6610_v11 }
 0x153   : > { %v1707_v57 = vpop.f32.mrf.mxu1 }
 0x154   : > { %v2107_v21 = vpop.f32.mrf.mxu0  ;;  %v6786_v38 = vadd.f32 %v5291_v2, %v1867_v4  ;;  %v1866_v24 = vadd.f32 %v1707_v57, %v6616_v42 }
 0x155   : > { %v5244_v5 = vpop.f32.mrf.mxu1 }
 0x156   : > { %v5297_v16 = vpop.f32.mrf.mxu0  ;;  %v6789_v39 = vadd.f32 %v2097_v40, %v1866_v24  ;;  %v1869_v3 = vadd.f32 %v5244_v5, %v6622_v35 }
 0x157   : > { %v1717_v8 = vpop.f32.mrf.mxu1 }
 0x158   : > { %v2117_v59 = vpop.f32.mrf.mxu0  ;;  %v6792_v28 = vadd.f32 %v5294_v45, %v1869_v3  ;;  %v1868_v50 = vadd.f32 %v1717_v8, %v6628_v44 }
 0x159   : > { %v5247_v36 = vpop.f32.mrf.mxu1 }
 0x15a   : > { %v5300_v11 = vpop.f32.mrf.mxu0  ;;  %v6795_v33 = vadd.f32 %v2107_v21, %v1868_v50  ;;  %v1871_v53 = vadd.f32 %v5247_v36, %v6634_v7 }
 0x15b   : > { %v1727_v15 = vpop.f32.mrf.mxu1 }
 0x15c   : > { %v2127_v42 = vpop.f32.mrf.mxu0  ;;  %v6798_v51 = vadd.f32 %v5297_v16, %v1871_v53  ;;  %v1870_v49 = vadd.f32 %v1727_v15, %v6640_v13 }
 0x15d   : > { %v5250_v30 = vpop.f32.mrf.mxu1 }
 0x15e   : > { %v5303_v35 = vpop.f32.mrf.mxu0  ;;  %v6801_v63 = vadd.f32 %v2117_v59, %v1870_v49  ;;  %v1873_v60 = vadd.f32 %v5250_v30, %v6646_v43 }
 0x15f   : > { %v1737_v26 = vpop.f32.mrf.mxu1 }
 0x160   : > { %v2137_v44 = vpop.f32.mrf.mxu0  ;;  %v6804_v2 = vadd.f32 %v5300_v11, %v1873_v60  ;;  %v1872_v31 = vadd.f32 %v1737_v26, %v6652_v23 }
 0x161   : > { %v5253_v10 = vpop.f32.mrf.mxu1 }
 0x162   : > { %v5306_v7 = vpop.f32.mrf.mxu0  ;;  %v6807_v18 = vadd.f32 %v2127_v42, %v1872_v31  ;;  %v1875_v40 = vadd.f32 %v5253_v10, %v6658_v29 }
 0x163   : > { %v1747_v25 = vpop.f32.mrf.mxu1 }
 0x164   : > { %v2147_v13 = vpop.f32.mrf.mxu0  ;;  %v6810_v1 = vadd.f32 %v5303_v35, %v1875_v40  ;;  %v1874_v0 = vadd.f32 %v1747_v25, %v6664_v34 }
 0x165   : > { %v5256_v45 = vpop.f32.mrf.mxu1 }
 0x166   : > { %v5309_v43 = vpop.f32.mrf.mxu0  ;;  %v6813_v4 = vadd.f32 %v2137_v44, %v1874_v0  ;;  %v1877_v57 = vadd.f32 %v5256_v45, %v6670_v41 }
 0x167   : > { %v1757_v21 = vpop.f32.mrf.mxu1 }
 0x168   : > { %v2157_v23 = vpop.f32.mrf.mxu0  ;;  %v6816_v24 = vadd.f32 %v5306_v7, %v1877_v57  ;;  %v1876_v5 = vadd.f32 %v1757_v21, %v6676_v48 }
 0x169   : > { %v5259_v16 = vpop.f32.mrf.mxu1 }
 0x16a   : > { %v5312_v29 = vpop.f32.mrf.mxu0  ;;  %v6819_v3 = vadd.f32 %v2147_v13, %v1876_v5  ;;  %v1879_v8 = vadd.f32 %v5259_v16, %v6682_v58 }
 0x16b   : > { %v1767_v59 = vpop.f32.mrf.mxu1 }
 0x16c   : > { %v2167_v34 = vpop.f32.mrf.mxu0  ;;  %v6822_v50 = vadd.f32 %v5309_v43, %v1879_v8  ;;  %v1878_v36 = vadd.f32 %v1767_v59, %v6688_v6 }
 0x16d   : > { %v5262_v11 = vpop.f32.mrf.mxu1 }
 0x16e   : > { %v5315_v41 = vpop.f32.mrf.mxu0  ;;  %v6825_v53 = vadd.f32 %v2157_v23, %v1878_v36  ;;  %v1881_v15 = vadd.f32 %v5262_v11, %v6694_v55 }
 0x16f   : > { %v1777_v42 = vpop.f32.mrf.mxu1 }
 0x170   : > { %7433 = vst [vmem:[#allocation9_spill] sm:$0xff] %v6825_v53  ;;  %v2177_v48 = vpop.f32.mrf.mxu0  ;;  %v6828_v49 = vadd.f32 %v5312_v29, %v1881_v15  ;;  %v1880_v30 = vadd.f32 %v1777_v42, %v6700_v32 }
 0x171   : > { %v5265_v35 = vpop.f32.mrf.mxu1 }
 0x172   : > { %7434 = vst [vmem:[#allocation10_spill] sm:$0xff] %v6828_v49  ;;  %v5318_v58 = vpop.f32.mrf.mxu0  ;;  %v6831_v60 = vadd.f32 %v2167_v34, %v1880_v30  ;;  %v1883_v26 = vadd.f32 %v5265_v35, %v6706_v56 }
 0x173   : > { %v1787_v44 = vpop.f32.mrf.mxu1 }
 0x174   : > { %v2187_v6 = vpop.f32.mrf.mxu0  ;;  %v6834_v31 = vadd.f32 %v5315_v41, %v1883_v26  ;;  %v1882_v10 = vadd.f32 %v1787_v44, %v6712_v62 }
 0x175   : > { %v5268_v7 = vpop.f32.mrf.mxu1 }
 0x176   : > { %7435 = vst [vmem:[#allocation11_spill] sm:$0xff] %v6834_v31  ;;  %v5321_v55 = vpop.f32.mrf.mxu0  ;;  %v6837_v40 = vadd.f32 %v2177_v48, %v1882_v10  ;;  %v1885_v25 = vadd.f32 %v5268_v7, %v6718_v22 }
 0x177   : > { %v1797_v13 = vpop.f32.mrf.mxu1 }
 0x178   : > { %v2197_v32 = vpop.f32.mrf.mxu0  ;;  %v6840_v0 = vadd.f32 %v5318_v58, %v1885_v25  ;;  %v1884_v45 = vadd.f32 %v1797_v13, %v6724_v9 }
 0x179   : > { %v5271_v43 = vpop.f32.mrf.mxu1 }
 0x17a   : > { %v5324_v56 = vpop.f32.mrf.mxu0  ;;  %v6843_v57 = vadd.f32 %v2187_v6, %v1884_v45  ;;  %v1887_v21 = vadd.f32 %v5271_v43, %v6730_v17 }
 0x17b   : > { %v1807_v23 = vpop.f32.mrf.mxu1 }
 0x17c   : > { %7436 = vst [vmem:[#allocation12_spill] sm:$0xff] %v6843_v57  ;;  %v2207_v62 = vpop.f32.mrf.mxu0  ;;  %v6846_v5 = vadd.f32 %v5321_v55, %v1887_v21  ;;  %v1886_v16 = vadd.f32 %v1807_v23, %v6735_v19 }
 0x17d   : > { %v5274_v29 = vpop.f32.mrf.mxu1 }
 0x17e   : > { %v5327_v22 = vpop.f32.mrf.mxu0  ;;  %v6849_v8 = vadd.f32 %v2197_v32, %v1886_v16  ;;  %v1889_v59 = vadd.f32 %v5274_v29, %v6740_v20 }
 0x17f   : > { %v1817_v34 = vpop.f32.mrf.mxu1 }
 0x180   : > { %v2217_v9 = vpop.f32.mrf.mxu0  ;;  %v6852_v36 = vadd.f32 %v5324_v56, %v1889_v59  ;;  %v1888_v11 = vadd.f32 %v1817_v34, %v6745_v27 }
 0x181   : > { %v5277_v41 = vpop.f32.mrf.mxu1 }
 0x182   : > { %v5330_v17 = vpop.f32.mrf.mxu0  ;;  %v6855_v15 = vadd.f32 %v2207_v62, %v1888_v11  ;;  %v1891_v42 = vadd.f32 %v5277_v41, %v6751_v14 }
 0x183   : > { %v1827_v48 = vpop.f32.mrf.mxu1 }
 0x184   : > { %v2227_v19 = vpop.f32.mrf.mxu0  ;;  %v6858_v30 = vadd.f32 %v5327_v22, %v1891_v42  ;;  %v1890_v35 = vadd.f32 %v1827_v48, %v6757_v46 }
 0x185   : > { %v5280_v58 = vpop.f32.mrf.mxu1 }
 0x186   : > { %v5333_v20 = vpop.f32.mrf.mxu0  ;;  %v6861_v26 = vadd.f32 %v2217_v9, %v1890_v35  ;;  %v1893_v44 = vadd.f32 %v5280_v58, %v6763_v52 }
 0x187   : > { %v1837_v6 = vpop.f32.mrf.mxu1 }
 0x188   : > { %v2237_v27 = vpop.f32.mrf.mxu0  ;;  %v6864_v10 = vadd.f32 %v5330_v17, %v1893_v44  ;;  %v1892_v7 = vadd.f32 %v1837_v6, %v6769_v61  ;;  %v7440_v44 = vmov 0.0  }
 0x189   : > { %v5283_v55 = vpop.f32.mrf.mxu1  ;;  %393 = vst.msk [vmem:[%s6917_s25] sm:$0x1] %vm392_vm3, %v7440_v44  ;;  %394 = vst.msk [vmem:[%s6923_s29] sm:$0x1] %vm392_vm3, %v7440_v44 }
 0x18a   : > { %v5336_v14 = vpop.f32.mrf.mxu0  ;;  %v6867_v25 = vadd.f32 %v2227_v19, %v1892_v7  ;;  %v1895_v13 = vadd.f32 %v5283_v55, %v6773_v47 }
 0x18b   : > { %v1847_v32 = vpop.f32.mrf.mxu1 }
 0x18c   : > { %v2247_v46 = vpop.f32.mrf.mxu0  ;;  %v6870_v45 = vadd.f32 %v5333_v20, %v1895_v13  ;;  %v1894_v43 = vadd.f32 %v1847_v32, %v6777_v54 }
 0x18d   : > { %v5286_v56 = vpop.f32.mrf.mxu1 }
 0x18e   : > { %v6873_v52 = vpop.f32.mrf.mxu0  ;;  %v6875_v21 = vadd.f32 %v2237_v27, %v1894_v43  ;;  %v1897_v23 = vadd.f32 %v5286_v56, %v6780_v12 }
 0x18f   : > { %v1857_v61 = vpop.f32.mrf.mxu1 }
 0x190   : > { %v6878_v62 = vpop.f32.mrf.mxu0  ;;  %v6880_v16 = vadd.f32 %v5336_v14, %v1897_v23  ;;  %v1896_v47 = vadd.f32 %v1857_v61, %v6783_v37 }
 0x191   : > { %v6883_v29 = vpop.f32.mrf.mxu1 }
 0x192   : > { %v6885_v22 = vpop.f32.mrf.mxu0  ;;  %v6887_v54 = vadd.f32 %v2247_v46, %v1896_v47 }
 0x193   : > { %v6889_v59 = vpop.f32.mrf.mxu1 }
 0x194   : > { %v6891_v34 = vpop.f32.mrf.mxu0 }
 0x195   : > { %v6893_v12 = vpop.f32.mrf.mxu1 }
 0x196   : > { %v6895_v9 = vpop.f32.mrf.mxu0 }
 0x197   : > { %v6897_v11 = vpop.f32.mrf.mxu1 }
 0x198   : > { %v6899_v41 = vpop.f32.mrf.mxu0 }
 0x199   : > { %v6901_v37 = vpop.f32.mrf.mxu1 }
 0x19a   : > { %v6903_v17 = vpop.f32.mrf.mxu0 }
 0x19b   : > { %v6905_v42 = vpop.f32.mrf.mxu1 }
 0x19c   : > { %v6907_v48 = vpop.f32.mrf.mxu0 }
 0x19d   : > { %7437 = vst [vmem:[#allocation13_spill] sm:$0xff] %v6907_v48  ;;  %v6909_v19 = vpop.f32.mrf.mxu1 }
 0x19e   : > { %v6911_v35 = vpop.f32.mrf.mxu0 }
 0x19f   : > { %7438 = vst [vmem:[#allocation14_spill] sm:$0xff] %v6911_v35  ;;  %v6925_v58 = vpop.f32.mrf.mxu1 }
 0x1a0   : > { %v6927_v20 = vpop.f32.mrf.mxu0 }
 0x1a1   : > { %7439 = vst [vmem:[#allocation15_spill] sm:$0xff] %v6927_v20  ;;  %v6935_v6 = vpop.f32.mrf.mxu1 }
 0x1a2   : > { %v6937_v27 = vpop.f32.mrf.mxu0 }
 0x1a3   : > { %7441 = vst [vmem:[#allocation16_spill] sm:$0xff] %v6937_v27  ;;  %v6939_v7 = vpop.f32.mrf.mxu1 }
 0x1a4   : > { %v6941_v55 = vpop.f32.mrf.mxu0 }
 0x1a5   : > { %7442 = vst [vmem:[#allocation17_spill] sm:$0xff] %v6941_v55  ;;  %v6943_v14 = vpop.f32.mrf.mxu1 }
 0x1a6   : > { %v6945_v13 = vpop.f32.mrf.mxu0 }
 0x1a7   : > { %7443 = vst [vmem:[#allocation18_spill] sm:$0xff] %v6945_v13  ;;  %v6947_v32 = vpop.f32.mrf.mxu1 }
 0x1a8   : > { %v6949_v46 = vpop.f32.mrf.mxu0 }
 0x1a9   : > { %7444 = vst [vmem:[#allocation19_spill] sm:$0xff] %v6949_v46  ;;  %v6951_v43 = vpop.f32.mrf.mxu1 }
 0x1aa   : > { %v6953_v56 = vpop.f32.mrf.mxu0 }
 0x1ab   : > { %7445 = vst [vmem:[#allocation20_spill] sm:$0xff] %v6953_v56  ;;  %v6955_v23 = vpop.f32.mrf.mxu1 }
 0x1ac   : > { %7446 = vst [vmem:[#allocation21_spill] sm:$0xff] %v6955_v23  ;;  %v2950_v61 = vpop.f32.mrf.mxu0 }
 0x1ad   : > { %v6957_v47 = vpop.f32.mrf.mxu1 }
 0x1ae   : > { %7447 = vst [vmem:[#allocation22_spill] sm:$0xff] %v6957_v47  ;;  %v6959_v44 = vpop.f32.mrf.mxu0 }
 0x1af   : > { %7448 = vst [vmem:[#allocation23_spill] sm:$0xff] %v6959_v44  ;;  %v2557_v57 = vpop.f32.mrf.mxu1 }
 0x1b0   : > { %v2960_v55 = vpop.f32.mrf.mxu0  ;;  %v2660_v27 = vadd.f32 %v2557_v57, %v6831_v60 }
 0x1b1   : > { %v6962_v13 = vpop.f32.mrf.mxu1 }
 0x1b2   : > { %7449 = vst [vmem:[#allocation24_spill] sm:$0xff] %v6962_v13  ;;  %v5418_v31 = vpop.f32.mrf.mxu0  ;;  %v6964_v20 = vadd.f32 %v2950_v61, %v2660_v27 }
 0x1b3   : > { %v2567_v46 = vpop.f32.mrf.mxu1 }
 0x1b4   : > { %7450 = vst [vmem:[#allocation25_spill] sm:$0xff] %v6964_v20  ;;  %v6966_v35 = vpop.f32.mrf.mxu0  ;;  %v2662_v56 = vadd.f32 %v2567_v46, %v6837_v40 }
 0x1b5   : > { %7451 = vst [vmem:[#allocation26_spill] sm:$0xff] %v6966_v35  ;;  %v5368_v48 = vpop.f32.mrf.mxu1 }
 0x1b6   : > { %v5421_v49 = vpop.f32.mrf.mxu0  ;;  %v6969_v23 = vadd.f32 %v2960_v55, %v2662_v56  ;;  %v2665_v44 = vadd.f32 %v5368_v48, %v6840_v0 }
 0x1b7   : > { %v6972_v47 = vpop.f32.mrf.mxu1 }
 0x1b8   : > { %7452 = vst [vmem:[#allocation27_spill] sm:$0xff] %v6969_v23  ;;  %v2980_v53 = vpop.f32.mrf.mxu0  ;;  %v6974_v60 = vadd.f32 %v5418_v31, %v2665_v44 }
 0x1b9   : > { %v5371_v57 = vpop.f32.mrf.mxu1 }
 0x1ba   : > { %7453 = vst [vmem:[#allocation28_spill] sm:$0xff] %v6974_v60  ;;  %v5424_v13 = vpop.f32.mrf.mxu0  ;;  %v2667_v27 = vadd.f32 %v5371_v57, %v6846_v5 }
 0x1bb   : > { %v2587_v61 = vpop.f32.mrf.mxu1 }
 0x1bc   : > { %v2990_v20 = vpop.f32.mrf.mxu0  ;;  %v6977_v35 = vadd.f32 %v5421_v49, %v2667_v27  ;;  %v2666_v40 = vadd.f32 %v2587_v61, %v6849_v8 }
 0x1bd   : > { %v5374_v46 = vpop.f32.mrf.mxu1 }
 0x1be   : > { %v5427_v55 = vpop.f32.mrf.mxu0  ;;  %v6980_v56 = vadd.f32 %v2980_v53, %v2666_v40  ;;  %v2669_v0 = vadd.f32 %v5374_v46, %v6852_v36 }
 0x1bf   : > { %v2597_v48 = vpop.f32.mrf.mxu1 }
 0x1c0   : > { %v3000_v23 = vpop.f32.mrf.mxu0  ;;  %v6983_v31 = vadd.f32 %v5424_v13, %v2669_v0  ;;  %v2668_v44 = vadd.f32 %v2597_v48, %v6855_v15 }
 0x1c1   : > { %v5377_v60 = vpop.f32.mrf.mxu1 }
 0x1c2   : > { %v5430_v5 = vpop.f32.mrf.mxu0  ;;  %v6986_v57 = vadd.f32 %v2990_v20, %v2668_v44  ;;  %v2671_v49 = vadd.f32 %v5377_v60, %v6858_v30 }
 0x1c3   : > { %v2607_v27 = vpop.f32.mrf.mxu1 }
 0x1c4   : > { %v3010_v8 = vpop.f32.mrf.mxu0  ;;  %v6989_v61 = vadd.f32 %v5427_v55, %v2671_v49  ;;  %v2670_v53 = vadd.f32 %v2607_v27, %v6861_v26  ;;  %v2647_v26 = vadd.f32 %v6883_v29, %v6786_v38 }
 0x1c5   : > { %v5380_v40 = vpop.f32.mrf.mxu1 }
 0x1c6   : > { %v5433_v36 = vpop.f32.mrf.mxu0  ;;  %v6992_v46 = vadd.f32 %v3000_v23, %v2670_v53  ;;  %v2673_v13 = vadd.f32 %v5380_v40, %v6864_v10  ;;  %v3040_v29 = vadd.f32 %v6873_v52, %v2647_v26 }
 0x1c7   : > { %v2617_v0 = vpop.f32.mrf.mxu1 }
 0x1c8   : > { %v3020_v15 = vpop.f32.mrf.mxu0  ;;  %v6995_v48 = vadd.f32 %v5430_v5, %v2673_v13  ;;  %v2672_v20 = vadd.f32 %v2617_v0, %v6867_v25  ;;  %v2646_v5 = vadd.f32 %v6889_v59, %v6789_v39  ;;  %v2650_v39 = vadd.f32 %v6905_v42, %v6801_v63 }
 0x1c9   : > { %v5383_v44 = vpop.f32.mrf.mxu1 }
 0x1ca   : > { %v5436_v30 = vpop.f32.mrf.mxu0  ;;  %v6998_v60 = vadd.f32 %v3010_v8, %v2672_v20  ;;  %v2675_v55 = vadd.f32 %v5383_v44, %v6870_v45  ;;  %v2649_v8 = vadd.f32 %v6893_v12, %v6792_v28  ;;  %v2648_v45 = vadd.f32 %v6897_v11, %v6795_v33 }
 0x1cb   : > { %v2627_v49 = vpop.f32.mrf.mxu1  ;;  %v2653_v28 = vadd.f32 %v6909_v19, %v6804_v2  ;;  %v3039_v12 = vadd.f32 %v6878_v62, %v2646_v5  ;;  %v2652_v2 = vadd.f32 %v6925_v58, %v6807_v18  ;;  %v2654_v62 = vadd.f32 %v6939_v7, %v6813_v4  ;;  %v7455_v7 = vld [vmem:[#allocation21_spill] sm:$0xff] }
 0x1cc   : > { %v3030_v23 = vpop.f32.mrf.mxu0  ;;  %v7003_v27 = vadd.f32 %v5433_v36, %v2675_v55  ;;  %v2674_v10 = vadd.f32 %v2627_v49, %v6875_v21  ;;  %v2651_v21 = vadd.f32 %v6901_v37, %v6798_v51  ;;  %v3042_v11 = vadd.f32 %v6885_v22, %v2649_v8  ;;  %v7040_v22 = vld [vmem:[%s7297_s2] ss:$0 sm:$0xff]  ;;  %v7457_v55 = vld [vmem:[#allocation22_spill] sm:$0xff] }
 0x1cd   : > { %v5386_v53 = vpop.f32.mrf.mxu1  ;;  %v3041_v51 = vadd.f32 %v6891_v34, %v2648_v45  ;;  %v3043_v19 = vadd.f32 %v6899_v41, %v2650_v39  ;;  %v2656_v4 = vadd.f32 %v6947_v32, %v6819_v3  ;;  %v2659_v58 = vadd.f32 %v6951_v43, %v6822_v50  ;;  %v7456_v41 = vld [vmem:[#allocation10_spill] sm:$0xff]  ;;  %v7460_v3 = vld [vmem:[#allocation15_spill] sm:$0xff]  ;;  %v7462_v43 = vld [vmem:[#allocation24_spill] sm:$0xff] }
 0x1ce   : > { %v5491_v25 = vpop.f32.mrf.mxu0  ;;  %v7012_v40 = vadd.f32 %v3020_v15, %v2674_v10  ;;  %v2677_v38 = vadd.f32 %v5386_v53, %v6880_v16  ;;  %v3044_v63 = vadd.f32 %v6895_v9, %v2651_v21  ;;  %v3046_v9 = vadd.f32 %v6903_v17, %v2653_v28  ;;  %v7458_v10 = vld [vmem:[#allocation13_spill] sm:$0xff]  ;;  %v7461_v50 = vld [vmem:[#allocation11_spill] sm:$0xff] }
 0x1cf   : > { %v2637_v36 = vpop.f32.mrf.mxu1  ;;  %v2661_v17 = vadd.f32 %v7457_v55, %v7456_v41  ;;  %v7060_v32 = vadd.f32 %v7460_v3, %v2654_v62  ;;  %v2663_v53 = vadd.f32 %v7462_v43, %v7461_v50  ;;  %v7464_v39 = vld [vmem:[#allocation17_spill] sm:$0xff] }
 0x1d0   : > { %v3660_v13 = vpop.f32.mrf.mxu0  ;;  %v7022_v59 = vadd.f32 %v5436_v30, %v2677_v38  ;;  %v2676_v33 = vadd.f32 %v2637_v36, %v6887_v54  ;;  %v2655_v54 = vadd.f32 %v6935_v6, %v6810_v1  ;;  %v2657_v1 = vadd.f32 %v6943_v14, %v6816_v24  ;;  %v7454_v6 = vld [vmem:[#allocation9_spill] sm:$0xff]  ;;  %v7459_v14 = vld [vmem:[#allocation14_spill] sm:$0xff]  ;;  %v7463_v36 = vld [vmem:[#allocation16_spill] sm:$0xff] }
 0x1d1   : > { %v5441_v16 = vpop.f32.mrf.mxu1  ;;  %v2658_v20 = vadd.f32 %v7455_v7, %v7454_v6  ;;  %v3045_v24 = vadd.f32 %v7458_v10, %v2652_v2  ;;  %v7076_v28 = vadd.f32 %v7464_v39, %v2656_v4 }
 0x1d2   : > { %v5494_v52 = vpop.f32.mrf.mxu0  ;;  %v7028_v37 = vadd.f32 %v3030_v23, %v2676_v33  ;;  %v3430_v0 = vadd.f32 %v5441_v16, %v3040_v29  ;;  %v7057_v5 = vadd.f32 %v7459_v14, %v2655_v54  ;;  %v7465_v33 = vld [vmem:[#allocation18_spill] sm:$0xff]  ;;  %v7466_v16 = vld [vmem:[#allocation19_spill] sm:$0xff]  ;;  %v7467_v54 = vld [vmem:[#allocation20_spill] sm:$0xff] }
 0x1d3   : > { %v3270_v34 = vpop.f32.mrf.mxu1  ;;  %v7085_v62 = vadd.f32 %v7467_v54, %v2661_v17 }
 0x1d4   : > { %v3670_v42 = vpop.f32.mrf.mxu0  ;;  %v3820_v15 = vadd.f32 %v5491_v25, %v3430_v0  ;;  %v3429_v18 = vadd.f32 %v3270_v34, %v3039_v12  ;;  %v7079_v12 = vadd.f32 %v7465_v33, %v2659_v58 }
 0x1d5   : > { %v5444_v44 = vpop.f32.mrf.mxu1 }
 0x1d6   : > { %v5497_v30 = vpop.f32.mrf.mxu0  ;;  %v3859_v26 = vadd.f32 %v7040_v22, %v3820_v15  ;;  %v3819_v49 = vadd.f32 %v3660_v13, %v3429_v18  ;;  %v3432_v23 = vadd.f32 %v5444_v44, %v3042_v11  ;;  %v7073_v13 = vadd.f32 %v7463_v36, %v2657_v1  ;;  %v7468_v15 = vld [vmem:[#allocation23_spill] sm:$0xff]  ;;  %v7469_v1 = vld [vmem:[#allocation12_spill] sm:$0xff] }
 0x1d7   : > { %v3280_v25 = vpop.f32.mrf.mxu1  ;;  %v7082_v11 = vadd.f32 %v7466_v16, %v2658_v20  ;;  %v7091_v18 = vadd.f32 %v7468_v15, %v2663_v53  ;;  %v2664_v4 = vadd.f32 %v6972_v47, %v7469_v1 }
 0x1d8   : > { %v3680_v8 = vpop.f32.mrf.mxu0  ;;  %v3891_v45 = vmax.f32 %v3859_v26, 0.0  ;;  %v3858_v38 = vadd.f32 %v7040_v22, %v3819_v49  ;;  %v3822_v29 = vadd.f32 %v5494_v52, %v3432_v23  ;;  %v3431_v21 = vadd.f32 %v3280_v25, %v3041_v51 }
 0x1d9   : > { %v5447_v0 = vpop.f32.mrf.mxu1 }
 0x1da   : > { %v5500_v2 = vpop.f32.mrf.mxu0  ;;  %3924 = vst.msk [vmem:[%s7069_s9 + $0x8] sm:$0xff] %vm3922_vm4, %v3891_v45  ;;  %v4030_v52 = vmul.f32 %v3891_v45, %v3891_v45  ;;  %v3890_v51 = vmax.f32 %v3858_v38, 0.0  ;;  %v3861_v34 = vadd.f32 %v7040_v22, %v3822_v29  ;;  %v3821_v58 = vadd.f32 %v3670_v42, %v3431_v21 }
 0x1db   : > { %v3434_v6 = vadd.f32 %v5447_v0, %v3044_v63  ;;  %v3290_v7 = vpop.f32.mrf.mxu1  ;;  %v3957_v44 = vsel %vm3922_vm4, %v3891_v45, 0.0 }
 0x1dc   : > { %v3690_v20 = vpop.f32.mrf.mxu0  ;;  %3923 = vst.msk [vmem:[%s7069_s9] sm:$0xff] %vm3922_vm4, %v3890_v51  ;;  %v3956_v41 = vsel %vm3922_vm4, %v3890_v51, 0.0  ;;  %v4029_v55 = vmul.f32 %v3890_v51, %v3890_v51  ;;  %v3893_v17 = vmax.f32 %v3861_v34, 0.0  ;;  %v3860_v49 = vadd.f32 %v7040_v22, %v3821_v58 }
 0x1dd   : > { %v3958_v26 = vadd.f32 %v3957_v44, %v3956_v41  ;;  %v3824_v23 = vadd.f32 %v5497_v30, %v3434_v6  ;;  %v3433_v10 = vadd.f32 %v3290_v7, %v3043_v19  ;;  %v5450_v14 = vpop.f32.mrf.mxu1  ;;  %v4062_v63 = vsel %vm3922_vm4, %v4030_v52, 0.0  ;;  %v7470_v30 = vld [vmem:[#allocation26_spill] sm:$0xff] }
 0x1de   : > { %v5503_v47 = vpop.f32.mrf.mxu0  ;;  %v4061_v42 = vsel %vm3922_vm4, %v4029_v55, 0.0  ;;  %3926 = vst.msk [vmem:[%s7069_s9 + $0x18] sm:$0xff] %vm3922_vm4, %v3893_v17  ;;  %v4032_v3 = vmul.f32 %v3893_v17, %v3893_v17  ;;  %v3436_v50 = vadd.f32 %v5450_v14, %v3046_v9  ;;  %v3892_v53 = vmax.f32 %v3860_v49, 0.0 }
 0x1df   : > { %v4063_v43 = vadd.f32 %v4062_v63, %v4061_v42  ;;  %v3863_v25 = vadd.f32 %v7040_v22, %v3824_v23  ;;  %v3823_v45 = vadd.f32 %v3680_v8, %v3433_v10  ;;  %v3300_v38 = vpop.f32.mrf.mxu1  ;;  %v7106_v19 = vadd.f32 %v7470_v30, %v2664_v4 }
 0x1e0   : > { %v3700_v29 = vpop.f32.mrf.mxu0  ;;  %v3961_v21 = vsel %vm3922_vm4, %v3893_v17, 0.0  ;;  %v3826_v36 = vadd.f32 %v5500_v2, %v3436_v50  ;;  %v3435_v39 = vadd.f32 %v3300_v38, %v3045_v24  ;;  %3925 = vst.msk [vmem:[%s7069_s9 + $0x10] sm:$0xff] %vm3922_vm4, %v3892_v53  ;;  %v3959_v33 = vsel %vm3922_vm4, %v3892_v53, 0.0 }
 0x1e1   : > { %v4031_v9 = vmul.f32 %v3892_v53, %v3892_v53  ;;  %v3895_v16 = vmax.f32 %v3863_v25, 0.0  ;;  %v3862_v0 = vadd.f32 %v7040_v22, %v3823_v45  ;;  %v5453_v54 = vpop.f32.mrf.mxu1  ;;  %v3960_v52 = vadd.f32 %v3959_v33, %v3958_v26 }
 0x1e2   : > { %v5506_v8 = vpop.f32.mrf.mxu0  ;;  %v3865_v51 = vadd.f32 %v7040_v22, %v3826_v36  ;;  %v3825_v34 = vadd.f32 %v3690_v20, %v3435_v39  ;;  %v3438_v15 = vadd.f32 %v5453_v54, %v7057_v5  ;;  %v4066_v2 = vsel %vm3922_vm4, %v4032_v3, 0.0 }
 0x1e3   : > { %v4064_v24 = vsel %vm3922_vm4, %v4031_v9, 0.0  ;;  %3928 = vst.msk [vmem:[%s7069_s9 + $0x28] sm:$0xff] %vm3922_vm4, %v3895_v16  ;;  %v4034_v1 = vmul.f32 %v3895_v16, %v3895_v16  ;;  %v3894_v4 = vmax.f32 %v3862_v0, 0.0  ;;  %v3310_v58 = vpop.f32.mrf.mxu1  ;;  %v3962_v44 = vadd.f32 %v3961_v21, %v3960_v52 }
 0x1e4   : > { %v3710_v6 = vpop.f32.mrf.mxu0  ;;  %v4065_v7 = vadd.f32 %v4064_v24, %v4063_v43  ;;  %v3897_v41 = vmax.f32 %v3865_v51, 0.0  ;;  %v3864_v55 = vadd.f32 %v7040_v22, %v3825_v34  ;;  %v3965_v20 = vsel %vm3922_vm4, %v3895_v16, 0.0 }
 0x1e5   : > { %3927 = vst.msk [vmem:[%s7069_s9 + $0x20] sm:$0xff] %vm3922_vm4, %v3894_v4  ;;  %v3963_v5 = vsel %vm3922_vm4, %v3894_v4, 0.0  ;;  %v4033_v17 = vmul.f32 %v3894_v4, %v3894_v4  ;;  %v3828_v26 = vadd.f32 %v5503_v47, %v3438_v15  ;;  %v5456_v49 = vpop.f32.mrf.mxu1  ;;  %v4070_v10 = vsel %vm3922_vm4, %v4034_v1, 0.0 }
 0x1e6   : > { %v5509_v23 = vpop.f32.mrf.mxu0  ;;  %v3964_v14 = vadd.f32 %v3963_v5, %v3962_v44  ;;  %v4067_v63 = vadd.f32 %v4066_v2, %v4065_v7  ;;  %3930 = vst.msk [vmem:[%s7069_s9 + $0x38] sm:$0xff] %vm3922_vm4, %v3897_v41  ;;  %v4036_v42 = vmul.f32 %v3897_v41, %v3897_v41  ;;  %v3896_v50 = vmax.f32 %v3864_v55, 0.0 }
 0x1e7   : > { %v4068_v3 = vsel %vm3922_vm4, %v4033_v17, 0.0  ;;  %v3867_v43 = vadd.f32 %v7040_v22, %v3828_v26  ;;  %v3437_v53 = vadd.f32 %v3310_v58, %v7060_v32  ;;  %v3320_v25 = vpop.f32.mrf.mxu1  ;;  %v3969_v38 = vsel %vm3922_vm4, %v3897_v41, 0.0 }
 0x1e8   : > { %v3720_v45 = vpop.f32.mrf.mxu0  ;;  %v4069_v47 = vadd.f32 %v4068_v3, %v4067_v63  ;;  %v3966_v30 = vadd.f32 %v3965_v20, %v3964_v14  ;;  %v3440_v21 = vadd.f32 %v5456_v49, %v7073_v13  ;;  %3929 = vst.msk [vmem:[%s7069_s9 + $0x30] sm:$0xff] %vm3922_vm4, %v3896_v50  ;;  %v3967_v36 = vsel %vm3922_vm4, %v3896_v50, 0.0 }
 0x1e9   : > { %v4035_v39 = vmul.f32 %v3896_v50, %v3896_v50  ;;  %v3899_v33 = vmax.f32 %v3867_v43, 0.0  ;;  %v3827_v9 = vadd.f32 %v3700_v29, %v3437_v53  ;;  %v5459_v16 = vpop.f32.mrf.mxu1  ;;  %v3439_v51 = vadd.f32 %v3320_v25, %v7076_v28 }
 0x1ea   : > { %v5512_v0 = vpop.f32.mrf.mxu0  ;;  %v3968_v54 = vadd.f32 %v3967_v36, %v3966_v30  ;;  %v4071_v32 = vadd.f32 %v4070_v10, %v4069_v47  ;;  %v3830_v52 = vadd.f32 %v5506_v8, %v3440_v21  ;;  %v4074_v34 = vsel %vm3922_vm4, %v4036_v42, 0.0 }
 0x1eb   : > { %v4072_v15 = vsel %vm3922_vm4, %v4035_v39, 0.0  ;;  %3932 = vst.msk [vmem:[%s7069_s9 + $0x48] sm:$0xff] %vm3922_vm4, %v3899_v33  ;;  %v4038_v13 = vmul.f32 %v3899_v33, %v3899_v33  ;;  %v3866_v2 = vadd.f32 %v7040_v22, %v3827_v9  ;;  %v3330_v24 = vpop.f32.mrf.mxu1  ;;  %v3829_v7 = vadd.f32 %v3710_v6, %v3439_v51  ;;  %v7471_v51 = vld [vmem:[#allocation25_spill] sm:$0xff] }
 0x1ec   : > { %v3730_v1 = vpop.f32.mrf.mxu0  ;;  %v4073_v29 = vadd.f32 %v4072_v15, %v4071_v32  ;;  %v3970_v4 = vadd.f32 %v3969_v38, %v3968_v54  ;;  %v3869_v58 = vadd.f32 %v7040_v22, %v3830_v52  ;;  %v3973_v8 = vsel %vm3922_vm4, %v3899_v33, 0.0 }
 0x1ed   : > { %v3898_v28 = vmax.f32 %v3866_v2, 0.0  ;;  %v3442_v44 = vadd.f32 %v5459_v16, %v7079_v12  ;;  %v3441_v41 = vadd.f32 %v3330_v24, %v7082_v11  ;;  %v5462_v55 = vpop.f32.mrf.mxu1  ;;  %v3868_v26 = vadd.f32 %v7040_v22, %v3829_v7 }
 0x1ee   : > { %v5515_v20 = vpop.f32.mrf.mxu0  ;;  %v4075_v5 = vadd.f32 %v4074_v34, %v4073_v29  ;;  %v3901_v17 = vmax.f32 %v3869_v58, 0.0  ;;  %v3444_v49 = vadd.f32 %v5462_v55, %v7085_v62  ;;  %v4078_v11 = vsel %vm3922_vm4, %v4038_v13, 0.0 }
 0x1ef   : > { %3931 = vst.msk [vmem:[%s7069_s9 + $0x40] sm:$0xff] %vm3922_vm4, %v3898_v28  ;;  %v3971_v6 = vsel %vm3922_vm4, %v3898_v28, 0.0  ;;  %v4037_v10 = vmul.f32 %v3898_v28, %v3898_v28  ;;  %v3832_v14 = vadd.f32 %v5509_v23, %v3442_v44  ;;  %v3831_v63 = vadd.f32 %v3720_v45, %v3441_v41  ;;  %v3340_v12 = vpop.f32.mrf.mxu1 }
 0x1f0   : > { %v3740_v42 = vpop.f32.mrf.mxu0  ;;  %v3972_v3 = vadd.f32 %v3971_v6, %v3970_v4  ;;  %3934 = vst.msk [vmem:[%s7069_s9 + $0x58] sm:$0xff] %vm3922_vm4, %v3901_v17  ;;  %v4040_v50 = vmul.f32 %v3901_v17, %v3901_v17  ;;  %v3900_v43 = vmax.f32 %v3868_v26, 0.0  ;;  %v3834_v47 = vadd.f32 %v5512_v0, %v3444_v49 }
 0x1f1   : > { %v4076_v53 = vsel %vm3922_vm4, %v4037_v10, 0.0  ;;  %v3871_v62 = vadd.f32 %v7040_v22, %v3832_v14  ;;  %v3870_v25 = vadd.f32 %v7040_v22, %v3831_v63  ;;  %v5465_v38 = vpop.f32.mrf.mxu1  ;;  %v3977_v30 = vsel %vm3922_vm4, %v3901_v17, 0.0 }
 0x1f2   : > { %v5518_v23 = vpop.f32.mrf.mxu0  ;;  %v4077_v45 = vadd.f32 %v4076_v53, %v4075_v5  ;;  %3933 = vst.msk [vmem:[%s7069_s9 + $0x50] sm:$0xff] %vm3922_vm4, %v3900_v43  ;;  %v3974_v21 = vadd.f32 %v3973_v8, %v3972_v3  ;;  %v3975_v36 = vsel %vm3922_vm4, %v3900_v43, 0.0  ;;  %v4039_v39 = vmul.f32 %v3900_v43, %v3900_v43  ;;  %v7472_v5 = vld [vmem:[#allocation27_spill] sm:$0xff] }
 0x1f3   : > { %v3903_v33 = vmax.f32 %v3871_v62, 0.0  ;;  %v3902_v9 = vmax.f32 %v3870_v25, 0.0  ;;  %v3873_v16 = vadd.f32 %v7040_v22, %v3834_v47  ;;  %v3350_v54 = vpop.f32.mrf.mxu1  ;;  %v3443_v34 = vadd.f32 %v3340_v12, %v7471_v51  ;;  %v7473_v62 = vld [vmem:[#allocation28_spill] sm:$0xff] }
 0x1f4   : > { %v3750_v32 = vpop.f32.mrf.mxu0  ;;  %v3976_v0 = vadd.f32 %v3975_v36, %v3974_v21  ;;  %v4079_v52 = vadd.f32 %v4078_v11, %v4077_v45  ;;  %v3446_v15 = vadd.f32 %v5465_v38, %v7091_v18  ;;  %v4082_v13 = vsel %vm3922_vm4, %v4040_v50, 0.0 }
 0x1f5   : > { %v4080_v2 = vsel %vm3922_vm4, %v4039_v39, 0.0  ;;  %3936 = vst.msk [vmem:[%s7069_s9 + $0x68] sm:$0xff] %vm3922_vm4, %v3903_v33  ;;  %v4042_v24 = vmul.f32 %v3903_v33, %v3903_v33  ;;  %3935 = vst.msk [vmem:[%s7069_s9 + $0x60] sm:$0xff] %vm3922_vm4, %v3902_v9  ;;  %v3979_v29 = vsel %vm3922_vm4, %v3902_v9, 0.0  ;;  %v5468_v4 = vpop.f32.mrf.mxu1  ;;  %v4041_v28 = vmul.f32 %v3902_v9, %v3902_v9 }
 0x1f6   : > { %v5521_v58 = vpop.f32.mrf.mxu0  ;;  %v4081_v7 = vadd.f32 %v4080_v2, %v4079_v52  ;;  %v3978_v8 = vadd.f32 %v3977_v30, %v3976_v0  ;;  %v3905_v44 = vmax.f32 %v3873_v16, 0.0  ;;  %v3981_v18 = vsel %vm3922_vm4, %v3903_v33, 0.0 }
 0x1f7   : > { %v3833_v41 = vadd.f32 %v3730_v1, %v3443_v34  ;;  %v3836_v55 = vadd.f32 %v5515_v20, %v3446_v15  ;;  %v3445_v17 = vadd.f32 %v3350_v54, %v7472_v5  ;;  %v3360_v26 = vpop.f32.mrf.mxu1  ;;  %v4086_v6 = vsel %vm3922_vm4, %v4042_v24, 0.0 }
 0x1f8   : > { %v3760_v49 = vpop.f32.mrf.mxu0  ;;  %v3980_v10 = vadd.f32 %v3979_v29, %v3978_v8  ;;  %v4083_v14 = vadd.f32 %v4082_v13, %v4081_v7  ;;  %v4084_v63 = vsel %vm3922_vm4, %v4041_v28, 0.0  ;;  %3938 = vst.msk [vmem:[%s7069_s9 + $0x78] sm:$0xff] %vm3922_vm4, %v3905_v44  ;;  %v4044_v12 = vmul.f32 %v3905_v44, %v3905_v44 }
 0x1f9   : > { %v3872_v11 = vadd.f32 %v7040_v22, %v3833_v41  ;;  %v3875_v3 = vadd.f32 %v7040_v22, %v3836_v55  ;;  %v3835_v50 = vadd.f32 %v3740_v42, %v3445_v17  ;;  %v5471_v1 = vpop.f32.mrf.mxu1  ;;  %v3448_v25 = vadd.f32 %v5468_v4, %v7473_v62 }
 0x1fa   : > { %v5524_v20 = vpop.f32.mrf.mxu0  ;;  %v4085_v43 = vadd.f32 %v4084_v63, %v4083_v14  ;;  %v3982_v53 = vadd.f32 %v3981_v18, %v3980_v10  ;;  %v3447_v47 = vadd.f32 %v3360_v26, %v7106_v19  ;;  %v3985_v38 = vsel %vm3922_vm4, %v3905_v44, 0.0 }
 0x1fb   : > { %v3904_v45 = vmax.f32 %v3872_v11, 0.0  ;;  %v3907_v30 = vmax.f32 %v3875_v3, 0.0  ;;  %v3874_v21 = vadd.f32 %v7040_v22, %v3835_v50  ;;  %v3370_v36 = vpop.f32.mrf.mxu1  ;;  %v3838_v42 = vadd.f32 %v5518_v23, %v3448_v25 }
 0x1fc   : > { %v3770_v39 = vpop.f32.mrf.mxu0  ;;  %v4087_v33 = vadd.f32 %v4086_v6, %v4085_v43  ;;  %v3837_v9 = vadd.f32 %v3750_v32, %v3447_v47  ;;  %v3450_v16 = vadd.f32 %v5471_v1, %v6977_v35  ;;  %v4090_v54 = vsel %vm3922_vm4, %v4044_v12, 0.0 }
 0x1fd   : > { %3937 = vst.msk [vmem:[%s7069_s9 + $0x70] sm:$0xff] %vm3922_vm4, %v3904_v45  ;;  %v3983_v0 = vsel %vm3922_vm4, %v3904_v45, 0.0  ;;  %v4043_v19 = vmul.f32 %v3904_v45, %v3904_v45  ;;  %3940 = vst.msk [vmem:[%s7069_s9 + $0x88] sm:$0xff] %vm3922_vm4, %v3907_v30  ;;  %v3989_v52 = vsel %vm3922_vm4, %v3907_v30, 0.0  ;;  %v5474_v51 = vpop.f32.mrf.mxu1  ;;  %v3906_v23 = vmax.f32 %v3874_v21, 0.0 }
 0x1fe   : > { %v7190_v34 = vpop.f32.mrf.mxu0  ;;  %v3984_v15 = vadd.f32 %v3983_v0, %v3982_v53  ;;  %v3877_v32 = vadd.f32 %v7040_v22, %v3838_v42  ;;  %v3876_v35 = vadd.f32 %v7040_v22, %v3837_v9  ;;  %v4046_v2 = vmul.f32 %v3907_v30, %v3907_v30 }
 0x1ff   : > { %v4088_v13 = vsel %vm3922_vm4, %v4043_v19, 0.0  ;;  %v3840_v24 = vadd.f32 %v5521_v58, %v3450_v16  ;;  %v3449_v29 = vadd.f32 %v3370_v36, %v6980_v56  ;;  %v3380_v4 = vpop.f32.mrf.mxu1  ;;  %3939 = vst.msk [vmem:[%s7069_s9 + $0x80] sm:$0xff] %vm3922_vm4, %v3906_v23  ;;  %v3987_v28 = vsel %vm3922_vm4, %v3906_v23, 0.0 }
 0x200   : > { %v4089_v7 = vadd.f32 %v4088_v13, %v4087_v33  ;;  %v3986_v8 = vadd.f32 %v3985_v38, %v3984_v15  ;;  %v4045_v44 = vmul.f32 %v3906_v23, %v3906_v23  ;;  %v3780_v18 = vpop.f32.mrf.mxu0  ;;  %v3909_v41 = vmax.f32 %v3877_v32, 0.0 }
 0x201   : > { %v3908_v55 = vmax.f32 %v3876_v35, 0.0  ;;  %v3879_v5 = vadd.f32 %v7040_v22, %v3840_v24  ;;  %v3839_v17 = vadd.f32 %v3760_v49, %v3449_v29  ;;  %v5477_v26 = vpop.f32.mrf.mxu1  ;;  %v3452_v10 = vadd.f32 %v5474_v51, %v6983_v31 }
 0x202   : > { %v3988_v58 = vadd.f32 %v3987_v28, %v3986_v8  ;;  %v4091_v6 = vadd.f32 %v4090_v54, %v4089_v7  ;;  %v4092_v56 = vsel %vm3922_vm4, %v4045_v44, 0.0  ;;  %v4094_v14 = vsel %vm3922_vm4, %v4046_v2, 0.0  ;;  %3942 = vst.msk [vmem:[%s7069_s9 + $0x98] sm:$0xff] %vm3922_vm4, %v3909_v41  ;;  %v5530_v53 = vpop.f32.mrf.mxu0 }
 0x203   : > { %v4048_v63 = vmul.f32 %v3909_v41, %v3909_v41  ;;  %3941 = vst.msk [vmem:[%s7069_s9 + $0x90] sm:$0xff] %vm3922_vm4, %v3908_v55  ;;  %v3991_v12 = vsel %vm3922_vm4, %v3908_v55, 0.0  ;;  %v4047_v11 = vmul.f32 %v3908_v55, %v3908_v55  ;;  %v3390_v3 = vpop.f32.mrf.mxu1  ;;  %v3911_v1 = vmax.f32 %v3879_v5, 0.0 }
 0x204   : > { %v4093_v49 = vadd.f32 %v4092_v56, %v4091_v6  ;;  %v3990_v50 = vadd.f32 %v3989_v52, %v3988_v58  ;;  %v3878_v43 = vadd.f32 %v7040_v22, %v3839_v17  ;;  %v3993_v31 = vsel %vm3922_vm4, %v3909_v41, 0.0  ;;  %v3790_v52 = vpop.f32.mrf.mxu0 }
 0x205   : > { %v4096_v62 = vsel %vm3922_vm4, %v4047_v11, 0.0  ;;  %v3842_v25 = vadd.f32 %v5524_v20, %v3452_v10  ;;  %v3451_v47 = vadd.f32 %v3380_v4, %v6986_v57  ;;  %v5480_v38 = vpop.f32.mrf.mxu1  ;;  %v4098_v45 = vsel %vm3922_vm4, %v4048_v63, 0.0  ;;  %3944 = vst.msk [vmem:[%s7069_s9 + $0xa8] sm:$0xff] %vm3922_vm4, %v3911_v1 }
 0x206   : > { %v3992_v30 = vadd.f32 %v3991_v12, %v3990_v50  ;;  %v4095_v21 = vadd.f32 %v4094_v14, %v4093_v49  ;;  %v4050_v36 = vmul.f32 %v3911_v1, %v3911_v1  ;;  %v3910_v33 = vmax.f32 %v3878_v43, 0.0  ;;  %v5533_v55 = vpop.f32.mrf.mxu0 }
 0x207   : > { %v3881_v42 = vadd.f32 %v7040_v22, %v3842_v25  ;;  %v3841_v9 = vadd.f32 %v3770_v39, %v3451_v47  ;;  %v3454_v16 = vadd.f32 %v5477_v26, %v6989_v61  ;;  %v3400_v54 = vpop.f32.mrf.mxu1  ;;  %v3997_v20 = vsel %vm3922_vm4, %v3911_v1, 0.0 }
 0x208   : > { %v4097_v0 = vadd.f32 %v4096_v62, %v4095_v21  ;;  %v3994_v57 = vadd.f32 %v3993_v31, %v3992_v30  ;;  %v3453_v19 = vadd.f32 %v3390_v3, %v6992_v46  ;;  %3943 = vst.msk [vmem:[%s7069_s9 + $0xa0] sm:$0xff] %vm3922_vm4, %v3910_v33  ;;  %v3995_v51 = vsel %vm3922_vm4, %v3910_v33, 0.0  ;;  %v3800_v1 = vpop.f32.mrf.mxu0 }
 0x209   : > { %v4049_v15 = vmul.f32 %v3910_v33, %v3910_v33  ;;  %v3913_v23 = vmax.f32 %v3881_v42, 0.0  ;;  %v3880_v32 = vadd.f32 %v7040_v22, %v3841_v9  ;;  %v5483_v39 = vpop.f32.mrf.mxu1  ;;  %v3844_v13 = vadd.f32 %v7190_v34, %v3454_v16 }
 0x20a   : > { %v3996_v35 = vadd.f32 %v3995_v51, %v3994_v57  ;;  %v4099_v61 = vadd.f32 %v4098_v45, %v4097_v0  ;;  %v3843_v2 = vadd.f32 %v3780_v18, %v3453_v19  ;;  %v4102_v24 = vsel %vm3922_vm4, %v4050_v36, 0.0 }
 0x20b   : > { %v4100_v46 = vsel %vm3922_vm4, %v4049_v15, 0.0  ;;  %3946 = vst.msk [vmem:[%s7069_s9 + $0xb8] sm:$0xff] %vm3922_vm4, %v3913_v23  ;;  %v4052_v29 = vmul.f32 %v3913_v23, %v3913_v23  ;;  %v3912_v4 = vmax.f32 %v3880_v32, 0.0  ;;  %v3410_v7 = vpop.f32.mrf.mxu1  ;;  %v3883_v44 = vadd.f32 %v7040_v22, %v3844_v13 }
 0x20c   : > { %v4101_v8 = vadd.f32 %v4100_v46, %v4099_v61  ;;  %v3998_v28 = vadd.f32 %v3997_v20, %v3996_v35  ;;  %v3882_v41 = vadd.f32 %v7040_v22, %v3843_v2  ;;  %v4001_v5 = vsel %vm3922_vm4, %v3913_v23, 0.0 }
 0x20d   : > { %3945 = vst.msk [vmem:[%s7069_s9 + $0xb0] sm:$0xff] %vm3922_vm4, %v3912_v4  ;;  %v3999_v34 = vsel %vm3922_vm4, %v3912_v4, 0.0  ;;  %v4051_v18 = vmul.f32 %v3912_v4, %v3912_v4  ;;  %v3456_v17 = vadd.f32 %v5480_v38, %v6995_v48  ;;  %v3915_v6 = vmax.f32 %v3883_v44, 0.0  ;;  %v5486_v11 = vpop.f32.mrf.mxu1 }
 0x20e   : > { %v4000_v26 = vadd.f32 %v3999_v34, %v3998_v28  ;;  %v4103_v58 = vadd.f32 %v4102_v24, %v4101_v8  ;;  %v3914_v56 = vmax.f32 %v3882_v41, 0.0  ;;  %v3455_v63 = vadd.f32 %v3400_v54, %v6998_v60  ;;  %v5536_v54 = vpop.f32.mrf.mxu0 }
 0x20f   : > { %v4104_v10 = vsel %vm3922_vm4, %v4051_v18, 0.0  ;;  %v3846_v14 = vadd.f32 %v5530_v53, %v3456_v17  ;;  %v3458_v12 = vadd.f32 %v5483_v39, %v7003_v27  ;;  %v4106_v3 = vsel %vm3922_vm4, %v4052_v29, 0.0  ;;  %3948 = vst.msk [vmem:[%s7069_s9 + $0xc8] sm:$0xff] %vm3922_vm4, %v3915_v6  ;;  %v3420_v36 = vpop.f32.mrf.mxu1 }
 0x210   : > { %v4105_v49 = vadd.f32 %v4104_v10, %v4103_v58  ;;  %v4054_v50 = vmul.f32 %v3915_v6, %v3915_v6  ;;  %3947 = vst.msk [vmem:[%s7069_s9 + $0xc0] sm:$0xff] %vm3922_vm4, %v3914_v56  ;;  %v4002_v48 = vadd.f32 %v4001_v5, %v4000_v26  ;;  %v4003_v43 = vsel %vm3922_vm4, %v3914_v56, 0.0  ;;  %v3810_v61 = vpop.f32.mrf.mxu0 }
 0x211   : > { %v4053_v31 = vmul.f32 %v3914_v56, %v3914_v56  ;;  %v3885_v53 = vadd.f32 %v7040_v22, %v3846_v14  ;;  %v3845_v62 = vadd.f32 %v3790_v52, %v3455_v63  ;;  %v4005_v60 = vsel %vm3922_vm4, %v3915_v6, 0.0 }
 0x212   : > { %v4004_v27 = vadd.f32 %v4003_v43, %v4002_v48  ;;  %v4107_v25 = vadd.f32 %v4106_v3, %v4105_v49  ;;  %v3848_v47 = vadd.f32 %v5533_v55, %v3458_v12  ;;  %v3457_v21 = vadd.f32 %v3410_v7, %v7012_v40 }
 0x213   : > { %v4108_v38 = vsel %vm3922_vm4, %v4053_v31, 0.0  ;;  %v3917_v45 = vmax.f32 %v3885_v53, 0.0  ;;  %v3884_v30 = vadd.f32 %v7040_v22, %v3845_v62  ;;  %v3460_v16 = vadd.f32 %v5486_v11, %v7022_v59 }
 0x214   : > { %v4109_v33 = vadd.f32 %v4108_v38, %v4107_v25  ;;  %v4006_v42 = vadd.f32 %v4005_v60, %v4004_v27  ;;  %v3887_v9 = vadd.f32 %v7040_v22, %v3848_v47  ;;  %v4110_v0 = vsel %vm3922_vm4, %v4054_v50, 0.0  ;;  %v3955_v38 = vld [vmem:[%s6917_s25] sm:$0x1] }
 0x215   : > { %3950 = vst.msk [vmem:[%s7069_s9 + $0xd8] sm:$0xff] %vm3922_vm4, %v3917_v45  ;;  %v4056_v20 = vmul.f32 %v3917_v45, %v3917_v45  ;;  %v3916_v57 = vmax.f32 %v3884_v30, 0.0  ;;  %v3847_v19 = vadd.f32 %v3800_v1, %v3457_v21  ;;  %v3850_v40 = vadd.f32 %v5536_v54, %v3460_v16  ;;  %v4028_v21 = vld [vmem:[%s6923_s29] sm:$0x1] }
 0x216   : > { %v4111_v52 = vadd.f32 %v4110_v0, %v4109_v33  ;;  %v3919_v51 = vmax.f32 %v3887_v9, 0.0  ;;  %v3459_v15 = vadd.f32 %v3420_v36, %v7028_v37  ;;  %v4009_v13 = vsel %vm3922_vm4, %v3917_v45, 0.0 }
 0x217   : > { %3949 = vst.msk [vmem:[%s7069_s9 + $0xd0] sm:$0xff] %vm3922_vm4, %v3916_v57  ;;  %v4007_v23 = vsel %vm3922_vm4, %v3916_v57, 0.0  ;;  %v4055_v59 = vmul.f32 %v3916_v57, %v3916_v57  ;;  %v3886_v32 = vadd.f32 %v7040_v22, %v3847_v19  ;;  %v3889_v35 = vadd.f32 %v7040_v22, %v3850_v40 }
 0x218   : > { %v4008_v39 = vadd.f32 %v4007_v23, %v4006_v42  ;;  %3952 = vst.msk [vmem:[%s7069_s9 + $0xe8] sm:$0xff] %vm3922_vm4, %v3919_v51  ;;  %v3849_v24 = vadd.f32 %v3810_v61, %v3459_v15  ;;  %v4114_v46 = vsel %vm3922_vm4, %v4056_v20, 0.0  ;;  %v4058_v8 = vmul.f32 %v3919_v51, %v3919_v51 }
 0x219   : > { %v4112_v2 = vsel %vm3922_vm4, %v4055_v59, 0.0  ;;  %v3918_v37 = vmax.f32 %v3886_v32, 0.0  ;;  %v3921_v7 = vmax.f32 %v3889_v35, 0.0  ;;  %v4013_v34 = vsel %vm3922_vm4, %v3919_v51, 0.0 }
 0x21a   : > { %v4113_v29 = vadd.f32 %v4112_v2, %v4111_v52  ;;  %v4010_v4 = vadd.f32 %v4009_v13, %v4008_v39  ;;  %v3888_v41 = vadd.f32 %v7040_v22, %v3849_v24  ;;  %v4118_v6 = vsel %vm3922_vm4, %v4058_v8, 0.0 }
 0x21b   : > { %3951 = vst.msk [vmem:[%s7069_s9 + $0xe0] sm:$0xff] %vm3922_vm4, %v3918_v37  ;;  %v4011_v28 = vsel %vm3922_vm4, %v3918_v37, 0.0  ;;  %v4057_v44 = vmul.f32 %v3918_v37, %v3918_v37  ;;  %3954 = vst.msk [vmem:[%s7069_s9 + $0xf8] sm:$0xff] %vm3922_vm4, %v3921_v7  ;;  %v4060_v56 = vmul.f32 %v3921_v7, %v3921_v7  ;;  %v4017_v12 = vsel %vm3922_vm4, %v3921_v7, 0.0 }
 0x21c   : > { %v4012_v55 = vadd.f32 %v4011_v28, %v4010_v4  ;;  %v4115_v5 = vadd.f32 %v4114_v46, %v4113_v29  ;;  %v3920_v17 = vmax.f32 %v3888_v41, 0.0 }
 0x21d   : > { %v4116_v18 = vsel %vm3922_vm4, %v4057_v44, 0.0  ;;  %v4122_v50 = vsel %vm3922_vm4, %v4060_v56, 0.0 }
 0x21e   : > { %v4117_v26 = vadd.f32 %v4116_v18, %v4115_v5  ;;  %v4014_v58 = vadd.f32 %v4013_v34, %v4012_v55  ;;  %3953 = vst.msk [vmem:[%s7069_s9 + $0xf0] sm:$0xff] %vm3922_vm4, %v3920_v17  ;;  %v4015_v10 = vsel %vm3922_vm4, %v3920_v17, 0.0  ;;  %v4059_v14 = vmul.f32 %v3920_v17, %v3920_v17 }
 0x220   : > { %v4016_v22 = vadd.f32 %v4015_v10, %v4014_v58  ;;  %v4119_v63 = vadd.f32 %v4118_v6, %v4117_v26  ;;  %v4120_v11 = vsel %vm3922_vm4, %v4059_v14, 0.0 }
 0x222   : > { %v4018_v3 = vadd.f32 %v4017_v12, %v4016_v22  ;;  %v4121_v49 = vadd.f32 %v4120_v11, %v4119_v63 }
 0x224   : > { %v4019_v48 = vrot.slane %v4018_v3, 4  ;;  %v4123_v1 = vadd.f32 %v4122_v50, %v4121_v49 }
 0x226   : > { %v4020_v43 = vadd.f32 %v4019_v48, %v4018_v3  ;;  %v4124_v31 = vrot.slane %v4123_v1, 4 }
 0x228   : > { %v4021_v53 = vrot.slane %v4020_v43, 2  ;;  %v4125_v62 = vadd.f32 %v4124_v31, %v4123_v1 }
 0x22a   : > { %v4022_v60 = vadd.f32 %v4021_v53, %v4020_v43  ;;  %v4126_v27 = vrot.slane %v4125_v62, 2 }
 0x22c   : > { %v4023_v25 = vrot.slane %v4022_v60, 1  ;;  %v4127_v47 = vadd.f32 %v4126_v27, %v4125_v62 }
 0x22e   : > { %v4024_v45 = vadd.f32 %v4023_v25, %v4022_v60  ;;  %v4128_v30 = vrot.slane %v4127_v47, 1 }
 0x230   : > { %v4025_v36 = vadd.f32 %v4024_v45, %v3955_v38  ;;  %v4129_v33 = vadd.f32 %v4128_v30, %v4127_v47 }
 0x232   : > { %4027 = vst.msk [vmem:[%s6917_s25] sm:$0x1] %vm392_vm3, %v4025_v36  ;;  %v4130_v42 = vadd.f32 %v4129_v33, %v4028_v21 }
 0x234   : > { %4131 = vst.msk [vmem:[%s6923_s29] sm:$0x1] %vm392_vm3, %v4130_v42 }
 0x235 PF: > { %s16_s20 = sadd.s32 1, %s5586_s20   ;;  %s7474_s18 = smov %s5582_s19 }
 0x236   : > { %p13_p5 = scmp.ge.s32.totalorder %s16_s20, 4   ;;  %s7475_s19 = smov %s7477_s21 }
 0x238   :  { %15 = sbr.rel (!%p13_p5) target bundleno = 2 (0x2), region = 102 }

// kernel: inception_forward.7
= control target key start
LH: loop header
LB: loop body
LE: loop exit
PB: predicated region body
PF: predicated region fallthrough
CT: control target
= control target key end

     0   :  { %s5499_s24 = smov 0   ;;  %s5501_s25 = smov 0   ;;  %s7159_s0 = inlined_call_operand.vmem [shape: f32[2,16,16,16], index: 0, kind: input, shape index: {}]   ;;  %s7160_s1 = inlined_call_operand.vmem [shape: f32[9,8,8], index: 1, kind: input, shape index: {}]   ;;  %s7161_s2 = inlined_call_operand.vmem [shape: f32[1,8], index: 2, kind: input, shape index: {}]   ;;  %s7162_s3 = inlined_call_operand.vmem [shape: f32[2,1,16], index: 3, kind: input, shape index: {}]   ;;  %s7163_s4 = inlined_call_operand.vmem [shape: f32[2,1,16], index: 4, kind: input, shape index: {}]   ;;  %s7164_s5 = inlined_call_operand.vmem [shape: f32[1,8], index: 5, kind: input, shape index: {}]   ;;  %s7165_s6 = inlined_call_operand.vmem [shape: f32[1,8], index: 6, kind: input, shape index: {}]   ;;  %s7166_s7 = inlined_call_operand.vmem [shape: f32[2,16,16,8], index: 7, kind: output, shape index: {}]  }
   0x1   :  { %s5503_s26 = smov 0  }
   0x2 LB: > { %s29_s27 = sadd.s32 1, %s5452_s25  ;;  %p4160_p0 = scmp.ge.s32.totalorder %s5456_s26, 1  ;;  %s5456_s26 = sphi %s5503_s26, %s17_s26   ;;  %s5452_s25 = sphi %s5501_s25, %s7381_s25   ;;  %s5448_s24 = sphi %s5499_s24, %s7380_s24  }
   0x3   : > { %p31_p1 = scmp.ge.s32.totalorder %s29_s27, 2  ;;  %p251_p2 = scmp.lt.s32.totalorder %s5456_s26, 3 }
   0x5   : > { %s7383_s27 = smov (%p31_p1, %s29_s27), 0  ;;  %p252_p3 = pnand %p4160_p0, %p251_p2 }
   0x7   : > { %255 = sbr.rel (%p252_p3) target bundleno = 549 (0x225), region = 48 }
   0xc   : > { %v4165_v0 = vld [vmem:[%s7160_s1 + $0x8] sm:$0xff]  ;;  %vm308_vm0 = vcmask 64512   ;;  %v396_v1 = vld [vmem:[%s7162_s3] sm:$0x1]  ;;  %v5458_v2 = vmov 0.0   ;;  %vm398_vm1 = vcmask 122880   ;;  %v420_v23 = vlaneseq }
   0xd   : > { %5405 = vmatprep.subr.mxu1 %v4165_v0  ;;  %4955 = vmatprep.subr.mxu0 %v4165_v0  ;;  %309 = vst.msk [vmem:[#allocation2] sm:$0xff] %vm308_vm0, %v5458_v2  ;;  %310 = vst.msk [vmem:[#allocation2 + $0x8] sm:$0xff] %vm308_vm0, %v5458_v2  ;;  %v397_v3 = vld [vmem:[%s7162_s3 + $0x1] sm:$0x1]  ;;  %v402_v4 = vld [vmem:[%s7163_s4] sm:$0x1] }
   0xe   : > { %313 = vst.msk [vmem:[#allocation2 + $0x18] sm:$0xff] %vm308_vm0, %v5458_v2  ;;  %314 = vst.msk [vmem:[#allocation2 + $0x20] sm:$0xff] %vm308_vm0, %v5458_v2  ;;  %v5606_v5 = vld [vmem:[%s7160_s1] sm:$0xff]  ;;  %5406 = vmatpush3.msra.mxu1 %v4165_v0  ;;  %4956 = vmatpush3.msra.mxu0 %v4165_v0  ;;  %v399_v6 = vsel %vm398_vm1, %v396_v1, 0.0  ;;  %v400_v7 = vsel %vm398_vm1, %v397_v3, 0.0  ;;  %v404_v9 = vsel %vm398_vm1, %v402_v4, 0.0 }
   0xf   : > { %316 = vst.msk [vmem:[#allocation2 + $0x30] sm:$0xff] %vm308_vm0, %v5458_v2  ;;  %317 = vst.msk [vmem:[#allocation2 + $0x38] sm:$0xff] %vm308_vm0, %v5458_v2  ;;  %v403_v8 = vld [vmem:[%s7163_s4 + $0x1] sm:$0x1]  ;;  %v401_v10 = vadd.f32 %v400_v7, %v399_v6  ;;  %5005 = vmatprep.subr.mxu1 %v5606_v5  ;;  %vm311_vm2 = vcmask 58368   ;;  %v4230_v13 = vld [vmem:[%s7160_s1 + $0x10] sm:$0xff] }
  0x10   : > { %319 = vst.msk [vmem:[#allocation2 + $0x48] sm:$0xff] %vm308_vm0, %v5458_v2  ;;  %320 = vst.msk [vmem:[#allocation2 + $0x50] sm:$0xff] %vm308_vm0, %v5458_v2  ;;  %v405_v11 = vsel %vm398_vm1, %v403_v8, 0.0  ;;  %5055 = vmatprep.subr.mxu0 %v4230_v13  ;;  %v5655_v21 = vld [vmem:[%s7160_s1 + $0x20] sm:$0xff]  ;;  %p288_p4 = scmp.lt.s32.totalorder %s5448_s24, 1  ;;  %v421_v24 = vshrl.u32 %v420_v23, 7 }
  0x11   : > { %322 = vst.msk [vmem:[#allocation2 + $0x60] sm:$0xff] %vm308_vm0, %v5458_v2  ;;  %323 = vst.msk [vmem:[#allocation2 + $0x68] sm:$0xff] %vm308_vm0, %v5458_v2  ;;  %v406_v12 = vadd.f32 %v405_v11, %v404_v9  ;;  %v407_v14 = vmul.f32 0.001953125, %v401_v10  ;;  %v414_v25 = vld [vmem:[%s7164_s5] sm:$0x1] }
  0x12   : > { %325 = vst.msk [vmem:[#allocation2 + $0x78] sm:$0xff] %vm308_vm0, %v5458_v2  ;;  %326 = vst.msk [vmem:[#allocation2 + $0x80] sm:$0xff] %vm308_vm0, %v5458_v2  ;;  %s7385_s24 = smov (!%p288_p4, %s5448_s24), 1  ;;  %v422_v26 = vsub.s32 0, %v421_v24  ;;  %v416_v30 = vld [vmem:[%s7165_s6] sm:$0x1] }
  0x13   : > { %328 = vst.msk [vmem:[#allocation2 + $0x90] sm:$0xff] %vm308_vm0, %v5458_v2  ;;  %329 = vst.msk [vmem:[#allocation2 + $0x98] sm:$0xff] %vm308_vm0, %v5458_v2  ;;  %v408_v15 = vmul.f32 0.001953125, %v406_v12  ;;  %v409_v16 = vmul.f32 %v407_v14, %v407_v14  ;;  %s4656_s21 = sshll.u32 %s7385_s24, 8 }
  0x14   : > { %331 = vst.msk [vmem:[#allocation2 + $0xa8] sm:$0xff] %vm308_vm0, %v5458_v2  ;;  %332 = vst.msk [vmem:[#allocation2 + $0xb0] sm:$0xff] %vm308_vm0, %v5458_v2  ;;  %v564_v17 = vld [vmem:[#allocation2 + $0x1] sm:$0xff]  ;;  %s5669_s28 = scalar_lea.vmem %s7159_s0, %s4656_s21  ;;  %s6976_s29 = scalar_lea.vmem %s7166_s7, %s4656_s21 }
  0x15   : > { %334 = vst.msk [vmem:[#allocation2 + $0xc0] sm:$0xff] %vm308_vm0, %v5458_v2  ;;  %335 = vst.msk [vmem:[#allocation2 + $0xc8] sm:$0xff] %vm308_vm0, %v5458_v2  ;;  %4957 = vmatprep.mubr.msk.f32.mxu0 %vm308_vm0, %v564_v17  ;;  %v410_v18 = vsub.f32 %v408_v15, %v409_v16  ;;  %v378_v28 = vld [vmem:[%s5669_s28 + $0x70] sm:$0xff]  ;;  %v379_v31 = vld [vmem:[%s5669_s28 + $0x78] sm:$0xff] }
  0x16   : > { %337 = vst.msk [vmem:[#allocation2 + $0xd8] sm:$0xff] %vm308_vm0, %v5458_v2  ;;  %338 = vst.msk [vmem:[#allocation2 + $0xe0] sm:$0xff] %vm308_vm0, %v5458_v2  ;;  %v364_v32 = vld [vmem:[%s5669_s28] sm:$0xff]  ;;  %v365_v34 = vld [vmem:[%s5669_s28 + $0x8] sm:$0xff] }
  0x17   : > { %340 = vst.msk [vmem:[#allocation2 + $0xf0] sm:$0xff] %vm308_vm0, %v5458_v2  ;;  %341 = vst.msk [vmem:[#allocation2 + $0xf8] sm:$0xff] %vm308_vm0, %v5458_v2  ;;  %v411_v19 = vmax.f32 %v410_v18, 0.0  ;;  %v380_v33 = vld [vmem:[%s5669_s28 + $0x80] sm:$0xff]  ;;  %v381_v37 = vld [vmem:[%s5669_s28 + $0x88] sm:$0xff] }
  0x18   : > { %343 = vst.msk [vmem:[#allocation2 + $0x108] sm:$0xff] %vm308_vm0, %v5458_v2  ;;  %344 = vst.msk [vmem:[#allocation2 + $0x110] sm:$0xff] %vm308_vm0, %v5458_v2  ;;  %v366_v38 = vld [vmem:[%s5669_s28 + $0x10] sm:$0xff]  ;;  %v367_v40 = vld [vmem:[%s5669_s28 + $0x18] sm:$0xff] }
  0x19   : > { %346 = vst.msk [vmem:[#allocation2 + $0x120] sm:$0xff] %vm308_vm0, %v5458_v2  ;;  %347 = vst.msk [vmem:[#allocation2 + $0x128] sm:$0xff] %vm308_vm0, %v5458_v2  ;;  %v412_v22 = vadd.f32 1e-05, %v411_v19  ;;  %v382_v39 = vld [vmem:[%s5669_s28 + $0x90] sm:$0xff]  ;;  %v383_v41 = vld [vmem:[%s5669_s28 + $0x98] sm:$0xff] }
  0x1a   : > { %349 = vst.msk [vmem:[#allocation2 + $0x138] sm:$0xff] %vm308_vm0, %v5458_v2  ;;  %350 = vst.msk [vmem:[#allocation2 + $0x140] sm:$0xff] %vm308_vm0, %v5458_v2  ;;  %v368_v42 = vld [vmem:[%s5669_s28 + $0x20] sm:$0xff]  ;;  %v369_v48 = vld [vmem:[%s5669_s28 + $0x28] sm:$0xff] }
  0x1b   : > { %352 = vst.msk [vmem:[#allocation2 + $0x150] sm:$0xff] %vm308_vm0, %v5458_v2  ;;  %353 = vst.msk [vmem:[#allocation2 + $0x158] sm:$0xff] %vm308_vm0, %v5458_v2  ;;  %5432 = vrsqrt.f32 %v412_v22  ;;  %v384_v47 = vld [vmem:[%s5669_s28 + $0xa0] sm:$0xff]  ;;  %v385_v49 = vld [vmem:[%s5669_s28 + $0xa8] sm:$0xff] }
  0x1c   : > { %355 = vst.msk [vmem:[#allocation2 + $0x168] sm:$0xff] %vm308_vm0, %v5458_v2  ;;  %356 = vst.msk [vmem:[#allocation2 + $0x170] sm:$0xff] %vm308_vm0, %v5458_v2  ;;  %v386_v3 = vld [vmem:[%s5669_s28 + $0xb0] sm:$0xff]  ;;  %v371_v4 = vld [vmem:[%s5669_s28 + $0x38] sm:$0xff] }
  0x1d   : > { %358 = vst.msk [vmem:[#allocation2 + $0x180] sm:$0xff] %vm308_vm0, %v5458_v2  ;;  %359 = vst.msk [vmem:[#allocation2 + $0x188] sm:$0xff] %vm308_vm0, %v5458_v2  ;;  %v387_v10 = vld [vmem:[%s5669_s28 + $0xb8] sm:$0xff]  ;;  %v372_v11 = vld [vmem:[%s5669_s28 + $0x40] sm:$0xff] }
  0x1e   : > { %361 = vst.msk [vmem:[#allocation2 + $0x198] sm:$0xff] %vm308_vm0, %v5458_v2  ;;  %362 = vst.msk [vmem:[#allocation2 + $0x1a0] sm:$0xff] %vm308_vm0, %v5458_v2  ;;  %v388_v12 = vld [vmem:[%s5669_s28 + $0xc0] sm:$0xff]  ;;  %v373_v17 = vld [vmem:[%s5669_s28 + $0x48] sm:$0xff] }
  0x1f   : > { %312 = vst.msk [vmem:[#allocation2 + $0x10] sm:$0x3] %vm311_vm2, %v5458_v2  ;;  %315 = vst.msk [vmem:[#allocation2 + $0x28] sm:$0x3] %vm311_vm2, %v5458_v2  ;;  %v389_v18 = vld [vmem:[%s5669_s28 + $0xc8] sm:$0xff] }
  0x20   : > { %318 = vst.msk [vmem:[#allocation2 + $0x40] sm:$0x3] %vm311_vm2, %v5458_v2  ;;  %321 = vst.msk [vmem:[#allocation2 + $0x58] sm:$0x3] %vm311_vm2, %v5458_v2 }
  0x21   : > { %324 = vst.msk [vmem:[#allocation2 + $0x70] sm:$0x3] %vm311_vm2, %v5458_v2  ;;  %327 = vst.msk [vmem:[#allocation2 + $0x88] sm:$0x3] %vm311_vm2, %v5458_v2 }
  0x22   : > { %330 = vst.msk [vmem:[#allocation2 + $0xa0] sm:$0x3] %vm311_vm2, %v5458_v2  ;;  %333 = vst.msk [vmem:[#allocation2 + $0xb8] sm:$0x3] %vm311_vm2, %v5458_v2 }
  0x23   : > { %336 = vst.msk [vmem:[#allocation2 + $0xd0] sm:$0x3] %vm311_vm2, %v5458_v2  ;;  %339 = vst.msk [vmem:[#allocation2 + $0xe8] sm:$0x3] %vm311_vm2, %v5458_v2 }
  0x24   : > { %342 = vst.msk [vmem:[#allocation2 + $0x100] sm:$0x3] %vm311_vm2, %v5458_v2  ;;  %345 = vst.msk [vmem:[#allocation2 + $0x118] sm:$0x3] %vm311_vm2, %v5458_v2 }
  0x25   : > { %348 = vst.msk [vmem:[#allocation2 + $0x130] sm:$0x3] %vm311_vm2, %v5458_v2  ;;  %351 = vst.msk [vmem:[#allocation2 + $0x148] sm:$0x3] %vm311_vm2, %v5458_v2 }
  0x26   : > { %354 = vst.msk [vmem:[#allocation2 + $0x160] sm:$0x3] %vm311_vm2, %v5458_v2  ;;  %357 = vst.msk [vmem:[#allocation2 + $0x178] sm:$0x3] %vm311_vm2, %v5458_v2  ;;  %v565_v20 = vld [vmem:[#allocation2 + $0x9] sm:$0xff] }
  0x27   : > { %360 = vst.msk [vmem:[#allocation2 + $0x190] sm:$0x3] %vm311_vm2, %v5458_v2  ;;  %363 = vst.msk [vmem:[#allocation2 + $0x1a8] sm:$0x3] %vm311_vm2, %v5458_v2  ;;  %4958 = vmatmul.mubr.msk.f32.vlgmr.msra.gmra.mxu0 %vm308_vm0, %v565_v20  ;;  %v370_v2 = vld [vmem:[%s5669_s28 + $0x30] sm:$0xff] }
  0x28   : > { %5056 = vmatpush3.msra.mxu0 %v4230_v13  ;;  %v5433_v27 = vpop.eup %5432 }
  0x29   : > { %5155 = vmatprep.subr.mxu0 %v5655_v21  ;;  %v415_v29 = vmul.f32 %v5433_v27, %v414_v25 }
  0x2b   : > { %v417_v35 = vmul.f32 %v415_v29, %v407_v14  ;;  %v5682_v36 = vrot.slane %v415_v29, %v422_v26  ;;  %v390_v29 = vld [vmem:[%s5669_s28 + $0xd0] sm:$0xff] }
  0x2d   : > { %v418_v43 = vsub.f32 %v416_v30, %v417_v35  ;;  %v439_v44 = vmul.f32 %v5682_v36, %v378_v28  ;;  %v440_v45 = vmul.f32 %v5682_v36, %v379_v31  ;;  %v425_v46 = vmul.f32 %v5682_v36, %v364_v32  ;;  %v374_v28 = vld [vmem:[%s5669_s28 + $0x50] sm:$0xff]  ;;  %v375_v30 = vld [vmem:[%s5669_s28 + $0x58] sm:$0xff] }
  0x2e   : > { %v441_v50 = vmul.f32 %v5682_v36, %v380_v33  ;;  %v426_v51 = vmul.f32 %v5682_v36, %v365_v34  ;;  %v442_v52 = vmul.f32 %v5682_v36, %v381_v37  ;;  %v427_v53 = vmul.f32 %v5682_v36, %v366_v38  ;;  %v391_v35 = vld [vmem:[%s5669_s28 + $0xd8] sm:$0xff]  ;;  %v376_v37 = vld [vmem:[%s5669_s28 + $0x60] sm:$0xff] }
  0x2f   : > { %v5700_v54 = vrot.slane %v418_v43, %v422_v26  ;;  %v443_v55 = vmul.f32 %v5682_v36, %v382_v39  ;;  %v428_v56 = vmul.f32 %v5682_v36, %v367_v40  ;;  %v444_v57 = vmul.f32 %v5682_v36, %v383_v41  ;;  %v392_v38 = vld [vmem:[%s5669_s28 + $0xe0] sm:$0xff]  ;;  %v377_v43 = vld [vmem:[%s5669_s28 + $0x68] sm:$0xff] }
  0x30   : > { %v429_v58 = vmul.f32 %v5682_v36, %v368_v42  ;;  %v445_v59 = vmul.f32 %v5682_v36, %v384_v47  ;;  %v430_v60 = vmul.f32 %v5682_v36, %v369_v48  ;;  %v446_v61 = vmul.f32 %v5682_v36, %v385_v49 }
  0x31   : > { %v477_v62 = vadd.f32 %v5700_v54, %v439_v44  ;;  %v478_v63 = vadd.f32 %v5700_v54, %v440_v45  ;;  %v463_v0 = vadd.f32 %v5700_v54, %v425_v46  ;;  %v479_v1 = vadd.f32 %v5700_v54, %v441_v50  ;;  %v393_v44 = vld [vmem:[%s5669_s28 + $0xe8] sm:$0xff] }
  0x32   : > { %v464_v6 = vadd.f32 %v5700_v54, %v426_v51  ;;  %v480_v7 = vadd.f32 %v5700_v54, %v442_v52  ;;  %v465_v8 = vadd.f32 %v5700_v54, %v427_v53  ;;  %v481_v9 = vadd.f32 %v5700_v54, %v443_v55 }
  0x33   : > { %510 = vst.msk [vmem:[#allocation2 + $0xc1] sm:$0xff] %vm308_vm0, %v477_v62  ;;  %511 = vst.msk [vmem:[#allocation2 + $0xc9] sm:$0xff] %vm308_vm0, %v478_v63  ;;  %v466_v13 = vadd.f32 %v5700_v54, %v428_v56  ;;  %v482_v14 = vadd.f32 %v5700_v54, %v444_v57  ;;  %v467_v15 = vadd.f32 %v5700_v54, %v429_v58 }
  0x34   : > { %496 = vst.msk [vmem:[#allocation2 + $0x19] sm:$0xff] %vm308_vm0, %v463_v0  ;;  %512 = vst.msk [vmem:[#allocation2 + $0xd9] sm:$0xff] %vm308_vm0, %v479_v1  ;;  %v483_v16 = vadd.f32 %v5700_v54, %v445_v59  ;;  %v468_v19 = vadd.f32 %v5700_v54, %v430_v60  ;;  %v484_v20 = vadd.f32 %v5700_v54, %v446_v61 }
  0x35   : > { %497 = vst.msk [vmem:[#allocation2 + $0x21] sm:$0xff] %vm308_vm0, %v464_v6  ;;  %513 = vst.msk [vmem:[#allocation2 + $0xe1] sm:$0xff] %vm308_vm0, %v480_v7  ;;  %v431_v22 = vmul.f32 %v5682_v36, %v370_v2  ;;  %v447_v23 = vmul.f32 %v5682_v36, %v386_v3  ;;  %v432_v24 = vmul.f32 %v5682_v36, %v371_v4  ;;  %v5807_v2 = vld [vmem:[%s7160_s1 + $0x18] sm:$0xff] }
  0x36   : > { %498 = vst.msk [vmem:[#allocation2 + $0x31] sm:$0xff] %vm308_vm0, %v465_v8  ;;  %514 = vst.msk [vmem:[#allocation2 + $0xf1] sm:$0xff] %vm308_vm0, %v481_v9  ;;  %v448_v25 = vmul.f32 %v5682_v36, %v387_v10  ;;  %v433_v26 = vmul.f32 %v5682_v36, %v372_v11  ;;  %v449_v27 = vmul.f32 %v5682_v36, %v388_v12 }
  0x37   : > { %499 = vst.msk [vmem:[#allocation2 + $0x39] sm:$0xff] %vm308_vm0, %v466_v13  ;;  %515 = vst.msk [vmem:[#allocation2 + $0xf9] sm:$0xff] %vm308_vm0, %v482_v14  ;;  %v469_v31 = vadd.f32 %v5700_v54, %v431_v22  ;;  %v485_v32 = vadd.f32 %v5700_v54, %v447_v23  ;;  %v434_v33 = vmul.f32 %v5682_v36, %v373_v17 }
  0x38   : > { %500 = vst.msk [vmem:[#allocation2 + $0x49] sm:$0xff] %vm308_vm0, %v467_v15  ;;  %516 = vst.msk [vmem:[#allocation2 + $0x109] sm:$0xff] %vm308_vm0, %v483_v16  ;;  %v450_v34 = vmul.f32 %v5682_v36, %v389_v18  ;;  %v470_v39 = vadd.f32 %v5700_v54, %v432_v24  ;;  %v486_v40 = vadd.f32 %v5700_v54, %v448_v25 }
  0x39   : > { %501 = vst.msk [vmem:[#allocation2 + $0x51] sm:$0xff] %vm308_vm0, %v468_v19  ;;  %517 = vst.msk [vmem:[#allocation2 + $0x111] sm:$0xff] %vm308_vm0, %v484_v20  ;;  %v471_v41 = vadd.f32 %v5700_v54, %v433_v26  ;;  %v487_v42 = vadd.f32 %v5700_v54, %v449_v27  ;;  %v472_v45 = vadd.f32 %v5700_v54, %v434_v33  ;;  %v1242_v33 = vld [vmem:[#allocation2 + $0xa] sm:$0xff] }
  0x3a   : > { %502 = vst.msk [vmem:[#allocation2 + $0x61] sm:$0xff] %vm308_vm0, %v469_v31  ;;  %518 = vst.msk [vmem:[#allocation2 + $0x121] sm:$0xff] %vm308_vm0, %v485_v32  ;;  %v488_v46 = vadd.f32 %v5700_v54, %v450_v34  ;;  %v435_v47 = vmul.f32 %v5682_v36, %v374_v28  ;;  %v451_v48 = vmul.f32 %v5682_v36, %v390_v29  ;;  %v5781_v53 = vld [vmem:[#allocation2 + $0xc1] sm:$0xff]  ;;  %v5783_v55 = vld [vmem:[#allocation2 + $0xc9] sm:$0xff] }
  0x3b   : > { %503 = vst.msk [vmem:[#allocation2 + $0x69] sm:$0xff] %vm308_vm0, %v470_v39  ;;  %519 = vst.msk [vmem:[#allocation2 + $0x129] sm:$0xff] %vm308_vm0, %v486_v40  ;;  %v436_v49 = vmul.f32 %v5682_v36, %v375_v30  ;;  %v452_v50 = vmul.f32 %v5682_v36, %v391_v35  ;;  %v437_v51 = vmul.f32 %v5682_v36, %v376_v37  ;;  %v5785_v56 = vld [vmem:[#allocation2 + $0x19] sm:$0xff]  ;;  %4981 = vmatprep.mubr.msk.f32.mxu1 %vm308_vm0, %v5781_v53  ;;  %v1241_v31 = vld [vmem:[#allocation2 + $0x2] sm:$0xff] }
  0x3c   : > { %504 = vst.msk [vmem:[#allocation2 + $0x79] sm:$0xff] %vm308_vm0, %v471_v41  ;;  %520 = vst.msk [vmem:[#allocation2 + $0x139] sm:$0xff] %vm308_vm0, %v487_v42  ;;  %v453_v52 = vmul.f32 %v5682_v36, %v392_v38  ;;  %v473_v57 = vadd.f32 %v5700_v54, %v435_v47  ;;  %v489_v58 = vadd.f32 %v5700_v54, %v451_v48  ;;  %4960 = vmatprep.mubr.msk.f32.mxu0 %vm308_vm0, %v5785_v56  ;;  %v5797_v61 = vld [vmem:[#allocation2 + $0xd9] sm:$0xff]  ;;  %v5799_v62 = vld [vmem:[#allocation2 + $0x21] sm:$0xff] }
  0x3d   : > { %505 = vst.msk [vmem:[#allocation2 + $0x81] sm:$0xff] %vm308_vm0, %v472_v45  ;;  %521 = vst.msk [vmem:[#allocation2 + $0x141] sm:$0xff] %vm308_vm0, %v488_v46  ;;  %v438_v59 = vmul.f32 %v5682_v36, %v377_v43  ;;  %v454_v60 = vmul.f32 %v5682_v36, %v393_v44  ;;  %v474_v63 = vadd.f32 %v5700_v54, %v436_v49  ;;  %4982 = vmatmul.mubr.msk.f32.vlgmr.msra.gmra.mxu1 %vm308_vm0, %v5783_v55  ;;  %v5813_v3 = vld [vmem:[#allocation2 + $0x31] sm:$0xff]  ;;  %v5823_v8 = vld [vmem:[#allocation2 + $0xe1] sm:$0xff] }
  0x3e   : > { %v490_v0 = vadd.f32 %v5700_v54, %v452_v50  ;;  %v475_v1 = vadd.f32 %v5700_v54, %v437_v51  ;;  %4961 = vmatmul.mubr.msk.f32.gmra.mxu0 %vm308_vm0, %v5799_v62  ;;  %506 = vst.msk [vmem:[#allocation2 + $0x91] sm:$0xff] %vm308_vm0, %v473_v57  ;;  %522 = vst.msk [vmem:[#allocation2 + $0x151] sm:$0xff] %vm308_vm0, %v489_v58  ;;  %v491_v4 = vadd.f32 %v5700_v54, %v453_v52  ;;  %v5825_v9 = vld [vmem:[#allocation2 + $0x39] sm:$0xff]  ;;  %v5832_v10 = vld [vmem:[#allocation2 + $0xf1] sm:$0xff] }
  0x3f   : > { %v476_v6 = vadd.f32 %v5700_v54, %v438_v59  ;;  %v492_v7 = vadd.f32 %v5700_v54, %v454_v60  ;;  %5006 = vmatpush3.msra.mxu1 %v5606_v5  ;;  %4984 = vmatprep.mubr.msk.f32.mxu1 %vm308_vm0, %v5797_v61  ;;  %507 = vst.msk [vmem:[#allocation2 + $0x99] sm:$0xff] %vm308_vm0, %v474_v63  ;;  %v5834_v11 = vld [vmem:[#allocation2 + $0x49] sm:$0xff]  ;;  %v5846_v5 = vld [vmem:[#allocation2 + $0xf9] sm:$0xff] }
  0x40   : > { %523 = vst.msk [vmem:[#allocation2 + $0x159] sm:$0xff] %vm308_vm0, %v490_v0  ;;  %508 = vst.msk [vmem:[#allocation2 + $0xa9] sm:$0xff] %vm308_vm0, %v475_v1  ;;  %4963 = vmatprep.mubr.msk.f32.mxu0 %vm308_vm0, %v5813_v3  ;;  %5105 = vmatprep.subr.mxu1 %v5807_v2  ;;  %v5850_v12 = vld [vmem:[#allocation2 + $0x51] sm:$0xff]  ;;  %v5852_v13 = vld [vmem:[#allocation2 + $0x109] sm:$0xff] }
  0x41   : > { %524 = vst.msk [vmem:[#allocation2 + $0x169] sm:$0xff] %vm308_vm0, %v491_v4  ;;  %509 = vst.msk [vmem:[#allocation2 + $0xb1] sm:$0xff] %vm308_vm0, %v476_v6  ;;  %4985 = vmatmul.mubr.msk.f32.gmra.mxu1 %vm308_vm0, %v5823_v8  ;;  %v5854_v14 = vld [vmem:[#allocation2 + $0x61] sm:$0xff]  ;;  %v5862_v15 = vld [vmem:[#allocation2 + $0x111] sm:$0xff] }
  0x42   : > { %525 = vst.msk [vmem:[#allocation2 + $0x171] sm:$0xff] %vm308_vm0, %v492_v7  ;;  %4964 = vmatmul.mubr.msk.f32.gmra.mxu0 %vm308_vm0, %v5825_v9  ;;  %4987 = vmatprep.mubr.msk.f32.mxu1 %vm308_vm0, %v5832_v10  ;;  %v5866_v16 = vld [vmem:[#allocation2 + $0x69] sm:$0xff]  ;;  %v5868_v17 = vld [vmem:[#allocation2 + $0x121] sm:$0xff]  ;;  %v395_v39 = vld [vmem:[%s5669_s28 + $0xf8] sm:$0xff] }
  0x43   : > { %4966 = vmatprep.mubr.msk.f32.mxu0 %vm308_vm0, %v5834_v11  ;;  %v5870_v18 = vld [vmem:[#allocation2 + $0x79] sm:$0xff]  ;;  %v5878_v19 = vld [vmem:[#allocation2 + $0x129] sm:$0xff]  ;;  %v456_v43 = vmul.f32 %v5682_v36, %v395_v39 }
  0x44   : > { %v5882_v20 = vld [vmem:[#allocation2 + $0x81] sm:$0xff]  ;;  %v5884_v22 = vld [vmem:[#allocation2 + $0x139] sm:$0xff]  ;;  %v5932_v37 = vld [vmem:[%s7160_s1 + $0x30] sm:$0xff] }
  0x45   : > { %4988 = vmatmul.mubr.msk.f32.gmra.mxu1 %vm308_vm0, %v5846_v5  ;;  %v5886_v23 = vld [vmem:[#allocation2 + $0x91] sm:$0xff]  ;;  %v5894_v24 = vld [vmem:[#allocation2 + $0x141] sm:$0xff]  ;;  %v494_v47 = vadd.f32 %v5700_v54, %v456_v43 }
  0x46   : > { %4967 = vmatmul.mubr.msk.f32.gmra.mxu0 %vm308_vm0, %v5850_v12  ;;  %4990 = vmatprep.mubr.msk.f32.mxu1 %vm308_vm0, %v5852_v13  ;;  %v5898_v25 = vld [vmem:[#allocation2 + $0x99] sm:$0xff]  ;;  %v5900_v26 = vld [vmem:[#allocation2 + $0x151] sm:$0xff]  ;;  %v532_v40 = vld [vmem:[#allocation2 + $0x8] sm:$0xff] }
  0x47   : > { %4969 = vmatprep.mubr.msk.f32.mxu0 %vm308_vm0, %v5854_v14  ;;  %v5902_v27 = vld [vmem:[#allocation2 + $0xa9] sm:$0xff]  ;;  %v5910_v28 = vld [vmem:[#allocation2 + $0x159] sm:$0xff]  ;;  %527 = vst.msk [vmem:[#allocation2 + $0x189] sm:$0xff] %vm308_vm0, %v494_v47 }
  0x48   : > { %v5914_v29 = vld [vmem:[#allocation2 + $0xb1] sm:$0xff]  ;;  %v5916_v30 = vld [vmem:[#allocation2 + $0x169] sm:$0xff]  ;;  %v531_v34 = vld [vmem:[#allocation2] sm:$0xff] }
  0x49   : > { %4991 = vmatmul.mubr.msk.f32.gmra.mxu1 %vm308_vm0, %v5862_v15  ;;  %v5924_v32 = vld [vmem:[#allocation2 + $0x171] sm:$0xff]  ;;  %v5927_v35 = vld [vmem:[#allocation2 + $0x1a] sm:$0xff]  ;;  %v5941_v41 = vld [vmem:[#allocation2 + $0x22] sm:$0xff] }
  0x4a   : > { %4970 = vmatmul.mubr.msk.f32.gmra.mxu0 %vm308_vm0, %v5866_v16  ;;  %4993 = vmatprep.mubr.msk.f32.mxu1 %vm308_vm0, %v5868_v17  ;;  %7222 = vst [vmem:[#allocation3_spill] sm:$0xff] %v5927_v35  ;;  %v394_v38 = vld [vmem:[%s5669_s28 + $0xf0] sm:$0xff]  ;;  %7223 = vst [vmem:[#allocation4_spill] sm:$0xff] %v5941_v41  ;;  %v5945_v44 = vld [vmem:[#allocation2 + $0x18] sm:$0xff] }
  0x4b   : > { %4972 = vmatprep.mubr.msk.f32.mxu0 %vm308_vm0, %v5870_v18  ;;  %v455_v42 = vmul.f32 %v5682_v36, %v394_v38  ;;  %v5950_v45 = vld [vmem:[#allocation2 + $0x32] sm:$0xff]  ;;  %v5955_v46 = vld [vmem:[%s7160_s1 + $0x28] sm:$0xff]  ;;  %v5965_v36 = vld [vmem:[#allocation2 + $0x20] sm:$0xff] }
  0x4c   : > { %7224 = vst [vmem:[#allocation5_spill] sm:$0xff] %v5950_v45  ;;  %v5967_v48 = vld [vmem:[#allocation2 + $0x3a] sm:$0xff]  ;;  %v5971_v49 = vld [vmem:[#allocation2 + $0x30] sm:$0xff]  ;;  %v5990_v52 = vld [vmem:[#allocation2 + $0x48] sm:$0xff] }
  0x4d   : > { %4994 = vmatmul.mubr.msk.f32.gmra.mxu1 %vm308_vm0, %v5878_v19  ;;  %7225 = vst [vmem:[#allocation6_spill] sm:$0xff] %v5967_v48  ;;  %v5984_v50 = vld [vmem:[#allocation2 + $0x38] sm:$0xff]  ;;  %v5992_v57 = vld [vmem:[#allocation2 + $0x62] sm:$0xff]  ;;  %v6000_v58 = vld [vmem:[#allocation2 + $0x50] sm:$0xff] }
  0x4e   : > { %4973 = vmatmul.mubr.msk.f32.gmra.mxu0 %vm308_vm0, %v5882_v20  ;;  %4996 = vmatprep.mubr.msk.f32.mxu1 %vm308_vm0, %v5884_v22  ;;  %v5988_v51 = vld [vmem:[#allocation2 + $0x52] sm:$0xff]  ;;  %7228 = vst [vmem:[#allocation9_spill] sm:$0xff] %v5992_v57  ;;  %v6004_v59 = vld [vmem:[#allocation2 + $0x6a] sm:$0xff]  ;;  %v6006_v60 = vld [vmem:[#allocation2 + $0x60] sm:$0xff] }
  0x4f   : > { %4975 = vmatprep.mubr.msk.f32.mxu0 %vm308_vm0, %v5886_v23  ;;  %7227 = vst [vmem:[#allocation8_spill] sm:$0xff] %v5988_v51  ;;  %7229 = vst [vmem:[#allocation10_spill] sm:$0xff] %v6004_v59  ;;  %v6008_v63 = vld [vmem:[#allocation2 + $0x7a] sm:$0xff]  ;;  %v6016_v0 = vld [vmem:[#allocation2 + $0x68] sm:$0xff] }
  0x50   : > { %7230 = vst [vmem:[#allocation11_spill] sm:$0xff] %v6008_v63  ;;  %v6020_v1 = vld [vmem:[#allocation2 + $0x82] sm:$0xff]  ;;  %v6024_v4 = vld [vmem:[#allocation2 + $0x92] sm:$0xff]  ;;  %v6036_v7 = vld [vmem:[#allocation2 + $0x9a] sm:$0xff] }
  0x51   : > { %4997 = vmatmul.mubr.msk.f32.gmra.mxu1 %vm308_vm0, %v5894_v24  ;;  %7231 = vst [vmem:[#allocation12_spill] sm:$0xff] %v6020_v1  ;;  %7232 = vst [vmem:[#allocation13_spill] sm:$0xff] %v6024_v4  ;;  %v6032_v6 = vld [vmem:[#allocation2 + $0x80] sm:$0xff]  ;;  %v6052_v38 = vld [vmem:[#allocation2 + $0xb2] sm:$0xff] }
  0x52   : > { %4976 = vmatmul.mubr.msk.f32.gmra.mxu0 %vm308_vm0, %v5898_v25  ;;  %4999 = vmatprep.mubr.msk.f32.mxu1 %vm308_vm0, %v5900_v26  ;;  %7233 = vst [vmem:[#allocation14_spill] sm:$0xff] %v6036_v7  ;;  %7235 = vst [vmem:[#allocation16_spill] sm:$0xff] %v6052_v38  ;;  %v6054_v39 = vld [vmem:[#allocation2 + $0xa8] sm:$0xff]  ;;  %v6072_v47 = vld [vmem:[#allocation2 + $0xda] sm:$0xff] }
  0x53   : > { %4978 = vmatprep.mubr.msk.f32.mxu0 %vm308_vm0, %v5902_v27  ;;  %v6068_v43 = vld [vmem:[#allocation2 + $0xca] sm:$0xff]  ;;  %7238 = vst [vmem:[#allocation19_spill] sm:$0xff] %v6072_v47 }
  0x54   : > { %7237 = vst [vmem:[#allocation18_spill] sm:$0xff] %v6068_v43 }
  0x55   : > { %5000 = vmatmul.mubr.msk.f32.gmra.mxu1 %vm308_vm0, %v5910_v28 }
  0x56   : > { %4979 = vmatmul.mubr.msk.f32.gmra.mxu0 %vm308_vm0, %v5914_v29  ;;  %5002 = vmatprep.mubr.msk.f32.mxu1 %vm308_vm0, %v5916_v30 }
  0x57   : > { %5057 = vmatprep.mubr.msk.f32.mxu0 %vm308_vm0, %v1241_v31  ;;  %v6038_v31 = vld [vmem:[#allocation2 + $0x90] sm:$0xff] }
  0x59   : > { %5003 = vmatmul.mubr.msk.f32.gmra.mxu1 %vm308_vm0, %v5924_v32 }
  0x5a   : > { %5058 = vmatmul.mubr.msk.f32.vlgmr.msra.gmra.mxu0 %vm308_vm0, %v1242_v33  ;;  %5007 = vmatprep.mubr.msk.f32.mxu1 %vm308_vm0, %v531_v34  ;;  %v6040_v33 = vld [vmem:[#allocation2 + $0xaa] sm:$0xff]  ;;  %v6048_v34 = vld [vmem:[#allocation2 + $0x98] sm:$0xff] }
  0x5b   : > { %5156 = vmatpush3.msra.mxu0 %v5655_v21  ;;  %5060 = vmatprep.mubr.msk.f32.mxu0 %vm308_vm0, %v5927_v35  ;;  %v493_v21 = vadd.f32 %v5700_v54, %v455_v42  ;;  %v5975_v54 = vld [vmem:[#allocation2 + $0x4a] sm:$0xff]  ;;  %7234 = vst [vmem:[#allocation15_spill] sm:$0xff] %v6040_v33 }
  0x5c   : > { %5255 = vmatprep.subr.mxu0 %v5932_v37  ;;  %7226 = vst [vmem:[#allocation7_spill] sm:$0xff] %v5975_v54  ;;  %v6064_v42 = vld [vmem:[#allocation2 + $0xb0] sm:$0xff]  ;;  %v6182_v35 = vld [vmem:[#allocation2 + $0x168] sm:$0xff] }
  0x5d   : > { %5008 = vmatmul.mubr.msk.f32.vlgmr.msra.gmra.mxu1 %vm308_vm0, %v532_v40  ;;  %526 = vst.msk [vmem:[#allocation2 + $0x181] sm:$0xff] %vm308_vm0, %v493_v21  ;;  %v6056_v40 = vld [vmem:[#allocation2 + $0xc2] sm:$0xff] }
  0x5e   : > { %5061 = vmatmul.mubr.msk.f32.gmra.mxu0 %vm308_vm0, %v5941_v41  ;;  %5106 = vmatpush3.msra.mxu1 %v5807_v2  ;;  %v6022_v2 = vld [vmem:[#allocation2 + $0x78] sm:$0xff]  ;;  %7236 = vst [vmem:[#allocation17_spill] sm:$0xff] %v6056_v40  ;;  %v6070_v21 = vld [vmem:[#allocation2 + $0xc0] sm:$0xff]  ;;  %v6168_v41 = vld [vmem:[#allocation2 + $0x16a] sm:$0xff] }
  0x5f   : > { %5010 = vmatprep.mubr.msk.f32.mxu1 %vm308_vm0, %v5945_v44  ;;  %5063 = vmatprep.mubr.msk.f32.mxu0 %vm308_vm0, %v5950_v45  ;;  %v6166_v45 = vld [vmem:[#allocation2 + $0x150] sm:$0xff]  ;;  %7250 = vst [vmem:[#allocation31_spill] sm:$0xff] %v6168_v41 }
  0x60   : > { %5205 = vmatprep.subr.mxu1 %v5955_v46 }
  0x61   : > { %5011 = vmatmul.mubr.msk.f32.gmra.mxu1 %vm308_vm0, %v5965_v36 }
  0x62   : > { %5064 = vmatmul.mubr.msk.f32.gmra.mxu0 %vm308_vm0, %v5967_v48  ;;  %5013 = vmatprep.mubr.msk.f32.mxu1 %vm308_vm0, %v5971_v49  ;;  %v6152_v48 = vld [vmem:[#allocation2 + $0x152] sm:$0xff] }
  0x63   : > { %5066 = vmatprep.mubr.msk.f32.mxu0 %vm308_vm0, %v5975_v54  ;;  %v6150_v54 = vld [vmem:[#allocation2 + $0x138] sm:$0xff]  ;;  %7248 = vst [vmem:[#allocation29_spill] sm:$0xff] %v6152_v48 }
  0x65   : > { %5014 = vmatmul.mubr.msk.f32.gmra.mxu1 %vm308_vm0, %v5984_v50 }
  0x66   : > { %5067 = vmatmul.mubr.msk.f32.gmra.mxu0 %vm308_vm0, %v5988_v51  ;;  %5016 = vmatprep.mubr.msk.f32.mxu1 %vm308_vm0, %v5990_v52  ;;  %v6136_v51 = vld [vmem:[#allocation2 + $0x13a] sm:$0xff] }
  0x67   : > { %5069 = vmatprep.mubr.msk.f32.mxu0 %vm308_vm0, %v5992_v57  ;;  %v6134_v57 = vld [vmem:[#allocation2 + $0x120] sm:$0xff]  ;;  %7246 = vst [vmem:[#allocation27_spill] sm:$0xff] %v6136_v51 }
  0x69   : > { %5017 = vmatmul.mubr.msk.f32.gmra.mxu1 %vm308_vm0, %v6000_v58 }
  0x6a   : > { %5070 = vmatmul.mubr.msk.f32.gmra.mxu0 %vm308_vm0, %v6004_v59  ;;  %5019 = vmatprep.mubr.msk.f32.mxu1 %vm308_vm0, %v6006_v60  ;;  %v6120_v59 = vld [vmem:[#allocation2 + $0x122] sm:$0xff] }
  0x6b   : > { %5072 = vmatprep.mubr.msk.f32.mxu0 %vm308_vm0, %v6008_v63  ;;  %v6118_v63 = vld [vmem:[#allocation2 + $0x108] sm:$0xff]  ;;  %7244 = vst [vmem:[#allocation25_spill] sm:$0xff] %v6120_v59 }
  0x6d   : > { %5020 = vmatmul.mubr.msk.f32.gmra.mxu1 %vm308_vm0, %v6016_v0 }
  0x6e   : > { %5073 = vmatmul.mubr.msk.f32.gmra.mxu0 %vm308_vm0, %v6020_v1  ;;  %5022 = vmatprep.mubr.msk.f32.mxu1 %vm308_vm0, %v6022_v2  ;;  %v6104_v1 = vld [vmem:[#allocation2 + $0x10a] sm:$0xff] }
  0x6f   : > { %5075 = vmatprep.mubr.msk.f32.mxu0 %vm308_vm0, %v6024_v4  ;;  %v6102_v4 = vld [vmem:[#allocation2 + $0xf0] sm:$0xff]  ;;  %7242 = vst [vmem:[#allocation23_spill] sm:$0xff] %v6104_v1 }
  0x71   : > { %5023 = vmatmul.mubr.msk.f32.gmra.mxu1 %vm308_vm0, %v6032_v6 }
  0x72   : > { %5076 = vmatmul.mubr.msk.f32.gmra.mxu0 %vm308_vm0, %v6036_v7  ;;  %5025 = vmatprep.mubr.msk.f32.mxu1 %vm308_vm0, %v6038_v31  ;;  %v6088_v7 = vld [vmem:[#allocation2 + $0xf2] sm:$0xff] }
  0x73   : > { %5078 = vmatprep.mubr.msk.f32.mxu0 %vm308_vm0, %v6040_v33  ;;  %v6086_v33 = vld [vmem:[#allocation2 + $0xd8] sm:$0xff]  ;;  %7240 = vst [vmem:[#allocation21_spill] sm:$0xff] %v6088_v7 }
  0x75   : > { %5026 = vmatmul.mubr.msk.f32.gmra.mxu1 %vm308_vm0, %v6048_v34 }
  0x76   : > { %5079 = vmatmul.mubr.msk.f32.gmra.mxu0 %vm308_vm0, %v6052_v38  ;;  %5028 = vmatprep.mubr.msk.f32.mxu1 %vm308_vm0, %v6054_v39  ;;  %v6080_v38 = vld [vmem:[#allocation2 + $0xc8] sm:$0xff] }
  0x77   : > { %5081 = vmatprep.mubr.msk.f32.mxu0 %vm308_vm0, %v6056_v40  ;;  %v6084_v40 = vld [vmem:[#allocation2 + $0xe2] sm:$0xff] }
  0x78   : > { %7239 = vst [vmem:[#allocation20_spill] sm:$0xff] %v6084_v40 }
  0x79   : > { %5029 = vmatmul.mubr.msk.f32.gmra.mxu1 %vm308_vm0, %v6064_v42 }
  0x7a   : > { %5082 = vmatmul.mubr.msk.f32.gmra.mxu0 %vm308_vm0, %v6068_v43  ;;  %5031 = vmatprep.mubr.msk.f32.mxu1 %vm308_vm0, %v6070_v21  ;;  %v6096_v43 = vld [vmem:[#allocation2 + $0xe0] sm:$0xff] }
  0x7b   : > { %5084 = vmatprep.mubr.msk.f32.mxu0 %vm308_vm0, %v6072_v47  ;;  %v6100_v47 = vld [vmem:[#allocation2 + $0xfa] sm:$0xff] }
  0x7c   : > { %7241 = vst [vmem:[#allocation22_spill] sm:$0xff] %v6100_v47 }
  0x7d   : > { %5032 = vmatmul.mubr.msk.f32.gmra.mxu1 %vm308_vm0, %v6080_v38 }
  0x7e   : > { %5085 = vmatmul.mubr.msk.f32.gmra.mxu0 %vm308_vm0, %v6084_v40  ;;  %5034 = vmatprep.mubr.msk.f32.mxu1 %vm308_vm0, %v6086_v33  ;;  %v6112_v40 = vld [vmem:[#allocation2 + $0xf8] sm:$0xff] }
  0x7f   : > { %5087 = vmatprep.mubr.msk.f32.mxu0 %vm308_vm0, %v6088_v7  ;;  %v6116_v7 = vld [vmem:[#allocation2 + $0x112] sm:$0xff] }
  0x80   : > { %7243 = vst [vmem:[#allocation24_spill] sm:$0xff] %v6116_v7 }
  0x81   : > { %5035 = vmatmul.mubr.msk.f32.gmra.mxu1 %vm308_vm0, %v6096_v43 }
  0x82   : > { %5088 = vmatmul.mubr.msk.f32.gmra.mxu0 %vm308_vm0, %v6100_v47  ;;  %5037 = vmatprep.mubr.msk.f32.mxu1 %vm308_vm0, %v6102_v4  ;;  %v6128_v47 = vld [vmem:[#allocation2 + $0x110] sm:$0xff] }
  0x83   : > { %5090 = vmatprep.mubr.msk.f32.mxu0 %vm308_vm0, %v6104_v1  ;;  %v6132_v1 = vld [vmem:[#allocation2 + $0x12a] sm:$0xff] }
  0x84   : > { %7245 = vst [vmem:[#allocation26_spill] sm:$0xff] %v6132_v1 }
  0x85   : > { %5038 = vmatmul.mubr.msk.f32.gmra.mxu1 %vm308_vm0, %v6112_v40 }
  0x86   : > { %5091 = vmatmul.mubr.msk.f32.gmra.mxu0 %vm308_vm0, %v6116_v7  ;;  %5040 = vmatprep.mubr.msk.f32.mxu1 %vm308_vm0, %v6118_v63  ;;  %v6144_v7 = vld [vmem:[#allocation2 + $0x128] sm:$0xff] }
  0x87   : > { %5093 = vmatprep.mubr.msk.f32.mxu0 %vm308_vm0, %v6120_v59  ;;  %v6148_v59 = vld [vmem:[#allocation2 + $0x142] sm:$0xff] }
  0x88   : > { %7247 = vst [vmem:[#allocation28_spill] sm:$0xff] %v6148_v59 }
  0x89   : > { %5041 = vmatmul.mubr.msk.f32.gmra.mxu1 %vm308_vm0, %v6128_v47 }
  0x8a   : > { %5094 = vmatmul.mubr.msk.f32.gmra.mxu0 %vm308_vm0, %v6132_v1  ;;  %5043 = vmatprep.mubr.msk.f32.mxu1 %vm308_vm0, %v6134_v57  ;;  %v6160_v1 = vld [vmem:[#allocation2 + $0x140] sm:$0xff] }
  0x8b   : > { %5096 = vmatprep.mubr.msk.f32.mxu0 %vm308_vm0, %v6136_v51  ;;  %v6164_v51 = vld [vmem:[#allocation2 + $0x15a] sm:$0xff] }
  0x8c   : > { %7249 = vst [vmem:[#allocation30_spill] sm:$0xff] %v6164_v51 }
  0x8d   : > { %5044 = vmatmul.mubr.msk.f32.gmra.mxu1 %vm308_vm0, %v6144_v7 }
  0x8e   : > { %5097 = vmatmul.mubr.msk.f32.gmra.mxu0 %vm308_vm0, %v6148_v59  ;;  %5046 = vmatprep.mubr.msk.f32.mxu1 %vm308_vm0, %v6150_v54  ;;  %v6176_v59 = vld [vmem:[#allocation2 + $0x158] sm:$0xff] }
  0x8f   : > { %5099 = vmatprep.mubr.msk.f32.mxu0 %vm308_vm0, %v6152_v48  ;;  %v6180_v48 = vld [vmem:[#allocation2 + $0x172] sm:$0xff] }
  0x91   : > { %5047 = vmatmul.mubr.msk.f32.gmra.mxu1 %vm308_vm0, %v6160_v1 }
  0x92   : > { %5100 = vmatmul.mubr.msk.f32.gmra.mxu0 %vm308_vm0, %v6164_v51  ;;  %5049 = vmatprep.mubr.msk.f32.mxu1 %vm308_vm0, %v6166_v45  ;;  %v6190_v51 = vld [vmem:[#allocation2 + $0x170] sm:$0xff] }
  0x93   : > { %5102 = vmatprep.mubr.msk.f32.mxu0 %vm308_vm0, %v6168_v41  ;;  %v6197_v41 = vld [vmem:[%s7160_s1 + $0x40] sm:$0xff] }
  0x95   : > { %5050 = vmatmul.mubr.msk.f32.gmra.mxu1 %vm308_vm0, %v6176_v59 }
  0x96   : > { %5103 = vmatmul.mubr.msk.f32.gmra.mxu0 %vm308_vm0, %v6180_v48  ;;  %5052 = vmatprep.mubr.msk.f32.mxu1 %vm308_vm0, %v6182_v35 }
  0x97   : > { %5157 = vmatprep.mubr.msk.f32.mxu0 %vm308_vm0, %v5785_v56  ;;  %v6212_v56 = vld [vmem:[%s7160_s1 + $0x38] sm:$0xff] }
  0x99   : > { %5053 = vmatmul.mubr.msk.f32.gmra.mxu1 %vm308_vm0, %v6190_v51 }
  0x9a   : > { %5158 = vmatmul.mubr.msk.f32.vlgmr.msra.gmra.mxu0 %vm308_vm0, %v5799_v62  ;;  %5107 = vmatprep.mubr.msk.f32.mxu1 %vm308_vm0, %v5945_v44  ;;  %v6340_v62 = vld [vmem:[#allocation2 + $0x188] sm:$0xff] }
  0x9b   : > { %5256 = vmatpush3.msra.mxu0 %v5932_v37  ;;  %5160 = vmatprep.mubr.msk.f32.mxu0 %vm308_vm0, %v5813_v3  ;;  %v7253_v3 = vld [vmem:[#allocation3_spill] sm:$0xff] }
  0x9c   : > { %5355 = vmatprep.subr.mxu0 %v6197_v41 }
  0x9d   : > { %5108 = vmatmul.mubr.msk.f32.vlgmr.msra.gmra.mxu1 %vm308_vm0, %v5965_v36 }
  0x9e   : > { %5161 = vmatmul.mubr.msk.f32.gmra.mxu0 %vm308_vm0, %v5825_v9  ;;  %5206 = vmatpush3.msra.mxu1 %v5955_v46  ;;  %v7255_v9 = vld [vmem:[#allocation5_spill] sm:$0xff]  ;;  %v7273_v46 = vld [vmem:[#allocation23_spill] sm:$0xff] }
  0x9f   : > { %5110 = vmatprep.mubr.msk.f32.mxu1 %vm308_vm0, %v5971_v49  ;;  %5163 = vmatprep.mubr.msk.f32.mxu0 %vm308_vm0, %v5834_v11  ;;  %v7257_v11 = vld [vmem:[#allocation7_spill] sm:$0xff] }
  0xa0   : > { %5305 = vmatprep.subr.mxu1 %v6212_v56 }
  0xa1   : > { %5111 = vmatmul.mubr.msk.f32.gmra.mxu1 %vm308_vm0, %v5984_v50 }
  0xa2   : > { %5164 = vmatmul.mubr.msk.f32.gmra.mxu0 %vm308_vm0, %v5850_v12  ;;  %5113 = vmatprep.mubr.msk.f32.mxu1 %vm308_vm0, %v5990_v52  ;;  %v7259_v12 = vld [vmem:[#allocation9_spill] sm:$0xff] }
  0xa3   : > { %5166 = vmatprep.mubr.msk.f32.mxu0 %vm308_vm0, %v5854_v14  ;;  %v7261_v14 = vld [vmem:[#allocation11_spill] sm:$0xff] }
  0xa5   : > { %5114 = vmatmul.mubr.msk.f32.gmra.mxu1 %vm308_vm0, %v6000_v58 }
  0xa6   : > { %5167 = vmatmul.mubr.msk.f32.gmra.mxu0 %vm308_vm0, %v5866_v16  ;;  %5116 = vmatprep.mubr.msk.f32.mxu1 %vm308_vm0, %v6006_v60  ;;  %v7263_v16 = vld [vmem:[#allocation13_spill] sm:$0xff] }
  0xa7   : > { %5169 = vmatprep.mubr.msk.f32.mxu0 %vm308_vm0, %v5870_v18  ;;  %v7265_v18 = vld [vmem:[#allocation15_spill] sm:$0xff] }
  0xa9   : > { %5117 = vmatmul.mubr.msk.f32.gmra.mxu1 %vm308_vm0, %v6016_v0 }
  0xaa   : > { %5170 = vmatmul.mubr.msk.f32.gmra.mxu0 %vm308_vm0, %v5882_v20  ;;  %5119 = vmatprep.mubr.msk.f32.mxu1 %vm308_vm0, %v6022_v2 }
  0xab   : > { %5172 = vmatprep.mubr.msk.f32.mxu0 %vm308_vm0, %v5886_v23  ;;  %v7268_v23 = vld [vmem:[#allocation18_spill] sm:$0xff] }
  0xad   : > { %5120 = vmatmul.mubr.msk.f32.gmra.mxu1 %vm308_vm0, %v6032_v6 }
  0xae   : > { %5173 = vmatmul.mubr.msk.f32.gmra.mxu0 %vm308_vm0, %v5898_v25  ;;  %5122 = vmatprep.mubr.msk.f32.mxu1 %vm308_vm0, %v6038_v31  ;;  %v7269_v25 = vld [vmem:[#allocation19_spill] sm:$0xff] }
  0xaf   : > { %5175 = vmatprep.mubr.msk.f32.mxu0 %vm308_vm0, %v5902_v27  ;;  %v7270_v27 = vld [vmem:[#allocation20_spill] sm:$0xff] }
  0xb1   : > { %5123 = vmatmul.mubr.msk.f32.gmra.mxu1 %vm308_vm0, %v6048_v34 }
  0xb2   : > { %5176 = vmatmul.mubr.msk.f32.gmra.mxu0 %vm308_vm0, %v5914_v29  ;;  %5125 = vmatprep.mubr.msk.f32.mxu1 %vm308_vm0, %v6054_v39  ;;  %v7271_v29 = vld [vmem:[#allocation21_spill] sm:$0xff] }
  0xb3   : > { %5178 = vmatprep.mubr.msk.f32.mxu0 %vm308_vm0, %v5781_v53  ;;  %v6320_v53 = vld [vmem:[#allocation2 + $0x181] sm:$0xff] }
  0xb4   : > { %7251 = vst [vmem:[#allocation32_spill] sm:$0xff] %v6320_v53 }
  0xb5   : > { %5126 = vmatmul.mubr.msk.f32.gmra.mxu1 %vm308_vm0, %v6064_v42 }
  0xb6   : > { %5179 = vmatmul.mubr.msk.f32.gmra.mxu0 %vm308_vm0, %v5783_v55  ;;  %5128 = vmatprep.mubr.msk.f32.mxu1 %vm308_vm0, %v6070_v21  ;;  %v6330_v55 = vld [vmem:[#allocation2 + $0x189] sm:$0xff] }
  0xb7   : > { %5181 = vmatprep.mubr.msk.f32.mxu0 %vm308_vm0, %v5797_v61  ;;  %7252 = vst [vmem:[#allocation33_spill] sm:$0xff] %v6330_v55  ;;  %v6332_v61 = vld [vmem:[#allocation2 + $0x180] sm:$0xff] }
  0xb9   : > { %5129 = vmatmul.mubr.msk.f32.gmra.mxu1 %vm308_vm0, %v6080_v38 }
  0xba   : > { %5182 = vmatmul.mubr.msk.f32.gmra.mxu0 %vm308_vm0, %v5823_v8  ;;  %5131 = vmatprep.mubr.msk.f32.mxu1 %vm308_vm0, %v6086_v33  ;;  %v7254_v8 = vld [vmem:[#allocation4_spill] sm:$0xff] }
  0xbb   : > { %5184 = vmatprep.mubr.msk.f32.mxu0 %vm308_vm0, %v5832_v10  ;;  %v7256_v10 = vld [vmem:[#allocation6_spill] sm:$0xff] }
  0xbd   : > { %5132 = vmatmul.mubr.msk.f32.gmra.mxu1 %vm308_vm0, %v6096_v43 }
  0xbe   : > { %5185 = vmatmul.mubr.msk.f32.gmra.mxu0 %vm308_vm0, %v5846_v5  ;;  %5134 = vmatprep.mubr.msk.f32.mxu1 %vm308_vm0, %v6102_v4  ;;  %v7258_v5 = vld [vmem:[#allocation8_spill] sm:$0xff] }
  0xbf   : > { %5187 = vmatprep.mubr.msk.f32.mxu0 %vm308_vm0, %v5852_v13  ;;  %v7260_v13 = vld [vmem:[#allocation10_spill] sm:$0xff] }
  0xc1   : > { %5135 = vmatmul.mubr.msk.f32.gmra.mxu1 %vm308_vm0, %v6112_v40 }
  0xc2   : > { %5188 = vmatmul.mubr.msk.f32.gmra.mxu0 %vm308_vm0, %v5862_v15  ;;  %5137 = vmatprep.mubr.msk.f32.mxu1 %vm308_vm0, %v6118_v63  ;;  %v7262_v15 = vld [vmem:[#allocation12_spill] sm:$0xff] }
  0xc3   : > { %5190 = vmatprep.mubr.msk.f32.mxu0 %vm308_vm0, %v5868_v17  ;;  %v7264_v17 = vld [vmem:[#allocation14_spill] sm:$0xff] }
  0xc5   : > { %5138 = vmatmul.mubr.msk.f32.gmra.mxu1 %vm308_vm0, %v6128_v47 }
  0xc6   : > { %5191 = vmatmul.mubr.msk.f32.gmra.mxu0 %vm308_vm0, %v5878_v19  ;;  %5140 = vmatprep.mubr.msk.f32.mxu1 %vm308_vm0, %v6134_v57  ;;  %v7266_v19 = vld [vmem:[#allocation16_spill] sm:$0xff] }
  0xc7   : > { %5193 = vmatprep.mubr.msk.f32.mxu0 %vm308_vm0, %v5884_v22  ;;  %v7267_v22 = vld [vmem:[#allocation17_spill] sm:$0xff] }
  0xc9   : > { %5141 = vmatmul.mubr.msk.f32.gmra.mxu1 %vm308_vm0, %v6144_v7 }
  0xca   : > { %5194 = vmatmul.mubr.msk.f32.gmra.mxu0 %vm308_vm0, %v5894_v24  ;;  %5143 = vmatprep.mubr.msk.f32.mxu1 %vm308_vm0, %v6150_v54 }
  0xcb   : > { %5196 = vmatprep.mubr.msk.f32.mxu0 %vm308_vm0, %v5900_v26 }
  0xcd   : > { %5144 = vmatmul.mubr.msk.f32.gmra.mxu1 %vm308_vm0, %v6160_v1 }
  0xce   : > { %5197 = vmatmul.mubr.msk.f32.gmra.mxu0 %vm308_vm0, %v5910_v28  ;;  %5146 = vmatprep.mubr.msk.f32.mxu1 %vm308_vm0, %v6166_v45 }
  0xcf   : > { %5199 = vmatprep.mubr.msk.f32.mxu0 %vm308_vm0, %v5916_v30 }
  0xd1   : > { %5147 = vmatmul.mubr.msk.f32.gmra.mxu1 %vm308_vm0, %v6176_v59 }
  0xd2   : > { %5200 = vmatmul.mubr.msk.f32.gmra.mxu0 %vm308_vm0, %v5924_v32  ;;  %5149 = vmatprep.mubr.msk.f32.mxu1 %vm308_vm0, %v6182_v35 }
  0xd3   : > { %5202 = vmatprep.mubr.msk.f32.mxu0 %vm308_vm0, %v6320_v53 }
  0xd5   : > { %5150 = vmatmul.mubr.msk.f32.gmra.mxu1 %vm308_vm0, %v6190_v51 }
  0xd6   : > { %5203 = vmatmul.mubr.msk.f32.gmra.mxu0 %vm308_vm0, %v6330_v55  ;;  %5152 = vmatprep.mubr.msk.f32.mxu1 %vm308_vm0, %v6332_v61 }
  0xd7   : > { %5257 = vmatprep.mubr.msk.f32.mxu0 %vm308_vm0, %v5971_v49 }
  0xd9   : > { %5153 = vmatmul.mubr.msk.f32.gmra.mxu1 %vm308_vm0, %v6340_v62 }
  0xda   : > { %5258 = vmatmul.mubr.msk.f32.vlgmr.msra.gmra.mxu0 %vm308_vm0, %v5984_v50  ;;  %5207 = vmatprep.mubr.msk.f32.mxu1 %vm308_vm0, %v7253_v3 }
  0xdb   : > { %5356 = vmatpush3.msra.mxu0 %v6197_v41  ;;  %5260 = vmatprep.mubr.msk.f32.mxu0 %vm308_vm0, %v5990_v52  ;;  %v7272_v41 = vld [vmem:[#allocation22_spill] sm:$0xff]  ;;  %v7274_v52 = vld [vmem:[#allocation24_spill] sm:$0xff] }
  0xdd   : > { %5208 = vmatmul.mubr.msk.f32.vlgmr.msra.gmra.mxu1 %vm308_vm0, %v7254_v8 }
  0xde   : > { %5261 = vmatmul.mubr.msk.f32.gmra.mxu0 %vm308_vm0, %v6000_v58  ;;  %5306 = vmatpush3.msra.mxu1 %v6212_v56  ;;  %v7275_v58 = vld [vmem:[#allocation25_spill] sm:$0xff] }
  0xdf   : > { %5210 = vmatprep.mubr.msk.f32.mxu1 %vm308_vm0, %v7255_v9  ;;  %5263 = vmatprep.mubr.msk.f32.mxu0 %vm308_vm0, %v6006_v60 }
  0xe1   : > { %5211 = vmatmul.mubr.msk.f32.gmra.mxu1 %vm308_vm0, %v7256_v10 }
  0xe2   : > { %5264 = vmatmul.mubr.msk.f32.gmra.mxu0 %vm308_vm0, %v6016_v0  ;;  %5213 = vmatprep.mubr.msk.f32.mxu1 %vm308_vm0, %v7257_v11  ;;  %v7276_v0 = vld [vmem:[#allocation26_spill] sm:$0xff] }
  0xe3   : > { %5266 = vmatprep.mubr.msk.f32.mxu0 %vm308_vm0, %v6022_v2 }
  0xe5   : > { %5214 = vmatmul.mubr.msk.f32.gmra.mxu1 %vm308_vm0, %v7258_v5 }
  0xe6   : > { %5267 = vmatmul.mubr.msk.f32.gmra.mxu0 %vm308_vm0, %v6032_v6  ;;  %5216 = vmatprep.mubr.msk.f32.mxu1 %vm308_vm0, %v7259_v12 }
  0xe7   : > { %5269 = vmatprep.mubr.msk.f32.mxu0 %vm308_vm0, %v6038_v31  ;;  %v6406_v20 = vpop.f32.mrf.mxu0 }
  0xe9   : > { %5217 = vmatmul.mubr.msk.f32.gmra.mxu1 %vm308_vm0, %v7260_v13  ;;  %v6416_v24 = vpop.f32.mrf.mxu0 }
  0xea   : > { %5270 = vmatmul.mubr.msk.f32.gmra.mxu0 %vm308_vm0, %v6048_v34  ;;  %5219 = vmatprep.mubr.msk.f32.mxu1 %vm308_vm0, %v7261_v14  ;;  %v4488_v34 = vld [vmem:[#allocation2 + $0x198] sm:$0xff] }
  0xeb   : > { %5272 = vmatprep.mubr.msk.f32.mxu0 %vm308_vm0, %v6054_v39  ;;  %v7280_v39 = vld [vmem:[#allocation30_spill] sm:$0xff] }
  0xed   : > { %5220 = vmatmul.mubr.msk.f32.gmra.mxu1 %vm308_vm0, %v7262_v15 }
  0xee   : > { %5273 = vmatmul.mubr.msk.f32.gmra.mxu0 %vm308_vm0, %v6064_v42  ;;  %5222 = vmatprep.mubr.msk.f32.mxu1 %vm308_vm0, %v7263_v16  ;;  %v4489_v42 = vld [vmem:[#allocation2 + $0x1a0] sm:$0xff] }
  0xef   : > { %5275 = vmatprep.mubr.msk.f32.mxu0 %vm308_vm0, %v6070_v21 }
  0xf1   : > { %5223 = vmatmul.mubr.msk.f32.gmra.mxu1 %vm308_vm0, %v7264_v17 }
  0xf2   : > { %5276 = vmatmul.mubr.msk.f32.gmra.mxu0 %vm308_vm0, %v6080_v38  ;;  %5225 = vmatprep.mubr.msk.f32.mxu1 %vm308_vm0, %v7265_v18 }
  0xf3   : > { %5278 = vmatprep.mubr.msk.f32.mxu0 %vm308_vm0, %v6086_v33 }
  0xf5   : > { %5226 = vmatmul.mubr.msk.f32.gmra.mxu1 %vm308_vm0, %v7266_v19 }
  0xf6   : > { %5279 = vmatmul.mubr.msk.f32.gmra.mxu0 %vm308_vm0, %v6096_v43  ;;  %5228 = vmatprep.mubr.msk.f32.mxu1 %vm308_vm0, %v7267_v22 }
  0xf7   : > { %5281 = vmatprep.mubr.msk.f32.mxu0 %vm308_vm0, %v6102_v4 }
  0xf9   : > { %5229 = vmatmul.mubr.msk.f32.gmra.mxu1 %vm308_vm0, %v7268_v23 }
  0xfa   : > { %5282 = vmatmul.mubr.msk.f32.gmra.mxu0 %vm308_vm0, %v6112_v40  ;;  %5231 = vmatprep.mubr.msk.f32.mxu1 %vm308_vm0, %v7269_v25 }
  0xfb   : > { %5284 = vmatprep.mubr.msk.f32.mxu0 %vm308_vm0, %v6118_v63 }
  0xfd   : > { %v6422_v26 = vpop.f32.mrf.mxu1  ;;  %5232 = vmatmul.mubr.msk.f32.gmra.mxu1 %vm308_vm0, %v7270_v27 }
  0xfe   : > { %v6426_v28 = vpop.f32.mrf.mxu0  ;;  %5285 = vmatmul.mubr.msk.f32.gmra.mxu0 %vm308_vm0, %v6128_v47  ;;  %5234 = vmatprep.mubr.msk.f32.mxu1 %vm308_vm0, %v7271_v29  ;;  %v6517_v47 = vld [vmem:[#allocation2 + $0x182] sm:$0xff] }
  0xff   : > { %5287 = vmatprep.mubr.msk.f32.mxu0 %vm308_vm0, %v6134_v57  ;;  %v6434_v30 = vpop.f32.mrf.mxu1 }
 0x100   : > { %v6436_v32 = vpop.f32.mrf.mxu0 }
 0x101   : > { %v6438_v37 = vpop.f32.mrf.mxu1  ;;  %5235 = vmatmul.mubr.msk.f32.gmra.mxu1 %vm308_vm0, %v7272_v41 }
 0x102   : > { %v6442_v44 = vpop.f32.mrf.mxu0  ;;  %5288 = vmatmul.mubr.msk.f32.gmra.mxu0 %vm308_vm0, %v6144_v7  ;;  %5237 = vmatprep.mubr.msk.f32.mxu1 %vm308_vm0, %v7273_v46  ;;  %v7278_v7 = vld [vmem:[#allocation28_spill] sm:$0xff] }
 0x103   : > { %5290 = vmatprep.mubr.msk.f32.mxu0 %vm308_vm0, %v6150_v54  ;;  %v6450_v36 = vpop.f32.mrf.mxu1 }
 0x104   : > { %v6452_v49 = vpop.f32.mrf.mxu0 }
 0x105   : > { %v6454_v50 = vpop.f32.mrf.mxu1  ;;  %5238 = vmatmul.mubr.msk.f32.gmra.mxu1 %vm308_vm0, %v7274_v52 }
 0x106   : > { %v6458_v57 = vpop.f32.mrf.mxu0  ;;  %5291 = vmatmul.mubr.msk.f32.gmra.mxu0 %vm308_vm0, %v6160_v1  ;;  %5240 = vmatprep.mubr.msk.f32.mxu1 %vm308_vm0, %v7275_v58  ;;  %v7277_v1 = vld [vmem:[#allocation27_spill] sm:$0xff] }
 0x107   : > { %5293 = vmatprep.mubr.msk.f32.mxu0 %vm308_vm0, %v6166_v45  ;;  %v6466_v54 = vpop.f32.mrf.mxu1 }
 0x108   : > { %v6468_v60 = vpop.f32.mrf.mxu0 }
 0x109   : > { %v6470_v63 = vpop.f32.mrf.mxu1  ;;  %5241 = vmatmul.mubr.msk.f32.gmra.mxu1 %vm308_vm0, %v7276_v0 }
 0x10a   : > { %v6474_v2 = vpop.f32.mrf.mxu0  ;;  %5294 = vmatmul.mubr.msk.f32.gmra.mxu0 %vm308_vm0, %v6176_v59  ;;  %5243 = vmatprep.mubr.msk.f32.mxu1 %vm308_vm0, %v7277_v1  ;;  %v7279_v59 = vld [vmem:[#allocation29_spill] sm:$0xff] }
 0x10b   : > { %5296 = vmatprep.mubr.msk.f32.mxu0 %vm308_vm0, %v6182_v35  ;;  %v6482_v45 = vpop.f32.mrf.mxu1 }
 0x10c   : > { %v6484_v4 = vpop.f32.mrf.mxu0 }
 0x10d   : > { %v6486_v6 = vpop.f32.mrf.mxu1  ;;  %5244 = vmatmul.mubr.msk.f32.gmra.mxu1 %vm308_vm0, %v7278_v7 }
 0x10e   : > { %v6490_v31 = vpop.f32.mrf.mxu0  ;;  %5297 = vmatmul.mubr.msk.f32.gmra.mxu0 %vm308_vm0, %v6190_v51  ;;  %5246 = vmatprep.mubr.msk.f32.mxu1 %vm308_vm0, %v7279_v59  ;;  %v7281_v51 = vld [vmem:[#allocation31_spill] sm:$0xff] }
 0x10f   : > { %5299 = vmatprep.mubr.msk.f32.mxu0 %vm308_vm0, %v6332_v61  ;;  %v6498_v35 = vpop.f32.mrf.mxu1  ;;  %v4523_v59 = vld [vmem:[#allocation2 + $0x31] sm:$0xff] }
 0x110   : > { %v6500_v33 = vpop.f32.mrf.mxu0 }
 0x111   : > { %v6502_v38 = vpop.f32.mrf.mxu1  ;;  %5247 = vmatmul.mubr.msk.f32.gmra.mxu1 %vm308_vm0, %v7280_v39  ;;  %v4524_v39 = vld [vmem:[#allocation2 + $0x39] sm:$0xff] }
 0x112   : > { %v6506_v40 = vpop.f32.mrf.mxu0  ;;  %5300 = vmatmul.mubr.msk.f32.gmra.mxu0 %vm308_vm0, %v6340_v62  ;;  %5249 = vmatprep.mubr.msk.f32.mxu1 %vm308_vm0, %v7281_v51  ;;  %v6528_v62 = vld [vmem:[#allocation2 + $0x18a] sm:$0xff] }
 0x113   : > { %5302 = vmatprep.mubr.msk.f32.mxu0 %vm308_vm0, %v4488_v34  ;;  %v6513_v43 = vpop.f32.mrf.mxu1 }
 0x114   : > { %7282 = vst [vmem:[#allocation3_spill] sm:$0xff] %v6513_v43  ;;  %v6515_v21 = vpop.f32.mrf.mxu0 }
 0x115   : > { %v6519_v56 = vpop.f32.mrf.mxu1  ;;  %5250 = vmatmul.mubr.msk.f32.gmra.mxu1 %vm308_vm0, %v6180_v48 }
 0x116   : > { %7283 = vst [vmem:[#allocation4_spill] sm:$0xff] %v6519_v56  ;;  %v6523_v61 = vpop.f32.mrf.mxu0  ;;  %5303 = vmatmul.mubr.msk.f32.gmra.mxu0 %vm308_vm0, %v4489_v42  ;;  %5252 = vmatprep.mubr.msk.f32.mxu1 %vm308_vm0, %v6517_v47  ;;  %v4525_v42 = vld [vmem:[#allocation2 + $0x49] sm:$0xff] }
 0x117   : > { %5357 = vmatprep.mubr.msk.f32.mxu0 %vm308_vm0, %v7255_v9  ;;  %v6532_v3 = vpop.f32.mrf.mxu1 }
 0x118   : > { %7284 = vst [vmem:[#allocation5_spill] sm:$0xff] %v6532_v3  ;;  %v6534_v8 = vpop.f32.mrf.mxu0 }
 0x119   : > { %v6536_v34 = vpop.f32.mrf.mxu1  ;;  %5253 = vmatmul.mubr.msk.f32.gmra.mxu1 %vm308_vm0, %v6528_v62 }
 0x11a   : > { %7285 = vst [vmem:[#allocation6_spill] sm:$0xff] %v6536_v34  ;;  %v5059_v48 = vpop.f32.mrf.mxu0  ;;  %5358 = vmatmul.mubr.msk.f32.vlgmr.msra.gmra.mxu0 %vm308_vm0, %v7256_v10  ;;  %5307 = vmatprep.mubr.msk.f32.mxu1 %vm308_vm0, %v4523_v59  ;;  %v4526_v10 = vld [vmem:[#allocation2 + $0x51] sm:$0xff] }
 0x11b   : > { %5360 = vmatprep.mubr.msk.f32.mxu0 %vm308_vm0, %v7257_v11  ;;  %v6545_v9 = vpop.f32.mrf.mxu1 }
 0x11c   : > { %7286 = vst [vmem:[#allocation7_spill] sm:$0xff] %v6545_v9  ;;  %v1437_v51 = vpop.f32.mrf.mxu0  ;;  %v4527_v9 = vld [vmem:[#allocation2 + $0x61] sm:$0xff] }
 0x11d   : > { %v5009_v3 = vpop.f32.mrf.mxu1  ;;  %5308 = vmatmul.mubr.msk.f32.vlgmr.msra.gmra.mxu1 %vm308_vm0, %v4524_v39 }
 0x11e   : > { %v5062_v34 = vpop.f32.mrf.mxu0  ;;  %5361 = vmatmul.mubr.msk.f32.gmra.mxu0 %vm308_vm0, %v7258_v5  ;;  %v1088_v56 = vadd.f32 %v5009_v3, %v6406_v20  ;;  %5310 = vmatprep.mubr.msk.f32.mxu1 %vm308_vm0, %v4525_v42 }
 0x11f   : > { %5363 = vmatprep.mubr.msk.f32.mxu0 %vm308_vm0, %v7259_v12  ;;  %v1082_v11 = vpop.f32.mrf.mxu1  ;;  %v4528_v12 = vld [vmem:[#allocation2 + $0x69] sm:$0xff] }
 0x120   : > { %v1447_v59 = vpop.f32.mrf.mxu0  ;;  %v6554_v55 = vadd.f32 %v5059_v48, %v1088_v56  ;;  %v1083_v43 = vadd.f32 %v1082_v11, %v6416_v24  ;;  %v4529_v24 = vld [vmem:[#allocation2 + $0x79] sm:$0xff] }
 0x121   : > { %v5012_v39 = vpop.f32.mrf.mxu1  ;;  %5311 = vmatmul.mubr.msk.f32.gmra.mxu1 %vm308_vm0, %v4526_v10 }
 0x122   : > { %v5065_v53 = vpop.f32.mrf.mxu0  ;;  %5364 = vmatmul.mubr.msk.f32.gmra.mxu0 %vm308_vm0, %v7260_v13  ;;  %v6560_v5 = vadd.f32 %v1437_v51, %v1083_v43  ;;  %v1098_v20 = vadd.f32 %v5012_v39, %v6426_v28  ;;  %5313 = vmatprep.mubr.msk.f32.mxu1 %vm308_vm0, %v4527_v9 }
 0x123   : > { %5366 = vmatprep.mubr.msk.f32.mxu0 %vm308_vm0, %v7261_v14  ;;  %v1092_v56 = vpop.f32.mrf.mxu1  ;;  %v4530_v14 = vld [vmem:[#allocation2 + $0x81] sm:$0xff] }
 0x124   : > { %v1457_v3 = vpop.f32.mrf.mxu0  ;;  %v6566_v48 = vadd.f32 %v5062_v34, %v1098_v20  ;;  %v1093_v42 = vadd.f32 %v1092_v56, %v6436_v32  ;;  %v4531_v32 = vld [vmem:[#allocation2 + $0x91] sm:$0xff] }
 0x125   : > { %v5015_v10 = vpop.f32.mrf.mxu1  ;;  %5314 = vmatmul.mubr.msk.f32.gmra.mxu1 %vm308_vm0, %v4528_v12 }
 0x126   : > { %v5068_v13 = vpop.f32.mrf.mxu0  ;;  %5367 = vmatmul.mubr.msk.f32.gmra.mxu0 %vm308_vm0, %v7262_v15  ;;  %v6572_v28 = vadd.f32 %v1447_v59, %v1093_v42  ;;  %v1108_v43 = vadd.f32 %v5015_v10, %v6442_v44  ;;  %5316 = vmatprep.mubr.msk.f32.mxu1 %vm308_vm0, %v4529_v24 }
 0x127   : > { %5369 = vmatprep.mubr.msk.f32.mxu0 %vm308_vm0, %v7263_v16  ;;  %v1102_v34 = vpop.f32.mrf.mxu1  ;;  %v4532_v16 = vld [vmem:[#allocation2 + $0x99] sm:$0xff] }
 0x128   : > { %v1467_v9 = vpop.f32.mrf.mxu0  ;;  %v6578_v51 = vadd.f32 %v5065_v53, %v1108_v43  ;;  %v1103_v11 = vadd.f32 %v1102_v34, %v6452_v49  ;;  %v4533_v49 = vld [vmem:[#allocation2 + $0xa9] sm:$0xff] }
 0x129   : > { %v5018_v39 = vpop.f32.mrf.mxu1  ;;  %5317 = vmatmul.mubr.msk.f32.gmra.mxu1 %vm308_vm0, %v4530_v14 }
 0x12a   : > { %v5071_v15 = vpop.f32.mrf.mxu0  ;;  %5370 = vmatmul.mubr.msk.f32.gmra.mxu0 %vm308_vm0, %v7264_v17  ;;  %v6584_v44 = vadd.f32 %v1457_v3, %v1103_v11  ;;  %v1118_v59 = vadd.f32 %v5018_v39, %v6458_v57  ;;  %5319 = vmatprep.mubr.msk.f32.mxu1 %vm308_vm0, %v4531_v32 }
 0x12b   : > { %5372 = vmatprep.mubr.msk.f32.mxu0 %vm308_vm0, %v7265_v18  ;;  %v1112_v53 = vpop.f32.mrf.mxu1  ;;  %v4534_v18 = vld [vmem:[#allocation2 + $0xb1] sm:$0xff] }
 0x12c   : > { %v1477_v20 = vpop.f32.mrf.mxu0  ;;  %v6590_v12 = vadd.f32 %v5068_v13, %v1118_v59  ;;  %v1113_v56 = vadd.f32 %v1112_v53, %v6468_v60  ;;  %v4535_v60 = vld [vmem:[#allocation2 + $0xc1] sm:$0xff] }
 0x12d   : > { %v5021_v24 = vpop.f32.mrf.mxu1  ;;  %5320 = vmatmul.mubr.msk.f32.gmra.mxu1 %vm308_vm0, %v4532_v16 }
 0x12e   : > { %v5074_v17 = vpop.f32.mrf.mxu0  ;;  %5373 = vmatmul.mubr.msk.f32.gmra.mxu0 %vm308_vm0, %v7266_v19  ;;  %v6596_v57 = vadd.f32 %v1467_v9, %v1113_v56  ;;  %v1128_v3 = vadd.f32 %v5021_v24, %v6474_v2  ;;  %5322 = vmatprep.mubr.msk.f32.mxu1 %vm308_vm0, %v4533_v49 }
 0x12f   : > { %5375 = vmatprep.mubr.msk.f32.mxu0 %vm308_vm0, %v7267_v22  ;;  %v1122_v42 = vpop.f32.mrf.mxu1  ;;  %v4536_v22 = vld [vmem:[#allocation2 + $0xc9] sm:$0xff] }
 0x130   : > { %v1487_v10 = vpop.f32.mrf.mxu0  ;;  %v6602_v13 = vadd.f32 %v5071_v15, %v1128_v3  ;;  %v1123_v43 = vadd.f32 %v1122_v42, %v6484_v4  ;;  %v4537_v4 = vld [vmem:[#allocation2 + $0xd9] sm:$0xff] }
 0x131   : > { %v5024_v14 = vpop.f32.mrf.mxu1  ;;  %5323 = vmatmul.mubr.msk.f32.gmra.mxu1 %vm308_vm0, %v4534_v18 }
 0x132   : > { %v5077_v19 = vpop.f32.mrf.mxu0  ;;  %5376 = vmatmul.mubr.msk.f32.gmra.mxu0 %vm308_vm0, %v7268_v23  ;;  %v6608_v2 = vadd.f32 %v1477_v20, %v1123_v43  ;;  %v1138_v34 = vadd.f32 %v5024_v14, %v6490_v31  ;;  %5325 = vmatprep.mubr.msk.f32.mxu1 %vm308_vm0, %v4535_v60 }
 0x133   : > { %5378 = vmatprep.mubr.msk.f32.mxu0 %vm308_vm0, %v7269_v25  ;;  %v1132_v9 = vpop.f32.mrf.mxu1  ;;  %v4538_v25 = vld [vmem:[#allocation2 + $0xe1] sm:$0xff] }
 0x134   : > { %v1497_v32 = vpop.f32.mrf.mxu0  ;;  %v6614_v11 = vadd.f32 %v5074_v17, %v1138_v34  ;;  %v1133_v39 = vadd.f32 %v1132_v9, %v6500_v33  ;;  %v4539_v33 = vld [vmem:[#allocation2 + $0xf1] sm:$0xff] }
 0x135   : > { %v5027_v15 = vpop.f32.mrf.mxu1  ;;  %5326 = vmatmul.mubr.msk.f32.gmra.mxu1 %vm308_vm0, %v4536_v22 }
 0x136   : > { %v5080_v23 = vpop.f32.mrf.mxu0  ;;  %5379 = vmatmul.mubr.msk.f32.gmra.mxu0 %vm308_vm0, %v7270_v27  ;;  %v6620_v31 = vadd.f32 %v1487_v10, %v1133_v39  ;;  %v1148_v59 = vadd.f32 %v5027_v15, %v6506_v40  ;;  %5328 = vmatprep.mubr.msk.f32.mxu1 %vm308_vm0, %v4537_v4  ;;  %v4612_v39 = vld [vmem:[#allocation2 + $0x152] sm:$0xff] }
 0x137   : > { %5381 = vmatprep.mubr.msk.f32.mxu0 %vm308_vm0, %v7271_v29  ;;  %v1142_v16 = vpop.f32.mrf.mxu1  ;;  %v4540_v29 = vld [vmem:[#allocation2 + $0xf9] sm:$0xff] }
 0x138   : > { %v1507_v53 = vpop.f32.mrf.mxu0  ;;  %v6626_v20 = vadd.f32 %v5077_v19, %v1148_v59  ;;  %v1143_v49 = vadd.f32 %v1142_v16, %v6515_v21  ;;  %v4541_v21 = vld [vmem:[#allocation2 + $0x109] sm:$0xff]  ;;  %v4613_v16 = vld [vmem:[#allocation2 + $0x15a] sm:$0xff] }
 0x139   : > { %v5030_v56 = vpop.f32.mrf.mxu1  ;;  %5329 = vmatmul.mubr.msk.f32.gmra.mxu1 %vm308_vm0, %v4538_v25 }
 0x13a   : > { %v5083_v27 = vpop.f32.mrf.mxu0  ;;  %5382 = vmatmul.mubr.msk.f32.gmra.mxu0 %vm308_vm0, %v7272_v41  ;;  %v6632_v40 = vadd.f32 %v1497_v32, %v1143_v49  ;;  %v1158_v24 = vadd.f32 %v5030_v56, %v6523_v61  ;;  %5331 = vmatprep.mubr.msk.f32.mxu1 %vm308_vm0, %v4539_v33  ;;  %v4614_v49 = vld [vmem:[#allocation2 + $0x16a] sm:$0xff] }
 0x13b   : > { %5384 = vmatprep.mubr.msk.f32.mxu0 %vm308_vm0, %v7273_v46  ;;  %v1152_v17 = vpop.f32.mrf.mxu1  ;;  %v4542_v46 = vld [vmem:[#allocation2 + $0x111] sm:$0xff] }
 0x13c   : > { %v1517_v3 = vpop.f32.mrf.mxu0  ;;  %v6638_v18 = vadd.f32 %v5080_v23, %v1158_v24  ;;  %v1153_v42 = vadd.f32 %v1152_v17, %v6534_v8  ;;  %v4543_v8 = vld [vmem:[#allocation2 + $0x121] sm:$0xff]  ;;  %v4548_v17 = vld [vmem:[#allocation2 + $0x159] sm:$0xff] }
 0x13d   : > { %v5033_v10 = vpop.f32.mrf.mxu1  ;;  %5332 = vmatmul.mubr.msk.f32.gmra.mxu1 %vm308_vm0, %v4540_v29 }
 0x13e   : > { %v5086_v41 = vpop.f32.mrf.mxu0  ;;  %5385 = vmatmul.mubr.msk.f32.gmra.mxu0 %vm308_vm0, %v7274_v52  ;;  %v6644_v61 = vadd.f32 %v1507_v53, %v1153_v42  ;;  %v1168_v60 = vadd.f32 %v5033_v10, %v6422_v26  ;;  %5334 = vmatprep.mubr.msk.f32.mxu1 %vm308_vm0, %v4541_v21  ;;  %v4549_v10 = vld [vmem:[#allocation2 + $0x169] sm:$0xff] }
 0x13f   : > { %5387 = vmatprep.mubr.msk.f32.mxu0 %vm308_vm0, %v7275_v58  ;;  %v1162_v43 = vpop.f32.mrf.mxu1  ;;  %v4544_v58 = vld [vmem:[#allocation2 + $0x129] sm:$0xff] }
 0x140   : > { %v1527_v14 = vpop.f32.mrf.mxu0  ;;  %v6650_v19 = vadd.f32 %v5083_v27, %v1168_v60  ;;  %v1163_v34 = vadd.f32 %v1162_v43, %v6434_v30  ;;  %v4545_v30 = vld [vmem:[#allocation2 + $0x139] sm:$0xff] }
 0x141   : > { %v5036_v22 = vpop.f32.mrf.mxu1  ;;  %5335 = vmatmul.mubr.msk.f32.gmra.mxu1 %vm308_vm0, %v4542_v46 }
 0x142   : > { %v5089_v52 = vpop.f32.mrf.mxu0  ;;  %5388 = vmatmul.mubr.msk.f32.gmra.mxu0 %vm308_vm0, %v7276_v0  ;;  %v6656_v26 = vadd.f32 %v1517_v3, %v1163_v34  ;;  %v1178_v9 = vadd.f32 %v5036_v22, %v6438_v37  ;;  %5337 = vmatprep.mubr.msk.f32.mxu1 %vm308_vm0, %v4543_v8  ;;  %v4615_v3 = vld [vmem:[#allocation2 + $0x172] sm:$0xff]  ;;  %v4618_v22 = vld [vmem:[#allocation2 + $0x19a] sm:$0xff] }
 0x143   : > { %5390 = vmatprep.mubr.msk.f32.mxu0 %vm308_vm0, %v7277_v1  ;;  %v1172_v32 = vpop.f32.mrf.mxu1  ;;  %v4546_v1 = vld [vmem:[#allocation2 + $0x141] sm:$0xff] }
 0x144   : > { %v1537_v4 = vpop.f32.mrf.mxu0  ;;  %v6662_v15 = vadd.f32 %v5086_v41, %v1178_v9  ;;  %v1173_v23 = vadd.f32 %v1172_v32, %v6450_v36  ;;  %v4547_v36 = vld [vmem:[#allocation2 + $0x151] sm:$0xff] }
 0x145   : > { %v5039_v59 = vpop.f32.mrf.mxu1  ;;  %5338 = vmatmul.mubr.msk.f32.gmra.mxu1 %vm308_vm0, %v4544_v58 }
 0x146   : > { %v5092_v0 = vpop.f32.mrf.mxu0  ;;  %5391 = vmatmul.mubr.msk.f32.gmra.mxu0 %vm308_vm0, %v7278_v7  ;;  %v6668_v37 = vadd.f32 %v1527_v14, %v1173_v23  ;;  %v1188_v25 = vadd.f32 %v5039_v59, %v6454_v50  ;;  %5340 = vmatprep.mubr.msk.f32.mxu1 %vm308_vm0, %v4545_v30  ;;  %v4550_v14 = vld [vmem:[#allocation2 + $0x171] sm:$0xff] }
 0x147   : > { %5393 = vmatprep.mubr.msk.f32.mxu0 %vm308_vm0, %v4612_v39  ;;  %v1182_v53 = vpop.f32.mrf.mxu1  ;;  %v7288_v59 = vld [vmem:[#allocation3_spill] sm:$0xff] }
 0x148   : > { %v1547_v33 = vpop.f32.mrf.mxu0  ;;  %v6673_v56 = vadd.f32 %v5089_v52, %v1188_v25  ;;  %v1183_v27 = vadd.f32 %v1182_v53, %v6466_v54 }
 0x149   : > { %v5042_v24 = vpop.f32.mrf.mxu1  ;;  %5341 = vmatmul.mubr.msk.f32.gmra.mxu1 %vm308_vm0, %v4546_v1  ;;  %v7289_v1 = vld [vmem:[#allocation33_spill] sm:$0xff] }
 0x14a   : > { %v5095_v7 = vpop.f32.mrf.mxu0  ;;  %5394 = vmatmul.mubr.msk.f32.gmra.mxu0 %vm308_vm0, %v4613_v16  ;;  %v6678_v50 = vadd.f32 %v1537_v4, %v1183_v27  ;;  %v1198_v29 = vadd.f32 %v5042_v24, %v6470_v63  ;;  %5343 = vmatprep.mubr.msk.f32.mxu1 %vm308_vm0, %v4547_v36  ;;  %v7287_v4 = vld [vmem:[#allocation32_spill] sm:$0xff]  ;;  %v7291_v24 = vld [vmem:[#allocation5_spill] sm:$0xff] }
 0x14b   : > { %5396 = vmatprep.mubr.msk.f32.mxu0 %vm308_vm0, %v4614_v49  ;;  %v1192_v21 = vpop.f32.mrf.mxu1  ;;  %v7290_v16 = vld [vmem:[#allocation4_spill] sm:$0xff] }
 0x14c   : > { %v1557_v42 = vpop.f32.mrf.mxu0  ;;  %v6683_v54 = vadd.f32 %v5092_v0, %v1198_v29  ;;  %v1193_v41 = vadd.f32 %v1192_v21, %v6482_v45  ;;  %v7292_v21 = vld [vmem:[#allocation6_spill] sm:$0xff] }
 0x14d   : > { %v5045_v60 = vpop.f32.mrf.mxu1  ;;  %5344 = vmatmul.mubr.msk.f32.gmra.mxu1 %vm308_vm0, %v4548_v17 }
 0x14e   : > { %v5098_v46 = vpop.f32.mrf.mxu0  ;;  %5397 = vmatmul.mubr.msk.f32.gmra.mxu0 %vm308_vm0, %v4615_v3  ;;  %v6688_v63 = vadd.f32 %v1547_v33, %v1193_v41  ;;  %v1208_v43 = vadd.f32 %v5045_v60, %v6486_v6  ;;  %5346 = vmatprep.mubr.msk.f32.mxu1 %vm308_vm0, %v4549_v10  ;;  %v4554_v33 = vld [vmem:[#allocation2 + $0x1a1] sm:$0xff] }
 0x14f   : > { %5399 = vmatprep.mubr.msk.f32.mxu0 %vm308_vm0, %v6517_v47  ;;  %v1202_v8 = vpop.f32.mrf.mxu1  ;;  %v4619_v47 = vld [vmem:[#allocation2 + $0x1a2] sm:$0xff] }
 0x150   : > { %v1567_v34 = vpop.f32.mrf.mxu0  ;;  %v6694_v45 = vadd.f32 %v5095_v7, %v1208_v43  ;;  %v1203_v52 = vadd.f32 %v1202_v8, %v6498_v35  ;;  %v4553_v35 = vld [vmem:[#allocation2 + $0x199] sm:$0xff] }
 0x151   : > { %v5048_v9 = vpop.f32.mrf.mxu1  ;;  %5347 = vmatmul.mubr.msk.f32.gmra.mxu1 %vm308_vm0, %v4550_v14 }
 0x152   : > { %v5101_v58 = vpop.f32.mrf.mxu0  ;;  %5400 = vmatmul.mubr.msk.f32.gmra.mxu0 %vm308_vm0, %v6528_v62  ;;  %v6700_v6 = vadd.f32 %v1557_v42, %v1203_v52  ;;  %v1218_v32 = vadd.f32 %v5048_v9, %v6502_v38  ;;  %5349 = vmatprep.mubr.msk.f32.mxu1 %vm308_vm0, %v7287_v4 }
 0x153   : > { %5402 = vmatprep.mubr.msk.f32.mxu0 %vm308_vm0, %v4618_v22  ;;  %v1212_v30 = vpop.f32.mrf.mxu1 }
 0x154   : > { %v1577_v39 = vpop.f32.mrf.mxu0  ;;  %v6706_v23 = vadd.f32 %v5098_v46, %v1218_v32  ;;  %v1213_v0 = vadd.f32 %v1212_v30, %v7288_v59  ;;  %v7293_v46 = vld [vmem:[#allocation7_spill] sm:$0xff] }
 0x155   : > { %v5051_v25 = vpop.f32.mrf.mxu1  ;;  %5350 = vmatmul.mubr.msk.f32.gmra.mxu1 %vm308_vm0, %v7289_v1 }
 0x156   : > { %v5104_v62 = vpop.f32.mrf.mxu0  ;;  %5403 = vmatmul.mubr.msk.f32.gmra.mxu0 %vm308_vm0, %v4619_v47  ;;  %v6712_v38 = vadd.f32 %v1567_v34, %v1213_v0  ;;  %v1228_v53 = vadd.f32 %v5051_v25, %v7290_v16  ;;  %5352 = vmatprep.mubr.msk.f32.mxu1 %vm308_vm0, %v4553_v35 }
 0x157   : > { %v1222_v36 = vpop.f32.mrf.mxu1 }
 0x158   : > { %v1587_v49 = vpop.f32.mrf.mxu0  ;;  %v6716_v27 = vadd.f32 %v5101_v58, %v1228_v53  ;;  %v1223_v7 = vadd.f32 %v1222_v36, %v7291_v24 }
 0x159   : > { %v5054_v29 = vpop.f32.mrf.mxu1  ;;  %5353 = vmatmul.mubr.msk.f32.gmra.mxu1 %vm308_vm0, %v4554_v33 }
 0x15a   : > { %v5159_v17 = vpop.f32.mrf.mxu0  ;;  %v6720_v3 = vadd.f32 %v1577_v39, %v1223_v7  ;;  %v1238_v42 = vadd.f32 %v5054_v29, %v7292_v21 }
 0x15b   : > { %v1232_v10 = vpop.f32.mrf.mxu1 }
 0x15c   : > { %v2214_v41 = vpop.f32.mrf.mxu0  ;;  %v6723_v60 = vadd.f32 %v5104_v62, %v1238_v42  ;;  %v1233_v43 = vadd.f32 %v1232_v10, %v7293_v46 }
 0x15d   : > { %v5109_v14 = vpop.f32.mrf.mxu1 }
 0x15e   : > { %v5162_v8 = vpop.f32.mrf.mxu0  ;;  %v6726_v34 = vadd.f32 %v1587_v49, %v1233_v43  ;;  %v1987_v22 = vadd.f32 %v5109_v14, %v6554_v55 }
 0x15f   : > { %v1827_v52 = vpop.f32.mrf.mxu1 }
 0x160   : > { %v2224_v9 = vpop.f32.mrf.mxu0  ;;  %v6729_v58 = vadd.f32 %v5159_v17, %v1987_v22  ;;  %v1986_v32 = vadd.f32 %v1827_v52, %v6560_v5 }
 0x161   : > { %v5112_v4 = vpop.f32.mrf.mxu1 }
 0x162   : > { %v5165_v47 = vpop.f32.mrf.mxu0  ;;  %v6732_v30 = vadd.f32 %v2214_v41, %v1986_v32  ;;  %v1989_v39 = vadd.f32 %v5112_v4, %v6566_v48 }
 0x163   : > { %v1837_v35 = vpop.f32.mrf.mxu1 }
 0x164   : > { %v2234_v59 = vpop.f32.mrf.mxu0  ;;  %v6735_v0 = vadd.f32 %v5162_v8, %v1989_v39  ;;  %v1988_v25 = vadd.f32 %v1837_v35, %v6572_v28 }
 0x165   : > { %v5115_v1 = vpop.f32.mrf.mxu1 }
 0x166   : > { %v5168_v55 = vpop.f32.mrf.mxu0  ;;  %v6738_v62 = vadd.f32 %v2224_v9, %v1988_v25  ;;  %v1991_v16 = vadd.f32 %v5115_v1, %v6578_v51 }
 0x167   : > { %v1847_v53 = vpop.f32.mrf.mxu1 }
 0x168   : > { %v2244_v5 = vpop.f32.mrf.mxu0  ;;  %v6741_v33 = vadd.f32 %v5165_v47, %v1991_v16  ;;  %v1990_v36 = vadd.f32 %v1847_v53, %v6584_v44 }
 0x169   : > { %v5118_v49 = vpop.f32.mrf.mxu1 }
 0x16a   : > { %v5171_v48 = vpop.f32.mrf.mxu0  ;;  %v6744_v24 = vadd.f32 %v2234_v59, %v1990_v36  ;;  %v1993_v7 = vadd.f32 %v5118_v49, %v6590_v12 }
 0x16b   : > { %v1857_v29 = vpop.f32.mrf.mxu1 }
 0x16c   : > { %v2254_v28 = vpop.f32.mrf.mxu0  ;;  %v6747_v17 = vadd.f32 %v5168_v55, %v1993_v7  ;;  %v1992_v21 = vadd.f32 %v1857_v29, %v6596_v57 }
 0x16d   : > { %v5121_v42 = vpop.f32.mrf.mxu1 }
 0x16e   : > { %v5174_v51 = vpop.f32.mrf.mxu0  ;;  %v6750_v10 = vadd.f32 %v2244_v5, %v1992_v21  ;;  %v1995_v41 = vadd.f32 %v5121_v42, %v6602_v13 }
 0x16f   : > { %v1867_v46 = vpop.f32.mrf.mxu1 }
 0x170   : > { %v2264_v44 = vpop.f32.mrf.mxu0  ;;  %v6753_v43 = vadd.f32 %v5171_v48, %v1995_v41  ;;  %v1994_v14 = vadd.f32 %v1867_v46, %v6608_v2 }
 0x171   : > { %v5124_v8 = vpop.f32.mrf.mxu1 }
 0x172   : > { %v5177_v12 = vpop.f32.mrf.mxu0  ;;  %v6756_v22 = vadd.f32 %v2254_v28, %v1994_v14  ;;  %v1997_v52 = vadd.f32 %v5124_v8, %v6614_v11 }
 0x173   : > { %v1877_v9 = vpop.f32.mrf.mxu1 }
 0x174   : > { %v2274_v57 = vpop.f32.mrf.mxu0  ;;  %v6759_v32 = vadd.f32 %v5174_v51, %v1997_v52  ;;  %v1996_v4 = vadd.f32 %v1877_v9, %v6620_v31 }
 0x175   : > { %v5127_v47 = vpop.f32.mrf.mxu1 }
 0x176   : > { %v5180_v13 = vpop.f32.mrf.mxu0  ;;  %v6762_v39 = vadd.f32 %v2264_v44, %v1996_v4  ;;  %v1999_v35 = vadd.f32 %v5127_v47, %v6626_v20 }
 0x177   : > { %v1887_v59 = vpop.f32.mrf.mxu1 }
 0x178   : > { %v2284_v2 = vpop.f32.mrf.mxu0  ;;  %v6765_v25 = vadd.f32 %v5177_v12, %v1999_v35  ;;  %v1998_v1 = vadd.f32 %v1887_v59, %v6632_v40 }
 0x179   : > { %v5130_v55 = vpop.f32.mrf.mxu1 }
 0x17a   : > { %v5183_v11 = vpop.f32.mrf.mxu0  ;;  %v6768_v16 = vadd.f32 %v2274_v57, %v1998_v1  ;;  %v2001_v53 = vadd.f32 %v5130_v55, %v6638_v18 }
 0x17b   : > { %v1897_v5 = vpop.f32.mrf.mxu1 }
 0x17c   : > { %v2294_v31 = vpop.f32.mrf.mxu0  ;;  %v6771_v36 = vadd.f32 %v5180_v13, %v2001_v53  ;;  %v2000_v49 = vadd.f32 %v1897_v5, %v6644_v61 }
 0x17d   : > { %v5133_v48 = vpop.f32.mrf.mxu1 }
 0x17e   : > { %v5186_v20 = vpop.f32.mrf.mxu0  ;;  %v6774_v7 = vadd.f32 %v2284_v2, %v2000_v49  ;;  %v2003_v29 = vadd.f32 %v5133_v48, %v6650_v19 }
 0x17f   : > { %v1907_v28 = vpop.f32.mrf.mxu1 }
 0x180   : > { %v2304_v40 = vpop.f32.mrf.mxu0  ;;  %v6777_v21 = vadd.f32 %v5183_v11, %v2003_v29  ;;  %v2002_v42 = vadd.f32 %v1907_v28, %v6656_v26 }
 0x181   : > { %v5136_v51 = vpop.f32.mrf.mxu1 }
 0x182   : > { %v5189_v18 = vpop.f32.mrf.mxu0  ;;  %v6780_v41 = vadd.f32 %v2294_v31, %v2002_v42  ;;  %v2005_v46 = vadd.f32 %v5136_v51, %v6662_v15 }
 0x183   : > { %v1917_v44 = vpop.f32.mrf.mxu1 }
 0x184   : > { %v2314_v61 = vpop.f32.mrf.mxu0  ;;  %v6783_v14 = vadd.f32 %v5186_v20, %v2005_v46  ;;  %v2004_v8 = vadd.f32 %v1917_v44, %v6668_v37 }
 0x185   : > { %v5139_v12 = vpop.f32.mrf.mxu1 }
 0x186   : > { %7294 = vst [vmem:[#allocation8_spill] sm:$0xff] %v6783_v14  ;;  %v5192_v19 = vpop.f32.mrf.mxu0  ;;  %v6786_v52 = vadd.f32 %v2304_v40, %v2004_v8  ;;  %v2007_v9 = vadd.f32 %v5139_v12, %v6673_v56 }
 0x187   : > { %v1927_v57 = vpop.f32.mrf.mxu1 }
 0x188   : > { %7295 = vst [vmem:[#allocation9_spill] sm:$0xff] %v6786_v52  ;;  %v2324_v26 = vpop.f32.mrf.mxu0  ;;  %v6789_v4 = vadd.f32 %v5189_v18, %v2007_v9  ;;  %v2006_v47 = vadd.f32 %v1927_v57, %v6678_v50 }
 0x189   : > { %v5142_v13 = vpop.f32.mrf.mxu1 }
 0x18a   : > { %7296 = vst [vmem:[#allocation10_spill] sm:$0xff] %v6789_v4  ;;  %v5195_v15 = vpop.f32.mrf.mxu0  ;;  %v6792_v35 = vadd.f32 %v2314_v61, %v2006_v47  ;;  %v2009_v59 = vadd.f32 %v5142_v13, %v6683_v54 }
 0x18b   : > { %v1937_v2 = vpop.f32.mrf.mxu1 }
 0x18c   : > { %7297 = vst [vmem:[#allocation11_spill] sm:$0xff] %v6792_v35  ;;  %v2334_v37 = vpop.f32.mrf.mxu0  ;;  %v6795_v1 = vadd.f32 %v5192_v19, %v2009_v59  ;;  %v2008_v55 = vadd.f32 %v1937_v2, %v6688_v63 }
 0x18d   : > { %v5145_v11 = vpop.f32.mrf.mxu1 }
 0x18e   : > { %7298 = vst [vmem:[#allocation12_spill] sm:$0xff] %v6795_v1  ;;  %v5198_v56 = vpop.f32.mrf.mxu0  ;;  %v6798_v53 = vadd.f32 %v2324_v26, %v2008_v55  ;;  %v2011_v5 = vadd.f32 %v5145_v11, %v6694_v45 }
 0x18f   : > { %v1947_v31 = vpop.f32.mrf.mxu1 }
 0x190   : > { %7299 = vst [vmem:[#allocation13_spill] sm:$0xff] %v6798_v53  ;;  %v2344_v50 = vpop.f32.mrf.mxu0  ;;  %v6801_v49 = vadd.f32 %v5195_v15, %v2011_v5  ;;  %v2010_v48 = vadd.f32 %v1947_v31, %v6700_v6 }
 0x191   : > { %v5148_v20 = vpop.f32.mrf.mxu1 }
 0x192   : > { %7300 = vst [vmem:[#allocation14_spill] sm:$0xff] %v6801_v49  ;;  %v5201_v54 = vpop.f32.mrf.mxu0  ;;  %v6804_v29 = vadd.f32 %v2334_v37, %v2010_v48  ;;  %v2013_v28 = vadd.f32 %v5148_v20, %v6706_v23 }
 0x193   : > { %v1957_v40 = vpop.f32.mrf.mxu1 }
 0x194   : > { %7301 = vst [vmem:[#allocation15_spill] sm:$0xff] %v6804_v29  ;;  %v2354_v63 = vpop.f32.mrf.mxu0  ;;  %v6807_v42 = vadd.f32 %v5198_v56, %v2013_v28  ;;  %v2012_v51 = vadd.f32 %v1957_v40, %v6712_v38 }
 0x195   : > { %v5151_v18 = vpop.f32.mrf.mxu1 }
 0x196   : > { %7302 = vst [vmem:[#allocation16_spill] sm:$0xff] %v6807_v42  ;;  %v5204_v45 = vpop.f32.mrf.mxu0  ;;  %v6810_v46 = vadd.f32 %v2344_v50, %v2012_v51  ;;  %v2015_v44 = vadd.f32 %v5151_v18, %v6716_v27 }
 0x197   : > { %v1967_v61 = vpop.f32.mrf.mxu1 }
 0x198   : > { %7303 = vst [vmem:[#allocation17_spill] sm:$0xff] %v6810_v46  ;;  %v2364_v6 = vpop.f32.mrf.mxu0  ;;  %v6813_v8 = vadd.f32 %v5201_v54, %v2015_v44  ;;  %v2014_v12 = vadd.f32 %v1967_v61, %v6720_v3 }
 0x199   : > { %v5154_v19 = vpop.f32.mrf.mxu1 }
 0x19a   : > { %7304 = vst [vmem:[#allocation18_spill] sm:$0xff] %v6813_v8  ;;  %v6816_v23 = vpop.f32.mrf.mxu0  ;;  %v6818_v9 = vadd.f32 %v2354_v63, %v2014_v12  ;;  %v2017_v57 = vadd.f32 %v5154_v19, %v6723_v60 }
 0x19b   : > { %v1977_v38 = vpop.f32.mrf.mxu1 }
 0x19c   : > { %7305 = vst [vmem:[#allocation19_spill] sm:$0xff] %v6818_v9  ;;  %v6821_v26 = vpop.f32.mrf.mxu0  ;;  %v6823_v47 = vadd.f32 %v5204_v45, %v2017_v57  ;;  %v2016_v27 = vadd.f32 %v1977_v38, %v6726_v34 }
 0x19d   : > { %v5209_v13 = vpop.f32.mrf.mxu1 }
 0x19e   : > { %7306 = vst [vmem:[#allocation20_spill] sm:$0xff] %v6823_v47  ;;  %v6826_v15 = vpop.f32.mrf.mxu0  ;;  %v6828_v59 = vadd.f32 %v2364_v6, %v2016_v27 }
 0x19f   : > { %v2601_v3 = vpop.f32.mrf.mxu1 }
 0x1a0   : > { %7307 = vst [vmem:[#allocation21_spill] sm:$0xff] %v6828_v59  ;;  %v6830_v2 = vpop.f32.mrf.mxu0 }
 0x1a1   : > { %v6832_v37 = vpop.f32.mrf.mxu1 }
 0x1a2   : > { %v6834_v55 = vpop.f32.mrf.mxu0 }
 0x1a3   : > { %v6836_v60 = vpop.f32.mrf.mxu1 }
 0x1a4   : > { %v6838_v11 = vpop.f32.mrf.mxu0 }
 0x1a5   : > { %v6840_v56 = vpop.f32.mrf.mxu1 }
 0x1a6   : > { %v6842_v5 = vpop.f32.mrf.mxu0 }
 0x1a7   : > { %v6844_v34 = vpop.f32.mrf.mxu1 }
 0x1a8   : > { %v6846_v31 = vpop.f32.mrf.mxu0 }
 0x1a9   : > { %v6848_v50 = vpop.f32.mrf.mxu1 }
 0x1aa   : > { %v6850_v48 = vpop.f32.mrf.mxu0 }
 0x1ab   : > { %v6852_v20 = vpop.f32.mrf.mxu1 }
 0x1ac   : > { %v6854_v54 = vpop.f32.mrf.mxu0 }
 0x1ad   : > { %v6856_v28 = vpop.f32.mrf.mxu1 }
 0x1ae   : > { %v6858_v40 = vpop.f32.mrf.mxu0 }
 0x1af   : > { %v6860_v63 = vpop.f32.mrf.mxu1 }
 0x1b0   : > { %v6862_v51 = vpop.f32.mrf.mxu0 }
 0x1b1   : > { %v6864_v18 = vpop.f32.mrf.mxu1 }
 0x1b2   : > { %v6866_v45 = vpop.f32.mrf.mxu0 }
 0x1b3   : > { %v6868_v44 = vpop.f32.mrf.mxu1 }
 0x1b4   : > { %v6870_v61 = vpop.f32.mrf.mxu0 }
 0x1b5   : > { %v6872_v6 = vpop.f32.mrf.mxu1 }
 0x1b6   : > { %v6874_v12 = vpop.f32.mrf.mxu0 }
 0x1b7   : > { %v6876_v19 = vpop.f32.mrf.mxu1 }
 0x1b8   : > { %v6878_v57 = vpop.f32.mrf.mxu0 }
 0x1b9   : > { %v6880_v38 = vpop.f32.mrf.mxu1 }
 0x1ba   : > { %v6882_v27 = vpop.f32.mrf.mxu0 }
 0x1bb   : > { %7308 = vst [vmem:[#allocation22_spill] sm:$0xff] %v6882_v27  ;;  %v6884_v59 = vpop.f32.mrf.mxu1 }
 0x1bc   : > { %v6886_v47 = vpop.f32.mrf.mxu0 }
 0x1bd   : > { %7309 = vst [vmem:[#allocation23_spill] sm:$0xff] %v6886_v47  ;;  %v6888_v9 = vpop.f32.mrf.mxu1 }
 0x1be   : > { %v6890_v8 = vpop.f32.mrf.mxu0 }
 0x1bf   : > { %7310 = vst [vmem:[#allocation24_spill] sm:$0xff] %v6890_v8  ;;  %v6892_v46 = vpop.f32.mrf.mxu1 }
 0x1c0   : > { %v6894_v42 = vpop.f32.mrf.mxu0 }
 0x1c1   : > { %7311 = vst [vmem:[#allocation25_spill] sm:$0xff] %v6894_v42  ;;  %v6896_v29 = vpop.f32.mrf.mxu1 }
 0x1c2   : > { %7312 = vst [vmem:[#allocation26_spill] sm:$0xff] %v6896_v29  ;;  %v6898_v49 = vpop.f32.mrf.mxu0 }
 0x1c3   : > { %7313 = vst [vmem:[#allocation27_spill] sm:$0xff] %v6898_v49  ;;  %v6900_v53 = vpop.f32.mrf.mxu1 }
 0x1c4   : > { %7314 = vst [vmem:[#allocation28_spill] sm:$0xff] %v6900_v53  ;;  %v6902_v1 = vpop.f32.mrf.mxu0 }
 0x1c5   : > { %7315 = vst [vmem:[#allocation29_spill] sm:$0xff] %v6902_v1  ;;  %v6904_v35 = vpop.f32.mrf.mxu1 }
 0x1c6   : > { %7316 = vst [vmem:[#allocation30_spill] sm:$0xff] %v6904_v35  ;;  %v6906_v4 = vpop.f32.mrf.mxu0 }
 0x1c7   : > { %7317 = vst [vmem:[#allocation31_spill] sm:$0xff] %v6906_v4  ;;  %v6908_v52 = vpop.f32.mrf.mxu1 }
 0x1c8   : > { %7318 = vst [vmem:[#allocation32_spill] sm:$0xff] %v6908_v52  ;;  %v6910_v47 = vpop.f32.mrf.mxu0 }
 0x1c9   : > { %7319 = vst [vmem:[#allocation3_spill] sm:$0xff] %v6910_v47  ;;  %v6912_v8 = vpop.f32.mrf.mxu1 }
 0x1ca   : > { %7320 = vst [vmem:[#allocation33_spill] sm:$0xff] %v6912_v8  ;;  %v6914_v14 = vpop.f32.mrf.mxu0 }
 0x1cb   : > { %7321 = vst [vmem:[#allocation4_spill] sm:$0xff] %v6914_v14  ;;  %v6916_v42 = vpop.f32.mrf.mxu1 }
 0x1cc   : > { %7322 = vst [vmem:[#allocation5_spill] sm:$0xff] %v6916_v42  ;;  %v6918_v29 = vpop.f32.mrf.mxu0 }
 0x1cd   : > { %7323 = vst [vmem:[#allocation6_spill] sm:$0xff] %v6918_v29  ;;  %v6920_v49 = vpop.f32.mrf.mxu1 }
 0x1ce   : > { %7324 = vst [vmem:[#allocation7_spill] sm:$0xff] %v6920_v49  ;;  %v6922_v53 = vpop.f32.mrf.mxu0 }
 0x1cf   : > { %7325 = vst [vmem:[#allocation34_spill] sm:$0xff] %v6922_v53  ;;  %v6924_v1 = vpop.f32.mrf.mxu1  ;;  %v2761_v53 = vadd.f32 %v5209_v13, %v6729_v58  ;;  %v2762_v58 = vadd.f32 %v6836_v60, %v6738_v62 }
 0x1d0   : > { %7326 = vst [vmem:[#allocation35_spill] sm:$0xff] %v6924_v1  ;;  %v6926_v35 = vpop.f32.mrf.mxu0 }
 0x1d1   : > { %7327 = vst [vmem:[#allocation36_spill] sm:$0xff] %v6926_v35  ;;  %v6928_v4 = vpop.f32.mrf.mxu1 }
 0x1d2   : > { %7328 = vst [vmem:[#allocation37_spill] sm:$0xff] %v6928_v4  ;;  %v6930_v52 = vpop.f32.mrf.mxu0  ;;  %v2760_v4 = vadd.f32 %v2601_v3, %v6732_v30  ;;  %v6961_v30 = vld [vmem:[%s7161_s2] ss:$0 sm:$0xff] }
 0x1d3   : > { %7329 = vst [vmem:[#allocation38_spill] sm:$0xff] %v6930_v52  ;;  %v6932_v47 = vpop.f32.mrf.mxu1 }
 0x1d4   : > { %7330 = vst [vmem:[#allocation39_spill] sm:$0xff] %v6932_v47  ;;  %v6934_v8 = vpop.f32.mrf.mxu0 }
 0x1d5   : > { %7331 = vst [vmem:[#allocation40_spill] sm:$0xff] %v6934_v8  ;;  %v6936_v14 = vpop.f32.mrf.mxu1  ;;  %v3151_v8 = vadd.f32 %v6816_v23, %v2761_v53 }
 0x1d6   : > { %7332 = vst [vmem:[#allocation41_spill] sm:$0xff] %v6936_v14  ;;  %v6938_v42 = vpop.f32.mrf.mxu0  ;;  %v2763_v14 = vadd.f32 %v6832_v37, %v6735_v0 }
 0x1d7   : > { %7333 = vst [vmem:[#allocation42_spill] sm:$0xff] %v6938_v42  ;;  %v6940_v29 = vpop.f32.mrf.mxu1 }
 0x1d8   : > { %7334 = vst [vmem:[#allocation43_spill] sm:$0xff] %v6940_v29  ;;  %v6942_v49 = vpop.f32.mrf.mxu0  ;;  %v3150_v29 = vadd.f32 %v6821_v26, %v2760_v4  ;;  %v3153_v0 = vadd.f32 %v6826_v15, %v2763_v14  ;;  %v2764_v4 = vadd.f32 %v6844_v34, %v6744_v24 }
 0x1d9   : > { %7335 = vst [vmem:[#allocation44_spill] sm:$0xff] %v6942_v49  ;;  %v6945_v1 = vpop.f32.mrf.mxu1  ;;  %v2765_v49 = vadd.f32 %v6840_v56, %v6741_v33 }
 0x1da   : > { %v5359_v35 = vpop.f32.mrf.mxu0 }
 0x1db   : > { %v6948_v52 = vpop.f32.mrf.mxu1  ;;  %v3155_v56 = vadd.f32 %v6834_v55, %v2765_v49  ;;  %v3154_v49 = vadd.f32 %v6838_v11, %v2764_v4 }
 0x1dc   : > { %7336 = vst [vmem:[#allocation45_spill] sm:$0xff] %v6948_v52  ;;  %v3765_v47 = vpop.f32.mrf.mxu0  ;;  %v2767_v52 = vadd.f32 %v6848_v50, %v6747_v17  ;;  %v2766_v17 = vadd.f32 %v6852_v20, %v6750_v10 }
 0x1dd   : > { %v5309_v42 = vpop.f32.mrf.mxu1 }
 0x1de   : > { %v5362_v27 = vpop.f32.mrf.mxu0  ;;  %v3538_v13 = vadd.f32 %v5309_v42, %v3151_v8  ;;  %v3152_v8 = vadd.f32 %v6830_v2, %v2762_v58  ;;  %v3156_v4 = vadd.f32 %v6846_v31, %v2766_v17 }
 0x1df   : > { %v3378_v53 = vpop.f32.mrf.mxu1 }
 0x1e0   : > { %v3775_v23 = vpop.f32.mrf.mxu0  ;;  %v3925_v3 = vadd.f32 %v5359_v35, %v3538_v13  ;;  %v3537_v37 = vadd.f32 %v3378_v53, %v3150_v29  ;;  %v3157_v53 = vadd.f32 %v6842_v5, %v2767_v52 }
 0x1e1   : > { %v5312_v62 = vpop.f32.mrf.mxu1 }
 0x1e2   : > { %v5365_v42 = vpop.f32.mrf.mxu0  ;;  %v3964_v33 = vadd.f32 %v6961_v30, %v3925_v3  ;;  %v3924_v26 = vadd.f32 %v3765_v47, %v3537_v37  ;;  %v3540_v60 = vadd.f32 %v5312_v62, %v3153_v0 }
 0x1e3   : > { %v3388_v24 = vpop.f32.mrf.mxu1 }
 0x1e4   : > { %v3785_v14 = vpop.f32.mrf.mxu0  ;;  %v3996_v35 = vmax.f32 %v3964_v33, 0.0  ;;  %v3963_v29 = vadd.f32 %v6961_v30, %v3924_v26  ;;  %v3927_v47 = vadd.f32 %v5362_v27, %v3540_v60  ;;  %v3539_v15 = vadd.f32 %v3388_v24, %v3152_v8 }
 0x1e5   : > { %v5315_v2 = vpop.f32.mrf.mxu1  ;;  %v2769_v27 = vadd.f32 %v6856_v28, %v6753_v43 }
 0x1e6   : > { %v5368_v55 = vpop.f32.mrf.mxu0  ;;  %4028 = vst.msk [vmem:[%s6976_s29 + $0x8] sm:$0xff] %vm308_vm0, %v3996_v35  ;;  %v3995_v34 = vmax.f32 %v3963_v29, 0.0  ;;  %v3966_v50 = vadd.f32 %v6961_v30, %v3927_v47  ;;  %v3926_v58 = vadd.f32 %v3775_v23, %v3539_v15  ;;  %v3542_v13 = vadd.f32 %v5315_v2, %v3155_v56 }
 0x1e7   : > { %v3398_v0 = vpop.f32.mrf.mxu1  ;;  %v2768_v23 = vadd.f32 %v6860_v63, %v6756_v22  ;;  %v3159_v33 = vadd.f32 %v6850_v48, %v2769_v27 }
 0x1e8   : > { %v3795_v11 = vpop.f32.mrf.mxu0  ;;  %4027 = vst.msk [vmem:[%s6976_s29] sm:$0xff] %vm308_vm0, %v3995_v34  ;;  %v3998_v10 = vmax.f32 %v3966_v50, 0.0  ;;  %v3965_v20 = vadd.f32 %v6961_v30, %v3926_v58  ;;  %v3929_v3 = vadd.f32 %v5365_v42, %v3542_v13  ;;  %v3541_v37 = vadd.f32 %v3398_v0, %v3154_v49 }
 0x1e9   : > { %v5318_v62 = vpop.f32.mrf.mxu1  ;;  %v2771_v42 = vadd.f32 %v6864_v18, %v6759_v32  ;;  %v3158_v24 = vadd.f32 %v6854_v54, %v2768_v23  ;;  %v2773_v49 = vadd.f32 %v6872_v6, %v6765_v25  ;;  %v2772_v50 = vadd.f32 %v6876_v19, %v6768_v16 }
 0x1ea   : > { %v5371_v52 = vpop.f32.mrf.mxu0  ;;  %4030 = vst.msk [vmem:[%s6976_s29 + $0x18] sm:$0xff] %vm308_vm0, %v3998_v10  ;;  %v3997_v43 = vmax.f32 %v3965_v20, 0.0  ;;  %v3968_v5 = vadd.f32 %v6961_v30, %v3929_v3  ;;  %v3928_v28 = vadd.f32 %v3785_v14, %v3541_v37  ;;  %v3544_v8 = vadd.f32 %v5318_v62, %v3157_v53 }
 0x1eb   : > { %v3408_v26 = vpop.f32.mrf.mxu1  ;;  %v2770_v14 = vadd.f32 %v6868_v44, %v6762_v39  ;;  %v3161_v15 = vadd.f32 %v6858_v40, %v2771_v42  ;;  %v3163_v27 = vadd.f32 %v6866_v45, %v2773_v49  ;;  %v2775_v0 = vadd.f32 %v6880_v38, %v6771_v36 }
 0x1ec   : > { %v3805_v31 = vpop.f32.mrf.mxu0  ;;  %4029 = vst.msk [vmem:[%s6976_s29 + $0x10] sm:$0xff] %vm308_vm0, %v3997_v43  ;;  %v4000_v22 = vmax.f32 %v3968_v5, 0.0  ;;  %v3967_v63 = vadd.f32 %v6961_v30, %v3928_v28  ;;  %v3931_v60 = vadd.f32 %v5368_v55, %v3544_v8  ;;  %v3543_v56 = vadd.f32 %v3408_v26, %v3156_v4 }
 0x1ed   : > { %v5321_v35 = vpop.f32.mrf.mxu1  ;;  %v3160_v34 = vadd.f32 %v6862_v51, %v2770_v14  ;;  %v3162_v3 = vadd.f32 %v6870_v61, %v2772_v50  ;;  %v2774_v37 = vadd.f32 %v6884_v59, %v6774_v7  ;;  %v2777_v43 = vadd.f32 %v6888_v9, %v6777_v21 }
 0x1ee   : > { %v5374_v48 = vpop.f32.mrf.mxu0  ;;  %4032 = vst.msk [vmem:[%s6976_s29 + $0x28] sm:$0xff] %vm308_vm0, %v4000_v22  ;;  %v3999_v32 = vmax.f32 %v3967_v63, 0.0  ;;  %v3970_v18 = vadd.f32 %v6961_v30, %v3931_v60  ;;  %v3930_v29 = vadd.f32 %v3795_v11, %v3543_v56  ;;  %v3546_v47 = vadd.f32 %v5321_v35, %v3159_v33  ;;  %v7337_v63 = vld [vmem:[#allocation22_spill] sm:$0xff]  ;;  %v7338_v56 = vld [vmem:[#allocation8_spill] sm:$0xff] }
 0x1ef   : > { %v3418_v17 = vpop.f32.mrf.mxu1  ;;  %v3164_v33 = vadd.f32 %v6878_v57, %v2774_v37  ;;  %v2776_v42 = vadd.f32 %v6892_v46, %v6780_v41  ;;  %v3167_v60 = vadd.f32 %v7337_v63, %v2777_v43  ;;  %v7351_v43 = vld [vmem:[#allocation33_spill] sm:$0xff] }
 0x1f0   : > { %v3815_v54 = vpop.f32.mrf.mxu0  ;;  %4031 = vst.msk [vmem:[%s6976_s29 + $0x20] sm:$0xff] %vm308_vm0, %v3999_v32  ;;  %v4002_v39 = vmax.f32 %v3970_v18, 0.0  ;;  %v3969_v44 = vadd.f32 %v6961_v30, %v3930_v29  ;;  %v3933_v2 = vadd.f32 %v5371_v52, %v3546_v47  ;;  %v3545_v55 = vadd.f32 %v3418_v17, %v3158_v24  ;;  %v7339_v24 = vld [vmem:[#allocation26_spill] sm:$0xff]  ;;  %v7340_v18 = vld [vmem:[#allocation23_spill] sm:$0xff]  ;;  %v7341_v47 = vld [vmem:[#allocation9_spill] sm:$0xff] }
 0x1f1   : > { %v5324_v58 = vpop.f32.mrf.mxu1  ;;  %v3165_v52 = vadd.f32 %v6874_v12, %v2775_v0  ;;  %v2779_v14 = vadd.f32 %v7339_v24, %v7338_v56  ;;  %v3166_v29 = vadd.f32 %v7340_v18, %v2776_v42  ;;  %v7352_v42 = vld [vmem:[#allocation29_spill] sm:$0xff] }
 0x1f2   : > { %v5377_v40 = vpop.f32.mrf.mxu0  ;;  %4034 = vst.msk [vmem:[%s6976_s29 + $0x38] sm:$0xff] %vm308_vm0, %v4002_v39  ;;  %v4001_v25 = vmax.f32 %v3969_v44, 0.0  ;;  %v3972_v6 = vadd.f32 %v6961_v30, %v3933_v2  ;;  %v3932_v13 = vadd.f32 %v3805_v31, %v3545_v55  ;;  %v3548_v53 = vadd.f32 %v5324_v58, %v3161_v15  ;;  %v7342_v15 = vld [vmem:[#allocation28_spill] sm:$0xff]  ;;  %v7344_v58 = vld [vmem:[#allocation10_spill] sm:$0xff] }
 0x1f3   : > { %v3428_v11 = vpop.f32.mrf.mxu1  ;;  %v2778_v49 = vadd.f32 %v7342_v15, %v7341_v47 }
 0x1f4   : > { %v3825_v51 = vpop.f32.mrf.mxu0  ;;  %4033 = vst.msk [vmem:[%s6976_s29 + $0x30] sm:$0xff] %vm308_vm0, %v4001_v25  ;;  %v4004_v16 = vmax.f32 %v3972_v6, 0.0  ;;  %v3971_v19 = vadd.f32 %v6961_v30, %v3932_v13  ;;  %v3935_v10 = vadd.f32 %v5374_v48, %v3548_v53  ;;  %v3547_v20 = vadd.f32 %v3428_v11, %v3160_v34  ;;  %v7343_v34 = vld [vmem:[#allocation24_spill] sm:$0xff] }
 0x1f5   : > { %v5327_v4 = vpop.f32.mrf.mxu1  ;;  %v3169_v50 = vadd.f32 %v7343_v34, %v2779_v14  ;;  %v7355_v14 = vld [vmem:[#allocation31_spill] sm:$0xff] }
 0x1f6   : > { %v5380_v45 = vpop.f32.mrf.mxu0  ;;  %4036 = vst.msk [vmem:[%s6976_s29 + $0x48] sm:$0xff] %vm308_vm0, %v4004_v16  ;;  %v4003_v36 = vmax.f32 %v3971_v19, 0.0  ;;  %v3974_v38 = vadd.f32 %v6961_v30, %v3935_v10  ;;  %v3934_v23 = vadd.f32 %v3815_v54, %v3547_v20  ;;  %v3550_v62 = vadd.f32 %v5327_v4, %v3163_v27  ;;  %v7347_v19 = vld [vmem:[#allocation11_spill] sm:$0xff]  ;;  %v7348_v10 = vld [vmem:[#allocation32_spill] sm:$0xff] }
 0x1f7   : > { %v3438_v5 = vpop.f32.mrf.mxu1  ;;  %v2780_v20 = vadd.f32 %v7348_v10, %v7347_v19 }
 0x1f8   : > { %v3835_v61 = vpop.f32.mrf.mxu0  ;;  %4035 = vst.msk [vmem:[%s6976_s29 + $0x40] sm:$0xff] %vm308_vm0, %v4003_v36  ;;  %v4006_v7 = vmax.f32 %v3974_v38, 0.0  ;;  %v3973_v59 = vadd.f32 %v6961_v30, %v3934_v23  ;;  %v3937_v28 = vadd.f32 %v5377_v40, %v3550_v62  ;;  %v3549_v8 = vadd.f32 %v3438_v5, %v3162_v3  ;;  %v7345_v40 = vld [vmem:[#allocation30_spill] sm:$0xff]  ;;  %v7349_v23 = vld [vmem:[#allocation27_spill] sm:$0xff] }
 0x1f9   : > { %v5330_v26 = vpop.f32.mrf.mxu1  ;;  %v2781_v25 = vadd.f32 %v7345_v40, %v7344_v58 }
 0x1fa   : > { %v5383_v12 = vpop.f32.mrf.mxu0  ;;  %4038 = vst.msk [vmem:[%s6976_s29 + $0x58] sm:$0xff] %vm308_vm0, %v4006_v7  ;;  %v4005_v21 = vmax.f32 %v3973_v59, 0.0  ;;  %v3976_v9 = vadd.f32 %v6961_v30, %v3937_v28  ;;  %v3936_v31 = vadd.f32 %v3825_v51, %v3549_v8  ;;  %v3552_v22 = vadd.f32 %v5330_v26, %v3165_v52  ;;  %v7346_v51 = vld [vmem:[#allocation25_spill] sm:$0xff]  ;;  %v7350_v52 = vld [vmem:[#allocation12_spill] sm:$0xff] }
 0x1fb   : > { %v3448_v35 = vpop.f32.mrf.mxu1  ;;  %v3168_v16 = vadd.f32 %v7346_v51, %v2778_v49  ;;  %v3171_v62 = vadd.f32 %v7349_v23, %v2781_v25  ;;  %v2783_v5 = vadd.f32 %v7351_v43, %v7350_v52  ;;  %v3170_v26 = vadd.f32 %v7352_v42, %v2780_v20  ;;  %v7358_v49 = vld [vmem:[#allocation3_spill] sm:$0xff]  ;;  %v7361_v25 = vld [vmem:[#allocation4_spill] sm:$0xff]  ;;  %v7364_v20 = vld [vmem:[#allocation6_spill] sm:$0xff] }
 0x1fc   : > { %v3845_v57 = vpop.f32.mrf.mxu0  ;;  %4037 = vst.msk [vmem:[%s6976_s29 + $0x50] sm:$0xff] %vm308_vm0, %v4005_v21  ;;  %v4008_v41 = vmax.f32 %v3976_v9, 0.0  ;;  %v3975_v46 = vadd.f32 %v6961_v30, %v3936_v31  ;;  %v3939_v48 = vadd.f32 %v5380_v45, %v3552_v22  ;;  %v3551_v32 = vadd.f32 %v3448_v35, %v3164_v33  ;;  %v7354_v21 = vld [vmem:[#allocation5_spill] sm:$0xff] }
 0x1fd   : > { %v5333_v17 = vpop.f32.mrf.mxu1  ;;  %v3173_v35 = vadd.f32 %v7355_v14, %v2783_v5  ;;  %v7367_v5 = vld [vmem:[#allocation34_spill] sm:$0xff] }
 0x1fe   : > { %v5386_v54 = vpop.f32.mrf.mxu0  ;;  %4040 = vst.msk [vmem:[%s6976_s29 + $0x68] sm:$0xff] %vm308_vm0, %v4008_v41  ;;  %v4007_v39 = vmax.f32 %v3975_v46, 0.0  ;;  %v3978_v44 = vadd.f32 %v6961_v30, %v3939_v48  ;;  %v3938_v2 = vadd.f32 %v3835_v61, %v3551_v32  ;;  %v3554_v55 = vadd.f32 %v5333_v17, %v3167_v60  ;;  %v7357_v41 = vld [vmem:[#allocation7_spill] sm:$0xff] }
 0x1ff   : > { %v3458_v6 = vpop.f32.mrf.mxu1 }
 0x200   : > { %v3855_v13 = vpop.f32.mrf.mxu0  ;;  %4039 = vst.msk [vmem:[%s6976_s29 + $0x60] sm:$0xff] %vm308_vm0, %v4007_v39  ;;  %v4010_v53 = vmax.f32 %v3978_v44, 0.0  ;;  %v3977_v27 = vadd.f32 %v6961_v30, %v3938_v2  ;;  %v3941_v0 = vadd.f32 %v5383_v12, %v3554_v55  ;;  %v3553_v11 = vadd.f32 %v3458_v6, %v3166_v29  ;;  %v7353_v12 = vld [vmem:[#allocation13_spill] sm:$0xff]  ;;  %v7360_v39 = vld [vmem:[#allocation35_spill] sm:$0xff] }
 0x201   : > { %v5336_v3 = vpop.f32.mrf.mxu1  ;;  %v2782_v9 = vadd.f32 %v7354_v21, %v7353_v12 }
 0x202   : > { %v5389_v37 = vpop.f32.mrf.mxu0  ;;  %4042 = vst.msk [vmem:[%s6976_s29 + $0x78] sm:$0xff] %vm308_vm0, %v4010_v53  ;;  %v4009_v4 = vmax.f32 %v3977_v27, 0.0  ;;  %v3980_v45 = vadd.f32 %v6961_v30, %v3941_v0  ;;  %v3940_v36 = vadd.f32 %v3845_v57, %v3553_v11  ;;  %v3556_v38 = vadd.f32 %v5336_v3, %v3169_v50  ;;  %v7356_v57 = vld [vmem:[#allocation14_spill] sm:$0xff]  ;;  %v7363_v53 = vld [vmem:[#allocation37_spill] sm:$0xff] }
 0x203   : > { %v3468_v61 = vpop.f32.mrf.mxu1  ;;  %v2785_v46 = vadd.f32 %v7357_v41, %v7356_v57  ;;  %v3172_v17 = vadd.f32 %v7358_v49, %v2782_v9  ;;  %v7370_v9 = vld [vmem:[#allocation36_spill] sm:$0xff] }
 0x204   : > { %v3865_v7 = vpop.f32.mrf.mxu0  ;;  %4041 = vst.msk [vmem:[%s6976_s29 + $0x70] sm:$0xff] %vm308_vm0, %v4009_v4  ;;  %v4012_v59 = vmax.f32 %v3980_v45, 0.0  ;;  %v3979_v28 = vadd.f32 %v6961_v30, %v3940_v36  ;;  %v3943_v8 = vadd.f32 %v5386_v54, %v3556_v38  ;;  %v3555_v33 = vadd.f32 %v3468_v61, %v3168_v16  ;;  %v7359_v54 = vld [vmem:[#allocation15_spill] sm:$0xff] }
 0x205   : > { %v5339_v31 = vpop.f32.mrf.mxu1  ;;  %v2784_v44 = vadd.f32 %v7360_v39, %v7359_v54  ;;  %v3175_v6 = vadd.f32 %v7361_v25, %v2785_v46  ;;  %v7366_v4 = vld [vmem:[#allocation39_spill] sm:$0xff]  ;;  %v7373_v46 = vld [vmem:[#allocation38_spill] sm:$0xff]  ;;  %v7375_v54 = vld [vmem:[#allocation40_spill] sm:$0xff] }
 0x206   : > { %v5392_v22 = vpop.f32.mrf.mxu0  ;;  %4044 = vst.msk [vmem:[%s6976_s29 + $0x88] sm:$0xff] %vm308_vm0, %v4012_v59  ;;  %v4011_v63 = vmax.f32 %v3979_v28, 0.0  ;;  %v3982_v60 = vadd.f32 %v6961_v30, %v3943_v8  ;;  %v3942_v56 = vadd.f32 %v3855_v13, %v3555_v33  ;;  %v3558_v24 = vadd.f32 %v5339_v31, %v3171_v62  ;;  %v7362_v13 = vld [vmem:[#allocation16_spill] sm:$0xff]  ;;  %v7369_v59 = vld [vmem:[#allocation41_spill] sm:$0xff] }
 0x207   : > { %v3478_v48 = vpop.f32.mrf.mxu1  ;;  %v2787_v27 = vadd.f32 %v7363_v53, %v7362_v13  ;;  %v3174_v3 = vadd.f32 %v7364_v20, %v2784_v44  ;;  %v7376_v44 = vld [vmem:[#allocation21_spill] sm:$0xff] }
 0x208   : > { %v3875_v32 = vpop.f32.mrf.mxu0  ;;  %4043 = vst.msk [vmem:[%s6976_s29 + $0x80] sm:$0xff] %vm308_vm0, %v4011_v63  ;;  %v4014_v18 = vmax.f32 %v3982_v60, 0.0  ;;  %v3981_v29 = vadd.f32 %v6961_v30, %v3942_v56  ;;  %v3945_v47 = vadd.f32 %v5389_v37, %v3558_v24  ;;  %v3557_v15 = vadd.f32 %v3478_v48, %v3170_v26  ;;  %v7365_v37 = vld [vmem:[#allocation17_spill] sm:$0xff]  ;;  %v7372_v63 = vld [vmem:[#allocation43_spill] sm:$0xff] }
 0x209   : > { %v5342_v2 = vpop.f32.mrf.mxu1  ;;  %v2786_v45 = vadd.f32 %v7366_v4, %v7365_v37  ;;  %v3177_v61 = vadd.f32 %v7367_v5, %v2787_v27 }
 0x20a   : > { %v5395_v55 = vpop.f32.mrf.mxu0  ;;  %4046 = vst.msk [vmem:[%s6976_s29 + $0x98] sm:$0xff] %vm308_vm0, %v4014_v18  ;;  %v4013_v34 = vmax.f32 %v3981_v29, 0.0  ;;  %v3984_v50 = vadd.f32 %v6961_v30, %v3945_v47  ;;  %v3944_v58 = vadd.f32 %v3865_v7, %v3557_v15  ;;  %v3560_v40 = vadd.f32 %v5342_v2, %v3173_v35  ;;  %v7368_v7 = vld [vmem:[#allocation18_spill] sm:$0xff]  ;;  %v7377_v2 = vld [vmem:[#allocation45_spill] sm:$0xff] }
 0x20b   : > { %v3488_v0 = vpop.f32.mrf.mxu1  ;;  %v2789_v28 = vadd.f32 %v7369_v59, %v7368_v7  ;;  %v3176_v31 = vadd.f32 %v7370_v9, %v2786_v45 }
 0x20c   : > { %v3885_v11 = vpop.f32.mrf.mxu0  ;;  %4045 = vst.msk [vmem:[%s6976_s29 + $0x90] sm:$0xff] %vm308_vm0, %v4013_v34  ;;  %v4016_v51 = vmax.f32 %v3984_v50, 0.0  ;;  %v3983_v16 = vadd.f32 %v6961_v30, %v3944_v58  ;;  %v3947_v19 = vadd.f32 %v5392_v22, %v3560_v40  ;;  %v3559_v10 = vadd.f32 %v3488_v0, %v3172_v17  ;;  %v7371_v22 = vld [vmem:[#allocation19_spill] sm:$0xff] }
 0x20d   : > { %v5345_v36 = vpop.f32.mrf.mxu1  ;;  %v2788_v60 = vadd.f32 %v7372_v63, %v7371_v22  ;;  %v3179_v48 = vadd.f32 %v7373_v46, %v2789_v28 }
 0x20e   : > { %v5398_v38 = vpop.f32.mrf.mxu0  ;;  %4048 = vst.msk [vmem:[%s6976_s29 + $0xa8] sm:$0xff] %vm308_vm0, %v4016_v51  ;;  %v4015_v23 = vmax.f32 %v3983_v16, 0.0  ;;  %v3986_v62 = vadd.f32 %v6961_v30, %v3947_v19  ;;  %v3946_v52 = vadd.f32 %v3875_v32, %v3559_v10  ;;  %v3562_v43 = vadd.f32 %v5345_v36, %v3175_v6  ;;  %v7374_v32 = vld [vmem:[#allocation20_spill] sm:$0xff]  ;;  %v7378_v6 = vld [vmem:[#allocation42_spill] sm:$0xff] }
 0x20f   : > { %v3498_v8 = vpop.f32.mrf.mxu1  ;;  %v2791_v18 = vadd.f32 %v6945_v1, %v7374_v32  ;;  %v3178_v39 = vadd.f32 %v7375_v54, %v2788_v60  ;;  %v7379_v16 = vld [vmem:[#allocation44_spill] sm:$0xff] }
 0x210   : > { %v3895_v33 = vpop.f32.mrf.mxu0  ;;  %4047 = vst.msk [vmem:[%s6976_s29 + $0xa0] sm:$0xff] %vm308_vm0, %v4015_v23  ;;  %v4018_v42 = vmax.f32 %v3986_v62, 0.0  ;;  %v3985_v26 = vadd.f32 %v6961_v30, %v3946_v52  ;;  %v3949_v12 = vadd.f32 %v5395_v55, %v3562_v43  ;;  %v3561_v21 = vadd.f32 %v3498_v8, %v3174_v3 }
 0x211   : > { %v5348_v56 = vpop.f32.mrf.mxu1  ;;  %v2790_v55 = vadd.f32 %v7377_v2, %v7376_v44  ;;  %v3181_v13 = vadd.f32 %v7378_v6, %v2791_v18 }
 0x212   : > { %v5401_v24 = vpop.f32.mrf.mxu0  ;;  %4050 = vst.msk [vmem:[%s6976_s29 + $0xb8] sm:$0xff] %vm308_vm0, %v4018_v42  ;;  %v4017_v14 = vmax.f32 %v3985_v26, 0.0  ;;  %v3988_v35 = vadd.f32 %v6961_v30, %v3949_v12  ;;  %v3948_v57 = vadd.f32 %v3885_v11, %v3561_v21  ;;  %v3564_v41 = vadd.f32 %v5348_v56, %v3177_v61 }
 0x213   : > { %v3508_v29 = vpop.f32.mrf.mxu1  ;;  %v3180_v19 = vadd.f32 %v7379_v16, %v2790_v55 }
 0x214   : > { %4049 = vst.msk [vmem:[%s6976_s29 + $0xb0] sm:$0xff] %vm308_vm0, %v4017_v14  ;;  %v4020_v47 = vmax.f32 %v3988_v35, 0.0  ;;  %v3987_v15 = vadd.f32 %v6961_v30, %v3948_v57  ;;  %v3951_v49 = vadd.f32 %v5398_v38, %v3564_v41  ;;  %v3563_v17 = vadd.f32 %v3508_v29, %v3176_v31  ;;  %v3905_v50 = vpop.f32.mrf.mxu0 }
 0x215   : > { %v5351_v34 = vpop.f32.mrf.mxu1 }
 0x216   : > { %4052 = vst.msk [vmem:[%s6976_s29 + $0xc8] sm:$0xff] %vm308_vm0, %v4020_v47  ;;  %v4019_v1 = vmax.f32 %v3987_v15, 0.0  ;;  %v3990_v58 = vadd.f32 %v6961_v30, %v3951_v49  ;;  %v3950_v40 = vadd.f32 %v3895_v33, %v3563_v17  ;;  %v3566_v25 = vadd.f32 %v5351_v34, %v3179_v48  ;;  %v5404_v20 = vpop.f32.mrf.mxu0 }
 0x217   : > { %v3518_v53 = vpop.f32.mrf.mxu1 }
 0x218   : > { %4051 = vst.msk [vmem:[%s6976_s29 + $0xc0] sm:$0xff] %vm308_vm0, %v4019_v1  ;;  %v4022_v27 = vmax.f32 %v3990_v58, 0.0  ;;  %v3989_v0 = vadd.f32 %v6961_v30, %v3950_v40  ;;  %v3953_v11 = vadd.f32 %v5401_v24, %v3566_v25  ;;  %v3565_v51 = vadd.f32 %v3518_v53, %v3178_v39  ;;  %v3915_v43 = vpop.f32.mrf.mxu0 }
 0x219   : > { %v5354_v10 = vpop.f32.mrf.mxu1 }
 0x21a   : > { %4054 = vst.msk [vmem:[%s6976_s29 + $0xd8] sm:$0xff] %vm308_vm0, %v4022_v27  ;;  %v4021_v3 = vmax.f32 %v3989_v0, 0.0  ;;  %v3992_v37 = vadd.f32 %v6961_v30, %v3953_v11  ;;  %v3952_v4 = vadd.f32 %v3905_v50, %v3565_v51  ;;  %v3568_v45 = vadd.f32 %v5354_v10, %v3181_v13 }
 0x21b   : > { %v3528_v36 = vpop.f32.mrf.mxu1 }
 0x21c   : > { %4053 = vst.msk [vmem:[%s6976_s29 + $0xd0] sm:$0xff] %vm308_vm0, %v4021_v3  ;;  %v4024_v38 = vmax.f32 %v3992_v37, 0.0  ;;  %v3991_v23 = vadd.f32 %v6961_v30, %v3952_v4  ;;  %v3955_v62 = vadd.f32 %v5404_v20, %v3568_v45  ;;  %v3567_v52 = vadd.f32 %v3528_v36, %v3180_v19 }
 0x21e   : > { %4056 = vst.msk [vmem:[%s6976_s29 + $0xe8] sm:$0xff] %vm308_vm0, %v4024_v38  ;;  %v4023_v5 = vmax.f32 %v3991_v23, 0.0  ;;  %v3994_v61 = vadd.f32 %v6961_v30, %v3955_v62  ;;  %v3954_v7 = vadd.f32 %v3915_v43, %v3567_v52 }
 0x220   : > { %4055 = vst.msk [vmem:[%s6976_s29 + $0xe0] sm:$0xff] %vm308_vm0, %v4023_v5  ;;  %v4026_v59 = vmax.f32 %v3994_v61, 0.0  ;;  %v3993_v28 = vadd.f32 %v6961_v30, %v3954_v7 }
 0x222   : > { %4058 = vst.msk [vmem:[%s6976_s29 + $0xf8] sm:$0xff] %vm308_vm0, %v4026_v59  ;;  %v4025_v8 = vmax.f32 %v3993_v28, 0.0 }
 0x224   : > { %4057 = vst.msk [vmem:[%s6976_s29 + $0xf0] sm:$0xff] %vm308_vm0, %v4025_v8 }
 0x225 PF: > { %s17_s26 = sadd.s32 1, %s5456_s26   ;;  %s7380_s24 = smov %s5452_s25 }
 0x226   : > { %p14_p5 = scmp.ge.s32.totalorder %s17_s26, 4   ;;  %s7381_s25 = smov %s7383_s27 }
 0x228   :  { %16 = sbr.rel (!%p14_p5) target bundleno = 2 (0x2), region = 94 }

// kernel: inception_forward.6
= control target key start
LH: loop header
LB: loop body
LE: loop exit
PB: predicated region body
PF: predicated region fallthrough
CT: control target
= control target key end

     0   :  { %s6030_s30 = smov 0   ;;  %s6032_s10 = smov 0   ;;  %s7815_s0 = inlined_call_operand.vmem [shape: f32[2,16,16,32], index: 0, kind: input, shape index: {}]   ;;  %s7816_s1 = inlined_call_operand.vmem [shape: f32[9,16,16], index: 1, kind: input, shape index: {}]   ;;  %s7817_s2 = inlined_call_operand.vmem [shape: f32[1,16], index: 2, kind: input, shape index: {}]   ;;  %s7818_s3 = inlined_call_operand.vmem [shape: f32[2,1,32], index: 3, kind: input, shape index: {}]   ;;  %s7819_s4 = inlined_call_operand.vmem [shape: f32[2,1,32], index: 4, kind: input, shape index: {}]   ;;  %s7820_s5 = inlined_call_operand.vmem [shape: f32[1,16], index: 5, kind: input, shape index: {}]   ;;  %s7821_s6 = inlined_call_operand.vmem [shape: f32[1,16], index: 6, kind: input, shape index: {}]   ;;  %s7822_s7 = inlined_call_operand.vmem [shape: f32[2,16,16,16], index: 7, kind: output, shape index: {0}]   ;;  %s7823_s8 = inlined_call_operand.vmem [shape: f32[2,1,16], index: 8, kind: output, shape index: {1}]   ;;  %s7824_s9 = inlined_call_operand.vmem [shape: f32[2,1,16], index: 9, kind: output, shape index: {2}]  }
   0x1   :  { %s6034_s11 = smov 0  }
   0x2 LB: > { %s32_s12 = sadd.s32 1, %s5970_s10  ;;  %p4638_p0 = scmp.ge.s32.totalorder %s5974_s11, 1  ;;  %s5974_s11 = sphi %s6034_s11, %s20_s11   ;;  %s5970_s10 = sphi %s6032_s10, %s7981_s10   ;;  %s5966_s30 = sphi %s6030_s30, %s7980_s30  }
   0x3   : > { %p34_p1 = scmp.ge.s32.totalorder %s32_s12, 2  ;;  %p306_p2 = scmp.lt.s32.totalorder %s5974_s11, 3 }
   0x5   : > { %s7983_s12 = smov (%p34_p1, %s32_s12), 0  ;;  %p307_p3 = pnand %p4638_p0, %p306_p2 }
   0x7   : > { %310 = sbr.rel (%p307_p3) target bundleno = 1186 (0x4a2), region = 48 }
   0xc   : > { %v467_v0 = vld [vmem:[%s7818_s3] sm:$0x1]  ;;  %v468_v1 = vld [vmem:[%s7818_s3 + $0x1] sm:$0x1]  ;;  %vm469_vm0 = vcmask 253952   ;;  %v490_v18 = vlaneseq  ;;  %s5977_s21 = smov 120  }
   0xd   : > { %v470_v2 = vsel %vm469_vm0, %v467_v0, 0.0  ;;  %v471_v3 = vsel %vm469_vm0, %v468_v1, 0.0  ;;  %v473_v4 = vld [vmem:[%s7819_s4] sm:$0x1]  ;;  %v474_v5 = vld [vmem:[%s7819_s4 + $0x1] sm:$0x1] }
   0xe   : > { %v472_v6 = vadd.f32 %v471_v3, %v470_v2  ;;  %v475_v7 = vsel %vm469_vm0, %v473_v4, 0.0  ;;  %v476_v8 = vsel %vm469_vm0, %v474_v5, 0.0  ;;  %v5976_v16 = vmov 1966171168   ;;  %v485_v25 = vld [vmem:[%s7820_s5] sm:$0x1] }
   0xf   : > { %v477_v9 = vadd.f32 %v476_v8, %v475_v7  ;;  %v488_v17 = vunpack.c.l.s4 %v5976_v16  ;;  %v491_v20 = vshrl.u32 %v490_v18, 7  ;;  %s5978_s24 = smov 8   ;;  %v505_v34 = vld [vmem:[%s7821_s6] sm:$0x1]  ;;  %vm379_vm1 = vcmask 130048   ;;  %p353_p4 = scmp.lt.s32.totalorder %s5966_s30, 1 }
  0x10   : > { %v478_v10 = vmul.f32 0.001953125, %v472_v6  ;;  %vm382_vm2 = vcmask 123904   ;;  %v7825_v38 = vmov 0.0   ;;  %v4644_v39 = vld [vmem:[%s7816_s1 + $0x18] sm:$0xff]  ;;  %v4643_v40 = vld [vmem:[%s7816_s1 + $0x10] sm:$0xff]  ;;  %vm767_vm3 = vcmask 122880  }
  0x11   : > { %v479_v11 = vmul.f32 0.001953125, %v477_v9  ;;  %v489_v19 = vunpack.c.0.s8 %v488_v17  ;;  %v509_v26 = vsub.s32 0, %v491_v20  ;;  %406 = vst.msk [vmem:[#allocation2 + $0xc8] sm:$0xff] %vm379_vm1, %v7825_v38  ;;  %380 = vst.msk [vmem:[#allocation2] sm:$0xff] %vm379_vm1, %v7825_v38  ;;  %s7985_s30 = smov (!%p353_p4, %s5966_s30), 1  ;;  %5918 = vmatprep.subr.mxu1 %v4644_v39  ;;  %5450 = vmatprep.subr.mxu0 %v4644_v39 }
  0x12   : > { %v480_v12 = vmul.f32 %v478_v10, %v478_v10  ;;  %407 = vst.msk [vmem:[#allocation2 + $0xd0] sm:$0x3] %vm382_vm2, %v7825_v38  ;;  %383 = vst.msk [vmem:[#allocation2 + $0x10] sm:$0x3] %vm382_vm2, %v7825_v38  ;;  %s5142_s27 = sshll.u32 %s7985_s30, 8  ;;  %5920 = vmatpush3.msra.mxu1 %v4644_v39  ;;  %5451 = vmatpush3.msra.mxu0 %v4644_v39  ;;  %s7452_s20 = scalar_lea.vmem %s7823_s8, %s7985_s30 }
  0x13   : > { %v492_v21 = vsub.s32 %v489_v19, %v491_v20  ;;  %381 = vst.msk [vmem:[#allocation2 + $0x8] sm:$0xff] %vm379_vm1, %v7825_v38  ;;  %384 = vst.msk [vmem:[#allocation2 + $0x18] sm:$0xff] %vm379_vm1, %v7825_v38  ;;  %s6191_s13 = scalar_lea.vmem %s7815_s0, %s5142_s27  ;;  %5919 = vmatprep.subr.mxu1 %v4643_v40  ;;  %5452 = vmatprep.subr.mxu0 %v4643_v40  ;;  %v6258_v20 = vld [vmem:[%s7816_s1 + $0x8] sm:$0xff]  ;;  %s7594_s29 = scalar_lea.vmem %s7822_s7, %s5142_s27 }
  0x14   : > { %v481_v13 = vsub.f32 %v479_v11, %v480_v12  ;;  %385 = vst.msk [vmem:[#allocation2 + $0x20] sm:$0xff] %vm379_vm1, %v7825_v38  ;;  %387 = vst.msk [vmem:[#allocation2 + $0x30] sm:$0xff] %vm379_vm1, %v7825_v38  ;;  %v450_v41 = vld [vmem:[%s6191_s13 + $0x78] sm:$0xff]  ;;  %v449_v42 = vld [vmem:[%s6191_s13 + $0x70] sm:$0xff]  ;;  %5921 = vmatpush3.msra.mxu1 %v4643_v40  ;;  %5453 = vmatpush3.msra.mxu0 %v4643_v40 }
  0x15   : > { %386 = vst.msk [vmem:[#allocation2 + $0x28] sm:$0x3] %vm382_vm2, %v7825_v38  ;;  %389 = vst.msk [vmem:[#allocation2 + $0x40] sm:$0x3] %vm382_vm2, %v7825_v38  ;;  %v452_v46 = vld [vmem:[%s6191_s13 + $0x88] sm:$0xff]  ;;  %v451_v47 = vld [vmem:[%s6191_s13 + $0x80] sm:$0xff]  ;;  %5502 = vmatprep.subr.mxu1 %v6258_v20 }
  0x16   : > { %v482_v14 = vmax.f32 %v481_v13, 0.0  ;;  %388 = vst.msk [vmem:[#allocation2 + $0x38] sm:$0xff] %vm379_vm1, %v7825_v38  ;;  %390 = vst.msk [vmem:[#allocation2 + $0x48] sm:$0xff] %vm379_vm1, %v7825_v38  ;;  %v436_v54 = vld [vmem:[%s6191_s13 + $0x8] sm:$0xff]  ;;  %v435_v55 = vld [vmem:[%s6191_s13] sm:$0xff] }
  0x17   : > { %391 = vst.msk [vmem:[#allocation2 + $0x50] sm:$0xff] %vm379_vm1, %v7825_v38  ;;  %393 = vst.msk [vmem:[#allocation2 + $0x60] sm:$0xff] %vm379_vm1, %v7825_v38  ;;  %v454_v60 = vld [vmem:[%s6191_s13 + $0x98] sm:$0xff]  ;;  %v453_v61 = vld [vmem:[%s6191_s13 + $0x90] sm:$0xff] }
  0x18   : > { %v483_v15 = vadd.f32 1e-05, %v482_v14  ;;  %392 = vst.msk [vmem:[#allocation2 + $0x58] sm:$0x3] %vm382_vm2, %v7825_v38  ;;  %395 = vst.msk [vmem:[#allocation2 + $0x70] sm:$0x3] %vm382_vm2, %v7825_v38 }
  0x19   : > { %394 = vst.msk [vmem:[#allocation2 + $0x68] sm:$0xff] %vm379_vm1, %v7825_v38  ;;  %396 = vst.msk [vmem:[#allocation2 + $0x78] sm:$0xff] %vm379_vm1, %v7825_v38  ;;  %v438_v2 = vld [vmem:[%s6191_s13 + $0x18] sm:$0xff]  ;;  %v437_v3 = vld [vmem:[%s6191_s13 + $0x10] sm:$0xff] }
  0x1a   : > { %5950 = vrsqrt.f32 %v483_v15  ;;  %397 = vst.msk [vmem:[#allocation2 + $0x80] sm:$0xff] %vm379_vm1, %v7825_v38  ;;  %399 = vst.msk [vmem:[#allocation2 + $0x90] sm:$0xff] %vm379_vm1, %v7825_v38  ;;  %v807_v50 = vld [vmem:[#allocation2 + $0x1] sm:$0xff]  ;;  %v808_v51 = vld [vmem:[#allocation2 + $0x9] sm:$0xff] }
  0x1b   : > { %398 = vst.msk [vmem:[#allocation2 + $0x88] sm:$0x3] %vm382_vm2, %v7825_v38  ;;  %401 = vst.msk [vmem:[#allocation2 + $0xa0] sm:$0x3] %vm382_vm2, %v7825_v38  ;;  %5454 = vmatprep.mubr.msk.f32.mxu0 %vm379_vm1, %v807_v50  ;;  %v456_v8 = vld [vmem:[%s6191_s13 + $0xa8] sm:$0xff]  ;;  %v455_v9 = vld [vmem:[%s6191_s13 + $0xa0] sm:$0xff] }
  0x1c   : > { %400 = vst.msk [vmem:[#allocation2 + $0x98] sm:$0xff] %vm379_vm1, %v7825_v38  ;;  %402 = vst.msk [vmem:[#allocation2 + $0xa8] sm:$0xff] %vm379_vm1, %v7825_v38  ;;  %5455 = vmatmul.mubr.msk.f32.vlgmr.msra.gmra.mxu0 %vm379_vm1, %v808_v51  ;;  %v440_v14 = vld [vmem:[%s6191_s13 + $0x28] sm:$0xff]  ;;  %v439_v15 = vld [vmem:[%s6191_s13 + $0x20] sm:$0xff] }
  0x1d   : > { %403 = vst.msk [vmem:[#allocation2 + $0xb0] sm:$0xff] %vm379_vm1, %v7825_v38  ;;  %405 = vst.msk [vmem:[#allocation2 + $0xc0] sm:$0xff] %vm379_vm1, %v7825_v38  ;;  %v461_v50 = vld [vmem:[%s6191_s13 + $0xd0] sm:$0xff] }
  0x1e   : > { %404 = vst.msk [vmem:[#allocation2 + $0xb8] sm:$0x3] %vm382_vm2, %v7825_v38  ;;  %410 = vst.msk [vmem:[#allocation2 + $0xe8] sm:$0x3] %vm382_vm2, %v7825_v38 }
  0x1f   : > { %408 = vst.msk [vmem:[#allocation2 + $0xd8] sm:$0xff] %vm379_vm1, %v7825_v38  ;;  %409 = vst.msk [vmem:[#allocation2 + $0xe0] sm:$0xff] %vm379_vm1, %v7825_v38 }
  0x20   : > { %411 = vst.msk [vmem:[#allocation2 + $0xf0] sm:$0xff] %vm379_vm1, %v7825_v38  ;;  %412 = vst.msk [vmem:[#allocation2 + $0xf8] sm:$0xff] %vm379_vm1, %v7825_v38 }
  0x21   : > { %413 = vst.msk [vmem:[#allocation2 + $0x100] sm:$0x3] %vm382_vm2, %v7825_v38  ;;  %416 = vst.msk [vmem:[#allocation2 + $0x118] sm:$0x3] %vm382_vm2, %v7825_v38 }
  0x22   : > { %414 = vst.msk [vmem:[#allocation2 + $0x108] sm:$0xff] %vm379_vm1, %v7825_v38  ;;  %415 = vst.msk [vmem:[#allocation2 + $0x110] sm:$0xff] %vm379_vm1, %v7825_v38 }
  0x23   : > { %417 = vst.msk [vmem:[#allocation2 + $0x120] sm:$0xff] %vm379_vm1, %v7825_v38  ;;  %418 = vst.msk [vmem:[#allocation2 + $0x128] sm:$0xff] %vm379_vm1, %v7825_v38 }
  0x24   : > { %419 = vst.msk [vmem:[#allocation2 + $0x130] sm:$0x3] %vm382_vm2, %v7825_v38  ;;  %422 = vst.msk [vmem:[#allocation2 + $0x148] sm:$0x3] %vm382_vm2, %v7825_v38 }
  0x25   : > { %420 = vst.msk [vmem:[#allocation2 + $0x138] sm:$0xff] %vm379_vm1, %v7825_v38  ;;  %421 = vst.msk [vmem:[#allocation2 + $0x140] sm:$0xff] %vm379_vm1, %v7825_v38 }
  0x26   : > { %423 = vst.msk [vmem:[#allocation2 + $0x150] sm:$0xff] %vm379_vm1, %v7825_v38  ;;  %424 = vst.msk [vmem:[#allocation2 + $0x158] sm:$0xff] %vm379_vm1, %v7825_v38 }
  0x27   : > { %v5951_v22 = vpop.eup %5950  ;;  %425 = vst.msk [vmem:[#allocation2 + $0x160] sm:$0x3] %vm382_vm2, %v7825_v38  ;;  %428 = vst.msk [vmem:[#allocation2 + $0x178] sm:$0x3] %vm382_vm2, %v7825_v38 }
  0x28   : > { %v493_v23 = vrot.slane %v5951_v22, %v492_v21  ;;  %426 = vst.msk [vmem:[#allocation2 + $0x168] sm:$0xff] %vm379_vm1, %v7825_v38  ;;  %427 = vst.msk [vmem:[#allocation2 + $0x170] sm:$0xff] %vm379_vm1, %v7825_v38  ;;  %v457_v22 = vld [vmem:[%s6191_s13 + $0xb0] sm:$0xff] }
  0x29   : > { %429 = vst.msk [vmem:[#allocation2 + $0x180] sm:$0xff] %vm379_vm1, %v7825_v38  ;;  %430 = vst.msk [vmem:[#allocation2 + $0x188] sm:$0xff] %vm379_vm1, %v7825_v38 }
  0x2a   : > { %v500_v24 = vrot.slane %v493_v23, %v492_v21  ;;  %431 = vst.msk [vmem:[#allocation2 + $0x190] sm:$0x3] %vm382_vm2, %v7825_v38  ;;  %434 = vst.msk [vmem:[#allocation2 + $0x1a8] sm:$0x3] %vm382_vm2, %v7825_v38 }
  0x2b   : > { %432 = vst.msk [vmem:[#allocation2 + $0x198] sm:$0xff] %vm379_vm1, %v7825_v38  ;;  %433 = vst.msk [vmem:[#allocation2 + $0x1a0] sm:$0xff] %vm379_vm1, %v7825_v38 }
  0x2c   : > { %501 = vrot.lane.b32.xlu0 %v500_v24, %s5977_s21 }
  0x9e   : > { %v502_v27 = vpop.permute.xlu0 %501 }
  0x9f   : > { %v504_v28 = vmul.f32 %v502_v27, %v485_v25  ;;  %v4710_v25 = vld [vmem:[%s7816_s1 + $0x28] sm:$0xff] }
  0xa0   : > { %5554 = vmatprep.subr.mxu0 %v4710_v25 }
  0xa1   : > { %v510_v29 = vrot.slane %v504_v28, %v509_v26  ;;  %v442_v28 = vld [vmem:[%s6191_s13 + $0x38] sm:$0xff]  ;;  %5555 = vmatpush3.msra.mxu0 %v4710_v25 }
  0xa3   : > { %511 = vrot.lane.b32.xlu0 %v510_v29, %s5978_s24  ;;  %v441_v29 = vld [vmem:[%s6191_s13 + $0x30] sm:$0xff] }
 0x115   : > { %v6066_v30 = vpop.permute.xlu0 %511 }
 0x116   : > { %v514_v31 = vmul.f32 %v6066_v30, %v478_v10  ;;  %v549_v43 = vmul.f32 %v6066_v30, %v450_v41  ;;  %v548_v44 = vmul.f32 %v6066_v30, %v449_v42  ;;  %v551_v52 = vmul.f32 %v6066_v30, %v452_v46  ;;  %v444_v42 = vld [vmem:[%s6191_s13 + $0x48] sm:$0xff] }
 0x117   : > { %v550_v53 = vmul.f32 %v6066_v30, %v451_v47  ;;  %v535_v58 = vmul.f32 %v6066_v30, %v436_v54  ;;  %v534_v59 = vmul.f32 %v6066_v30, %v435_v55  ;;  %v553_v0 = vmul.f32 %v6066_v30, %v454_v60 }
 0x118   : > { %v522_v32 = vrot.slane %v514_v31, %v492_v21  ;;  %v552_v1 = vmul.f32 %v6066_v30, %v453_v61  ;;  %v537_v6 = vmul.f32 %v6066_v30, %v438_v2  ;;  %v536_v7 = vmul.f32 %v6066_v30, %v437_v3 }
 0x119   : > { %v555_v12 = vmul.f32 %v6066_v30, %v456_v8  ;;  %v554_v13 = vmul.f32 %v6066_v30, %v455_v9  ;;  %v539_v18 = vmul.f32 %v6066_v30, %v440_v14  ;;  %v538_v19 = vmul.f32 %v6066_v30, %v439_v15  ;;  %v6338_v14 = vld [vmem:[%s7816_s1 + $0x48] sm:$0xff] }
 0x11a   : > { %v529_v33 = vrot.slane %v522_v32, %v492_v21  ;;  %v458_v21 = vld [vmem:[%s6191_s13 + $0xb8] sm:$0xff]  ;;  %v556_v27 = vmul.f32 %v6066_v30, %v457_v22  ;;  %v543_v47 = vmul.f32 %v6066_v30, %v444_v42  ;;  %v560_v55 = vmul.f32 %v6066_v30, %v461_v50 }
 0x11c   : > { %530 = vrot.lane.b32.xlu1 %v529_v33, %s5977_s21  ;;  %v541_v33 = vmul.f32 %v6066_v30, %v442_v28 }
 0x18e   : > { %v531_v35 = vpop.permute.xlu1 %530 }
 0x18f   : > { %v533_v36 = vsub.f32 %v505_v34, %v531_v35  ;;  %v540_v34 = vmul.f32 %v6066_v30, %v441_v29  ;;  %v460_v35 = vld [vmem:[%s6191_s13 + $0xc8] sm:$0xff] }
 0x190   : > { %v559_v40 = vmul.f32 %v6066_v30, %v460_v35 }
 0x191   : > { %v570_v37 = vrot.slane %v533_v36, %v509_v26  ;;  %v557_v26 = vmul.f32 %v6066_v30, %v458_v21  ;;  %v459_v36 = vld [vmem:[%s6191_s13 + $0xc0] sm:$0xff] }
 0x192   : > { %v558_v41 = vmul.f32 %v6066_v30, %v459_v36 }
 0x193   : > { %571 = vrot.lane.b32.xlu1 %v570_v37, %s5978_s24  ;;  %s7458_s24 = scalar_lea.vmem %s7824_s9, %s7985_s30 }
 0x205   : > { %v6203_v45 = vpop.permute.xlu1 %571 }
 0x206   : > { %v589_v48 = vadd.f32 %v6203_v45, %v549_v43  ;;  %v588_v49 = vadd.f32 %v6203_v45, %v548_v44  ;;  %v591_v56 = vadd.f32 %v6203_v45, %v551_v52  ;;  %v590_v57 = vadd.f32 %v6203_v45, %v550_v53  ;;  %v443_v43 = vld [vmem:[%s6191_s13 + $0x40] sm:$0xff] }
 0x207   : > { %v575_v62 = vadd.f32 %v6203_v45, %v535_v58  ;;  %v574_v63 = vadd.f32 %v6203_v45, %v534_v59  ;;  %v593_v4 = vadd.f32 %v6203_v45, %v553_v0  ;;  %v592_v5 = vadd.f32 %v6203_v45, %v552_v1  ;;  %v4709_v53 = vld [vmem:[%s7816_s1 + $0x20] sm:$0xff] }
 0x208   : > { %668 = vrot.lane.b32.xlu1 %v589_v48, %s5977_s21  ;;  %666 = vrot.lane.b32.xlu0 %v588_v49, %s5977_s21  ;;  %v577_v10 = vadd.f32 %v6203_v45, %v537_v6  ;;  %v576_v11 = vadd.f32 %v6203_v45, %v536_v7  ;;  %v595_v16 = vadd.f32 %v6203_v45, %v555_v12  ;;  %v462_v49 = vld [vmem:[%s6191_s13 + $0xd8] sm:$0xff] }
 0x209   : > { %v594_v17 = vadd.f32 %v6203_v45, %v554_v13  ;;  %v579_v23 = vadd.f32 %v6203_v45, %v539_v18  ;;  %v578_v24 = vadd.f32 %v6203_v45, %v538_v19  ;;  %v597_v31 = vadd.f32 %v6203_v45, %v557_v26  ;;  %5556 = vmatprep.subr.mxu0 %v4709_v53  ;;  %v805_v26 = vld [vmem:[%s7816_s1] sm:$0xff] }
 0x20a   : > { %v596_v32 = vadd.f32 %v6203_v45, %v556_v27  ;;  %v581_v37 = vadd.f32 %v6203_v45, %v541_v33  ;;  %v580_v39 = vadd.f32 %v6203_v45, %v540_v34  ;;  %v599_v44 = vadd.f32 %v6203_v45, %v559_v40  ;;  %5557 = vmatpush3.msra.mxu0 %v4709_v53  ;;  %v6370_v27 = vld [vmem:[%s7816_s1 + $0x38] sm:$0xff] }
 0x20b   : > { %v598_v46 = vadd.f32 %v6203_v45, %v558_v41  ;;  %v542_v48 = vmul.f32 %v6066_v30, %v443_v43  ;;  %v583_v51 = vadd.f32 %v6203_v45, %v543_v47  ;;  %v561_v54 = vmul.f32 %v6066_v30, %v462_v49  ;;  %5658 = vmatprep.subr.mxu0 %v6338_v14 }
 0x20c   : > { %672 = vrot.lane.b32.xlu1 %v591_v56, %s5977_s21  ;;  %670 = vrot.lane.b32.xlu0 %v590_v57, %s5977_s21  ;;  %v446_v56 = vld [vmem:[%s6191_s13 + $0x58] sm:$0xff]  ;;  %v445_v57 = vld [vmem:[%s6191_s13 + $0x50] sm:$0xff]  ;;  %v600_v59 = vadd.f32 %v6203_v45, %v560_v55 }
 0x20d   : > { %v582_v52 = vadd.f32 %v6203_v45, %v542_v48  ;;  %v601_v58 = vadd.f32 %v6203_v45, %v561_v54  ;;  %v545_v60 = vmul.f32 %v6066_v30, %v446_v56  ;;  %v544_v61 = vmul.f32 %v6066_v30, %v445_v57 }
 0x20f   : > { %v585_v0 = vadd.f32 %v6203_v45, %v545_v60  ;;  %v584_v1 = vadd.f32 %v6203_v45, %v544_v61 }
 0x210   : > { %640 = vrot.lane.b32.xlu1 %v575_v62, %s5977_s21  ;;  %638 = vrot.lane.b32.xlu0 %v574_v63, %s5977_s21  ;;  %v464_v62 = vld [vmem:[%s6191_s13 + $0xe8] sm:$0xff]  ;;  %v463_v63 = vld [vmem:[%s6191_s13 + $0xe0] sm:$0xff] }
 0x211   : > { %v563_v2 = vmul.f32 %v6066_v30, %v464_v62  ;;  %v562_v3 = vmul.f32 %v6066_v30, %v463_v63 }
 0x213   : > { %v603_v6 = vadd.f32 %v6203_v45, %v563_v2  ;;  %v602_v7 = vadd.f32 %v6203_v45, %v562_v3 }
 0x214   : > { %676 = vrot.lane.b32.xlu1 %v593_v4, %s5977_s21  ;;  %674 = vrot.lane.b32.xlu0 %v592_v5, %s5977_s21  ;;  %v448_v4 = vld [vmem:[%s6191_s13 + $0x68] sm:$0xff]  ;;  %v447_v5 = vld [vmem:[%s6191_s13 + $0x60] sm:$0xff] }
 0x215   : > { %v547_v8 = vmul.f32 %v6066_v30, %v448_v4  ;;  %v546_v9 = vmul.f32 %v6066_v30, %v447_v5 }
 0x217   : > { %v587_v12 = vadd.f32 %v6203_v45, %v547_v8  ;;  %v586_v13 = vadd.f32 %v6203_v45, %v546_v9 }
 0x218   : > { %644 = vrot.lane.b32.xlu1 %v577_v10, %s5977_s21  ;;  %642 = vrot.lane.b32.xlu0 %v576_v11, %s5977_s21  ;;  %v466_v10 = vld [vmem:[%s6191_s13 + $0xf8] sm:$0xff]  ;;  %v465_v11 = vld [vmem:[%s6191_s13 + $0xf0] sm:$0xff] }
 0x219   : > { %v565_v15 = vmul.f32 %v6066_v30, %v466_v10 }
 0x21c   : > { %680 = vrot.lane.b32.xlu1 %v595_v16, %s5977_s21  ;;  %678 = vrot.lane.b32.xlu0 %v594_v17, %s5977_s21  ;;  %v564_v16 = vmul.f32 %v6066_v30, %v465_v11  ;;  %v605_v17 = vadd.f32 %v6203_v45, %v565_v15 }
 0x21e   : > { %v604_v18 = vadd.f32 %v6203_v45, %v564_v16 }
 0x220   : > { %648 = vrot.lane.b32.xlu1 %v579_v23, %s5977_s21  ;;  %646 = vrot.lane.b32.xlu0 %v578_v24, %s5977_s21 }
 0x224   : > { %684 = vrot.lane.b32.xlu1 %v597_v31, %s5977_s21  ;;  %682 = vrot.lane.b32.xlu0 %v596_v32, %s5977_s21 }
 0x228   : > { %652 = vrot.lane.b32.xlu1 %v581_v37, %s5977_s21  ;;  %650 = vrot.lane.b32.xlu0 %v580_v39, %s5977_s21 }
 0x22c   : > { %688 = vrot.lane.b32.xlu1 %v599_v44, %s5977_s21  ;;  %686 = vrot.lane.b32.xlu0 %v598_v46, %s5977_s21 }
 0x230   : > { %656 = vrot.lane.b32.xlu1 %v583_v51, %s5977_s21  ;;  %654 = vrot.lane.b32.xlu0 %v582_v52, %s5977_s21 }
 0x234   : > { %692 = vrot.lane.b32.xlu1 %v601_v58, %s5977_s21  ;;  %690 = vrot.lane.b32.xlu0 %v600_v59, %s5977_s21 }
 0x238   : > { %660 = vrot.lane.b32.xlu1 %v585_v0, %s5977_s21  ;;  %658 = vrot.lane.b32.xlu0 %v584_v1, %s5977_s21 }
 0x23c   : > { %696 = vrot.lane.b32.xlu1 %v603_v6, %s5977_s21  ;;  %694 = vrot.lane.b32.xlu0 %v602_v7, %s5977_s21 }
 0x240   : > { %664 = vrot.lane.b32.xlu1 %v587_v12, %s5977_s21  ;;  %662 = vrot.lane.b32.xlu0 %v586_v13, %s5977_s21 }
 0x244   : > { %700 = vrot.lane.b32.xlu1 %v605_v17, %s5977_s21  ;;  %698 = vrot.lane.b32.xlu0 %v604_v18, %s5977_s21 }
 0x27a   : > { %v669_v19 = vpop.permute.xlu1 %668  ;;  %v667_v21 = vpop.permute.xlu0 %666 }
 0x27b   : > { %750 = vst.msk [vmem:[#allocation2 + $0xc9] sm:$0xff] %vm379_vm1, %v669_v19  ;;  %749 = vst.msk [vmem:[#allocation2 + $0xc1] sm:$0xff] %vm379_vm1, %v667_v21  ;;  %v773_v19 = vld [vmem:[#allocation2] sm:$0xff]  ;;  %v774_v21 = vld [vmem:[#allocation2 + $0x8] sm:$0xff] }
 0x27e   : > { %v673_v22 = vpop.permute.xlu1 %672  ;;  %v671_v23 = vpop.permute.xlu0 %670 }
 0x27f   : > { %752 = vst.msk [vmem:[#allocation2 + $0xe1] sm:$0xff] %vm379_vm1, %v673_v22  ;;  %751 = vst.msk [vmem:[#allocation2 + $0xd9] sm:$0xff] %vm379_vm1, %v671_v23 }
 0x282   : > { %v641_v30 = vpop.permute.xlu1 %640  ;;  %v639_v24 = vpop.permute.xlu0 %638  ;;  %v6353_v25 = vld [vmem:[#allocation2 + $0xc1] sm:$0xff]  ;;  %v6355_v45 = vld [vmem:[#allocation2 + $0xc9] sm:$0xff] }
 0x283   : > { %736 = vst.msk [vmem:[#allocation2 + $0x21] sm:$0xff] %vm379_vm1, %v641_v30  ;;  %735 = vst.msk [vmem:[#allocation2 + $0x19] sm:$0xff] %vm379_vm1, %v639_v24  ;;  %5478 = vmatprep.mubr.msk.f32.mxu1 %vm379_vm1, %v6353_v25  ;;  %v1485_v30 = vld [vmem:[#allocation2 + $0x2] sm:$0xff]  ;;  %v4775_v24 = vld [vmem:[%s7816_s1 + $0x30] sm:$0xff] }
 0x284   : > { %5479 = vmatmul.mubr.msk.f32.vlgmr.msra.gmra.mxu1 %vm379_vm1, %v6355_v45  ;;  %v6657_v38 = vld [vmem:[#allocation2 + $0xc2] sm:$0xff] }
 0x285   : > { %5503 = vmatpush3.msra.mxu1 %v6258_v20  ;;  %7897 = vst [vmem:[#allocation19_spill] sm:$0xff] %v6657_v38 }
 0x286   : > { %v677_v28 = vpop.permute.xlu1 %676  ;;  %v675_v29 = vpop.permute.xlu0 %674  ;;  %v6372_v31 = vld [vmem:[#allocation2 + $0xd9] sm:$0xff]  ;;  %v6374_v32 = vld [vmem:[#allocation2 + $0xe1] sm:$0xff]  ;;  %5504 = vmatprep.subr.mxu1 %v805_v26 }
 0x287   : > { %754 = vst.msk [vmem:[#allocation2 + $0xf9] sm:$0xff] %vm379_vm1, %v677_v28  ;;  %753 = vst.msk [vmem:[#allocation2 + $0xf1] sm:$0xff] %vm379_vm1, %v675_v29  ;;  %5481 = vmatprep.mubr.msk.f32.mxu1 %vm379_vm1, %v6372_v31  ;;  %5505 = vmatpush3.msra.mxu1 %v805_v26  ;;  %v1486_v28 = vld [vmem:[#allocation2 + $0xa] sm:$0xff] }
 0x288   : > { %5482 = vmatmul.mubr.msk.f32.gmra.mxu1 %vm379_vm1, %v6374_v32  ;;  %5606 = vmatprep.subr.mxu1 %v6370_v27 }
 0x28a   : > { %v645_v20 = vpop.permute.xlu1 %644  ;;  %v643_v33 = vpop.permute.xlu0 %642  ;;  %v6383_v34 = vld [vmem:[#allocation2 + $0x19] sm:$0xff]  ;;  %v6385_v35 = vld [vmem:[#allocation2 + $0x21] sm:$0xff] }
 0x28b   : > { %738 = vst.msk [vmem:[#allocation2 + $0x39] sm:$0xff] %vm379_vm1, %v645_v20  ;;  %737 = vst.msk [vmem:[#allocation2 + $0x31] sm:$0xff] %vm379_vm1, %v643_v33  ;;  %5457 = vmatprep.mubr.msk.f32.mxu0 %vm379_vm1, %v6383_v34  ;;  %v6516_v26 = vld [vmem:[#allocation2 + $0x18] sm:$0xff]  ;;  %v6522_v29 = vld [vmem:[#allocation2 + $0x20] sm:$0xff] }
 0x28c   : > { %5458 = vmatmul.mubr.msk.f32.gmra.mxu0 %vm379_vm1, %v6385_v35  ;;  %v4841_v20 = vld [vmem:[%s7816_s1 + $0x40] sm:$0xff] }
 0x28e   : > { %v681_v36 = vpop.permute.xlu1 %680  ;;  %v679_v37 = vpop.permute.xlu0 %678  ;;  %v6393_v39 = vld [vmem:[#allocation2 + $0xf1] sm:$0xff]  ;;  %v6395_v40 = vld [vmem:[#allocation2 + $0xf9] sm:$0xff] }
 0x28f   : > { %756 = vst.msk [vmem:[#allocation2 + $0x111] sm:$0xff] %vm379_vm1, %v681_v36  ;;  %755 = vst.msk [vmem:[#allocation2 + $0x109] sm:$0xff] %vm379_vm1, %v679_v37  ;;  %5484 = vmatprep.mubr.msk.f32.mxu1 %vm379_vm1, %v6393_v39  ;;  %v6540_v36 = vld [vmem:[#allocation2 + $0x1a] sm:$0xff] }
 0x290   : > { %5485 = vmatmul.mubr.msk.f32.gmra.mxu1 %vm379_vm1, %v6395_v40  ;;  %7883 = vst [vmem:[#allocation5_spill] sm:$0xff] %v6540_v36 }
 0x292   : > { %v649_v41 = vpop.permute.xlu1 %648  ;;  %v647_v42 = vpop.permute.xlu0 %646  ;;  %v6403_v43 = vld [vmem:[#allocation2 + $0x31] sm:$0xff]  ;;  %v6405_v44 = vld [vmem:[#allocation2 + $0x39] sm:$0xff] }
 0x293   : > { %740 = vst.msk [vmem:[#allocation2 + $0x51] sm:$0xff] %vm379_vm1, %v649_v41  ;;  %739 = vst.msk [vmem:[#allocation2 + $0x49] sm:$0xff] %vm379_vm1, %v647_v42  ;;  %5460 = vmatprep.mubr.msk.f32.mxu0 %vm379_vm1, %v6403_v43  ;;  %v6530_v33 = vld [vmem:[#allocation2 + $0x30] sm:$0xff]  ;;  %v6544_v37 = vld [vmem:[#allocation2 + $0x38] sm:$0xff] }
 0x294   : > { %5461 = vmatmul.mubr.msk.f32.gmra.mxu0 %vm379_vm1, %v6405_v44  ;;  %v6546_v41 = vld [vmem:[#allocation2 + $0x22] sm:$0xff] }
 0x295   : > { %7884 = vst [vmem:[#allocation6_spill] sm:$0xff] %v6546_v41 }
 0x296   : > { %v685_v46 = vpop.permute.xlu1 %684  ;;  %v683_v47 = vpop.permute.xlu0 %682  ;;  %v6413_v48 = vld [vmem:[#allocation2 + $0x109] sm:$0xff]  ;;  %v6415_v49 = vld [vmem:[#allocation2 + $0x111] sm:$0xff] }
 0x297   : > { %758 = vst.msk [vmem:[#allocation2 + $0x129] sm:$0xff] %vm379_vm1, %v685_v46  ;;  %757 = vst.msk [vmem:[#allocation2 + $0x121] sm:$0xff] %vm379_vm1, %v683_v47  ;;  %5487 = vmatprep.mubr.msk.f32.mxu1 %vm379_vm1, %v6413_v48  ;;  %v6560_v46 = vld [vmem:[#allocation2 + $0x32] sm:$0xff] }
 0x298   : > { %5488 = vmatmul.mubr.msk.f32.gmra.mxu1 %vm379_vm1, %v6415_v49  ;;  %7885 = vst [vmem:[#allocation7_spill] sm:$0xff] %v6560_v46 }
 0x29a   : > { %v653_v50 = vpop.permute.xlu1 %652  ;;  %v651_v51 = vpop.permute.xlu0 %650  ;;  %v6423_v52 = vld [vmem:[#allocation2 + $0x49] sm:$0xff]  ;;  %v6425_v53 = vld [vmem:[#allocation2 + $0x51] sm:$0xff] }
 0x29b   : > { %742 = vst.msk [vmem:[#allocation2 + $0x69] sm:$0xff] %vm379_vm1, %v653_v50  ;;  %741 = vst.msk [vmem:[#allocation2 + $0x61] sm:$0xff] %vm379_vm1, %v651_v51  ;;  %5463 = vmatprep.mubr.msk.f32.mxu0 %vm379_vm1, %v6423_v52  ;;  %v6558_v42 = vld [vmem:[#allocation2 + $0x48] sm:$0xff]  ;;  %v6567_v47 = vld [vmem:[#allocation2 + $0x50] sm:$0xff] }
 0x29c   : > { %5464 = vmatmul.mubr.msk.f32.gmra.mxu0 %vm379_vm1, %v6425_v53  ;;  %v6569_v50 = vld [vmem:[#allocation2 + $0x3a] sm:$0xff] }
 0x29d   : > { %7886 = vst [vmem:[#allocation8_spill] sm:$0xff] %v6569_v50 }
 0x29e   : > { %v689_v54 = vpop.permute.xlu1 %688  ;;  %v687_v55 = vpop.permute.xlu0 %686  ;;  %v6433_v56 = vld [vmem:[#allocation2 + $0x121] sm:$0xff]  ;;  %v6435_v57 = vld [vmem:[#allocation2 + $0x129] sm:$0xff] }
 0x29f   : > { %760 = vst.msk [vmem:[#allocation2 + $0x141] sm:$0xff] %vm379_vm1, %v689_v54  ;;  %759 = vst.msk [vmem:[#allocation2 + $0x139] sm:$0xff] %vm379_vm1, %v687_v55  ;;  %5490 = vmatprep.mubr.msk.f32.mxu1 %vm379_vm1, %v6433_v56  ;;  %v6577_v54 = vld [vmem:[#allocation2 + $0x4a] sm:$0xff] }
 0x2a0   : > { %5491 = vmatmul.mubr.msk.f32.gmra.mxu1 %vm379_vm1, %v6435_v57  ;;  %7887 = vst [vmem:[#allocation9_spill] sm:$0xff] %v6577_v54 }
 0x2a2   : > { %v657_v58 = vpop.permute.xlu1 %656  ;;  %v655_v59 = vpop.permute.xlu0 %654  ;;  %v6443_v60 = vld [vmem:[#allocation2 + $0x61] sm:$0xff]  ;;  %v6445_v61 = vld [vmem:[#allocation2 + $0x69] sm:$0xff] }
 0x2a3   : > { %744 = vst.msk [vmem:[#allocation2 + $0x81] sm:$0xff] %vm379_vm1, %v657_v58  ;;  %743 = vst.msk [vmem:[#allocation2 + $0x79] sm:$0xff] %vm379_vm1, %v655_v59  ;;  %5466 = vmatprep.mubr.msk.f32.mxu0 %vm379_vm1, %v6443_v60  ;;  %v6575_v51 = vld [vmem:[#allocation2 + $0x60] sm:$0xff]  ;;  %v6583_v55 = vld [vmem:[#allocation2 + $0x68] sm:$0xff] }
 0x2a4   : > { %5467 = vmatmul.mubr.msk.f32.gmra.mxu0 %vm379_vm1, %v6445_v61  ;;  %v6585_v58 = vld [vmem:[#allocation2 + $0x52] sm:$0xff] }
 0x2a5   : > { %7888 = vst [vmem:[#allocation10_spill] sm:$0xff] %v6585_v58 }
 0x2a6   : > { %v693_v62 = vpop.permute.xlu1 %692  ;;  %v691_v63 = vpop.permute.xlu0 %690  ;;  %v6453_v0 = vld [vmem:[#allocation2 + $0x139] sm:$0xff]  ;;  %v6455_v1 = vld [vmem:[#allocation2 + $0x141] sm:$0xff] }
 0x2a7   : > { %762 = vst.msk [vmem:[#allocation2 + $0x159] sm:$0xff] %vm379_vm1, %v693_v62  ;;  %761 = vst.msk [vmem:[#allocation2 + $0x151] sm:$0xff] %vm379_vm1, %v691_v63  ;;  %5493 = vmatprep.mubr.msk.f32.mxu1 %vm379_vm1, %v6453_v0  ;;  %v6593_v62 = vld [vmem:[#allocation2 + $0x62] sm:$0xff] }
 0x2a8   : > { %5494 = vmatmul.mubr.msk.f32.gmra.mxu1 %vm379_vm1, %v6455_v1  ;;  %7889 = vst [vmem:[#allocation11_spill] sm:$0xff] %v6593_v62 }
 0x2aa   : > { %v661_v2 = vpop.permute.xlu1 %660  ;;  %v659_v3 = vpop.permute.xlu0 %658  ;;  %v6463_v4 = vld [vmem:[#allocation2 + $0x79] sm:$0xff]  ;;  %v6465_v5 = vld [vmem:[#allocation2 + $0x81] sm:$0xff] }
 0x2ab   : > { %746 = vst.msk [vmem:[#allocation2 + $0x99] sm:$0xff] %vm379_vm1, %v661_v2  ;;  %745 = vst.msk [vmem:[#allocation2 + $0x91] sm:$0xff] %vm379_vm1, %v659_v3  ;;  %5469 = vmatprep.mubr.msk.f32.mxu0 %vm379_vm1, %v6463_v4  ;;  %v6591_v59 = vld [vmem:[#allocation2 + $0x78] sm:$0xff]  ;;  %v6599_v63 = vld [vmem:[#allocation2 + $0x80] sm:$0xff] }
 0x2ac   : > { %5470 = vmatmul.mubr.msk.f32.gmra.mxu0 %vm379_vm1, %v6465_v5  ;;  %v6601_v2 = vld [vmem:[#allocation2 + $0x6a] sm:$0xff] }
 0x2ad   : > { %7890 = vst [vmem:[#allocation12_spill] sm:$0xff] %v6601_v2 }
 0x2ae   : > { %v697_v6 = vpop.permute.xlu1 %696  ;;  %v695_v7 = vpop.permute.xlu0 %694  ;;  %v6473_v8 = vld [vmem:[#allocation2 + $0x151] sm:$0xff]  ;;  %v6475_v9 = vld [vmem:[#allocation2 + $0x159] sm:$0xff] }
 0x2af   : > { %764 = vst.msk [vmem:[#allocation2 + $0x171] sm:$0xff] %vm379_vm1, %v697_v6  ;;  %763 = vst.msk [vmem:[#allocation2 + $0x169] sm:$0xff] %vm379_vm1, %v695_v7  ;;  %5496 = vmatprep.mubr.msk.f32.mxu1 %vm379_vm1, %v6473_v8  ;;  %v6609_v6 = vld [vmem:[#allocation2 + $0x7a] sm:$0xff] }
 0x2b0   : > { %5497 = vmatmul.mubr.msk.f32.gmra.mxu1 %vm379_vm1, %v6475_v9  ;;  %7891 = vst [vmem:[#allocation13_spill] sm:$0xff] %v6609_v6 }
 0x2b2   : > { %v665_v10 = vpop.permute.xlu1 %664  ;;  %v663_v11 = vpop.permute.xlu0 %662  ;;  %v6483_v12 = vld [vmem:[#allocation2 + $0x91] sm:$0xff]  ;;  %v6485_v13 = vld [vmem:[#allocation2 + $0x99] sm:$0xff] }
 0x2b3   : > { %748 = vst.msk [vmem:[#allocation2 + $0xb1] sm:$0xff] %vm379_vm1, %v665_v10  ;;  %747 = vst.msk [vmem:[#allocation2 + $0xa9] sm:$0xff] %vm379_vm1, %v663_v11  ;;  %5472 = vmatprep.mubr.msk.f32.mxu0 %vm379_vm1, %v6483_v12  ;;  %v6607_v3 = vld [vmem:[#allocation2 + $0x90] sm:$0xff]  ;;  %v6615_v7 = vld [vmem:[#allocation2 + $0x98] sm:$0xff] }
 0x2b4   : > { %5473 = vmatmul.mubr.msk.f32.gmra.mxu0 %vm379_vm1, %v6485_v13  ;;  %v6617_v10 = vld [vmem:[#allocation2 + $0x82] sm:$0xff] }
 0x2b5   : > { %7892 = vst [vmem:[#allocation14_spill] sm:$0xff] %v6617_v10 }
 0x2b6   : > { %v701_v15 = vpop.permute.xlu1 %700  ;;  %v699_v16 = vpop.permute.xlu0 %698  ;;  %v6493_v17 = vld [vmem:[#allocation2 + $0x169] sm:$0xff]  ;;  %v6495_v18 = vld [vmem:[#allocation2 + $0x171] sm:$0xff] }
 0x2b7   : > { %7881 = vst [vmem:[#allocation3_spill] sm:$0xff] %v6493_v17  ;;  %7882 = vst [vmem:[#allocation4_spill] sm:$0xff] %v6495_v18  ;;  %5499 = vmatprep.mubr.msk.f32.mxu1 %vm379_vm1, %v6493_v17  ;;  %v6773_v17 = vld [vmem:[#allocation2 + $0x172] sm:$0xff] }
 0x2b8   : > { %766 = vst.msk [vmem:[#allocation2 + $0x189] sm:$0xff] %vm379_vm1, %v701_v15  ;;  %765 = vst.msk [vmem:[#allocation2 + $0x181] sm:$0xff] %vm379_vm1, %v699_v16  ;;  %5500 = vmatmul.mubr.msk.f32.gmra.mxu1 %vm379_vm1, %v6495_v18  ;;  %v6625_v15 = vld [vmem:[#allocation2 + $0x92] sm:$0xff]  ;;  %v6761_v18 = vld [vmem:[#allocation2 + $0x15a] sm:$0xff] }
 0x2b9   : > { %5506 = vmatprep.mubr.msk.f32.mxu1 %vm379_vm1, %v773_v19  ;;  %7893 = vst [vmem:[#allocation15_spill] sm:$0xff] %v6625_v15  ;;  %v6633_v19 = vld [vmem:[#allocation2 + $0x9a] sm:$0xff]  ;;  %7909 = vst [vmem:[#allocation31_spill] sm:$0xff] %v6761_v18 }
 0x2ba   : > { %v6504_v22 = vld [vmem:[#allocation2 + $0xa9] sm:$0xff]  ;;  %v6506_v23 = vld [vmem:[#allocation2 + $0xb1] sm:$0xff]  ;;  %7894 = vst [vmem:[#allocation16_spill] sm:$0xff] %v6633_v19 }
 0x2bb   : > { %5475 = vmatprep.mubr.msk.f32.mxu0 %vm379_vm1, %v6504_v22  ;;  %v6623_v11 = vld [vmem:[#allocation2 + $0xa8] sm:$0xff]  ;;  %v6631_v16 = vld [vmem:[#allocation2 + $0xb0] sm:$0xff] }
 0x2bc   : > { %5476 = vmatmul.mubr.msk.f32.gmra.mxu0 %vm379_vm1, %v6506_v23  ;;  %5507 = vmatmul.mubr.msk.f32.vlgmr.msra.gmra.mxu1 %vm379_vm1, %v774_v21  ;;  %v6639_v21 = vld [vmem:[#allocation2 + $0xc0] sm:$0xff] }
 0x2bd   : > { %5509 = vmatprep.mubr.msk.f32.mxu1 %vm379_vm1, %v6516_v26  ;;  %5607 = vmatpush3.msra.mxu1 %v6370_v27  ;;  %v6535_v27 = vld [vmem:[%s7816_s1 + $0x58] sm:$0xff] }
 0x2be   : > { %5558 = vmatprep.mubr.msk.f32.mxu0 %vm379_vm1, %v1485_v30  ;;  %5608 = vmatprep.subr.mxu1 %v4775_v24  ;;  %v6641_v30 = vld [vmem:[#allocation2 + $0xaa] sm:$0xff] }
 0x2bf   : > { %5609 = vmatpush3.msra.mxu1 %v4775_v24  ;;  %7895 = vst [vmem:[#allocation17_spill] sm:$0xff] %v6641_v30  ;;  %v6647_v24 = vld [vmem:[#allocation2 + $0xc8] sm:$0xff] }
 0x2c0   : > { %5510 = vmatmul.mubr.msk.f32.gmra.mxu1 %vm379_vm1, %v6522_v29  ;;  %5559 = vmatmul.mubr.msk.f32.vlgmr.msra.gmra.mxu0 %vm379_vm1, %v1486_v28  ;;  %v6649_v28 = vld [vmem:[#allocation2 + $0xb2] sm:$0xff] }
 0x2c1   : > { %5659 = vmatpush3.msra.mxu0 %v6338_v14  ;;  %5512 = vmatprep.mubr.msk.f32.mxu1 %vm379_vm1, %v6530_v33  ;;  %v6552_v14 = vld [vmem:[%s7816_s1 + $0x68] sm:$0xff]  ;;  %7896 = vst [vmem:[#allocation18_spill] sm:$0xff] %v6649_v28 }
 0x2c2   : > { %5561 = vmatprep.mubr.msk.f32.mxu0 %vm379_vm1, %v6540_v36  ;;  %5660 = vmatprep.subr.mxu0 %v4841_v20  ;;  %v6753_v36 = vld [vmem:[#allocation2 + $0x152] sm:$0xff] }
 0x2c3   : > { %5661 = vmatpush3.msra.mxu0 %v4841_v20  ;;  %5710 = vmatprep.subr.mxu1 %v6535_v27  ;;  %v6655_v20 = vld [vmem:[#allocation2 + $0xd8] sm:$0xff] }
 0x2c4   : > { %5513 = vmatmul.mubr.msk.f32.gmra.mxu1 %vm379_vm1, %v6544_v37  ;;  %5562 = vmatmul.mubr.msk.f32.gmra.mxu0 %vm379_vm1, %v6546_v41  ;;  %v6745_v41 = vld [vmem:[#allocation2 + $0x142] sm:$0xff] }
 0x2c5   : > { %5515 = vmatprep.mubr.msk.f32.mxu1 %vm379_vm1, %v6558_v42  ;;  %5564 = vmatprep.mubr.msk.f32.mxu0 %vm379_vm1, %v6560_v46  ;;  %v6737_v46 = vld [vmem:[#allocation2 + $0x13a] sm:$0xff]  ;;  %7908 = vst [vmem:[#allocation30_spill] sm:$0xff] %v6745_v41 }
 0x2c6   : > { %5762 = vmatprep.subr.mxu0 %v6552_v14  ;;  %7907 = vst [vmem:[#allocation29_spill] sm:$0xff] %v6737_v46 }
 0x2c8   : > { %5516 = vmatmul.mubr.msk.f32.gmra.mxu1 %vm379_vm1, %v6567_v47  ;;  %5565 = vmatmul.mubr.msk.f32.gmra.mxu0 %vm379_vm1, %v6569_v50  ;;  %v6729_v50 = vld [vmem:[#allocation2 + $0x12a] sm:$0xff] }
 0x2c9   : > { %5518 = vmatprep.mubr.msk.f32.mxu1 %vm379_vm1, %v6575_v51  ;;  %5567 = vmatprep.mubr.msk.f32.mxu0 %vm379_vm1, %v6577_v54  ;;  %v6721_v54 = vld [vmem:[#allocation2 + $0x122] sm:$0xff]  ;;  %7906 = vst [vmem:[#allocation28_spill] sm:$0xff] %v6729_v50 }
 0x2ca   : > { %7905 = vst [vmem:[#allocation27_spill] sm:$0xff] %v6721_v54 }
 0x2cc   : > { %5519 = vmatmul.mubr.msk.f32.gmra.mxu1 %vm379_vm1, %v6583_v55  ;;  %5568 = vmatmul.mubr.msk.f32.gmra.mxu0 %vm379_vm1, %v6585_v58  ;;  %v6713_v58 = vld [vmem:[#allocation2 + $0x112] sm:$0xff] }
 0x2cd   : > { %5521 = vmatprep.mubr.msk.f32.mxu1 %vm379_vm1, %v6591_v59  ;;  %5570 = vmatprep.mubr.msk.f32.mxu0 %vm379_vm1, %v6593_v62  ;;  %v6705_v62 = vld [vmem:[#allocation2 + $0x10a] sm:$0xff]  ;;  %7904 = vst [vmem:[#allocation26_spill] sm:$0xff] %v6713_v58 }
 0x2ce   : > { %7903 = vst [vmem:[#allocation25_spill] sm:$0xff] %v6705_v62 }
 0x2d0   : > { %5522 = vmatmul.mubr.msk.f32.gmra.mxu1 %vm379_vm1, %v6599_v63  ;;  %5571 = vmatmul.mubr.msk.f32.gmra.mxu0 %vm379_vm1, %v6601_v2  ;;  %v6697_v2 = vld [vmem:[#allocation2 + $0xfa] sm:$0xff] }
 0x2d1   : > { %5524 = vmatprep.mubr.msk.f32.mxu1 %vm379_vm1, %v6607_v3  ;;  %5573 = vmatprep.mubr.msk.f32.mxu0 %vm379_vm1, %v6609_v6  ;;  %v6689_v6 = vld [vmem:[#allocation2 + $0xf2] sm:$0xff]  ;;  %7902 = vst [vmem:[#allocation24_spill] sm:$0xff] %v6697_v2 }
 0x2d2   : > { %7901 = vst [vmem:[#allocation23_spill] sm:$0xff] %v6689_v6 }
 0x2d4   : > { %5525 = vmatmul.mubr.msk.f32.gmra.mxu1 %vm379_vm1, %v6615_v7  ;;  %5574 = vmatmul.mubr.msk.f32.gmra.mxu0 %vm379_vm1, %v6617_v10  ;;  %v6681_v10 = vld [vmem:[#allocation2 + $0xe2] sm:$0xff] }
 0x2d5   : > { %5527 = vmatprep.mubr.msk.f32.mxu1 %vm379_vm1, %v6623_v11  ;;  %5576 = vmatprep.mubr.msk.f32.mxu0 %vm379_vm1, %v6625_v15  ;;  %v6673_v15 = vld [vmem:[#allocation2 + $0xda] sm:$0xff]  ;;  %7900 = vst [vmem:[#allocation22_spill] sm:$0xff] %v6681_v10 }
 0x2d6   : > { %7899 = vst [vmem:[#allocation21_spill] sm:$0xff] %v6673_v15 }
 0x2d8   : > { %5528 = vmatmul.mubr.msk.f32.gmra.mxu1 %vm379_vm1, %v6631_v16  ;;  %5577 = vmatmul.mubr.msk.f32.gmra.mxu0 %vm379_vm1, %v6633_v19  ;;  %v6665_v19 = vld [vmem:[#allocation2 + $0xca] sm:$0xff] }
 0x2d9   : > { %5530 = vmatprep.mubr.msk.f32.mxu1 %vm379_vm1, %v6639_v21  ;;  %5579 = vmatprep.mubr.msk.f32.mxu0 %vm379_vm1, %v6641_v30  ;;  %v6663_v30 = vld [vmem:[#allocation2 + $0xe0] sm:$0xff]  ;;  %7898 = vst [vmem:[#allocation20_spill] sm:$0xff] %v6665_v19 }
 0x2dc   : > { %5531 = vmatmul.mubr.msk.f32.gmra.mxu1 %vm379_vm1, %v6647_v24  ;;  %5580 = vmatmul.mubr.msk.f32.gmra.mxu0 %vm379_vm1, %v6649_v28  ;;  %v6671_v28 = vld [vmem:[#allocation2 + $0xf0] sm:$0xff] }
 0x2dd   : > { %5533 = vmatprep.mubr.msk.f32.mxu1 %vm379_vm1, %v6655_v20  ;;  %5582 = vmatprep.mubr.msk.f32.mxu0 %vm379_vm1, %v6657_v38  ;;  %v6679_v38 = vld [vmem:[#allocation2 + $0xf8] sm:$0xff] }
 0x2e0   : > { %5534 = vmatmul.mubr.msk.f32.gmra.mxu1 %vm379_vm1, %v6663_v30  ;;  %5583 = vmatmul.mubr.msk.f32.gmra.mxu0 %vm379_vm1, %v6665_v19  ;;  %v6687_v19 = vld [vmem:[#allocation2 + $0x108] sm:$0xff] }
 0x2e1   : > { %5536 = vmatprep.mubr.msk.f32.mxu1 %vm379_vm1, %v6671_v28  ;;  %5585 = vmatprep.mubr.msk.f32.mxu0 %vm379_vm1, %v6673_v15  ;;  %v6695_v15 = vld [vmem:[#allocation2 + $0x110] sm:$0xff] }
 0x2e4   : > { %5537 = vmatmul.mubr.msk.f32.gmra.mxu1 %vm379_vm1, %v6679_v38  ;;  %5586 = vmatmul.mubr.msk.f32.gmra.mxu0 %vm379_vm1, %v6681_v10  ;;  %v6703_v10 = vld [vmem:[#allocation2 + $0x120] sm:$0xff] }
 0x2e5   : > { %5539 = vmatprep.mubr.msk.f32.mxu1 %vm379_vm1, %v6687_v19  ;;  %5588 = vmatprep.mubr.msk.f32.mxu0 %vm379_vm1, %v6689_v6  ;;  %v6711_v6 = vld [vmem:[#allocation2 + $0x128] sm:$0xff] }
 0x2e8   : > { %5540 = vmatmul.mubr.msk.f32.gmra.mxu1 %vm379_vm1, %v6695_v15  ;;  %5589 = vmatmul.mubr.msk.f32.gmra.mxu0 %vm379_vm1, %v6697_v2  ;;  %v6719_v2 = vld [vmem:[#allocation2 + $0x138] sm:$0xff] }
 0x2e9   : > { %5542 = vmatprep.mubr.msk.f32.mxu1 %vm379_vm1, %v6703_v10  ;;  %5591 = vmatprep.mubr.msk.f32.mxu0 %vm379_vm1, %v6705_v62  ;;  %v6727_v62 = vld [vmem:[#allocation2 + $0x140] sm:$0xff] }
 0x2ec   : > { %5543 = vmatmul.mubr.msk.f32.gmra.mxu1 %vm379_vm1, %v6711_v6  ;;  %5592 = vmatmul.mubr.msk.f32.gmra.mxu0 %vm379_vm1, %v6713_v58  ;;  %v6735_v58 = vld [vmem:[#allocation2 + $0x150] sm:$0xff] }
 0x2ed   : > { %5545 = vmatprep.mubr.msk.f32.mxu1 %vm379_vm1, %v6719_v2  ;;  %5594 = vmatprep.mubr.msk.f32.mxu0 %vm379_vm1, %v6721_v54  ;;  %v6743_v54 = vld [vmem:[#allocation2 + $0x158] sm:$0xff] }
 0x2f0   : > { %5546 = vmatmul.mubr.msk.f32.gmra.mxu1 %vm379_vm1, %v6727_v62  ;;  %5595 = vmatmul.mubr.msk.f32.gmra.mxu0 %vm379_vm1, %v6729_v50  ;;  %v6751_v50 = vld [vmem:[#allocation2 + $0x168] sm:$0xff] }
 0x2f1   : > { %5548 = vmatprep.mubr.msk.f32.mxu1 %vm379_vm1, %v6735_v58  ;;  %5597 = vmatprep.mubr.msk.f32.mxu0 %vm379_vm1, %v6737_v46  ;;  %v6759_v46 = vld [vmem:[#allocation2 + $0x170] sm:$0xff] }
 0x2f4   : > { %5549 = vmatmul.mubr.msk.f32.gmra.mxu1 %vm379_vm1, %v6743_v54  ;;  %5598 = vmatmul.mubr.msk.f32.gmra.mxu0 %vm379_vm1, %v6745_v41  ;;  %v6767_v41 = vld [vmem:[#allocation2 + $0x16a] sm:$0xff] }
 0x2f5   : > { %5551 = vmatprep.mubr.msk.f32.mxu1 %vm379_vm1, %v6751_v50  ;;  %5600 = vmatprep.mubr.msk.f32.mxu0 %vm379_vm1, %v6753_v36 }
 0x2f8   : > { %5552 = vmatmul.mubr.msk.f32.gmra.mxu1 %vm379_vm1, %v6759_v46  ;;  %5601 = vmatmul.mubr.msk.f32.gmra.mxu0 %vm379_vm1, %v6761_v18  ;;  %v4907_v18 = vld [vmem:[%s7816_s1 + $0x50] sm:$0xff] }
 0x2f9   : > { %5603 = vmatprep.mubr.msk.f32.mxu0 %vm379_vm1, %v6767_v41  ;;  %5610 = vmatprep.mubr.msk.f32.mxu1 %vm379_vm1, %v6516_v26  ;;  %v4973_v26 = vld [vmem:[%s7816_s1 + $0x60] sm:$0xff] }
 0x2fc   : > { %5604 = vmatmul.mubr.msk.f32.gmra.mxu0 %vm379_vm1, %v6773_v17  ;;  %5611 = vmatmul.mubr.msk.f32.vlgmr.msra.gmra.mxu1 %vm379_vm1, %v6522_v29  ;;  %v6797_v29 = vld [vmem:[%s7816_s1 + $0x78] sm:$0xff] }
 0x2fd   : > { %5613 = vmatprep.mubr.msk.f32.mxu1 %vm379_vm1, %v6530_v33  ;;  %5662 = vmatprep.mubr.msk.f32.mxu0 %vm379_vm1, %v6383_v34  ;;  %v6812_v34 = vld [vmem:[%s7816_s1 + $0x88] sm:$0xff] }
 0x2fe   : > { %5711 = vmatpush3.msra.mxu1 %v6535_v27 }
 0x2ff   : > { %5712 = vmatprep.subr.mxu1 %v4907_v18 }
 0x300   : > { %5614 = vmatmul.mubr.msk.f32.gmra.mxu1 %vm379_vm1, %v6544_v37  ;;  %5663 = vmatmul.mubr.msk.f32.vlgmr.msra.gmra.mxu0 %vm379_vm1, %v6385_v35  ;;  %v6923_v35 = vld [vmem:[#allocation2 + $0x181] sm:$0xff] }
 0x301   : > { %5763 = vmatpush3.msra.mxu0 %v6552_v14  ;;  %5616 = vmatprep.mubr.msk.f32.mxu1 %vm379_vm1, %v6558_v42  ;;  %v7928_v14 = vld [vmem:[#allocation21_spill] sm:$0xff] }
 0x302   : > { %5665 = vmatprep.mubr.msk.f32.mxu0 %vm379_vm1, %v6403_v43  ;;  %5713 = vmatpush3.msra.mxu1 %v4907_v18  ;;  %v7913_v43 = vld [vmem:[#allocation6_spill] sm:$0xff] }
 0x303   : > { %5764 = vmatprep.subr.mxu0 %v4973_v26  ;;  %5814 = vmatprep.subr.mxu1 %v6797_v29 }
 0x304   : > { %5617 = vmatmul.mubr.msk.f32.gmra.mxu1 %vm379_vm1, %v6567_v47  ;;  %5666 = vmatmul.mubr.msk.f32.gmra.mxu0 %vm379_vm1, %v6405_v44  ;;  %v5039_v44 = vld [vmem:[%s7816_s1 + $0x70] sm:$0xff] }
 0x305   : > { %5619 = vmatprep.mubr.msk.f32.mxu1 %vm379_vm1, %v6575_v51  ;;  %5668 = vmatprep.mubr.msk.f32.mxu0 %vm379_vm1, %v6423_v52  ;;  %v5105_v52 = vld [vmem:[%s7816_s1 + $0x80] sm:$0xff] }
 0x306   : > { %5765 = vmatpush3.msra.mxu0 %v4973_v26  ;;  %v7936_v26 = vld [vmem:[#allocation29_spill] sm:$0xff] }
 0x307   : > { %5866 = vmatprep.subr.mxu0 %v6812_v34 }
 0x308   : > { %5620 = vmatmul.mubr.msk.f32.gmra.mxu1 %vm379_vm1, %v6583_v55  ;;  %5669 = vmatmul.mubr.msk.f32.gmra.mxu0 %vm379_vm1, %v6425_v53  ;;  %v7916_v53 = vld [vmem:[#allocation9_spill] sm:$0xff] }
 0x309   : > { %5622 = vmatprep.mubr.msk.f32.mxu1 %vm379_vm1, %v6591_v59  ;;  %5671 = vmatprep.mubr.msk.f32.mxu0 %vm379_vm1, %v6443_v60  ;;  %v7919_v60 = vld [vmem:[#allocation12_spill] sm:$0xff] }
 0x30c   : > { %5623 = vmatmul.mubr.msk.f32.gmra.mxu1 %vm379_vm1, %v6599_v63  ;;  %5672 = vmatmul.mubr.msk.f32.gmra.mxu0 %vm379_vm1, %v6445_v61  ;;  %v7920_v61 = vld [vmem:[#allocation13_spill] sm:$0xff] }
 0x30d   : > { %5625 = vmatprep.mubr.msk.f32.mxu1 %vm379_vm1, %v6607_v3  ;;  %5674 = vmatprep.mubr.msk.f32.mxu0 %vm379_vm1, %v6463_v4  ;;  %v7922_v4 = vld [vmem:[#allocation15_spill] sm:$0xff] }
 0x310   : > { %5626 = vmatmul.mubr.msk.f32.gmra.mxu1 %vm379_vm1, %v6615_v7  ;;  %5675 = vmatmul.mubr.msk.f32.gmra.mxu0 %vm379_vm1, %v6465_v5 }
 0x311   : > { %5628 = vmatprep.mubr.msk.f32.mxu1 %vm379_vm1, %v6623_v11  ;;  %5677 = vmatprep.mubr.msk.f32.mxu0 %vm379_vm1, %v6483_v12  ;;  %v7924_v12 = vld [vmem:[#allocation17_spill] sm:$0xff] }
 0x314   : > { %5629 = vmatmul.mubr.msk.f32.gmra.mxu1 %vm379_vm1, %v6631_v16  ;;  %5678 = vmatmul.mubr.msk.f32.gmra.mxu0 %vm379_vm1, %v6485_v13 }
 0x315   : > { %5631 = vmatprep.mubr.msk.f32.mxu1 %vm379_vm1, %v6639_v21  ;;  %5680 = vmatprep.mubr.msk.f32.mxu0 %vm379_vm1, %v6504_v22  ;;  %v7925_v22 = vld [vmem:[#allocation18_spill] sm:$0xff] }
 0x318   : > { %5632 = vmatmul.mubr.msk.f32.gmra.mxu1 %vm379_vm1, %v6647_v24  ;;  %5681 = vmatmul.mubr.msk.f32.gmra.mxu0 %vm379_vm1, %v6506_v23  ;;  %v7926_v23 = vld [vmem:[#allocation19_spill] sm:$0xff] }
 0x319   : > { %5634 = vmatprep.mubr.msk.f32.mxu1 %vm379_vm1, %v6655_v20  ;;  %5683 = vmatprep.mubr.msk.f32.mxu0 %vm379_vm1, %v6353_v25  ;;  %v6911_v25 = vld [vmem:[#allocation2 + $0x180] sm:$0xff] }
 0x31c   : > { %5635 = vmatmul.mubr.msk.f32.gmra.mxu1 %vm379_vm1, %v6663_v30  ;;  %5684 = vmatmul.mubr.msk.f32.gmra.mxu0 %vm379_vm1, %v6355_v45  ;;  %v7910_v45 = vld [vmem:[#allocation3_spill] sm:$0xff] }
 0x31d   : > { %5637 = vmatprep.mubr.msk.f32.mxu1 %vm379_vm1, %v6671_v28  ;;  %5686 = vmatprep.mubr.msk.f32.mxu0 %vm379_vm1, %v6372_v31  ;;  %v6917_v31 = vld [vmem:[#allocation2 + $0x188] sm:$0xff] }
 0x320   : > { %5638 = vmatmul.mubr.msk.f32.gmra.mxu1 %vm379_vm1, %v6679_v38  ;;  %5687 = vmatmul.mubr.msk.f32.gmra.mxu0 %vm379_vm1, %v6374_v32  ;;  %v7911_v32 = vld [vmem:[#allocation4_spill] sm:$0xff] }
 0x321   : > { %5640 = vmatprep.mubr.msk.f32.mxu1 %vm379_vm1, %v6687_v19  ;;  %5689 = vmatprep.mubr.msk.f32.mxu0 %vm379_vm1, %v6393_v39  ;;  %v7912_v39 = vld [vmem:[#allocation5_spill] sm:$0xff] }
 0x324   : > { %5641 = vmatmul.mubr.msk.f32.gmra.mxu1 %vm379_vm1, %v6695_v15  ;;  %5690 = vmatmul.mubr.msk.f32.gmra.mxu0 %vm379_vm1, %v6395_v40  ;;  %v6929_v40 = vld [vmem:[#allocation2 + $0x189] sm:$0xff] }
 0x325   : > { %5643 = vmatprep.mubr.msk.f32.mxu1 %vm379_vm1, %v6703_v10  ;;  %5692 = vmatprep.mubr.msk.f32.mxu0 %vm379_vm1, %v6413_v48  ;;  %v7914_v48 = vld [vmem:[#allocation7_spill] sm:$0xff] }
 0x328   : > { %5644 = vmatmul.mubr.msk.f32.gmra.mxu1 %vm379_vm1, %v6711_v6  ;;  %5693 = vmatmul.mubr.msk.f32.gmra.mxu0 %vm379_vm1, %v6415_v49  ;;  %v7915_v49 = vld [vmem:[#allocation8_spill] sm:$0xff] }
 0x329   : > { %5646 = vmatprep.mubr.msk.f32.mxu1 %vm379_vm1, %v6719_v2  ;;  %5695 = vmatprep.mubr.msk.f32.mxu0 %vm379_vm1, %v6433_v56  ;;  %v7917_v56 = vld [vmem:[#allocation10_spill] sm:$0xff] }
 0x32c   : > { %5647 = vmatmul.mubr.msk.f32.gmra.mxu1 %vm379_vm1, %v6727_v62  ;;  %5696 = vmatmul.mubr.msk.f32.gmra.mxu0 %vm379_vm1, %v6435_v57  ;;  %v7918_v57 = vld [vmem:[#allocation11_spill] sm:$0xff] }
 0x32d   : > { %5649 = vmatprep.mubr.msk.f32.mxu1 %vm379_vm1, %v6735_v58  ;;  %5698 = vmatprep.mubr.msk.f32.mxu0 %vm379_vm1, %v6453_v0 }
 0x330   : > { %5650 = vmatmul.mubr.msk.f32.gmra.mxu1 %vm379_vm1, %v6743_v54  ;;  %5699 = vmatmul.mubr.msk.f32.gmra.mxu0 %vm379_vm1, %v6455_v1  ;;  %v7921_v1 = vld [vmem:[#allocation14_spill] sm:$0xff] }
 0x331   : > { %5652 = vmatprep.mubr.msk.f32.mxu1 %vm379_vm1, %v6751_v50  ;;  %5701 = vmatprep.mubr.msk.f32.mxu0 %vm379_vm1, %v6473_v8  ;;  %v6983_v8 = vpop.f32.mrf.mxu0 }
 0x333   : > { %v6995_v18 = vpop.f32.mrf.mxu0 }
 0x334   : > { %5653 = vmatmul.mubr.msk.f32.gmra.mxu1 %vm379_vm1, %v6759_v46  ;;  %5702 = vmatmul.mubr.msk.f32.gmra.mxu0 %vm379_vm1, %v6475_v9  ;;  %v7923_v9 = vld [vmem:[#allocation16_spill] sm:$0xff] }
 0x335   : > { %5655 = vmatprep.mubr.msk.f32.mxu1 %vm379_vm1, %v6911_v25  ;;  %5704 = vmatprep.mubr.msk.f32.mxu0 %vm379_vm1, %v7910_v45 }
 0x338   : > { %5656 = vmatmul.mubr.msk.f32.gmra.mxu1 %vm379_vm1, %v6917_v31  ;;  %5705 = vmatmul.mubr.msk.f32.gmra.mxu0 %vm379_vm1, %v7911_v32  ;;  %v7938_v32 = vld [vmem:[#allocation31_spill] sm:$0xff] }
 0x339   : > { %5707 = vmatprep.mubr.msk.f32.mxu0 %vm379_vm1, %v6923_v35  ;;  %5714 = vmatprep.mubr.msk.f32.mxu1 %vm379_vm1, %v7912_v39  ;;  %v7115_v39 = vld [vmem:[#allocation2 + $0x18a] sm:$0xff] }
 0x33a   : > { %7942 = vst [vmem:[#allocation6_spill] sm:$0xff] %v7115_v39 }
 0x33c   : > { %5708 = vmatmul.mubr.msk.f32.gmra.mxu0 %vm379_vm1, %v6929_v40  ;;  %5715 = vmatmul.mubr.msk.f32.vlgmr.msra.gmra.mxu1 %vm379_vm1, %v7913_v43 }
 0x33d   : > { %5717 = vmatprep.mubr.msk.f32.mxu1 %vm379_vm1, %v7914_v48  ;;  %5766 = vmatprep.mubr.msk.f32.mxu0 %vm379_vm1, %v6530_v33 }
 0x33e   : > { %5815 = vmatpush3.msra.mxu1 %v6797_v29 }
 0x33f   : > { %5816 = vmatprep.subr.mxu1 %v5039_v44 }
 0x340   : > { %5718 = vmatmul.mubr.msk.f32.gmra.mxu1 %vm379_vm1, %v7915_v49  ;;  %5767 = vmatmul.mubr.msk.f32.vlgmr.msra.gmra.mxu0 %vm379_vm1, %v6544_v37  ;;  %v7927_v37 = vld [vmem:[#allocation20_spill] sm:$0xff] }
 0x341   : > { %5867 = vmatpush3.msra.mxu0 %v6812_v34  ;;  %5720 = vmatprep.mubr.msk.f32.mxu1 %vm379_vm1, %v7916_v53  ;;  %v7937_v34 = vld [vmem:[#allocation30_spill] sm:$0xff] }
 0x342   : > { %5769 = vmatprep.mubr.msk.f32.mxu0 %vm379_vm1, %v6558_v42  ;;  %5817 = vmatpush3.msra.mxu1 %v5039_v44 }
 0x343   : > { %5868 = vmatprep.subr.mxu0 %v5105_v52 }
 0x344   : > { %5721 = vmatmul.mubr.msk.f32.gmra.mxu1 %vm379_vm1, %v7917_v56  ;;  %5770 = vmatmul.mubr.msk.f32.gmra.mxu0 %vm379_vm1, %v6567_v47  ;;  %v6971_v0 = vpop.f32.mrf.mxu1 }
 0x345   : > { %5723 = vmatprep.mubr.msk.f32.mxu1 %vm379_vm1, %v7918_v57  ;;  %5772 = vmatprep.mubr.msk.f32.mxu0 %vm379_vm1, %v6575_v51  ;;  %v7929_v51 = vld [vmem:[#allocation22_spill] sm:$0xff] }
 0x346   : > { %5869 = vmatpush3.msra.mxu0 %v5105_v52  ;;  %v6981_v5 = vpop.f32.mrf.mxu1  ;;  %v5008_v52 = vld [vmem:[#allocation2 + $0x39] sm:$0xff] }
 0x348   : > { %5724 = vmatmul.mubr.msk.f32.gmra.mxu1 %vm379_vm1, %v7919_v60  ;;  %5773 = vmatmul.mubr.msk.f32.gmra.mxu0 %vm379_vm1, %v6583_v55  ;;  %v6993_v13 = vpop.f32.mrf.mxu1  ;;  %v7930_v55 = vld [vmem:[#allocation23_spill] sm:$0xff] }
 0x349   : > { %5726 = vmatprep.mubr.msk.f32.mxu1 %vm379_vm1, %v7920_v61  ;;  %5775 = vmatprep.mubr.msk.f32.mxu0 %vm379_vm1, %v6591_v59 }
 0x34a   : > { %v7005_v33 = vpop.f32.mrf.mxu1 }
 0x34c   : > { %5727 = vmatmul.mubr.msk.f32.gmra.mxu1 %vm379_vm1, %v7921_v1  ;;  %5776 = vmatmul.mubr.msk.f32.gmra.mxu0 %vm379_vm1, %v6599_v63  ;;  %v7007_v27 = vpop.f32.mrf.mxu0 }
 0x34d   : > { %5729 = vmatprep.mubr.msk.f32.mxu1 %vm379_vm1, %v7922_v4  ;;  %5778 = vmatprep.mubr.msk.f32.mxu0 %vm379_vm1, %v6607_v3 }
 0x34e   : > { %v7019_v47 = vpop.f32.mrf.mxu0 }
 0x350   : > { %5730 = vmatmul.mubr.msk.f32.gmra.mxu1 %vm379_vm1, %v7923_v9  ;;  %5779 = vmatmul.mubr.msk.f32.gmra.mxu0 %vm379_vm1, %v6615_v7  ;;  %v7017_v42 = vpop.f32.mrf.mxu1  ;;  %v7931_v7 = vld [vmem:[#allocation24_spill] sm:$0xff] }
 0x351   : > { %5732 = vmatprep.mubr.msk.f32.mxu1 %vm379_vm1, %v7924_v12  ;;  %5781 = vmatprep.mubr.msk.f32.mxu0 %vm379_vm1, %v6623_v11  ;;  %v7932_v11 = vld [vmem:[#allocation25_spill] sm:$0xff] }
 0x352   : > { %v7029_v59 = vpop.f32.mrf.mxu1 }
 0x354   : > { %5733 = vmatmul.mubr.msk.f32.gmra.mxu1 %vm379_vm1, %v7925_v22  ;;  %5782 = vmatmul.mubr.msk.f32.gmra.mxu0 %vm379_vm1, %v6631_v16  ;;  %v7031_v63 = vpop.f32.mrf.mxu0 }
 0x355   : > { %5735 = vmatprep.mubr.msk.f32.mxu1 %vm379_vm1, %v7926_v23  ;;  %5784 = vmatprep.mubr.msk.f32.mxu0 %vm379_vm1, %v6639_v21 }
 0x356   : > { %v7043_v16 = vpop.f32.mrf.mxu0 }
 0x358   : > { %5736 = vmatmul.mubr.msk.f32.gmra.mxu1 %vm379_vm1, %v7927_v37  ;;  %5785 = vmatmul.mubr.msk.f32.gmra.mxu0 %vm379_vm1, %v6647_v24  ;;  %v7033_v3 = vpop.f32.mrf.mxu1  ;;  %v7933_v24 = vld [vmem:[#allocation26_spill] sm:$0xff] }
 0x359   : > { %5738 = vmatprep.mubr.msk.f32.mxu1 %vm379_vm1, %v7928_v14  ;;  %5787 = vmatprep.mubr.msk.f32.mxu0 %vm379_vm1, %v6655_v20  ;;  %v7935_v20 = vld [vmem:[#allocation28_spill] sm:$0xff] }
 0x35a   : > { %v7045_v21 = vpop.f32.mrf.mxu1 }
 0x35c   : > { %5739 = vmatmul.mubr.msk.f32.gmra.mxu1 %vm379_vm1, %v7929_v51  ;;  %5788 = vmatmul.mubr.msk.f32.gmra.mxu0 %vm379_vm1, %v6663_v30  ;;  %v7047_v30 = vpop.f32.mrf.mxu0 }
 0x35d   : > { %5741 = vmatprep.mubr.msk.f32.mxu1 %vm379_vm1, %v7930_v55  ;;  %5790 = vmatprep.mubr.msk.f32.mxu0 %vm379_vm1, %v6671_v28  ;;  %v7934_v28 = vld [vmem:[#allocation27_spill] sm:$0xff] }
 0x360   : > { %5742 = vmatmul.mubr.msk.f32.gmra.mxu1 %vm379_vm1, %v7931_v7  ;;  %5791 = vmatmul.mubr.msk.f32.gmra.mxu0 %vm379_vm1, %v6679_v38  ;;  %v7057_v38 = vpop.f32.mrf.mxu1 }
 0x361   : > { %5744 = vmatprep.mubr.msk.f32.mxu1 %vm379_vm1, %v7932_v11  ;;  %5793 = vmatprep.mubr.msk.f32.mxu0 %vm379_vm1, %v6687_v19  ;;  %v7059_v19 = vpop.f32.mrf.mxu0 }
 0x364   : > { %5745 = vmatmul.mubr.msk.f32.gmra.mxu1 %vm379_vm1, %v7933_v24  ;;  %5794 = vmatmul.mubr.msk.f32.gmra.mxu0 %vm379_vm1, %v6695_v15  ;;  %v7069_v15 = vpop.f32.mrf.mxu1  ;;  %v7071_v29 = vpop.f32.mrf.mxu0 }
 0x365   : > { %5747 = vmatprep.mubr.msk.f32.mxu1 %vm379_vm1, %v7934_v28  ;;  %5796 = vmatprep.mubr.msk.f32.mxu0 %vm379_vm1, %v6703_v10 }
 0x368   : > { %5748 = vmatmul.mubr.msk.f32.gmra.mxu1 %vm379_vm1, %v7935_v20  ;;  %5797 = vmatmul.mubr.msk.f32.gmra.mxu0 %vm379_vm1, %v6711_v6  ;;  %v7073_v10 = vpop.f32.mrf.mxu1  ;;  %v7083_v6 = vpop.f32.mrf.mxu0 }
 0x369   : > { %5750 = vmatprep.mubr.msk.f32.mxu1 %vm379_vm1, %v7936_v26  ;;  %5799 = vmatprep.mubr.msk.f32.mxu0 %vm379_vm1, %v6719_v2 }
 0x36a   : > { %v7085_v2 = vpop.f32.mrf.mxu1 }
 0x36c   : > { %5751 = vmatmul.mubr.msk.f32.gmra.mxu1 %vm379_vm1, %v7937_v34  ;;  %5800 = vmatmul.mubr.msk.f32.gmra.mxu0 %vm379_vm1, %v6727_v62  ;;  %v7087_v45 = vpop.f32.mrf.mxu0  ;;  %v7105_v62 = vld [vmem:[#allocation2 + $0x182] sm:$0xff] }
 0x36d   : > { %5753 = vmatprep.mubr.msk.f32.mxu1 %vm379_vm1, %v6753_v36  ;;  %5802 = vmatprep.mubr.msk.f32.mxu0 %vm379_vm1, %v6735_v58  ;;  %7940 = vst [vmem:[#allocation4_spill] sm:$0xff] %v7105_v62 }
 0x36e   : > { %v7099_v58 = vpop.f32.mrf.mxu0 }
 0x370   : > { %5754 = vmatmul.mubr.msk.f32.gmra.mxu1 %vm379_vm1, %v7938_v32  ;;  %5803 = vmatmul.mubr.msk.f32.gmra.mxu0 %vm379_vm1, %v6743_v54  ;;  %v7097_v36 = vpop.f32.mrf.mxu1  ;;  %v4971_v54 = vld [vmem:[#allocation2 + $0x198] sm:$0xff] }
 0x371   : > { %5756 = vmatprep.mubr.msk.f32.mxu1 %vm379_vm1, %v6767_v41  ;;  %5805 = vmatprep.mubr.msk.f32.mxu0 %vm379_vm1, %v6751_v50  ;;  %7939 = vst [vmem:[#allocation3_spill] sm:$0xff] %v7097_v36 }
 0x372   : > { %v7111_v41 = vpop.f32.mrf.mxu1 }
 0x373   : > { %7941 = vst [vmem:[#allocation5_spill] sm:$0xff] %v7111_v41 }
 0x374   : > { %5757 = vmatmul.mubr.msk.f32.gmra.mxu1 %vm379_vm1, %v6773_v17  ;;  %5806 = vmatmul.mubr.msk.f32.gmra.mxu0 %vm379_vm1, %v6759_v46  ;;  %v7113_v50 = vpop.f32.mrf.mxu0  ;;  %v5007_v17 = vld [vmem:[#allocation2 + $0x31] sm:$0xff]  ;;  %v4972_v46 = vld [vmem:[#allocation2 + $0x1a0] sm:$0xff] }
 0x375   : > { %5759 = vmatprep.mubr.msk.f32.mxu1 %vm379_vm1, %v7105_v62  ;;  %5808 = vmatprep.mubr.msk.f32.mxu0 %vm379_vm1, %v6911_v25 }
 0x376   : > { %v7125_v25 = vpop.f32.mrf.mxu0 }
 0x378   : > { %v7117_v43 = vpop.f32.mrf.mxu1  ;;  %5760 = vmatmul.mubr.msk.f32.gmra.mxu1 %vm379_vm1, %v7115_v39  ;;  %5809 = vmatmul.mubr.msk.f32.gmra.mxu0 %vm379_vm1, %v6917_v31  ;;  %v5010_v39 = vld [vmem:[#allocation2 + $0x51] sm:$0xff] }
 0x379   : > { %7943 = vst [vmem:[#allocation7_spill] sm:$0xff] %v7117_v43  ;;  %5818 = vmatprep.mubr.msk.f32.mxu1 %vm379_vm1, %v5007_v17  ;;  %5811 = vmatprep.mubr.msk.f32.mxu0 %vm379_vm1, %v4971_v54  ;;  %v5009_v43 = vld [vmem:[#allocation2 + $0x49] sm:$0xff] }
 0x37a   : > { %v7127_v44 = vpop.f32.mrf.mxu1 }
 0x37b   : > { %7944 = vst [vmem:[#allocation8_spill] sm:$0xff] %v7127_v44 }
 0x37c   : > { %v7129_v34 = vpop.f32.mrf.mxu0  ;;  %v5508_v32 = vpop.f32.mrf.mxu1  ;;  %5812 = vmatmul.mubr.msk.f32.gmra.mxu0 %vm379_vm1, %v4972_v46  ;;  %5819 = vmatmul.mubr.msk.f32.vlgmr.msra.gmra.mxu1 %vm379_vm1, %v5008_v52  ;;  %v5011_v46 = vld [vmem:[#allocation2 + $0x61] sm:$0xff] }
 0x37d   : > { %5821 = vmatprep.mubr.msk.f32.mxu1 %vm379_vm1, %v5009_v43  ;;  %5870 = vmatprep.mubr.msk.f32.mxu0 %vm379_vm1, %v7914_v48  ;;  %v1332_v17 = vadd.f32 %v5508_v32, %v6983_v8 }
 0x37e   : > { %v7136_v31 = vpop.f32.mrf.mxu0  ;;  %v1326_v54 = vpop.f32.mrf.mxu1 }
 0x37f   : > { %v1327_v44 = vadd.f32 %v1326_v54, %v6995_v18 }
 0x380   : > { %v5511_v41 = vpop.f32.mrf.mxu1  ;;  %v5560_v36 = vpop.f32.mrf.mxu0  ;;  %5822 = vmatmul.mubr.msk.f32.gmra.mxu1 %vm379_vm1, %v5010_v39  ;;  %5871 = vmatmul.mubr.msk.f32.vlgmr.msra.gmra.mxu0 %vm379_vm1, %v7915_v49  ;;  %v5012_v39 = vld [vmem:[#allocation2 + $0x69] sm:$0xff]  ;;  %v5013_v49 = vld [vmem:[#allocation2 + $0x79] sm:$0xff] }
 0x381   : > { %v1342_v43 = vadd.f32 %v5511_v41, %v7007_v27  ;;  %v7144_v52 = vadd.f32 %v5560_v36, %v1332_v17  ;;  %5824 = vmatprep.mubr.msk.f32.mxu1 %vm379_vm1, %v5011_v46  ;;  %5873 = vmatprep.mubr.msk.f32.mxu0 %vm379_vm1, %v7916_v53  ;;  %v5014_v17 = vld [vmem:[#allocation2 + $0x81] sm:$0xff] }
 0x382   : > { %v1336_v48 = vpop.f32.mrf.mxu1  ;;  %v1682_v8 = vpop.f32.mrf.mxu0 }
 0x383   : > { %v1337_v18 = vadd.f32 %v1336_v48, %v7019_v47  ;;  %v7150_v32 = vadd.f32 %v1682_v8, %v1327_v44 }
 0x384   : > { %v5514_v54 = vpop.f32.mrf.mxu1  ;;  %v5563_v62 = vpop.f32.mrf.mxu0  ;;  %5825 = vmatmul.mubr.msk.f32.gmra.mxu1 %vm379_vm1, %v5012_v39  ;;  %5874 = vmatmul.mubr.msk.f32.gmra.mxu0 %vm379_vm1, %v7917_v56  ;;  %v5015_v56 = vld [vmem:[#allocation2 + $0x91] sm:$0xff] }
 0x385   : > { %v1352_v27 = vadd.f32 %v5514_v54, %v7031_v63  ;;  %v7156_v36 = vadd.f32 %v5563_v62, %v1342_v43  ;;  %5827 = vmatprep.mubr.msk.f32.mxu1 %vm379_vm1, %v5013_v49  ;;  %5876 = vmatprep.mubr.msk.f32.mxu0 %vm379_vm1, %v7918_v57 }
 0x386   : > { %v1346_v53 = vpop.f32.mrf.mxu1  ;;  %v1692_v47 = vpop.f32.mrf.mxu0 }
 0x387   : > { %v1347_v41 = vadd.f32 %v1346_v53, %v7043_v16  ;;  %v7162_v44 = vadd.f32 %v1692_v47, %v1337_v18  ;;  %v5016_v18 = vld [vmem:[#allocation2 + $0x99] sm:$0xff]  ;;  %v5018_v47 = vld [vmem:[#allocation2 + $0xb1] sm:$0xff] }
 0x388   : > { %v5517_v46 = vpop.f32.mrf.mxu1  ;;  %v5566_v48 = vpop.f32.mrf.mxu0  ;;  %5828 = vmatmul.mubr.msk.f32.gmra.mxu1 %vm379_vm1, %v5014_v17  ;;  %5877 = vmatmul.mubr.msk.f32.gmra.mxu0 %vm379_vm1, %v7919_v60  ;;  %v5017_v60 = vld [vmem:[#allocation2 + $0xa9] sm:$0xff] }
 0x389   : > { %v1362_v63 = vadd.f32 %v5517_v46, %v7047_v30  ;;  %v7168_v62 = vadd.f32 %v5566_v48, %v1352_v27  ;;  %5830 = vmatprep.mubr.msk.f32.mxu1 %vm379_vm1, %v5015_v56  ;;  %5879 = vmatprep.mubr.msk.f32.mxu0 %vm379_vm1, %v7920_v61 }
 0x38a   : > { %v1356_v57 = vpop.f32.mrf.mxu1  ;;  %v1702_v16 = vpop.f32.mrf.mxu0 }
 0x38b   : > { %v1357_v43 = vadd.f32 %v1356_v57, %v7059_v19  ;;  %v7174_v8 = vadd.f32 %v1702_v16, %v1347_v41 }
 0x38c   : > { %v5520_v39 = vpop.f32.mrf.mxu1  ;;  %v5569_v54 = vpop.f32.mrf.mxu0  ;;  %5831 = vmatmul.mubr.msk.f32.gmra.mxu1 %vm379_vm1, %v5016_v18  ;;  %5880 = vmatmul.mubr.msk.f32.gmra.mxu0 %vm379_vm1, %v7921_v1  ;;  %v5019_v1 = vld [vmem:[#allocation2 + $0xc1] sm:$0xff] }
 0x38d   : > { %v1372_v30 = vadd.f32 %v5520_v39, %v7071_v29  ;;  %v7180_v49 = vadd.f32 %v5569_v54, %v1362_v63  ;;  %5833 = vmatprep.mubr.msk.f32.mxu1 %vm379_vm1, %v5017_v60  ;;  %5882 = vmatprep.mubr.msk.f32.mxu0 %vm379_vm1, %v7922_v4  ;;  %v5020_v63 = vld [vmem:[#allocation2 + $0xc9] sm:$0xff]  ;;  %v5022_v54 = vld [vmem:[#allocation2 + $0xe1] sm:$0xff] }
 0x38e   : > { %v1366_v61 = vpop.f32.mrf.mxu1  ;;  %v1712_v19 = vpop.f32.mrf.mxu0 }
 0x38f   : > { %v1367_v27 = vadd.f32 %v1366_v61, %v7083_v6  ;;  %v7186_v53 = vadd.f32 %v1712_v19, %v1357_v43 }
 0x390   : > { %v5523_v41 = vpop.f32.mrf.mxu1  ;;  %v5572_v17 = vpop.f32.mrf.mxu0  ;;  %5834 = vmatmul.mubr.msk.f32.gmra.mxu1 %vm379_vm1, %v5018_v47  ;;  %5883 = vmatmul.mubr.msk.f32.gmra.mxu0 %vm379_vm1, %v7923_v9  ;;  %v5021_v9 = vld [vmem:[#allocation2 + $0xd9] sm:$0xff] }
 0x391   : > { %v1382_v29 = vadd.f32 %v5523_v41, %v7087_v45  ;;  %v7192_v46 = vadd.f32 %v5572_v17, %v1372_v30  ;;  %5836 = vmatprep.mubr.msk.f32.mxu1 %vm379_vm1, %v5019_v1  ;;  %5885 = vmatprep.mubr.msk.f32.mxu0 %vm379_vm1, %v7924_v12  ;;  %v5024_v47 = vld [vmem:[#allocation2 + $0xf9] sm:$0xff] }
 0x392   : > { %v1376_v4 = vpop.f32.mrf.mxu1  ;;  %v1722_v6 = vpop.f32.mrf.mxu0 }
 0x393   : > { %v1377_v48 = vadd.f32 %v1376_v4, %v7099_v58  ;;  %v7198_v56 = vadd.f32 %v1722_v6, %v1367_v27  ;;  %v5026_v4 = vld [vmem:[#allocation2 + $0x111] sm:$0xff] }
 0x394   : > { %v5526_v57 = vpop.f32.mrf.mxu1  ;;  %v5575_v16 = vpop.f32.mrf.mxu0  ;;  %5837 = vmatmul.mubr.msk.f32.gmra.mxu1 %vm379_vm1, %v5020_v63  ;;  %5886 = vmatmul.mubr.msk.f32.gmra.mxu0 %vm379_vm1, %v7925_v22  ;;  %v5023_v22 = vld [vmem:[#allocation2 + $0xf1] sm:$0xff] }
 0x395   : > { %v1392_v45 = vadd.f32 %v5526_v57, %v7113_v50  ;;  %v7204_v43 = vadd.f32 %v5575_v16, %v1382_v29  ;;  %5839 = vmatprep.mubr.msk.f32.mxu1 %vm379_vm1, %v5021_v9  ;;  %5888 = vmatprep.mubr.msk.f32.mxu0 %vm379_vm1, %v7926_v23 }
 0x396   : > { %v1386_v12 = vpop.f32.mrf.mxu1  ;;  %v1732_v58 = vpop.f32.mrf.mxu0 }
 0x397   : > { %v1387_v18 = vadd.f32 %v1386_v12, %v7125_v25  ;;  %v7210_v39 = vadd.f32 %v1732_v58, %v1377_v48 }
 0x398   : > { %v5529_v60 = vpop.f32.mrf.mxu1  ;;  %v5578_v30 = vpop.f32.mrf.mxu0  ;;  %5840 = vmatmul.mubr.msk.f32.gmra.mxu1 %vm379_vm1, %v5022_v54  ;;  %5889 = vmatmul.mubr.msk.f32.gmra.mxu0 %vm379_vm1, %v7927_v37  ;;  %v5025_v37 = vld [vmem:[#allocation2 + $0x109] sm:$0xff] }
 0x399   : > { %v1402_v50 = vadd.f32 %v5529_v60, %v7129_v34  ;;  %v7216_v61 = vadd.f32 %v5578_v30, %v1392_v45  ;;  %5842 = vmatprep.mubr.msk.f32.mxu1 %vm379_vm1, %v5023_v22  ;;  %5891 = vmatprep.mubr.msk.f32.mxu0 %vm379_vm1, %v7928_v14  ;;  %v5028_v45 = vld [vmem:[#allocation2 + $0x129] sm:$0xff]  ;;  %v5030_v30 = vld [vmem:[#allocation2 + $0x141] sm:$0xff] }
 0x39a   : > { %v1396_v23 = vpop.f32.mrf.mxu1  ;;  %v1742_v25 = vpop.f32.mrf.mxu0 }
 0x39b   : > { %v1397_v19 = vadd.f32 %v1396_v23, %v7136_v31  ;;  %v7222_v27 = vadd.f32 %v1742_v25, %v1387_v18 }
 0x39c   : > { %v5532_v41 = vpop.f32.mrf.mxu1  ;;  %v5581_v17 = vpop.f32.mrf.mxu0  ;;  %5843 = vmatmul.mubr.msk.f32.gmra.mxu1 %vm379_vm1, %v5024_v47  ;;  %5892 = vmatmul.mubr.msk.f32.gmra.mxu0 %vm379_vm1, %v7929_v51  ;;  %v5027_v51 = vld [vmem:[#allocation2 + $0x121] sm:$0xff]  ;;  %v5032_v47 = vld [vmem:[#allocation2 + $0x159] sm:$0xff] }
 0x39d   : > { %v7227_v34 = vadd.f32 %v5581_v17, %v1402_v50  ;;  %5845 = vmatprep.mubr.msk.f32.mxu1 %vm379_vm1, %v5025_v37  ;;  %5894 = vmatprep.mubr.msk.f32.mxu0 %vm379_vm1, %v7930_v55  ;;  %v1412_v1 = vadd.f32 %v5532_v41, %v6971_v0  ;;  %v5096_v41 = vld [vmem:[#allocation2 + $0x142] sm:$0xff]  ;;  %v5097_v37 = vld [vmem:[#allocation2 + $0x152] sm:$0xff] }
 0x39e   : > { %v1406_v14 = vpop.f32.mrf.mxu1  ;;  %v1752_v31 = vpop.f32.mrf.mxu0 }
 0x39f   : > { %v7233_v29 = vadd.f32 %v1752_v31, %v1397_v19  ;;  %v1407_v63 = vadd.f32 %v1406_v14, %v6981_v5  ;;  %v5029_v5 = vld [vmem:[#allocation2 + $0x139] sm:$0xff] }
 0x3a0   : > { %v5535_v6 = vpop.f32.mrf.mxu1  ;;  %v5584_v48 = vpop.f32.mrf.mxu0  ;;  %5846 = vmatmul.mubr.msk.f32.gmra.mxu1 %vm379_vm1, %v5026_v4  ;;  %5895 = vmatmul.mubr.msk.f32.gmra.mxu0 %vm379_vm1, %v7931_v7 }
 0x3a1   : > { %v7239_v57 = vadd.f32 %v5584_v48, %v1412_v1  ;;  %5848 = vmatprep.mubr.msk.f32.mxu1 %vm379_vm1, %v5027_v51  ;;  %5897 = vmatprep.mubr.msk.f32.mxu0 %vm379_vm1, %v7932_v11  ;;  %v1422_v16 = vadd.f32 %v5535_v6, %v6993_v13  ;;  %v5034_v6 = vld [vmem:[#allocation2 + $0x171] sm:$0xff]  ;;  %v5098_v48 = vld [vmem:[#allocation2 + $0x15a] sm:$0xff] }
 0x3a2   : > { %v1416_v0 = vpop.f32.mrf.mxu1  ;;  %v1762_v55 = vpop.f32.mrf.mxu0 }
 0x3a3   : > { %v7245_v9 = vadd.f32 %v1762_v55, %v1407_v63  ;;  %v1417_v7 = vadd.f32 %v1416_v0, %v7005_v33  ;;  %v5031_v33 = vld [vmem:[#allocation2 + $0x151] sm:$0xff] }
 0x3a4   : > { %v5538_v12 = vpop.f32.mrf.mxu1  ;;  %v5587_v58 = vpop.f32.mrf.mxu0  ;;  %5849 = vmatmul.mubr.msk.f32.gmra.mxu1 %vm379_vm1, %v5028_v45  ;;  %5898 = vmatmul.mubr.msk.f32.gmra.mxu0 %vm379_vm1, %v7933_v24  ;;  %v5037_v45 = vld [vmem:[#allocation2 + $0x199] sm:$0xff] }
 0x3a5   : > { %v7251_v18 = vadd.f32 %v5587_v58, %v1422_v16  ;;  %5851 = vmatprep.mubr.msk.f32.mxu1 %vm379_vm1, %v5029_v5  ;;  %5900 = vmatprep.mubr.msk.f32.mxu0 %vm379_vm1, %v7934_v28  ;;  %v1432_v54 = vadd.f32 %v5538_v12, %v7017_v42  ;;  %v5100_v5 = vld [vmem:[#allocation2 + $0x172] sm:$0xff] }
 0x3a6   : > { %v1426_v13 = vpop.f32.mrf.mxu1  ;;  %v1772_v11 = vpop.f32.mrf.mxu0 }
 0x3a7   : > { %v7257_v60 = vadd.f32 %v1772_v11, %v1417_v7  ;;  %v1427_v24 = vadd.f32 %v1426_v13, %v7029_v59  ;;  %v5033_v59 = vld [vmem:[#allocation2 + $0x169] sm:$0xff]  ;;  %v7945_v11 = vld [vmem:[#allocation4_spill] sm:$0xff] }
 0x3a8   : > { %v5541_v22 = vpop.f32.mrf.mxu1  ;;  %v5590_v50 = vpop.f32.mrf.mxu0  ;;  %5852 = vmatmul.mubr.msk.f32.gmra.mxu1 %vm379_vm1, %v5030_v30  ;;  %5901 = vmatmul.mubr.msk.f32.gmra.mxu0 %vm379_vm1, %v7935_v20 }
 0x3a9   : > { %v7263_v23 = vadd.f32 %v5590_v50, %v1432_v54  ;;  %5854 = vmatprep.mubr.msk.f32.mxu1 %vm379_vm1, %v5031_v33  ;;  %5903 = vmatprep.mubr.msk.f32.mxu0 %vm379_vm1, %v7936_v26  ;;  %v1442_v25 = vadd.f32 %v5541_v22, %v7033_v3  ;;  %v5103_v22 = vld [vmem:[#allocation2 + $0x19a] sm:$0xff]  ;;  %v7946_v50 = vld [vmem:[#allocation3_spill] sm:$0xff] }
 0x3aa   : > { %v1436_v42 = vpop.f32.mrf.mxu1  ;;  %v1782_v28 = vpop.f32.mrf.mxu0 }
 0x3ab   : > { %v7269_v19 = vadd.f32 %v1782_v28, %v1427_v24  ;;  %v1437_v14 = vadd.f32 %v1436_v42, %v7045_v21  ;;  %v5099_v21 = vld [vmem:[#allocation2 + $0x16a] sm:$0xff]  ;;  %v7947_v24 = vld [vmem:[#allocation5_spill] sm:$0xff] }
 0x3ac   : > { %v5544_v17 = vpop.f32.mrf.mxu1  ;;  %v5593_v20 = vpop.f32.mrf.mxu0  ;;  %5855 = vmatmul.mubr.msk.f32.gmra.mxu1 %vm379_vm1, %v5032_v47  ;;  %5904 = vmatmul.mubr.msk.f32.gmra.mxu0 %vm379_vm1, %v5096_v41  ;;  %v7949_v47 = vld [vmem:[#allocation7_spill] sm:$0xff] }
 0x3ad   : > { %v7274_v31 = vadd.f32 %v5593_v20, %v1442_v25  ;;  %5857 = vmatprep.mubr.msk.f32.mxu1 %vm379_vm1, %v5033_v59  ;;  %5906 = vmatprep.mubr.msk.f32.mxu0 %vm379_vm1, %v5097_v37  ;;  %v1452_v1 = vadd.f32 %v5544_v17, %v7057_v38  ;;  %v5104_v20 = vld [vmem:[#allocation2 + $0x1a2] sm:$0xff] }
 0x3ae   : > { %v1446_v3 = vpop.f32.mrf.mxu1  ;;  %v1792_v26 = vpop.f32.mrf.mxu0 }
 0x3af   : > { %v7279_v4 = vadd.f32 %v1792_v26, %v1437_v14  ;;  %v1447_v0 = vadd.f32 %v1446_v3, %v7069_v15  ;;  %v7950_v14 = vld [vmem:[#allocation8_spill] sm:$0xff] }
 0x3b0   : > { %v5547_v51 = vpop.f32.mrf.mxu1  ;;  %v5596_v63 = vpop.f32.mrf.mxu0  ;;  %5858 = vmatmul.mubr.msk.f32.gmra.mxu1 %vm379_vm1, %v5034_v6  ;;  %5907 = vmatmul.mubr.msk.f32.gmra.mxu0 %vm379_vm1, %v5098_v48 }
 0x3b1   : > { %v7284_v55 = vadd.f32 %v5596_v63, %v1452_v1  ;;  %5860 = vmatprep.mubr.msk.f32.mxu1 %vm379_vm1, %v6923_v35  ;;  %5909 = vmatprep.mubr.msk.f32.mxu0 %vm379_vm1, %v5099_v21  ;;  %v1462_v12 = vadd.f32 %v5547_v51, %v7073_v10  ;;  %v5038_v10 = vld [vmem:[#allocation2 + $0x1a1] sm:$0xff] }
 0x3b2   : > { %v1456_v38 = vpop.f32.mrf.mxu1  ;;  %v1802_v16 = vpop.f32.mrf.mxu0 }
 0x3b3   : > { %v7290_v58 = vadd.f32 %v1802_v16, %v1447_v0  ;;  %v1457_v15 = vadd.f32 %v1456_v38, %v7085_v2  ;;  %v7948_v2 = vld [vmem:[#allocation6_spill] sm:$0xff] }
 0x3b4   : > { %v5550_v7 = vpop.f32.mrf.mxu1  ;;  %v5599_v13 = vpop.f32.mrf.mxu0  ;;  %5861 = vmatmul.mubr.msk.f32.gmra.mxu1 %vm379_vm1, %v6929_v40  ;;  %5910 = vmatmul.mubr.msk.f32.gmra.mxu0 %vm379_vm1, %v5100_v5 }
 0x3b5   : > { %v7296_v35 = vadd.f32 %v5599_v13, %v1462_v12  ;;  %5912 = vmatprep.mubr.msk.f32.mxu0 %vm379_vm1, %v7945_v11  ;;  %5863 = vmatprep.mubr.msk.f32.mxu1 %vm379_vm1, %v5037_v45  ;;  %v1472_v33 = vadd.f32 %v5550_v7, %v7946_v50 }
 0x3b6   : > { %v1466_v54 = vpop.f32.mrf.mxu1  ;;  %v1812_v30 = vpop.f32.mrf.mxu0 }
 0x3b7   : > { %v1467_v42 = vadd.f32 %v1466_v54, %v7947_v24  ;;  %v7303_v40 = vadd.f32 %v1812_v30, %v1457_v15 }
 0x3b8   : > { %v5553_v28 = vpop.f32.mrf.mxu1  ;;  %v5602_v25 = vpop.f32.mrf.mxu0  ;;  %5864 = vmatmul.mubr.msk.f32.gmra.mxu1 %vm379_vm1, %v5038_v10  ;;  %5913 = vmatmul.mubr.msk.f32.gmra.mxu0 %vm379_vm1, %v7948_v2 }
 0x3b9   : > { %v1482_v41 = vadd.f32 %v5553_v28, %v7949_v47  ;;  %v7309_v17 = vadd.f32 %v5602_v25, %v1472_v33  ;;  %5915 = vmatprep.mubr.msk.f32.mxu0 %vm379_vm1, %v5103_v22 }
 0x3ba   : > { %v1476_v59 = vpop.f32.mrf.mxu1  ;;  %v1822_v37 = vpop.f32.mrf.mxu0 }
 0x3bb   : > { %v1477_v3 = vadd.f32 %v1476_v59, %v7950_v14  ;;  %v7313_v26 = vadd.f32 %v1822_v37, %v1467_v42 }
 0x3bc   : > { %v5605_v1 = vpop.f32.mrf.mxu0  ;;  %v5612_v6 = vpop.f32.mrf.mxu1  ;;  %5916 = vmatmul.mubr.msk.f32.gmra.mxu0 %vm379_vm1, %v5104_v20 }
 0x3bd   : > { %v7316_v48 = vadd.f32 %v5605_v1, %v1482_v41  ;;  %v2233_v51 = vadd.f32 %v5612_v6, %v7144_v52 }
 0x3be   : > { %v1832_v63 = vpop.f32.mrf.mxu0  ;;  %v2073_v21 = vpop.f32.mrf.mxu1 }
 0x3bf   : > { %v7319_v0 = vadd.f32 %v1832_v63, %v1477_v3  ;;  %v2232_v38 = vadd.f32 %v2073_v21, %v7150_v32 }
 0x3c0   : > { %v5615_v16 = vpop.f32.mrf.mxu1  ;;  %v5664_v45 = vpop.f32.mrf.mxu0 }
 0x3c1   : > { %v2235_v12 = vadd.f32 %v5615_v16, %v7156_v36  ;;  %v7323_v5 = vadd.f32 %v5664_v45, %v2233_v51 }
 0x3c2   : > { %v2083_v7 = vpop.f32.mrf.mxu1  ;;  %v2461_v13 = vpop.f32.mrf.mxu0 }
 0x3c3   : > { %v2234_v15 = vadd.f32 %v2083_v7, %v7162_v44  ;;  %v7326_v11 = vadd.f32 %v2461_v13, %v2232_v38 }
 0x3c4   : > { %v5618_v10 = vpop.f32.mrf.mxu1  ;;  %v5667_v52 = vpop.f32.mrf.mxu0 }
 0x3c5   : > { %v2237_v54 = vadd.f32 %v5618_v10, %v7168_v62  ;;  %v7329_v30 = vadd.f32 %v5667_v52, %v2235_v12 }
 0x3c6   : > { %v2093_v22 = vpop.f32.mrf.mxu1  ;;  %v2471_v32 = vpop.f32.mrf.mxu0 }
 0x3c7   : > { %v2236_v50 = vadd.f32 %v2093_v22, %v7174_v8  ;;  %v7332_v33 = vadd.f32 %v2471_v32, %v2234_v15 }
 0x3c8   : > { %v5621_v36 = vpop.f32.mrf.mxu1  ;;  %v5670_v24 = vpop.f32.mrf.mxu0 }
 0x3c9   : > { %v2239_v42 = vadd.f32 %v5621_v36, %v7180_v49  ;;  %v7335_v28 = vadd.f32 %v5670_v24, %v2237_v54 }
 0x3ca   : > { %v2103_v44 = vpop.f32.mrf.mxu1  ;;  %v2481_v25 = vpop.f32.mrf.mxu0 }
 0x3cb   : > { %v2238_v2 = vadd.f32 %v2103_v44, %v7186_v53  ;;  %v7338_v47 = vadd.f32 %v2481_v25, %v2236_v50 }
 0x3cc   : > { %v5624_v62 = vpop.f32.mrf.mxu1  ;;  %v5673_v41 = vpop.f32.mrf.mxu0 }
 0x3cd   : > { %v2241_v20 = vadd.f32 %v5624_v62, %v7192_v46  ;;  %v7341_v59 = vadd.f32 %v5673_v41, %v2239_v42 }
 0x3ce   : > { %v2113_v8 = vpop.f32.mrf.mxu1  ;;  %v2491_v37 = vpop.f32.mrf.mxu0 }
 0x3cf   : > { %v2240_v14 = vadd.f32 %v2113_v8, %v7198_v56  ;;  %v7344_v3 = vadd.f32 %v2491_v37, %v2238_v2 }
 0x3d0   : > { %v5627_v49 = vpop.f32.mrf.mxu1  ;;  %v5676_v1 = vpop.f32.mrf.mxu0 }
 0x3d1   : > { %v2243_v6 = vadd.f32 %v5627_v49, %v7204_v43  ;;  %v7347_v51 = vadd.f32 %v5676_v1, %v2241_v20 }
 0x3d2   : > { %v2123_v53 = vpop.f32.mrf.mxu1  ;;  %v2501_v63 = vpop.f32.mrf.mxu0 }
 0x3d3   : > { %v2242_v21 = vadd.f32 %v2123_v53, %v7210_v39  ;;  %v7350_v38 = vadd.f32 %v2501_v63, %v2240_v14 }
 0x3d4   : > { %v5630_v46 = vpop.f32.mrf.mxu1  ;;  %v5679_v16 = vpop.f32.mrf.mxu0 }
 0x3d5   : > { %v2245_v45 = vadd.f32 %v5630_v46, %v7216_v61  ;;  %v7353_v12 = vadd.f32 %v5679_v16, %v2243_v6 }
 0x3d6   : > { %v2133_v56 = vpop.f32.mrf.mxu1  ;;  %v2511_v7 = vpop.f32.mrf.mxu0 }
 0x3d7   : > { %v2244_v13 = vadd.f32 %v2133_v56, %v7222_v27  ;;  %v7356_v15 = vadd.f32 %v2511_v7, %v2242_v21 }
 0x3d8   : > { %v5633_v43 = vpop.f32.mrf.mxu1  ;;  %v5682_v10 = vpop.f32.mrf.mxu0 }
 0x3d9   : > { %v2247_v52 = vadd.f32 %v5633_v43, %v7227_v34  ;;  %v7359_v54 = vadd.f32 %v5682_v10, %v2245_v45 }
 0x3da   : > { %v2143_v39 = vpop.f32.mrf.mxu1  ;;  %v2521_v22 = vpop.f32.mrf.mxu0 }
 0x3db   : > { %v2246_v32 = vadd.f32 %v2143_v39, %v7233_v29  ;;  %v7362_v50 = vadd.f32 %v2521_v22, %v2244_v13 }
 0x3dc   : > { %v5636_v61 = vpop.f32.mrf.mxu1  ;;  %v5685_v36 = vpop.f32.mrf.mxu0 }
 0x3dd   : > { %v2249_v24 = vadd.f32 %v5636_v61, %v7239_v57  ;;  %v7365_v42 = vadd.f32 %v5685_v36, %v2247_v52 }
 0x3de   : > { %v2153_v27 = vpop.f32.mrf.mxu1  ;;  %v2531_v44 = vpop.f32.mrf.mxu0 }
 0x3df   : > { %7951 = vst [vmem:[#allocation9_spill] sm:$0xff] %v7365_v42  ;;  %v2248_v25 = vadd.f32 %v2153_v27, %v7245_v9  ;;  %v7368_v2 = vadd.f32 %v2531_v44, %v2246_v32 }
 0x3e0   : > { %v5639_v34 = vpop.f32.mrf.mxu1  ;;  %v5688_v62 = vpop.f32.mrf.mxu0 }
 0x3e1   : > { %7952 = vst [vmem:[#allocation10_spill] sm:$0xff] %v7368_v2  ;;  %v2251_v41 = vadd.f32 %v5639_v34, %v7251_v18  ;;  %v7371_v20 = vadd.f32 %v5688_v62, %v2249_v24 }
 0x3e2   : > { %v2163_v29 = vpop.f32.mrf.mxu1  ;;  %v2541_v8 = vpop.f32.mrf.mxu0 }
 0x3e3   : > { %7953 = vst [vmem:[#allocation11_spill] sm:$0xff] %v7371_v20  ;;  %v2250_v37 = vadd.f32 %v2163_v29, %v7257_v60  ;;  %v7374_v14 = vadd.f32 %v2541_v8, %v2248_v25 }
 0x3e4   : > { %v5642_v57 = vpop.f32.mrf.mxu1  ;;  %v5691_v49 = vpop.f32.mrf.mxu0 }
 0x3e5   : > { %v2253_v1 = vadd.f32 %v5642_v57, %v7263_v23  ;;  %v7377_v6 = vadd.f32 %v5691_v49, %v2251_v41 }
 0x3e6   : > { %v2173_v9 = vpop.f32.mrf.mxu1  ;;  %v2551_v53 = vpop.f32.mrf.mxu0 }
 0x3e7   : > { %v2252_v63 = vadd.f32 %v2173_v9, %v7269_v19  ;;  %v7380_v21 = vadd.f32 %v2551_v53, %v2250_v37 }
 0x3e8   : > { %v5645_v18 = vpop.f32.mrf.mxu1  ;;  %v5694_v46 = vpop.f32.mrf.mxu0 }
 0x3e9   : > { %v2255_v16 = vadd.f32 %v5645_v18, %v7274_v31  ;;  %v7383_v45 = vadd.f32 %v5694_v46, %v2253_v1 }
 0x3ea   : > { %v2183_v60 = vpop.f32.mrf.mxu1  ;;  %v2561_v56 = vpop.f32.mrf.mxu0 }
 0x3eb   : > { %v2254_v7 = vadd.f32 %v2183_v60, %v7279_v4  ;;  %v7386_v13 = vadd.f32 %v2561_v56, %v2252_v63 }
 0x3ec   : > { %v5648_v23 = vpop.f32.mrf.mxu1  ;;  %v5697_v43 = vpop.f32.mrf.mxu0 }
 0x3ed   : > { %v2257_v10 = vadd.f32 %v5648_v23, %v7284_v55  ;;  %v7389_v52 = vadd.f32 %v5697_v43, %v2255_v16 }
 0x3ee   : > { %v2193_v19 = vpop.f32.mrf.mxu1  ;;  %v2571_v39 = vpop.f32.mrf.mxu0 }
 0x3ef   : > { %v2256_v22 = vadd.f32 %v2193_v19, %v7290_v58  ;;  %v7392_v32 = vadd.f32 %v2571_v39, %v2254_v7 }
 0x3f0   : > { %v5651_v31 = vpop.f32.mrf.mxu1  ;;  %v5700_v61 = vpop.f32.mrf.mxu0 }
 0x3f1   : > { %v2259_v36 = vadd.f32 %v5651_v31, %v7296_v35  ;;  %v7395_v24 = vadd.f32 %v5700_v61, %v2257_v10 }
 0x3f2   : > { %v2203_v4 = vpop.f32.mrf.mxu1  ;;  %v2581_v27 = vpop.f32.mrf.mxu0 }
 0x3f3   : > { %v2258_v44 = vadd.f32 %v2203_v4, %v7303_v40  ;;  %v7398_v25 = vadd.f32 %v2581_v27, %v2256_v22 }
 0x3f4   : > { %v5654_v55 = vpop.f32.mrf.mxu1  ;;  %v5703_v34 = vpop.f32.mrf.mxu0 }
 0x3f5   : > { %v2261_v62 = vadd.f32 %v5654_v55, %v7309_v17  ;;  %v7401_v41 = vadd.f32 %v5703_v34, %v2259_v36  ;;  %v7954_v55 = vmov 0.0  }
 0x3f6   : > { %v2213_v58 = vpop.f32.mrf.mxu1  ;;  %v2591_v29 = vpop.f32.mrf.mxu0  ;;  %768 = vst.msk [vmem:[%s7452_s20] sm:$0x1] %vm767_vm3, %v7954_v55  ;;  %769 = vst.msk [vmem:[%s7458_s24] sm:$0x1] %vm767_vm3, %v7954_v55 }
 0x3f7   : > { %v2260_v8 = vadd.f32 %v2213_v58, %v7313_v26  ;;  %v7404_v37 = vadd.f32 %v2591_v29, %v2258_v44 }
 0x3f8   : > { %v5657_v35 = vpop.f32.mrf.mxu1  ;;  %v5706_v57 = vpop.f32.mrf.mxu0 }
 0x3f9   : > { %v2263_v49 = vadd.f32 %v5657_v35, %v7316_v48  ;;  %v7407_v1 = vadd.f32 %v5706_v57, %v2261_v62 }
 0x3fa   : > { %v2223_v40 = vpop.f32.mrf.mxu1  ;;  %v2601_v9 = vpop.f32.mrf.mxu0 }
 0x3fb   : > { %v2262_v53 = vadd.f32 %v2223_v40, %v7319_v0  ;;  %v7410_v63 = vadd.f32 %v2601_v9, %v2260_v8 }
 0x3fc   : > { %v5709_v17 = vpop.f32.mrf.mxu0  ;;  %v7412_v18 = vpop.f32.mrf.mxu1 }
 0x3fd   : > { %v7414_v46 = vadd.f32 %v5709_v17, %v2263_v49 }
 0x3fe   : > { %v2611_v26 = vpop.f32.mrf.mxu0  ;;  %v7416_v16 = vpop.f32.mrf.mxu1 }
 0x3ff   : > { %v7418_v60 = vadd.f32 %v2611_v26, %v2262_v53 }
 0x400   : > { %v7420_v48 = vpop.f32.mrf.mxu1  ;;  %v7422_v56 = vpop.f32.mrf.mxu0 }
 0x402   : > { %v7424_v7 = vpop.f32.mrf.mxu1  ;;  %v7426_v0 = vpop.f32.mrf.mxu0 }
 0x404   : > { %v7428_v23 = vpop.f32.mrf.mxu1  ;;  %v7430_v43 = vpop.f32.mrf.mxu0 }
 0x406   : > { %v7432_v10 = vpop.f32.mrf.mxu1  ;;  %v7434_v19 = vpop.f32.mrf.mxu0 }
 0x408   : > { %v7436_v39 = vpop.f32.mrf.mxu1  ;;  %v7438_v22 = vpop.f32.mrf.mxu0 }
 0x40a   : > { %v7440_v31 = vpop.f32.mrf.mxu1  ;;  %v7442_v61 = vpop.f32.mrf.mxu0 }
 0x40c   : > { %v7444_v36 = vpop.f32.mrf.mxu1  ;;  %v7446_v4 = vpop.f32.mrf.mxu0 }
 0x40e   : > { %v7460_v27 = vpop.f32.mrf.mxu1  ;;  %v7462_v44 = vpop.f32.mrf.mxu0 }
 0x410   : > { %v7470_v34 = vpop.f32.mrf.mxu1  ;;  %v7472_v62 = vpop.f32.mrf.mxu0 }
 0x412   : > { %v7474_v58 = vpop.f32.mrf.mxu1  ;;  %v7476_v29 = vpop.f32.mrf.mxu0 }
 0x413   : > { %7955 = vst [vmem:[#allocation12_spill] sm:$0xff] %v7476_v29 }
 0x414   : > { %v5734_v8 = vpop.f32.mrf.mxu1  ;;  %v7478_v35 = vpop.f32.mrf.mxu0 }
 0x415   : > { %7956 = vst [vmem:[#allocation13_spill] sm:$0xff] %v7478_v35  ;;  %v3021_v57 = vadd.f32 %v5734_v8, %v7359_v54 }
 0x416   : > { %v2909_v49 = vpop.f32.mrf.mxu1  ;;  %v7481_v40 = vpop.f32.mrf.mxu0 }
 0x417   : > { %7957 = vst [vmem:[#allocation14_spill] sm:$0xff] %v7481_v40  ;;  %v3020_v9 = vadd.f32 %v2909_v49, %v7362_v50 }
 0x418   : > { %v7484_v53 = vpop.f32.mrf.mxu1  ;;  %v5786_v17 = vpop.f32.mrf.mxu0 }
 0x419   : > { %7958 = vst [vmem:[#allocation15_spill] sm:$0xff] %v7484_v53  ;;  %v7486_v26 = vadd.f32 %v5786_v17, %v3021_v57 }
 0x41a   : > { %v7488_v55 = vpop.f32.mrf.mxu1  ;;  %v3300_v20 = vpop.f32.mrf.mxu0 }
 0x41b   : > { %7959 = vst [vmem:[#allocation16_spill] sm:$0xff] %v7486_v26  ;;  %7960 = vst [vmem:[#allocation17_spill] sm:$0xff] %v7488_v55  ;;  %v7490_v2 = vadd.f32 %v3300_v20, %v3020_v9 }
 0x41c   : > { %v7492_v42 = vpop.f32.mrf.mxu1  ;;  %v7494_v35 = vpop.f32.mrf.mxu0 }
 0x41d   : > { %7961 = vst [vmem:[#allocation18_spill] sm:$0xff] %v7490_v2  ;;  %7962 = vst [vmem:[#allocation19_spill] sm:$0xff] %v7492_v42 }
 0x41e   : > { %7963 = vst [vmem:[#allocation20_spill] sm:$0xff] %v7494_v35  ;;  %v2929_v54 = vpop.f32.mrf.mxu1  ;;  %v7496_v8 = vpop.f32.mrf.mxu0 }
 0x41f   : > { %7964 = vst [vmem:[#allocation21_spill] sm:$0xff] %v7496_v8  ;;  %v3024_v40 = vadd.f32 %v2929_v54, %v7374_v14 }
 0x420   : > { %v5743_v50 = vpop.f32.mrf.mxu1  ;;  %v7499_v49 = vpop.f32.mrf.mxu0 }
 0x421   : > { %7965 = vst [vmem:[#allocation22_spill] sm:$0xff] %v7499_v49  ;;  %v3027_v57 = vadd.f32 %v5743_v50, %v7377_v6 }
 0x422   : > { %v2939_v17 = vpop.f32.mrf.mxu1  ;;  %v3320_v26 = vpop.f32.mrf.mxu0 }
 0x423   : > { %v3026_v55 = vadd.f32 %v2939_v17, %v7380_v21  ;;  %v7503_v20 = vadd.f32 %v3320_v26, %v3024_v40 }
 0x424   : > { %v5746_v9 = vpop.f32.mrf.mxu1  ;;  %v5795_v2 = vpop.f32.mrf.mxu0 }
 0x425   : > { %v3029_v35 = vadd.f32 %v5746_v9, %v7383_v45  ;;  %v7506_v42 = vadd.f32 %v5795_v2, %v3027_v57 }
 0x426   : > { %v2949_v8 = vpop.f32.mrf.mxu1  ;;  %v3330_v53 = vpop.f32.mrf.mxu0 }
 0x427   : > { %v3028_v14 = vadd.f32 %v2949_v8, %v7386_v13  ;;  %v7509_v54 = vadd.f32 %v3330_v53, %v3026_v55 }
 0x428   : > { %v5749_v49 = vpop.f32.mrf.mxu1  ;;  %v5798_v6 = vpop.f32.mrf.mxu0 }
 0x429   : > { %v3031_v50 = vadd.f32 %v5749_v49, %v7389_v52  ;;  %v7512_v29 = vadd.f32 %v5798_v6, %v3029_v35 }
 0x42a   : > { %v2959_v21 = vpop.f32.mrf.mxu1  ;;  %v3340_v40 = vpop.f32.mrf.mxu0 }
 0x42b   : > { %v3030_v26 = vadd.f32 %v2959_v21, %v7392_v32  ;;  %v7515_v17 = vadd.f32 %v3340_v40, %v3028_v14 }
 0x42c   : > { %v5752_v2 = vpop.f32.mrf.mxu1  ;;  %v5801_v45 = vpop.f32.mrf.mxu0 }
 0x42d   : > { %v3033_v57 = vadd.f32 %v5752_v2, %v7395_v24  ;;  %v7518_v9 = vadd.f32 %v5801_v45, %v3031_v50 }
 0x42e   : > { %v2969_v13 = vpop.f32.mrf.mxu1  ;;  %v3350_v53 = vpop.f32.mrf.mxu0 }
 0x42f   : > { %v3032_v55 = vadd.f32 %v2969_v13, %v7398_v25  ;;  %v7521_v8 = vadd.f32 %v3350_v53, %v3030_v26 }
 0x430   : > { %v5755_v52 = vpop.f32.mrf.mxu1  ;;  %v5804_v35 = vpop.f32.mrf.mxu0 }
 0x431   : > { %v3035_v49 = vadd.f32 %v5755_v52, %v7401_v41  ;;  %v7524_v6 = vadd.f32 %v5804_v35, %v3033_v57 }
 0x432   : > { %v2979_v32 = vpop.f32.mrf.mxu1  ;;  %v3360_v14 = vpop.f32.mrf.mxu0 }
 0x433   : > { %v3034_v21 = vadd.f32 %v2979_v32, %v7404_v37  ;;  %v7527_v40 = vadd.f32 %v3360_v14, %v3032_v55  ;;  %v3009_v32 = vadd.f32 %v7412_v18, %v7323_v5 }
 0x434   : > { %v5758_v24 = vpop.f32.mrf.mxu1  ;;  %v5807_v50 = vpop.f32.mrf.mxu0 }
 0x435   : > { %v3037_v2 = vadd.f32 %v5758_v24, %v7407_v1  ;;  %v7530_v45 = vadd.f32 %v5807_v50, %v3035_v49 }
 0x436   : > { %v2989_v25 = vpop.f32.mrf.mxu1  ;;  %v3370_v26 = vpop.f32.mrf.mxu0 }
 0x437   : > { %v3036_v13 = vadd.f32 %v2989_v25, %v7410_v63  ;;  %v7533_v53 = vadd.f32 %v3370_v26, %v3034_v21  ;;  %v3008_v63 = vadd.f32 %v7416_v16, %v7326_v11  ;;  %v3400_v21 = vadd.f32 %v7422_v56, %v3009_v32  ;;  %v7970_v32 = vld [vmem:[#allocation15_spill] sm:$0xff] }
 0x438   : > { %v5761_v41 = vpop.f32.mrf.mxu1  ;;  %v5810_v57 = vpop.f32.mrf.mxu0  ;;  %v3013_v25 = vadd.f32 %v7428_v23, %v7335_v28  ;;  %v3012_v16 = vadd.f32 %v7432_v10, %v7338_v47 }
 0x439   : > { %v3039_v52 = vadd.f32 %v5761_v41, %v7414_v46  ;;  %v7536_v35 = vadd.f32 %v5810_v57, %v3037_v2  ;;  %v3011_v46 = vadd.f32 %v7420_v48, %v7329_v30  ;;  %v3010_v2 = vadd.f32 %v7424_v7, %v7332_v33  ;;  %v7566_v7 = vld [vmem:[%s7817_s2] ss:$0 sm:$0xff] }
 0x43a   : > { %v2999_v37 = vpop.f32.mrf.mxu1  ;;  %v3380_v55 = vpop.f32.mrf.mxu0  ;;  %v3015_v33 = vadd.f32 %v7436_v39, %v7341_v59  ;;  %v3404_v28 = vadd.f32 %v7438_v22, %v3013_v25  ;;  %v3017_v59 = vadd.f32 %v7444_v36, %v7347_v51  ;;  %v3019_v22 = vadd.f32 %v7470_v34, %v7353_v12  ;;  %v7966_v36 = vld [vmem:[#allocation12_spill] sm:$0xff] }
 0x43b   : > { %v3038_v1 = vadd.f32 %v2999_v37, %v7418_v60  ;;  %v7541_v49 = vadd.f32 %v3380_v55, %v3036_v13  ;;  %v3399_v60 = vadd.f32 %v7426_v0, %v3008_v63  ;;  %v3402_v11 = vadd.f32 %v7430_v43, %v3011_v46  ;;  %v7969_v55 = vld [vmem:[#allocation9_spill] sm:$0xff] }
 0x43c   : > { %v5813_v14 = vpop.f32.mrf.mxu0  ;;  %v5820_v24 = vpop.f32.mrf.mxu1  ;;  %v3401_v30 = vadd.f32 %v7434_v19, %v3010_v2  ;;  %v3014_v0 = vadd.f32 %v7440_v31, %v7344_v3  ;;  %v3403_v43 = vadd.f32 %v7442_v61, %v3012_v16  ;;  %v3406_v10 = vadd.f32 %v7446_v4, %v3015_v33  ;;  %v7975_v16 = vld [vmem:[#allocation20_spill] sm:$0xff] }
 0x43d   : > { %v7546_v50 = vadd.f32 %v5813_v14, %v3039_v52  ;;  %v3788_v26 = vadd.f32 %v5820_v24, %v3400_v21  ;;  %v3016_v19 = vadd.f32 %v7460_v27, %v7350_v38  ;;  %v7582_v61 = vadd.f32 %v7472_v62, %v3017_v59  ;;  %v7967_v27 = vld [vmem:[#allocation13_spill] sm:$0xff]  ;;  %v7971_v14 = vld [vmem:[#allocation10_spill] sm:$0xff] }
 0x43e   : > { %v3390_v5 = vpop.f32.mrf.mxu0  ;;  %v3628_v18 = vpop.f32.mrf.mxu1  ;;  %v3405_v52 = vadd.f32 %v7462_v44, %v3014_v0  ;;  %v3018_v51 = vadd.f32 %v7474_v58, %v7356_v15  ;;  %v7597_v44 = vadd.f32 %v7967_v27, %v3019_v22  ;;  %v7968_v15 = vld [vmem:[#allocation14_spill] sm:$0xff]  ;;  %v7972_v24 = vld [vmem:[#allocation17_spill] sm:$0xff] }
 0x43f   : > { %v7555_v13 = vadd.f32 %v3390_v5, %v3038_v1  ;;  %v3787_v23 = vadd.f32 %v3628_v18, %v3399_v60  ;;  %v7587_v4 = vadd.f32 %v7966_v36, %v3016_v19  ;;  %v3023_v1 = vadd.f32 %v7970_v32, %v7969_v55  ;;  %v7973_v5 = vld [vmem:[#allocation11_spill] sm:$0xff]  ;;  %v7977_v32 = vld [vmem:[#allocation22_spill] sm:$0xff] }
 0x440   : > { %v5823_v48 = vpop.f32.mrf.mxu1  ;;  %v5872_v56 = vpop.f32.mrf.mxu0  ;;  %v7601_v58 = vadd.f32 %v7968_v15, %v3018_v51  ;;  %v3022_v63 = vadd.f32 %v7972_v24, %v7971_v14  ;;  %v7974_v18 = vld [vmem:[#allocation19_spill] sm:$0xff] }
 0x441   : > { %v4176_v47 = vadd.f32 %v5872_v56, %v3788_v26  ;;  %v3790_v57 = vadd.f32 %v5823_v48, %v3402_v11  ;;  %v3025_v60 = vadd.f32 %v7974_v18, %v7973_v5  ;;  %v7613_v33 = vadd.f32 %v7975_v16, %v3023_v1  ;;  %v7976_v48 = vld [vmem:[#allocation21_spill] sm:$0xff] }
 0x442   : > { %v3638_v39 = vpop.f32.mrf.mxu1  ;;  %v4016_v41 = vpop.f32.mrf.mxu0  ;;  %v7616_v56 = vadd.f32 %v7976_v48, %v3022_v63 }
 0x443   : > { %v4215_v3 = vadd.f32 %v7566_v7, %v4176_v47  ;;  %v4175_v31 = vadd.f32 %v4016_v41, %v3787_v23  ;;  %v3789_v21 = vadd.f32 %v3638_v39, %v3401_v30  ;;  %v7629_v1 = vadd.f32 %v7977_v32, %v3025_v60 }
 0x444   : > { %v5826_v38 = vpop.f32.mrf.mxu1  ;;  %v5875_v12 = vpop.f32.mrf.mxu0 }
 0x445   : > { %v4247_v34 = vmax.f32 %v4215_v3, 0.0  ;;  %v4214_v62 = vadd.f32 %v7566_v7, %v4175_v31  ;;  %v4178_v37 = vadd.f32 %v5875_v12, %v3790_v57  ;;  %v3792_v0 = vadd.f32 %v5826_v38, %v3404_v28 }
 0x446   : > { %v3648_v46 = vpop.f32.mrf.mxu1  ;;  %v4026_v2 = vpop.f32.mrf.mxu0 }
 0x447   : > { %4279 = vst.msk [vmem:[%s7594_s29 + $0x8] sm:$0xff] %vm379_vm1, %v4247_v34  ;;  %v4385_v25 = vmul.f32 %v4247_v34, %v4247_v34  ;;  %v4246_v26 = vmax.f32 %v4214_v62, 0.0  ;;  %v4217_v11 = vadd.f32 %v7566_v7, %v4178_v37  ;;  %v4177_v23 = vadd.f32 %v4026_v2, %v3789_v21 }
 0x448   : > { %v5829_v30 = vpop.f32.mrf.mxu1  ;;  %v5878_v47 = vpop.f32.mrf.mxu0  ;;  %v4312_v59 = vsel %vm379_vm1, %v4247_v34, 0.0  ;;  %v3791_v57 = vadd.f32 %v3648_v46, %v3403_v43 }
 0x449   : > { %4278 = vst.msk [vmem:[%s7594_s29] sm:$0xff] %vm379_vm1, %v4246_v26  ;;  %v4311_v19 = vsel %vm379_vm1, %v4246_v26, 0.0  ;;  %v4384_v39 = vmul.f32 %v4246_v26, %v4246_v26  ;;  %v4249_v41 = vmax.f32 %v4217_v11, 0.0  ;;  %v4216_v3 = vadd.f32 %v7566_v7, %v4177_v23 }
 0x44a   : > { %v4313_v22 = vadd.f32 %v4312_v59, %v4311_v19  ;;  %v4180_v31 = vadd.f32 %v5878_v47, %v3792_v0  ;;  %v3658_v51 = vpop.f32.mrf.mxu1  ;;  %v4036_v36 = vpop.f32.mrf.mxu0  ;;  %v4417_v28 = vsel %vm379_vm1, %v4385_v25, 0.0  ;;  %v3794_v27 = vadd.f32 %v5829_v30, %v3406_v10 }
 0x44b   : > { %v4416_v38 = vsel %vm379_vm1, %v4384_v39, 0.0  ;;  %4281 = vst.msk [vmem:[%s7594_s29 + $0x18] sm:$0xff] %vm379_vm1, %v4249_v41  ;;  %v4387_v12 = vmul.f32 %v4249_v41, %v4249_v41  ;;  %v4248_v62 = vmax.f32 %v4216_v3, 0.0  ;;  %v4179_v15 = vadd.f32 %v4036_v36, %v3791_v57 }
 0x44c   : > { %v4418_v34 = vadd.f32 %v4417_v28, %v4416_v38  ;;  %v4219_v37 = vadd.f32 %v7566_v7, %v4180_v31  ;;  %v5832_v43 = vpop.f32.mrf.mxu1  ;;  %v5881_v55 = vpop.f32.mrf.mxu0  ;;  %v4316_v14 = vsel %vm379_vm1, %v4249_v41, 0.0  ;;  %v3793_v24 = vadd.f32 %v3658_v51, %v3405_v52 }
 0x44d   : > { %v4182_v63 = vadd.f32 %v5881_v55, %v3794_v27  ;;  %4280 = vst.msk [vmem:[%s7594_s29 + $0x10] sm:$0xff] %vm379_vm1, %v4248_v62  ;;  %v4314_v21 = vsel %vm379_vm1, %v4248_v62, 0.0  ;;  %v4386_v10 = vmul.f32 %v4248_v62, %v4248_v62  ;;  %v4218_v2 = vadd.f32 %v7566_v7, %v4179_v15 }
 0x44e   : > { %v4251_v46 = vmax.f32 %v4219_v37, 0.0  ;;  %v3668_v5 = vpop.f32.mrf.mxu1  ;;  %v4046_v18 = vpop.f32.mrf.mxu0  ;;  %v4421_v25 = vsel %vm379_vm1, %v4387_v12, 0.0  ;;  %v4315_v60 = vadd.f32 %v4314_v21, %v4313_v22  ;;  %v3796_v0 = vadd.f32 %v5832_v43, %v7582_v61 }
 0x44f   : > { %v4221_v26 = vadd.f32 %v7566_v7, %v4182_v63  ;;  %v4181_v11 = vadd.f32 %v4046_v18, %v3793_v24  ;;  %v4419_v52 = vsel %vm379_vm1, %v4386_v10, 0.0  ;;  %v4250_v48 = vmax.f32 %v4218_v2, 0.0 }
 0x450   : > { %4283 = vst.msk [vmem:[%s7594_s29 + $0x28] sm:$0xff] %vm379_vm1, %v4251_v46  ;;  %v4389_v16 = vmul.f32 %v4251_v46, %v4251_v46  ;;  %v5835_v23 = vpop.f32.mrf.mxu1  ;;  %v5884_v30 = vpop.f32.mrf.mxu0  ;;  %v4420_v47 = vadd.f32 %v4419_v52, %v4418_v34  ;;  %v4317_v59 = vadd.f32 %v4316_v14, %v4315_v60  ;;  %v4320_v41 = vsel %vm379_vm1, %v4251_v46, 0.0 }
 0x451   : > { %v4253_v19 = vmax.f32 %v4221_v26, 0.0  ;;  %v4220_v39 = vadd.f32 %v7566_v7, %v4181_v11  ;;  %4282 = vst.msk [vmem:[%s7594_s29 + $0x20] sm:$0xff] %vm379_vm1, %v4250_v48  ;;  %v4318_v22 = vsel %vm379_vm1, %v4250_v48, 0.0  ;;  %v4388_v57 = vmul.f32 %v4250_v48, %v4250_v48 }
 0x452   : > { %v3795_v3 = vadd.f32 %v3668_v5, %v7587_v4  ;;  %v3678_v31 = vpop.f32.mrf.mxu1  ;;  %v4056_v51 = vpop.f32.mrf.mxu0  ;;  %v4425_v61 = vsel %vm379_vm1, %v4389_v16, 0.0  ;;  %v4319_v36 = vadd.f32 %v4318_v22, %v4317_v59  ;;  %v4422_v28 = vadd.f32 %v4421_v25, %v4420_v47  ;;  %v7978_v47 = vld [vmem:[#allocation16_spill] sm:$0xff] }
 0x453   : > { %4285 = vst.msk [vmem:[%s7594_s29 + $0x38] sm:$0xff] %vm379_vm1, %v4253_v19  ;;  %v3798_v38 = vadd.f32 %v5835_v23, %v7597_v44  ;;  %v4423_v12 = vsel %vm379_vm1, %v4388_v57, 0.0  ;;  %v4391_v27 = vmul.f32 %v4253_v19, %v4253_v19  ;;  %v4252_v34 = vmax.f32 %v4220_v39, 0.0 }
 0x454   : > { %v4184_v62 = vadd.f32 %v5884_v30, %v3796_v0  ;;  %v5838_v37 = vpop.f32.mrf.mxu1  ;;  %v5887_v15 = vpop.f32.mrf.mxu0  ;;  %v4424_v43 = vadd.f32 %v4423_v12, %v4422_v28  ;;  %v4324_v4 = vsel %vm379_vm1, %v4253_v19, 0.0  ;;  %v4321_v55 = vadd.f32 %v4320_v41, %v4319_v36  ;;  %v7979_v19 = vld [vmem:[#allocation18_spill] sm:$0xff] }
 0x455   : > { %v4183_v32 = vadd.f32 %v4056_v51, %v3795_v3  ;;  %4284 = vst.msk [vmem:[%s7594_s29 + $0x30] sm:$0xff] %vm379_vm1, %v4252_v34  ;;  %v4322_v14 = vsel %vm379_vm1, %v4252_v34, 0.0  ;;  %v4390_v24 = vmul.f32 %v4252_v34, %v4252_v34  ;;  %v3797_v44 = vadd.f32 %v3678_v31, %v7601_v58 }
 0x456   : > { %v4223_v63 = vadd.f32 %v7566_v7, %v4184_v62  ;;  %v3688_v21 = vpop.f32.mrf.mxu1  ;;  %v4066_v10 = vpop.f32.mrf.mxu0  ;;  %v4323_v46 = vadd.f32 %v4322_v14, %v4321_v55  ;;  %v4426_v2 = vadd.f32 %v4425_v61, %v4424_v43  ;;  %v4186_v18 = vadd.f32 %v5887_v15, %v3798_v38 }
 0x457   : > { %v4222_v5 = vadd.f32 %v7566_v7, %v4183_v32  ;;  %v4429_v25 = vsel %vm379_vm1, %v4391_v27, 0.0  ;;  %v4427_v60 = vsel %vm379_vm1, %v4390_v24, 0.0  ;;  %v4185_v11 = vadd.f32 %v4066_v10, %v3797_v44 }
 0x458   : > { %v4255_v26 = vmax.f32 %v4223_v63, 0.0  ;;  %v5841_v52 = vpop.f32.mrf.mxu1  ;;  %v5890_v16 = vpop.f32.mrf.mxu0  ;;  %v4428_v48 = vadd.f32 %v4427_v60, %v4426_v2  ;;  %v4325_v58 = vadd.f32 %v4324_v4, %v4323_v46  ;;  %v4225_v23 = vadd.f32 %v7566_v7, %v4186_v18 }
 0x459   : > { %v4254_v0 = vmax.f32 %v4222_v5, 0.0  ;;  %v3800_v59 = vadd.f32 %v5838_v37, %v7978_v47  ;;  %v3799_v39 = vadd.f32 %v3688_v21, %v7979_v19  ;;  %v4224_v41 = vadd.f32 %v7566_v7, %v4185_v11 }
 0x45a   : > { %4287 = vst.msk [vmem:[%s7594_s29 + $0x48] sm:$0xff] %vm379_vm1, %v4255_v26  ;;  %v4393_v30 = vmul.f32 %v4255_v26, %v4255_v26  ;;  %v3698_v22 = vpop.f32.mrf.mxu1  ;;  %v4076_v57 = vpop.f32.mrf.mxu0  ;;  %v4430_v51 = vadd.f32 %v4429_v25, %v4428_v48  ;;  %v4257_v61 = vmax.f32 %v4225_v23, 0.0  ;;  %v4328_v36 = vsel %vm379_vm1, %v4255_v26, 0.0 }
 0x45b   : > { %4286 = vst.msk [vmem:[%s7594_s29 + $0x40] sm:$0xff] %vm379_vm1, %v4254_v0  ;;  %v4326_v3 = vsel %vm379_vm1, %v4254_v0, 0.0  ;;  %v4392_v31 = vmul.f32 %v4254_v0, %v4254_v0  ;;  %v4256_v38 = vmax.f32 %v4224_v41, 0.0  ;;  %v4188_v12 = vadd.f32 %v5890_v16, %v3800_v59 }
 0x45c   : > { %v4327_v28 = vadd.f32 %v4326_v3, %v4325_v58  ;;  %v5844_v27 = vpop.f32.mrf.mxu1  ;;  %v5893_v34 = vpop.f32.mrf.mxu0  ;;  %v4433_v62 = vsel %vm379_vm1, %v4393_v30, 0.0  ;;  %4289 = vst.msk [vmem:[%s7594_s29 + $0x58] sm:$0xff] %vm379_vm1, %v4257_v61  ;;  %v4395_v15 = vmul.f32 %v4257_v61, %v4257_v61  ;;  %v3802_v43 = vadd.f32 %v5841_v52, %v7613_v33 }
 0x45d   : > { %v4431_v37 = vsel %vm379_vm1, %v4392_v31, 0.0  ;;  %4288 = vst.msk [vmem:[%s7594_s29 + $0x50] sm:$0xff] %vm379_vm1, %v4256_v38  ;;  %v4330_v32 = vsel %vm379_vm1, %v4256_v38, 0.0  ;;  %v4394_v14 = vmul.f32 %v4256_v38, %v4256_v38  ;;  %v4332_v44 = vsel %vm379_vm1, %v4257_v61, 0.0 }
 0x45e   : > { %v4432_v4 = vadd.f32 %v4431_v37, %v4430_v51  ;;  %v4329_v55 = vadd.f32 %v4328_v36, %v4327_v28  ;;  %v3708_v24 = vpop.f32.mrf.mxu1  ;;  %v4086_v63 = vpop.f32.mrf.mxu0  ;;  %v4227_v21 = vadd.f32 %v7566_v7, %v4188_v12  ;;  %v3801_v10 = vadd.f32 %v3698_v22, %v7616_v56 }
 0x45f   : > { %v4187_v46 = vadd.f32 %v4076_v57, %v3799_v39  ;;  %v4435_v33 = vsel %vm379_vm1, %v4394_v14, 0.0  ;;  %v4190_v18 = vadd.f32 %v5893_v34, %v3802_v43  ;;  %v4437_v26 = vsel %vm379_vm1, %v4395_v15, 0.0 }
 0x460   : > { %v4331_v2 = vadd.f32 %v4330_v32, %v4329_v55  ;;  %v4434_v5 = vadd.f32 %v4433_v62, %v4432_v4  ;;  %v5847_v25 = vpop.f32.mrf.mxu1  ;;  %v5896_v60 = vpop.f32.mrf.mxu0  ;;  %v4259_v11 = vmax.f32 %v4227_v21, 0.0  ;;  %v4189_v16 = vadd.f32 %v4086_v63, %v3801_v10 }
 0x461   : > { %v4226_v52 = vadd.f32 %v7566_v7, %v4187_v46  ;;  %v3804_v58 = vadd.f32 %v5844_v27, %v7629_v1  ;;  %v4229_v56 = vadd.f32 %v7566_v7, %v4190_v18  ;;  %v3803_v59 = vadd.f32 %v3708_v24, %v7503_v20 }
 0x462   : > { %v4436_v48 = vadd.f32 %v4435_v33, %v4434_v5  ;;  %v4333_v0 = vadd.f32 %v4332_v44, %v4331_v2  ;;  %v3718_v23 = vpop.f32.mrf.mxu1  ;;  %v4096_v30 = vpop.f32.mrf.mxu0  ;;  %4291 = vst.msk [vmem:[%s7594_s29 + $0x68] sm:$0xff] %vm379_vm1, %v4259_v11  ;;  %v4228_v19 = vadd.f32 %v7566_v7, %v4189_v16  ;;  %v3806_v39 = vadd.f32 %v5847_v25, %v7506_v42 }
 0x463   : > { %v4258_v47 = vmax.f32 %v4226_v52, 0.0  ;;  %v4397_v41 = vmul.f32 %v4259_v11, %v4259_v11  ;;  %v4261_v57 = vmax.f32 %v4229_v56, 0.0  ;;  %v4192_v3 = vadd.f32 %v5896_v60, %v3804_v58 }
 0x464   : > { %v4438_v22 = vadd.f32 %v4437_v26, %v4436_v48  ;;  %v5850_v1 = vpop.f32.mrf.mxu1  ;;  %v5899_v31 = vpop.f32.mrf.mxu0  ;;  %v4336_v51 = vsel %vm379_vm1, %v4259_v11, 0.0  ;;  %v4260_v28 = vmax.f32 %v4228_v19, 0.0  ;;  %v3805_v12 = vadd.f32 %v3718_v23, %v7509_v54 }
 0x465   : > { %4290 = vst.msk [vmem:[%s7594_s29 + $0x60] sm:$0xff] %vm379_vm1, %v4258_v47  ;;  %v4334_v61 = vsel %vm379_vm1, %v4258_v47, 0.0  ;;  %v4396_v36 = vmul.f32 %v4258_v47, %v4258_v47  ;;  %4293 = vst.msk [vmem:[%s7594_s29 + $0x78] sm:$0xff] %vm379_vm1, %v4261_v57  ;;  %v4399_v38 = vmul.f32 %v4261_v57, %v4261_v57  ;;  %v4231_v42 = vadd.f32 %v7566_v7, %v4192_v3 }
 0x466   : > { %v4335_v20 = vadd.f32 %v4334_v61, %v4333_v0  ;;  %v3728_v27 = vpop.f32.mrf.mxu1  ;;  %v4106_v34 = vpop.f32.mrf.mxu0  ;;  %4292 = vst.msk [vmem:[%s7594_s29 + $0x70] sm:$0xff] %vm379_vm1, %v4260_v28  ;;  %v4338_v37 = vsel %vm379_vm1, %v4260_v28, 0.0  ;;  %v4398_v15 = vmul.f32 %v4260_v28, %v4260_v28  ;;  %v4191_v43 = vadd.f32 %v4096_v30, %v3803_v59 }
 0x467   : > { %v4439_v62 = vsel %vm379_vm1, %v4396_v36, 0.0  ;;  %v4441_v4 = vsel %vm379_vm1, %v4397_v41, 0.0  ;;  %v4263_v14 = vmax.f32 %v4231_v42, 0.0  ;;  %v4340_v54 = vsel %vm379_vm1, %v4261_v57, 0.0 }
 0x468   : > { %v4440_v55 = vadd.f32 %v4439_v62, %v4438_v22  ;;  %v4337_v32 = vadd.f32 %v4336_v51, %v4335_v20  ;;  %v5853_v24 = vpop.f32.mrf.mxu1  ;;  %v5902_v63 = vpop.f32.mrf.mxu0  ;;  %v4443_v44 = vsel %vm379_vm1, %v4398_v15, 0.0  ;;  %v4230_v21 = vadd.f32 %v7566_v7, %v4191_v43 }
 0x469   : > { %v4194_v10 = vadd.f32 %v5899_v31, %v3806_v39  ;;  %v4445_v46 = vsel %vm379_vm1, %v4399_v38, 0.0  ;;  %4295 = vst.msk [vmem:[%s7594_s29 + $0x88] sm:$0xff] %vm379_vm1, %v4263_v14  ;;  %v4401_v33 = vmul.f32 %v4263_v14, %v4263_v14  ;;  %v3808_v26 = vadd.f32 %v5850_v1, %v7512_v29 }
 0x46a   : > { %v4339_v2 = vadd.f32 %v4338_v37, %v4337_v32  ;;  %v4442_v5 = vadd.f32 %v4441_v4, %v4440_v55  ;;  %v3738_v18 = vpop.f32.mrf.mxu1  ;;  %v4116_v25 = vpop.f32.mrf.mxu0  ;;  %v4262_v60 = vmax.f32 %v4230_v21, 0.0  ;;  %v4193_v52 = vadd.f32 %v4106_v34, %v3805_v12 }
 0x46b   : > { %v4233_v11 = vadd.f32 %v7566_v7, %v4194_v10  ;;  %v4344_v48 = vsel %vm379_vm1, %v4263_v14, 0.0  ;;  %v3807_v58 = vadd.f32 %v3728_v27, %v7515_v17  ;;  %v4449_v19 = vsel %vm379_vm1, %v4401_v33, 0.0 }
 0x46c   : > { %v4444_v16 = vadd.f32 %v4443_v44, %v4442_v5  ;;  %v4341_v0 = vadd.f32 %v4340_v54, %v4339_v2  ;;  %v5856_v56 = vpop.f32.mrf.mxu1  ;;  %v5905_v23 = vpop.f32.mrf.mxu0  ;;  %4294 = vst.msk [vmem:[%s7594_s29 + $0x80] sm:$0xff] %vm379_vm1, %v4262_v60  ;;  %v4342_v30 = vsel %vm379_vm1, %v4262_v60, 0.0  ;;  %v4400_v47 = vmul.f32 %v4262_v60, %v4262_v60 }
 0x46d   : > { %v4265_v59 = vmax.f32 %v4233_v11, 0.0  ;;  %v4232_v29 = vadd.f32 %v7566_v7, %v4193_v52  ;;  %v4196_v22 = vadd.f32 %v5902_v63, %v3808_v26  ;;  %v3810_v51 = vadd.f32 %v5853_v24, %v7518_v9 }
 0x46e   : > { %v4343_v39 = vadd.f32 %v4342_v30, %v4341_v0  ;;  %v4446_v41 = vadd.f32 %v4445_v46, %v4444_v16  ;;  %v3748_v57 = vpop.f32.mrf.mxu1  ;;  %v4126_v3 = vpop.f32.mrf.mxu0  ;;  %v4447_v17 = vsel %vm379_vm1, %v4400_v47, 0.0  ;;  %v4195_v20 = vadd.f32 %v4116_v25, %v3807_v58 }
 0x46f   : > { %4297 = vst.msk [vmem:[%s7594_s29 + $0x98] sm:$0xff] %vm379_vm1, %v4265_v59  ;;  %v4403_v1 = vmul.f32 %v4265_v59, %v4265_v59  ;;  %v4264_v31 = vmax.f32 %v4232_v29, 0.0  ;;  %v4235_v28 = vadd.f32 %v7566_v7, %v4196_v22  ;;  %v4348_v12 = vsel %vm379_vm1, %v4265_v59, 0.0 }
 0x470   : > { %v4448_v61 = vadd.f32 %v4447_v17, %v4446_v41  ;;  %v4345_v36 = vadd.f32 %v4344_v48, %v4343_v39  ;;  %v5859_v38 = vpop.f32.mrf.mxu1  ;;  %v5908_v42 = vpop.f32.mrf.mxu0  ;;  %v3809_v62 = vadd.f32 %v3738_v18, %v7521_v8  ;;  %v4234_v43 = vadd.f32 %v7566_v7, %v4195_v20 }
 0x471   : > { %4296 = vst.msk [vmem:[%s7594_s29 + $0x90] sm:$0xff] %vm379_vm1, %v4264_v31  ;;  %v4346_v27 = vsel %vm379_vm1, %v4264_v31, 0.0  ;;  %v4402_v34 = vmul.f32 %v4264_v31, %v4264_v31  ;;  %v4267_v9 = vmax.f32 %v4235_v28, 0.0  ;;  %v4453_v32 = vsel %vm379_vm1, %v4403_v1, 0.0 }
 0x472   : > { %v4347_v37 = vadd.f32 %v4346_v27, %v4345_v36  ;;  %v4450_v15 = vadd.f32 %v4449_v19, %v4448_v61  ;;  %v3758_v4 = vpop.f32.mrf.mxu1  ;;  %v4136_v55 = vpop.f32.mrf.mxu0  ;;  %v4198_v24 = vadd.f32 %v5905_v23, %v3810_v51  ;;  %v4197_v63 = vadd.f32 %v4126_v3, %v3809_v62 }
 0x473   : > { %v4451_v14 = vsel %vm379_vm1, %v4402_v34, 0.0  ;;  %4299 = vst.msk [vmem:[%s7594_s29 + $0xa8] sm:$0xff] %vm379_vm1, %v4267_v9  ;;  %v4405_v44 = vmul.f32 %v4267_v9, %v4267_v9  ;;  %v4266_v21 = vmax.f32 %v4234_v43, 0.0  ;;  %v3812_v8 = vadd.f32 %v5856_v56, %v7524_v6 }
 0x474   : > { %v4452_v54 = vadd.f32 %v4451_v14, %v4450_v15  ;;  %v5862_v10 = vpop.f32.mrf.mxu1  ;;  %v5911_v46 = vpop.f32.mrf.mxu0  ;;  %v4349_v2 = vadd.f32 %v4348_v12, %v4347_v37  ;;  %v4237_v5 = vadd.f32 %v7566_v7, %v4198_v24  ;;  %v3811_v33 = vadd.f32 %v3748_v57, %v7527_v40 }
 0x475   : > { %v4236_v18 = vadd.f32 %v7566_v7, %v4197_v63  ;;  %v4352_v25 = vsel %vm379_vm1, %v4267_v9, 0.0  ;;  %4298 = vst.msk [vmem:[%s7594_s29 + $0xa0] sm:$0xff] %vm379_vm1, %v4266_v21  ;;  %v4350_v60 = vsel %vm379_vm1, %v4266_v21, 0.0  ;;  %v4404_v26 = vmul.f32 %v4266_v21, %v4266_v21 }
 0x476   : > { %v4454_v11 = vadd.f32 %v4453_v32, %v4452_v54  ;;  %v4146_v6 = vpop.f32.mrf.mxu0  ;;  %v4351_v52 = vadd.f32 %v4350_v60, %v4349_v2  ;;  %v4269_v16 = vmax.f32 %v4237_v5, 0.0  ;;  %v4200_v0 = vadd.f32 %v5908_v42, %v3812_v8  ;;  %v3768_v30 = vpop.f32.mrf.mxu1 }
 0x477   : > { %v4268_v48 = vmax.f32 %v4236_v18, 0.0  ;;  %v4457_v58 = vsel %vm379_vm1, %v4405_v44, 0.0  ;;  %v4455_v40 = vsel %vm379_vm1, %v4404_v26, 0.0  ;;  %v3814_v56 = vadd.f32 %v5859_v38, %v7530_v45 }
 0x478   : > { %v4199_v23 = vadd.f32 %v4136_v55, %v3811_v33  ;;  %v5914_v47 = vpop.f32.mrf.mxu0  ;;  %v4456_v59 = vadd.f32 %v4455_v40, %v4454_v11  ;;  %4301 = vst.msk [vmem:[%s7594_s29 + $0xb8] sm:$0xff] %vm379_vm1, %v4269_v16  ;;  %v4407_v29 = vmul.f32 %v4269_v16, %v4269_v16  ;;  %v4353_v19 = vadd.f32 %v4352_v25, %v4351_v52  ;;  %v5865_v20 = vpop.f32.mrf.mxu1 }
 0x479   : > { %4300 = vst.msk [vmem:[%s7594_s29 + $0xb0] sm:$0xff] %vm379_vm1, %v4268_v48  ;;  %v3813_v39 = vadd.f32 %v3758_v4, %v7533_v53  ;;  %v4354_v41 = vsel %vm379_vm1, %v4268_v48, 0.0  ;;  %v4406_v22 = vmul.f32 %v4268_v48, %v4268_v48  ;;  %v4239_v57 = vadd.f32 %v7566_v7, %v4200_v0 }
 0x47a   : > { %v4238_v3 = vadd.f32 %v7566_v7, %v4199_v23  ;;  %v4156_v45 = vpop.f32.mrf.mxu0  ;;  %v4355_v17 = vadd.f32 %v4354_v41, %v4353_v19  ;;  %v4458_v1 = vadd.f32 %v4457_v58, %v4456_v59  ;;  %v3816_v31 = vadd.f32 %v5862_v10, %v7536_v35  ;;  %v3778_v54 = vpop.f32.mrf.mxu1 }
 0x47b   : > { %v4202_v51 = vadd.f32 %v5911_v46, %v3814_v56  ;;  %v4356_v61 = vsel %vm379_vm1, %v4269_v16, 0.0  ;;  %v4459_v36 = vsel %vm379_vm1, %v4406_v22, 0.0  ;;  %v4271_v53 = vmax.f32 %v4239_v57, 0.0 }
 0x47c   : > { %v4270_v28 = vmax.f32 %v4238_v3, 0.0  ;;  %v4460_v38 = vadd.f32 %v4459_v36, %v4458_v1  ;;  %v4357_v42 = vadd.f32 %v4356_v61, %v4355_v17  ;;  %v4201_v27 = vadd.f32 %v4146_v6, %v3813_v39  ;;  %v5917_v15 = vpop.f32.mrf.mxu0 }
 0x47d   : > { %v4241_v12 = vadd.f32 %v7566_v7, %v4202_v51  ;;  %v4461_v34 = vsel %vm379_vm1, %v4407_v29, 0.0  ;;  %4303 = vst.msk [vmem:[%s7594_s29 + $0xc8] sm:$0xff] %vm379_vm1, %v4271_v53  ;;  %v4409_v62 = vmul.f32 %v4271_v53, %v4271_v53  ;;  %v4360_v32 = vsel %vm379_vm1, %v4271_v53, 0.0 }
 0x47e   : > { %4302 = vst.msk [vmem:[%s7594_s29 + $0xc0] sm:$0xff] %vm379_vm1, %v4270_v28  ;;  %v4358_v35 = vsel %vm379_vm1, %v4270_v28, 0.0  ;;  %v4408_v37 = vmul.f32 %v4270_v28, %v4270_v28  ;;  %v4462_v43 = vadd.f32 %v4461_v34, %v4460_v38  ;;  %v4240_v55 = vadd.f32 %v7566_v7, %v4201_v27  ;;  %v4166_v18 = vpop.f32.mrf.mxu0 }
 0x47f   : > { %v4359_v9 = vadd.f32 %v4358_v35, %v4357_v42  ;;  %v4273_v4 = vmax.f32 %v4241_v12, 0.0  ;;  %v3815_v24 = vadd.f32 %v3768_v30, %v7541_v49  ;;  %v4204_v63 = vadd.f32 %v5914_v47, %v3816_v31 }
 0x480   : > { %v4463_v14 = vsel %vm379_vm1, %v4408_v37, 0.0  ;;  %v4465_v44 = vsel %vm379_vm1, %v4409_v62, 0.0  ;;  %v4272_v8 = vmax.f32 %v4240_v55, 0.0  ;;  %v3818_v10 = vadd.f32 %v5865_v20, %v7546_v50  ;;  %v4310_v55 = vld [vmem:[%s7452_s20] sm:$0x1] }
 0x481   : > { %v4464_v21 = vadd.f32 %v4463_v14, %v4462_v43  ;;  %4305 = vst.msk [vmem:[%s7594_s29 + $0xd8] sm:$0xff] %vm379_vm1, %v4273_v4  ;;  %v4411_v46 = vmul.f32 %v4273_v4, %v4273_v4  ;;  %v4361_v2 = vadd.f32 %v4360_v32, %v4359_v9  ;;  %v4243_v5 = vadd.f32 %v7566_v7, %v4204_v63 }
 0x482   : > { %v4203_v33 = vadd.f32 %v4156_v45, %v3815_v24  ;;  %4304 = vst.msk [vmem:[%s7594_s29 + $0xd0] sm:$0xff] %vm379_vm1, %v4272_v8  ;;  %v4362_v49 = vsel %vm379_vm1, %v4272_v8, 0.0  ;;  %v4410_v25 = vmul.f32 %v4272_v8, %v4272_v8  ;;  %v3817_v26 = vadd.f32 %v3778_v54, %v7555_v13  ;;  %v4383_v24 = vld [vmem:[%s7458_s24] sm:$0x1] }
 0x483   : > { %v4466_v60 = vadd.f32 %v4465_v44, %v4464_v21  ;;  %v4363_v11 = vadd.f32 %v4362_v49, %v4361_v2  ;;  %v4275_v6 = vmax.f32 %v4243_v5, 0.0  ;;  %v4206_v52 = vadd.f32 %v5917_v15, %v3818_v10 }
 0x484   : > { %v4242_v50 = vadd.f32 %v7566_v7, %v4203_v33  ;;  %v4467_v16 = vsel %vm379_vm1, %v4410_v25, 0.0  ;;  %v4205_v48 = vadd.f32 %v4166_v18, %v3817_v26  ;;  %v4364_v0 = vsel %vm379_vm1, %v4273_v4, 0.0 }
 0x485   : > { %v4468_v58 = vadd.f32 %v4467_v16, %v4466_v60  ;;  %4307 = vst.msk [vmem:[%s7594_s29 + $0xe8] sm:$0xff] %vm379_vm1, %v4275_v6  ;;  %v4469_v56 = vsel %vm379_vm1, %v4411_v46, 0.0  ;;  %v4365_v13 = vadd.f32 %v4364_v0, %v4363_v11  ;;  %v4245_v23 = vadd.f32 %v7566_v7, %v4206_v52 }
 0x486   : > { %v4274_v40 = vmax.f32 %v4242_v50, 0.0  ;;  %v4244_v30 = vadd.f32 %v7566_v7, %v4205_v48  ;;  %v4413_v47 = vmul.f32 %v4275_v6, %v4275_v6  ;;  %v4368_v57 = vsel %vm379_vm1, %v4275_v6, 0.0 }
 0x487   : > { %v4470_v19 = vadd.f32 %v4469_v56, %v4468_v58  ;;  %v4277_v41 = vmax.f32 %v4245_v23, 0.0 }
 0x488   : > { %4306 = vst.msk [vmem:[%s7594_s29 + $0xe0] sm:$0xff] %vm379_vm1, %v4274_v40  ;;  %v4366_v59 = vsel %vm379_vm1, %v4274_v40, 0.0  ;;  %v4412_v29 = vmul.f32 %v4274_v40, %v4274_v40  ;;  %v4276_v22 = vmax.f32 %v4244_v30, 0.0  ;;  %v4473_v17 = vsel %vm379_vm1, %v4413_v47, 0.0 }
 0x489   : > { %v4367_v39 = vadd.f32 %v4366_v59, %v4365_v13  ;;  %4309 = vst.msk [vmem:[%s7594_s29 + $0xf8] sm:$0xff] %vm379_vm1, %v4277_v41  ;;  %v4415_v1 = vmul.f32 %v4277_v41, %v4277_v41  ;;  %v4372_v53 = vsel %vm379_vm1, %v4277_v41, 0.0 }
 0x48a   : > { %v4471_v3 = vsel %vm379_vm1, %v4412_v29, 0.0  ;;  %4308 = vst.msk [vmem:[%s7594_s29 + $0xf0] sm:$0xff] %vm379_vm1, %v4276_v22  ;;  %v4370_v31 = vsel %vm379_vm1, %v4276_v22, 0.0  ;;  %v4414_v51 = vmul.f32 %v4276_v22, %v4276_v22 }
 0x48b   : > { %v4472_v45 = vadd.f32 %v4471_v3, %v4470_v19  ;;  %v4369_v7 = vadd.f32 %v4368_v57, %v4367_v39  ;;  %v4477_v42 = vsel %vm379_vm1, %v4415_v1, 0.0 }
 0x48c   : > { %v4475_v28 = vsel %vm379_vm1, %v4414_v51, 0.0 }
 0x48d   : > { %v4371_v61 = vadd.f32 %v4370_v31, %v4369_v7  ;;  %v4474_v36 = vadd.f32 %v4473_v17, %v4472_v45 }
 0x48f   : > { %v4373_v20 = vadd.f32 %v4372_v53, %v4371_v61  ;;  %v4476_v38 = vadd.f32 %v4475_v28, %v4474_v36 }
 0x491   : > { %v4374_v12 = vrot.slane %v4373_v20, 4  ;;  %v4478_v27 = vadd.f32 %v4477_v42, %v4476_v38 }
 0x493   : > { %v4375_v34 = vadd.f32 %v4374_v12, %v4373_v20  ;;  %v4479_v62 = vrot.slane %v4478_v27, 4 }
 0x495   : > { %v4376_v35 = vrot.slane %v4375_v34, 2  ;;  %v4480_v37 = vadd.f32 %v4479_v62, %v4478_v27 }
 0x497   : > { %v4377_v15 = vadd.f32 %v4376_v35, %v4375_v34  ;;  %v4481_v9 = vrot.slane %v4480_v37, 2 }
 0x499   : > { %v4378_v43 = vrot.slane %v4377_v15, 1  ;;  %v4482_v4 = vadd.f32 %v4481_v9, %v4480_v37 }
 0x49b   : > { %v4379_v32 = vadd.f32 %v4378_v43, %v4377_v15  ;;  %v4483_v14 = vrot.slane %v4482_v4, 1 }
 0x49d   : > { %v4380_v63 = vadd.f32 %v4379_v32, %v4310_v55  ;;  %v4484_v54 = vadd.f32 %v4483_v14, %v4482_v4 }
 0x49f   : > { %4382 = vst.msk [vmem:[%s7452_s20] sm:$0x1] %vm767_vm3, %v4380_v63  ;;  %v4485_v44 = vadd.f32 %v4484_v54, %v4383_v24 }
 0x4a1   : > { %4486 = vst.msk [vmem:[%s7458_s24] sm:$0x1] %vm767_vm3, %v4485_v44 }
 0x4a2 PF: > { %s20_s11 = sadd.s32 1, %s5974_s11   ;;  %s7980_s30 = smov %s5970_s10 }
 0x4a3   : > { %p17_p5 = scmp.ge.s32.totalorder %s20_s11, 4   ;;  %s7981_s10 = smov %s7983_s12 }
 0x4a5   :  { %19 = sbr.rel (!%p17_p5) target bundleno = 2 (0x2), region = 118 }

</bundles_post_ra>
